<compile_context>
chip_gen: v7x
topology: tpu7x:2x2x1
jax: 0.10.0
libtpu: 0.0.40
codegen_flags: <defaults>
</compile_context>

<pallas_src>
import functools

import jax
import jax.numpy as jnp
from jax.experimental import pallas as pl
from jax.experimental.pallas import tpu as pltpu

BN_EPS = 1e-5
_VMEM_LIMIT = 32 * 1024 * 1024     # explicit budget; safe against v7x's 64 MiB physical VMEM
_FUSED_BUDGET = 24 * 1024 * 1024   # single-step fused conv+BN VMEM budget
_TILE_BUDGET = 12 * 1024 * 1024    # per-(double-buffered)-tile budget for multi-tile paths


# ----------------------------- Pallas kernels ------------------------------

def _conv_lrelu_kernel(p_ref, w_ref, o_ref):
    """(tm, K) @ (K, Cout) on the MXU with fused LeakyReLU(0.2).  No affine (layer 1)."""
    acc = jnp.dot(p_ref[...], w_ref[...], preferred_element_type=jnp.float32)
    o_ref[...] = jnp.where(acc > 0, acc, 0.2 * acc).astype(o_ref.dtype)


def _conv_bn_lrelu_kernel(p_ref, w_ref, g_ref, b_ref, o_ref):
    """Fully fused Conv + BatchNorm2d(batch stats) + LeakyReLU(0.2), single grid step.

    The whole (M, K) patch matrix is one block, so the per-channel batch moments are
    complete immediately after the dot.  Two-pass (centered) variance avoids the
    E[x^2]-E[x]^2 cancellation.  Only the final bf16 activation is written to HBM."""
    acc = jnp.dot(p_ref[...], w_ref[...], preferred_element_type=jnp.float32)
    mean = jnp.mean(acc, axis=0, keepdims=True)
    cen = acc - mean
    var = jnp.mean(cen * cen, axis=0, keepdims=True)
    scale = g_ref[...] * jax.lax.rsqrt(var + BN_EPS)
    y = cen * scale + b_ref[...]
    o_ref[...] = jnp.where(y > 0, y, 0.2 * y).astype(o_ref.dtype)


def _conv_bn_stats_kernel(p_ref, w_ref, raw_ref, sum_ref, sq_ref):
    """Fallback (M too large for one block): conv matmul with BN moments fused in.

    Writes the raw conv tile and accumulates per-channel sum / sum-of-squares into
    resident (1, Cout) outputs (block index constant along the row-tile axis)."""
    @pl.when(pl.program_id(0) == 0)
    def _():
        sum_ref[...] = jnp.zeros_like(sum_ref)
        sq_ref[...] = jnp.zeros_like(sq_ref)

    acc = jnp.dot(p_ref[...], w_ref[...], preferred_element_type=jnp.float32)
    sum_ref[...] += jnp.sum(acc, axis=0, keepdims=True)
    sq_ref[...] += jnp.sum(acc * acc, axis=0, keepdims=True)
    raw_ref[...] = acc.astype(raw_ref.dtype)


def _affine_lrelu_kernel(x_ref, scale_ref, shift_ref, o_ref):
    """Lane-dense y = LeakyReLU(x * scale + shift, 0.2) (fallback path only)."""
    y = x_ref[...] * scale_ref[...] + shift_ref[...]
    o_ref[...] = jnp.where(y > 0, y, 0.2 * y).astype(o_ref.dtype)


# ------------------------------ tiling helpers ------------------------------

def _choose_tm(m, bytes_per_row, budget=_TILE_BUDGET):
    """Largest multiple-of-8 divisor of m whose tile fits the byte budget, else m."""
    cap = max(8, int(budget // max(bytes_per_row, 1)) // 8 * 8)
    if m <= cap:
        return m
    for t in range((cap // 8) * 8, 7, -8):
        if m % t == 0:
            return t
    return m


def _fused_fits(m, k, cout, budget=_FUSED_BUDGET):
    # bf16 patches + bf16 weights + f32 acc/centered temporaries + bf16 out
    need = m * k * 2 + k * cout * 2 + m * cout * (4 + 4 + 2)
    return need <= budget


# ------------------------------ Pallas wrappers -----------------------------

def _conv_lrelu(patches, w_mat):
    """Layer-1 conv: bf16 matmul + fused LeakyReLU, bf16 activation out."""
    M, K = patches.shape
    cout = w_mat.shape[1]
    tm = _choose_tm(M, 2 * (K * 2) + 2 * (cout * 2))
    return pl.pallas_call(
        _conv_lrelu_kernel,
        out_shape=jax.ShapeDtypeStruct((M, cout), jnp.bfloat16),
        grid_spec=pltpu.PrefetchScalarGridSpec(
            num_scalar_prefetch=0,
            grid=(M // tm,),
            in_specs=[
                pl.BlockSpec((tm, K), lambda i: (i, 0)),
                pl.BlockSpec((K, cout), lambda i: (0, 0)),
            ],
            out_specs=pl.BlockSpec((tm, cout), lambda i: (i, 0)),
        ),
        compiler_params=pltpu.CompilerParams(
            dimension_semantics=("parallel",),
            vmem_limit_bytes=_VMEM_LIMIT),
    )(patches, w_mat)


def _conv_bn_lrelu_fused(patches, w_mat, gamma, beta):
    """Layers 2-4 (fits-in-VMEM case): one pallas_call = conv + BN + LeakyReLU."""
    M, K = patches.shape
    cout = w_mat.shape[1]
    return pl.pallas_call(
        _conv_bn_lrelu_kernel,
        out_shape=jax.ShapeDtypeStruct((M, cout), jnp.bfloat16),
        grid_spec=pltpu.PrefetchScalarGridSpec(
            num_scalar_prefetch=0,
            grid=(1,),
            in_specs=[
                pl.BlockSpec((M, K), lambda i: (0, 0)),
                pl.BlockSpec((K, cout), lambda i: (0, 0)),
                pl.BlockSpec((1, cout), lambda i: (0, 0)),
                pl.BlockSpec((1, cout), lambda i: (0, 0)),
            ],
            out_specs=pl.BlockSpec((M, cout), lambda i: (0, 0)),
        ),
        compiler_params=pltpu.CompilerParams(
            dimension_semantics=("arbitrary",),
            vmem_limit_bytes=_VMEM_LIMIT),
    )(patches, w_mat,
      gamma.astype(jnp.float32).reshape(1, cout),
      beta.astype(jnp.float32).reshape(1, cout))


def _conv_bn_stats(patches, w_mat):
    """Fallback conv: bf16 matmul + fused per-channel sum / sum-sq accumulation."""
    M, K = patches.shape
    cout = w_mat.shape[1]
    tm = _choose_tm(M, 2 * (K * 2) + 2 * (cout * 4))
    return pl.pallas_call(
        _conv_bn_stats_kernel,
        out_shape=(jax.ShapeDtypeStruct((M, cout), jnp.float32),
                   jax.ShapeDtypeStruct((1, cout), jnp.float32),
                   jax.ShapeDtypeStruct((1, cout), jnp.float32)),
        grid_spec=pltpu.PrefetchScalarGridSpec(
            num_scalar_prefetch=0,
            grid=(M // tm,),
            in_specs=[
                pl.BlockSpec((tm, K), lambda i: (i, 0)),
                pl.BlockSpec((K, cout), lambda i: (0, 0)),
            ],
            out_specs=(pl.BlockSpec((tm, cout), lambda i: (i, 0)),
                       pl.BlockSpec((1, cout), lambda i: (0, 0)),
                       pl.BlockSpec((1, cout), lambda i: (0, 0))),
        ),
        compiler_params=pltpu.CompilerParams(
            dimension_semantics=("arbitrary",),
            vmem_limit_bytes=_VMEM_LIMIT),
    )(patches, w_mat)


def _affine_lrelu(raw, scale, shift):
    """Fallback BN normalize + LeakyReLU(0.2), lane-dense when C divides 128."""
    M, C = raw.shape
    if C <= 128 and 128 % C == 0 and (M * C) % 128 == 0:
        reps = 128 // C
        x2d = raw.reshape((M * C) // 128, 128)
        scale2d = jnp.tile(scale, (1, reps))
        shift2d = jnp.tile(shift, (1, reps))
    else:  # lane-sparse but still correct
        x2d, scale2d, shift2d = raw, scale, shift

    R, L = x2d.shape
    tr = _choose_tm(R, 2 * (L * 4) + 2 * (L * 2))
    out = pl.pallas_call(
        _affine_lrelu_kernel,
        out_shape=jax.ShapeDtypeStruct((R, L), jnp.bfloat16),
        grid_spec=pltpu.PrefetchScalarGridSpec(
            num_scalar_prefetch=0,
            grid=(R // tr,),
            in_specs=[
                pl.BlockSpec((tr, L), lambda i: (i, 0)),
                pl.BlockSpec((1, L), lambda i: (0, 0)),
                pl.BlockSpec((1, L), lambda i: (0, 0)),
            ],
            out_specs=pl.BlockSpec((tr, L), lambda i: (i, 0)),
        ),
        compiler_params=pltpu.CompilerParams(
            dimension_semantics=("parallel",),
            vmem_limit_bytes=_VMEM_LIMIT),
    )(x2d, scale2d, shift2d)
    return out.reshape(M, C)


# -------------------- JAX glue: space-to-depth patch extraction -------------

def _im2col(x_nhwc, kh, kw, stride, pad):
    if pad:
        x_nhwc = jnp.pad(x_nhwc, ((0, 0), (pad, pad), (pad, pad), (0, 0)))
    n, h, w, c = x_nhwc.shape
    oh = (h - kh) // stride + 1
    ow = (w - kw) // stride + 1
    cols = []
    for i in range(kh):
        for j in range(kw):
            cols.append(x_nhwc[:, i:i + stride * oh:stride, j:j + stride * ow:stride, :])
    patches = jnp.stack(cols, axis=3)  # (N, OH, OW, KH*KW, C)
    return patches.reshape(n * oh * ow, kh * kw * c), oh, ow


def _s2d_patches(x_nhwc):
    """Patches for a 4x4 stride-2 pad-1 conv via pad + space-to-depth(2) + 2x2 im2col.

    Patch duplication is 4x instead of im2col's 16x; contraction ordering is
    (ki, kj, di, dj, cin), matched by _w_to_mat_s2d."""
    n, h, w, c = x_nhwc.shape
    xp = jnp.pad(x_nhwc, ((0, 0), (1, 1), (1, 1), (0, 0)))
    hp, wp = h + 2, w + 2
    xs = xp.reshape(n, hp // 2, 2, wp // 2, 2, c)
    xs = jnp.transpose(xs, (0, 1, 3, 2, 4, 5)).reshape(n, hp // 2, wp // 2, 4 * c)
    return _im2col(xs, 2, 2, 1, 0)


def _w_to_mat_s2d(w_oihw):
    """(Cout, Cin, 4, 4) -> (16*Cin, Cout) matching _s2d_patches ordering, bf16."""
    cout, cin, kh, kw = w_oihw.shape
    wt = jnp.transpose(w_oihw.astype(jnp.bfloat16), (2, 3, 1, 0))   # [p, q, cin, cout]
    wt = wt.reshape(2, 2, 2, 2, cin, cout)                          # [ki, di, kj, dj, cin, cout]
    wt = jnp.transpose(wt, (0, 2, 1, 3, 4, 5))                      # [ki, kj, di, dj, cin, cout]
    return wt.reshape(kh * kw * cin, cout)


def _w_to_mat(w_oihw):
    """Standard im2col ordering (p, q, cin) for the final 4x4 stride-1 conv."""
    cout, cin, kh, kw = w_oihw.shape
    return jnp.transpose(w_oihw, (2, 3, 1, 0)).reshape(kh * kw * cin, cout)


# ------------------------------ forward pass --------------------------------

def discriminator_ca_forward(x_nchw, action, params, *, site_fm=8, action_size=7):
    b, _, h, w = x_nchw.shape
    x = jnp.transpose(x_nchw, (0, 2, 3, 1))                       # NCHW -> NHWC
    a = jnp.broadcast_to(action[:, None, None, :], (b, h, w, action_size))
    # Cast BEFORE patch extraction: patches are 4x the activation bytes.
    x = jnp.concatenate([x, a], axis=-1).astype(jnp.bfloat16)

    # Layer 1: Conv(4,2,1) + LeakyReLU(0.2)  (no BN, no affine)
    patches, oh, ow = _s2d_patches(x)
    y = _conv_lrelu(patches, _w_to_mat_s2d(params["w1"]))
    x = y.reshape(b, oh, ow, -1)

    # Layers 2-4: Conv(4,2,1) + BatchNorm2d (batch statistics) + LeakyReLU(0.2)
    for idx in (2, 3, 4):
        wp, gamma, beta = params[f"w{idx}"], params[f"g{idx}"], params[f"b{idx}"]
        cout = wp.shape[0]
        patches, oh, ow = _s2d_patches(x)
        w_mat = _w_to_mat_s2d(wp)
        m_rows, k = patches.shape
        if _fused_fits(m_rows, k, cout):
            y = _conv_bn_lrelu_fused(patches, w_mat, gamma, beta)
        else:
            raw, s, sq = _conv_bn_stats(patches, w_mat)
            mean = s / m_rows
            var = jnp.maximum(sq / m_rows - mean * mean, 0.0)     # biased var, clamped
            scale = gamma[None, :] * jax.lax.rsqrt(var + BN_EPS)
            shift = beta[None, :] - mean * scale
            y = _affine_lrelu(raw, scale, shift)
        x = y.reshape(b, oh, ow, cout)

    # Layer 5: Conv(4,1,0) + Sigmoid.  M=B, N=1 -> a Pallas dispatch would dwarf
    # the compute, keep it as a single XLA dot.
    patches, oh, ow = _im2col(x, 4, 4, 1, 0)
    logits = jnp.dot(patches, _w_to_mat(params["w5"]).astype(jnp.bfloat16),
                     preferred_element_type=jnp.float32)
    out = jax.nn.sigmoid(logits).reshape(b, oh, ow, 1)            # (B, 1, 1, 1) NHWC
    return jnp.transpose(out, (0, 3, 1, 2))                       # back to NCHW


# ------------------------- pure-JAX f32 reference ----------------------------

def _reference_forward(x_nchw, action, params, *, action_size=7):
    b, _, h, w = x_nchw.shape
    a = jnp.broadcast_to(action[:, :, None, None], (b, action_size, h, w))
    x = jnp.concatenate([x_nchw, a], axis=1)

    def conv(z, wgt, stride, pad):
        return jax.lax.conv_general_dilated(
            z, wgt, (stride, stride), [(pad, pad), (pad, pad)],
            dimension_numbers=("NCHW", "OIHW", "NCHW"),
            precision=jax.lax.Precision.HIGHEST)

    def lrelu(z):
        return jnp.where(z > 0, z, 0.2 * z)

    def bn(z, g, bta):
        mean = jnp.mean(z, axis=(0, 2, 3), keepdims=True)
        var = jnp.mean((z - mean) ** 2, axis=(0, 2, 3), keepdims=True)
        return (g[None, :, None, None] * (z - mean) * jax.lax.rsqrt(var + BN_EPS)
                + bta[None, :, None, None])

    x = lrelu(conv(x, params["w1"], 2, 1))
    for i in (2, 3, 4):
        x = lrelu(bn(conv(x, params[f"w{i}"], 2, 1), params[f"g{i}"], params[f"b{i}"]))
    return jax.nn.sigmoid(conv(x, params["w5"], 1, 0))


# ---------------------------------- main -------------------------------------

if __name__ == "__main__":
    site_fm, channel_size, action_size = 8, 3, 7   # smaller site_fm for a quick run
    b, h, w = 2, 64, 64                            # 64x64 required by the 5-conv stack

    key = jax.random.PRNGKey(0)
    ks = jax.random.split(key, 13)

    def nrm(k, shape, s=0.02):
        return s * jax.random.normal(k, shape, jnp.float32)

    params = {
        "w1": nrm(ks[0], (site_fm, channel_size + action_size, 4, 4)),
        "w2": nrm(ks[1], (site_fm * 2, site_fm, 4, 4)),
        "g2": 1.0 + nrm(ks[2], (site_fm * 2,), 0.1),
        "b2": nrm(ks[3], (site_fm * 2,), 0.1),
        "w3": nrm(ks[4], (site_fm * 4, site_fm * 2, 4, 4)),
        "g3": 1.0 + nrm(ks[5], (site_fm * 4,), 0.1),
        "b3": nrm(ks[6], (site_fm * 4,), 0.1),
        "w4": nrm(ks[7], (site_fm * 8, site_fm * 4, 4, 4)),
        "g4": 1.0 + nrm(ks[8], (site_fm * 8,), 0.1),
        "b4": nrm(ks[9], (site_fm * 8,), 0.1),
        "w5": nrm(ks[10], (1, site_fm * 8, 4, 4)),
    }

    x = jax.random.normal(ks[11], (b, channel_size, h, w), jnp.float32)
    action = jax.random.normal(ks[12], (b, action_size), jnp.float32)

    fwd = jax.jit(functools.partial(discriminator_ca_forward,
                                    site_fm=site_fm, action_size=action_size))
    out = fwd(x, action, params)
    out = jax.block_until_ready(out)

    assert out.shape == (b, 1, 1, 1), out.shape
    assert bool(jnp.all(jnp.isfinite(out)))
    assert bool(jnp.all((out >= 0.0) & (out <= 1.0)))  # sigmoid range

    ref = jax.jit(functools.partial(_reference_forward,
                                    action_size=action_size))(x, action, params)
    ref = jax.block_until_ready(ref)
    assert float(jnp.max(jnp.abs(out - ref))) < 0.05   # bf16 MXU tolerance

    print("KERNEL_OK")
</pallas_src>

<mosaic_0001>
module attributes {stable_mosaic.version = 11 : i64} {
  func.func @_conv_lrelu_kernel(%arg0: i32, %arg1: memref<2048x160xbf16, #tpu.memory_space<vmem>>, %arg2: memref<160x8xbf16, #tpu.memory_space<vmem>>, %arg3: memref<2048x8xbf16, #tpu.memory_space<vmem>>) attributes {dimension_semantics = [#tpu.dimension_semantics<parallel>], iteration_bounds = array<i64: 1>, scalar_prefetch = 0 : i64, scratch_operands = 0 : i64, tpu.core_type = #tpu.core_type<tc>, window_params = [{transform_indices = @transform_0, window_bounds = array<i64: 2048, 160>}, {pipeline_mode = #tpu.pipeline_mode<synchronous>, transform_indices = @transform_1, window_bounds = array<i64: 160, 8>}, {transform_indices = @transform_2, window_bounds = array<i64: 2048, 8>}]} {
    %c0 = arith.constant 0 : index
    %c0_0 = arith.constant 0 : index
    %0 = vector.load %arg1[%c0, %c0_0] : memref<2048x160xbf16, #tpu.memory_space<vmem>>, vector<2048x160xbf16>
    %c0_1 = arith.constant 0 : index
    %c0_2 = arith.constant 0 : index
    %1 = vector.load %arg2[%c0_1, %c0_2] : memref<160x8xbf16, #tpu.memory_space<vmem>>, vector<160x8xbf16>
    %cst = arith.constant dense<0.000000e+00> : vector<2048x8xf32>
    %2 = tpu.matmul %0, %1, %cst {dimension_numbers = #tpu.dot_dimension_numbers<[1], [0], [0], [1], [0, 0, 1, 1], [], []>} : vector<2048x160xbf16>, vector<160x8xbf16>, vector<2048x8xf32> -> vector<2048x8xf32>
    %cst_3 = arith.constant 0.000000e+00 : f32
    %3 = vector.broadcast %cst_3 : f32 to vector<2048x8xf32>
    %4 = arith.cmpf ogt, %2, %3 : vector<2048x8xf32>
    %cst_4 = arith.constant 2.000000e-01 : f32
    %5 = vector.broadcast %cst_4 : f32 to vector<2048x8xf32>
    %6 = arith.mulf %5, %2 : vector<2048x8xf32>
    %7 = arith.select %4, %2, %6 : vector<2048x8xi1>, vector<2048x8xf32>
    %8 = arith.truncf %7 : vector<2048x8xf32> to vector<2048x8xbf16>
    %c0_5 = arith.constant 0 : index
    %c0_6 = arith.constant 0 : index
    %9 = vector.load %arg3[%c0_5, %c0_6] : memref<2048x8xbf16, #tpu.memory_space<vmem>>, vector<2048x8xbf16>
    tpu.vector_store %arg3[%c0_5, %c0_6], %8 {strides = array<i32>} : memref<2048x8xbf16, #tpu.memory_space<vmem>>, vector<2048x8xbf16>,
    return
  }
  func.func @transform_0(%arg0: i32) -> (i32, i32) {
    %c0_i32 = arith.constant 0 : i32
    %c0_i32_0 = arith.constant 0 : i32
    return %arg0, %c0_i32 : i32, i32
  }
  func.func @transform_1(%arg0: i32) -> (i32, i32) {
    %c0_i32 = arith.constant 0 : i32
    %c0_i32_0 = arith.constant 0 : i32
    %c0_i32_1 = arith.constant 0 : i32
    return %c0_i32, %c0_i32_0 : i32, i32
  }
  func.func @transform_2(%arg0: i32) -> (i32, i32) {
    %c0_i32 = arith.constant 0 : i32
    %c0_i32_0 = arith.constant 0 : i32
    return %arg0, %c0_i32 : i32, i32
  }
}

module attributes {stable_mosaic.version = 11 : i64} {
  func.func @_conv_bn_lrelu_kernel(%arg0: i32, %arg1: memref<512x128xbf16, #tpu.memory_space<vmem>>, %arg2: memref<128x16xbf16, #tpu.memory_space<vmem>>, %arg3: memref<1x16xf32, #tpu.memory_space<vmem>>, %arg4: memref<1x16xf32, #tpu.memory_space<vmem>>, %arg5: memref<512x16xbf16, #tpu.memory_space<vmem>>) attributes {dimension_semantics = [#tpu.dimension_semantics<arbitrary>], iteration_bounds = array<i64: 1>, scalar_prefetch = 0 : i64, scratch_operands = 0 : i64, tpu.core_type = #tpu.core_type<tc>, window_params = [{pipeline_mode = #tpu.pipeline_mode<synchronous>, transform_indices = @transform_0, window_bounds = array<i64: 512, 128>}, {pipeline_mode = #tpu.pipeline_mode<synchronous>, transform_indices = @transform_1, window_bounds = array<i64: 128, 16>}, {pipeline_mode = #tpu.pipeline_mode<synchronous>, transform_indices = @transform_2, window_bounds = array<i64: 1, 16>}, {pipeline_mode = #tpu.pipeline_mode<synchronous>, transform_indices = @transform_3, window_bounds = array<i64: 1, 16>}, {pipeline_mode = #tpu.pipeline_mode<synchronous>, transform_indices = @transform_4, window_bounds = array<i64: 512, 16>}]} {
    %c0 = arith.constant 0 : index
    %c0_0 = arith.constant 0 : index
    %0 = vector.load %arg1[%c0, %c0_0] : memref<512x128xbf16, #tpu.memory_space<vmem>>, vector<512x128xbf16>
    %c0_1 = arith.constant 0 : index
    %c0_2 = arith.constant 0 : index
    %1 = vector.load %arg2[%c0_1, %c0_2] : memref<128x16xbf16, #tpu.memory_space<vmem>>, vector<128x16xbf16>
    %cst = arith.constant dense<0.000000e+00> : vector<512x16xf32>
    %2 = tpu.matmul %0, %1, %cst {dimension_numbers = #tpu.dot_dimension_numbers<[1], [0], [0], [1], [0, 0, 1, 1], [], []>} : vector<512x128xbf16>, vector<128x16xbf16>, vector<512x16xf32> -> vector<512x16xf32>
    %cst_3 = arith.constant dense<0.000000e+00> : vector<16xf32>
    %3 = vector.multi_reduction <add>, %2, %cst_3 [0] : vector<512x16xf32> to vector<16xf32>
    %4 = vector.shape_cast %3 : vector<16xf32> to vector<1x16xf32>
    %cst_4 = arith.constant 5.120000e+02 : f32
    %5 = vector.broadcast %cst_4 : f32 to vector<1x16xf32>
    %6 = arith.divf %4, %5 : vector<1x16xf32>
    %7 = vector.broadcast %6 : vector<1x16xf32> to vector<512x16xf32>
    %8 = arith.subf %2, %7 : vector<512x16xf32>
    %9 = arith.mulf %8, %8 : vector<512x16xf32>
    %cst_5 = arith.constant dense<0.000000e+00> : vector<16xf32>
    %10 = vector.multi_reduction <add>, %9, %cst_5 [0] : vector<512x16xf32> to vector<16xf32>
    %11 = vector.shape_cast %10 : vector<16xf32> to vector<1x16xf32>
    %cst_6 = arith.constant 5.120000e+02 : f32
    %12 = vector.broadcast %cst_6 : f32 to vector<1x16xf32>
    %13 = arith.divf %11, %12 : vector<1x16xf32>
    %c0_7 = arith.constant 0 : index
    %c0_8 = arith.constant 0 : index
    %14 = vector.load %arg3[%c0_7, %c0_8] : memref<1x16xf32, #tpu.memory_space<vmem>>, vector<1x16xf32>
    %cst_9 = arith.constant 9.99999974E-6 : f32
    %15 = vector.broadcast %cst_9 : f32 to vector<1x16xf32>
    %16 = arith.addf %13, %15 : vector<1x16xf32>
    %17 = math.rsqrt %16 : vector<1x16xf32>
    %18 = arith.mulf %14, %17 : vector<1x16xf32>
    %19 = vector.broadcast %18 : vector<1x16xf32> to vector<512x16xf32>
    %20 = arith.mulf %8, %19 : vector<512x16xf32>
    %c0_10 = arith.constant 0 : index
    %c0_11 = arith.constant 0 : index
    %21 = vector.load %arg4[%c0_10, %c0_11] : memref<1x16xf32, #tpu.memory_space<vmem>>, vector<1x16xf32>
    %22 = vector.broadcast %21 : vector<1x16xf32> to vector<512x16xf32>
    %23 = arith.addf %20, %22 : vector<512x16xf32>
    %cst_12 = arith.constant 0.000000e+00 : f32
    %24 = vector.broadcast %cst_12 : f32 to vector<512x16xf32>
    %25 = arith.cmpf ogt, %23, %24 : vector<512x16xf32>
    %cst_13 = arith.constant 2.000000e-01 : f32
    %26 = vector.broadcast %cst_13 : f32 to vector<512x16xf32>
    %27 = arith.mulf %26, %23 : vector<512x16xf32>
    %28 = arith.select %25, %23, %27 : vector<512x16xi1>, vector<512x16xf32>
    %29 = arith.truncf %28 : vector<512x16xf32> to vector<512x16xbf16>
    %c0_14 = arith.constant 0 : index
    %c0_15 = arith.constant 0 : index
    %30 = vector.load %arg5[%c0_14, %c0_15] : memref<512x16xbf16, #tpu.memory_space<vmem>>, vector<512x16xbf16>
    tpu.vector_store %arg5[%c0_14, %c0_15], %29 {strides = array<i32>} : memref<512x16xbf16, #tpu.memory_space<vmem>>, vector<512x16xbf16>,
    return
  }
  func.func @transform_0(%arg0: i32) -> (i32, i32) {
    %c0_i32 = arith.constant 0 : i32
    %c0_i32_0 = arith.constant 0 : i32
    %c0_i32_1 = arith.constant 0 : i32
    return %c0_i32, %c0_i32_0 : i32, i32
  }
  func.func @transform_1(%arg0: i32) -> (i32, i32) {
    %c0_i32 = arith.constant 0 : i32
    %c0_i32_0 = arith.constant 0 : i32
    %c0_i32_1 = arith.constant 0 : i32
    return %c0_i32, %c0_i32_0 : i32, i32
  }
  func.func @transform_2(%arg0: i32) -> (i32, i32) {
    %c0_i32 = arith.constant 0 : i32
    %c0_i32_0 = arith.constant 0 : i32
    %c0_i32_1 = arith.constant 0 : i32
    return %c0_i32, %c0_i32_0 : i32, i32
  }
  func.func @transform_3(%arg0: i32) -> (i32, i32) {
    %c0_i32 = arith.constant 0 : i32
    %c0_i32_0 = arith.constant 0 : i32
    %c0_i32_1 = arith.constant 0 : i32
    return %c0_i32, %c0_i32_0 : i32, i32
  }
  func.func @transform_4(%arg0: i32) -> (i32, i32) {
    %c0_i32 = arith.constant 0 : i32
    %c0_i32_0 = arith.constant 0 : i32
    %c0_i32_1 = arith.constant 0 : i32
    return %c0_i32, %c0_i32_0 : i32, i32
  }
}

module attributes {stable_mosaic.version = 11 : i64} {
  func.func @_conv_bn_lrelu_kernel(%arg0: i32, %arg1: memref<128x256xbf16, #tpu.memory_space<vmem>>, %arg2: memref<256x32xbf16, #tpu.memory_space<vmem>>, %arg3: memref<1x32xf32, #tpu.memory_space<vmem>>, %arg4: memref<1x32xf32, #tpu.memory_space<vmem>>, %arg5: memref<128x32xbf16, #tpu.memory_space<vmem>>) attributes {dimension_semantics = [#tpu.dimension_semantics<arbitrary>], iteration_bounds = array<i64: 1>, scalar_prefetch = 0 : i64, scratch_operands = 0 : i64, tpu.core_type = #tpu.core_type<tc>, window_params = [{pipeline_mode = #tpu.pipeline_mode<synchronous>, transform_indices = @transform_0, window_bounds = array<i64: 128, 256>}, {pipeline_mode = #tpu.pipeline_mode<synchronous>, transform_indices = @transform_1, window_bounds = array<i64: 256, 32>}, {pipeline_mode = #tpu.pipeline_mode<synchronous>, transform_indices = @transform_2, window_bounds = array<i64: 1, 32>}, {pipeline_mode = #tpu.pipeline_mode<synchronous>, transform_indices = @transform_3, window_bounds = array<i64: 1, 32>}, {pipeline_mode = #tpu.pipeline_mode<synchronous>, transform_indices = @transform_4, window_bounds = array<i64: 128, 32>}]} {
    %c0 = arith.constant 0 : index
    %c0_0 = arith.constant 0 : index
    %0 = vector.load %arg1[%c0, %c0_0] : memref<128x256xbf16, #tpu.memory_space<vmem>>, vector<128x256xbf16>
    %c0_1 = arith.constant 0 : index
    %c0_2 = arith.constant 0 : index
    %1 = vector.load %arg2[%c0_1, %c0_2] : memref<256x32xbf16, #tpu.memory_space<vmem>>, vector<256x32xbf16>
    %cst = arith.constant dense<0.000000e+00> : vector<128x32xf32>
    %2 = tpu.matmul %0, %1, %cst {dimension_numbers = #tpu.dot_dimension_numbers<[1], [0], [0], [1], [0, 0, 1, 1], [], []>} : vector<128x256xbf16>, vector<256x32xbf16>, vector<128x32xf32> -> vector<128x32xf32>
    %cst_3 = arith.constant dense<0.000000e+00> : vector<32xf32>
    %3 = vector.multi_reduction <add>, %2, %cst_3 [0] : vector<128x32xf32> to vector<32xf32>
    %4 = vector.shape_cast %3 : vector<32xf32> to vector<1x32xf32>
    %cst_4 = arith.constant 1.280000e+02 : f32
    %5 = vector.broadcast %cst_4 : f32 to vector<1x32xf32>
    %6 = arith.divf %4, %5 : vector<1x32xf32>
    %7 = vector.broadcast %6 : vector<1x32xf32> to vector<128x32xf32>
    %8 = arith.subf %2, %7 : vector<128x32xf32>
    %9 = arith.mulf %8, %8 : vector<128x32xf32>
    %cst_5 = arith.constant dense<0.000000e+00> : vector<32xf32>
    %10 = vector.multi_reduction <add>, %9, %cst_5 [0] : vector<128x32xf32> to vector<32xf32>
    %11 = vector.shape_cast %10 : vector<32xf32> to vector<1x32xf32>
    %cst_6 = arith.constant 1.280000e+02 : f32
    %12 = vector.broadcast %cst_6 : f32 to vector<1x32xf32>
    %13 = arith.divf %11, %12 : vector<1x32xf32>
    %c0_7 = arith.constant 0 : index
    %c0_8 = arith.constant 0 : index
    %14 = vector.load %arg3[%c0_7, %c0_8] : memref<1x32xf32, #tpu.memory_space<vmem>>, vector<1x32xf32>
    %cst_9 = arith.constant 9.99999974E-6 : f32
    %15 = vector.broadcast %cst_9 : f32 to vector<1x32xf32>
    %16 = arith.addf %13, %15 : vector<1x32xf32>
    %17 = math.rsqrt %16 : vector<1x32xf32>
    %18 = arith.mulf %14, %17 : vector<1x32xf32>
    %19 = vector.broadcast %18 : vector<1x32xf32> to vector<128x32xf32>
    %20 = arith.mulf %8, %19 : vector<128x32xf32>
    %c0_10 = arith.constant 0 : index
    %c0_11 = arith.constant 0 : index
    %21 = vector.load %arg4[%c0_10, %c0_11] : memref<1x32xf32, #tpu.memory_space<vmem>>, vector<1x32xf32>
    %22 = vector.broadcast %21 : vector<1x32xf32> to vector<128x32xf32>
    %23 = arith.addf %20, %22 : vector<128x32xf32>
    %cst_12 = arith.constant 0.000000e+00 : f32
    %24 = vector.broadcast %cst_12 : f32 to vector<128x32xf32>
    %25 = arith.cmpf ogt, %23, %24 : vector<128x32xf32>
    %cst_13 = arith.constant 2.000000e-01 : f32
    %26 = vector.broadcast %cst_13 : f32 to vector<128x32xf32>
    %27 = arith.mulf %26, %23 : vector<128x32xf32>
    %28 = arith.select %25, %23, %27 : vector<128x32xi1>, vector<128x32xf32>
    %29 = arith.truncf %28 : vector<128x32xf32> to vector<128x32xbf16>
    %c0_14 = arith.constant 0 : index
    %c0_15 = arith.constant 0 : index
    %30 = vector.load %arg5[%c0_14, %c0_15] : memref<128x32xbf16, #tpu.memory_space<vmem>>, vector<128x32xbf16>
    tpu.vector_store %arg5[%c0_14, %c0_15], %29 {strides = array<i32>} : memref<128x32xbf16, #tpu.memory_space<vmem>>, vector<128x32xbf16>,
    return
  }
  func.func @transform_0(%arg0: i32) -> (i32, i32) {
    %c0_i32 = arith.constant 0 : i32
    %c0_i32_0 = arith.constant 0 : i32
    %c0_i32_1 = arith.constant 0 : i32
    return %c0_i32, %c0_i32_0 : i32, i32
  }
  func.func @transform_1(%arg0: i32) -> (i32, i32) {
    %c0_i32 = arith.constant 0 : i32
    %c0_i32_0 = arith.constant 0 : i32
    %c0_i32_1 = arith.constant 0 : i32
    return %c0_i32, %c0_i32_0 : i32, i32
  }
  func.func @transform_2(%arg0: i32) -> (i32, i32) {
    %c0_i32 = arith.constant 0 : i32
    %c0_i32_0 = arith.constant 0 : i32
    %c0_i32_1 = arith.constant 0 : i32
    return %c0_i32, %c0_i32_0 : i32, i32
  }
  func.func @transform_3(%arg0: i32) -> (i32, i32) {
    %c0_i32 = arith.constant 0 : i32
    %c0_i32_0 = arith.constant 0 : i32
    %c0_i32_1 = arith.constant 0 : i32
    return %c0_i32, %c0_i32_0 : i32, i32
  }
  func.func @transform_4(%arg0: i32) -> (i32, i32) {
    %c0_i32 = arith.constant 0 : i32
    %c0_i32_0 = arith.constant 0 : i32
    %c0_i32_1 = arith.constant 0 : i32
    return %c0_i32, %c0_i32_0 : i32, i32
  }
}

module attributes {stable_mosaic.version = 11 : i64} {
  func.func @_conv_bn_lrelu_kernel(%arg0: i32, %arg1: memref<32x512xbf16, #tpu.memory_space<vmem>>, %arg2: memref<512x64xbf16, #tpu.memory_space<vmem>>, %arg3: memref<1x64xf32, #tpu.memory_space<vmem>>, %arg4: memref<1x64xf32, #tpu.memory_space<vmem>>, %arg5: memref<32x64xbf16, #tpu.memory_space<vmem>>) attributes {dimension_semantics = [#tpu.dimension_semantics<arbitrary>], iteration_bounds = array<i64: 1>, scalar_prefetch = 0 : i64, scratch_operands = 0 : i64, tpu.core_type = #tpu.core_type<tc>, window_params = [{pipeline_mode = #tpu.pipeline_mode<synchronous>, transform_indices = @transform_0, window_bounds = array<i64: 32, 512>}, {pipeline_mode = #tpu.pipeline_mode<synchronous>, transform_indices = @transform_1, window_bounds = array<i64: 512, 64>}, {pipeline_mode = #tpu.pipeline_mode<synchronous>, transform_indices = @transform_2, window_bounds = array<i64: 1, 64>}, {pipeline_mode = #tpu.pipeline_mode<synchronous>, transform_indices = @transform_3, window_bounds = array<i64: 1, 64>}, {pipeline_mode = #tpu.pipeline_mode<synchronous>, transform_indices = @transform_4, window_bounds = array<i64: 32, 64>}]} {
    %c0 = arith.constant 0 : index
    %c0_0 = arith.constant 0 : index
    %0 = vector.load %arg1[%c0, %c0_0] : memref<32x512xbf16, #tpu.memory_space<vmem>>, vector<32x512xbf16>
    %c0_1 = arith.constant 0 : index
    %c0_2 = arith.constant 0 : index
    %1 = vector.load %arg2[%c0_1, %c0_2] : memref<512x64xbf16, #tpu.memory_space<vmem>>, vector<512x64xbf16>
    %cst = arith.constant dense<0.000000e+00> : vector<32x64xf32>
    %2 = tpu.matmul %0, %1, %cst {dimension_numbers = #tpu.dot_dimension_numbers<[1], [0], [0], [1], [0, 0, 1, 1], [], []>} : vector<32x512xbf16>, vector<512x64xbf16>, vector<32x64xf32> -> vector<32x64xf32>
    %cst_3 = arith.constant dense<0.000000e+00> : vector<64xf32>
    %3 = vector.multi_reduction <add>, %2, %cst_3 [0] : vector<32x64xf32> to vector<64xf32>
    %4 = vector.shape_cast %3 : vector<64xf32> to vector<1x64xf32>
    %cst_4 = arith.constant 3.200000e+01 : f32
    %5 = vector.broadcast %cst_4 : f32 to vector<1x64xf32>
    %6 = arith.divf %4, %5 : vector<1x64xf32>
    %7 = vector.broadcast %6 : vector<1x64xf32> to vector<32x64xf32>
    %8 = arith.subf %2, %7 : vector<32x64xf32>
    %9 = arith.mulf %8, %8 : vector<32x64xf32>
    %cst_5 = arith.constant dense<0.000000e+00> : vector<64xf32>
    %10 = vector.multi_reduction <add>, %9, %cst_5 [0] : vector<32x64xf32> to vector<64xf32>
    %11 = vector.shape_cast %10 : vector<64xf32> to vector<1x64xf32>
    %cst_6 = arith.constant 3.200000e+01 : f32
    %12 = vector.broadcast %cst_6 : f32 to vector<1x64xf32>
    %13 = arith.divf %11, %12 : vector<1x64xf32>
    %c0_7 = arith.constant 0 : index
    %c0_8 = arith.constant 0 : index
    %14 = vector.load %arg3[%c0_7, %c0_8] : memref<1x64xf32, #tpu.memory_space<vmem>>, vector<1x64xf32>
    %cst_9 = arith.constant 9.99999974E-6 : f32
    %15 = vector.broadcast %cst_9 : f32 to vector<1x64xf32>
    %16 = arith.addf %13, %15 : vector<1x64xf32>
    %17 = math.rsqrt %16 : vector<1x64xf32>
    %18 = arith.mulf %14, %17 : vector<1x64xf32>
    %19 = vector.broadcast %18 : vector<1x64xf32> to vector<32x64xf32>
    %20 = arith.mulf %8, %19 : vector<32x64xf32>
    %c0_10 = arith.constant 0 : index
    %c0_11 = arith.constant 0 : index
    %21 = vector.load %arg4[%c0_10, %c0_11] : memref<1x64xf32, #tpu.memory_space<vmem>>, vector<1x64xf32>
    %22 = vector.broadcast %21 : vector<1x64xf32> to vector<32x64xf32>
    %23 = arith.addf %20, %22 : vector<32x64xf32>
    %cst_12 = arith.constant 0.000000e+00 : f32
    %24 = vector.broadcast %cst_12 : f32 to vector<32x64xf32>
    %25 = arith.cmpf ogt, %23, %24 : vector<32x64xf32>
    %cst_13 = arith.constant 2.000000e-01 : f32
    %26 = vector.broadcast %cst_13 : f32 to vector<32x64xf32>
    %27 = arith.mulf %26, %23 : vector<32x64xf32>
    %28 = arith.select %25, %23, %27 : vector<32x64xi1>, vector<32x64xf32>
    %29 = arith.truncf %28 : vector<32x64xf32> to vector<32x64xbf16>
    %c0_14 = arith.constant 0 : index
    %c0_15 = arith.constant 0 : index
    %30 = vector.load %arg5[%c0_14, %c0_15] : memref<32x64xbf16, #tpu.memory_space<vmem>>, vector<32x64xbf16>
    tpu.vector_store %arg5[%c0_14, %c0_15], %29 {strides = array<i32>} : memref<32x64xbf16, #tpu.memory_space<vmem>>, vector<32x64xbf16>,
    return
  }
  func.func @transform_0(%arg0: i32) -> (i32, i32) {
    %c0_i32 = arith.constant 0 : i32
    %c0_i32_0 = arith.constant 0 : i32
    %c0_i32_1 = arith.constant 0 : i32
    return %c0_i32, %c0_i32_0 : i32, i32
  }
  func.func @transform_1(%arg0: i32) -> (i32, i32) {
    %c0_i32 = arith.constant 0 : i32
    %c0_i32_0 = arith.constant 0 : i32
    %c0_i32_1 = arith.constant 0 : i32
    return %c0_i32, %c0_i32_0 : i32, i32
  }
  func.func @transform_2(%arg0: i32) -> (i32, i32) {
    %c0_i32 = arith.constant 0 : i32
    %c0_i32_0 = arith.constant 0 : i32
    %c0_i32_1 = arith.constant 0 : i32
    return %c0_i32, %c0_i32_0 : i32, i32
  }
  func.func @transform_3(%arg0: i32) -> (i32, i32) {
    %c0_i32 = arith.constant 0 : i32
    %c0_i32_0 = arith.constant 0 : i32
    %c0_i32_1 = arith.constant 0 : i32
    return %c0_i32, %c0_i32_0 : i32, i32
  }
  func.func @transform_4(%arg0: i32) -> (i32, i32) {
    %c0_i32 = arith.constant 0 : i32
    %c0_i32_0 = arith.constant 0 : i32
    %c0_i32_1 = arith.constant 0 : i32
    return %c0_i32, %c0_i32_0 : i32, i32
  }
}

</mosaic_0001>

<bundles_post_ra>
// kernel: discriminator_ca_forward.4
= control target key start
LH: loop header
LB: loop body
LE: loop exit
PB: predicated region body
PF: predicated region fallthrough
CT: control target
= control target key end

     0   :  { %v6316_v0 = vmov 0   ;;  %vm1500_vm0 = vcmask 261120   ;;  %vm4734_vm3 = vcmask 60416   ;;  %s8282_s1 = inlined_call_operand.vmem [shape: bf16[160,8], index: 1, kind: input, shape index: {}]   ;;  %s8283_s0 = inlined_call_operand.vmem [shape: bf16[2048,160], index: 0, kind: input, shape index: {}]   ;;  %s8284_s2 = inlined_call_operand.vmem [shape: bf16[2048,8], index: 2, kind: output, shape index: {}]  }
   0x1   :  { %1885 = vmatprep.subr.bf16.mxu0 %v6316_v0  ;;  %5901 = vmatprep.subr.bf16.mxu1 %v6316_v0  ;;  %v5922_v1 = vld [vmem:[%s8282_s1] sm:$0xff]   ;;  %v5923_v2 = vld [vmem:[%s8282_s1 + $0x8] sm:$0xff]   ;;  %v5924_v3 = vld [vmem:[%s8282_s1 + $0x10] sm:$0xff]  }
   0x2   :  { %1886 = vmatpush1.bf16.msra.mxu0 %v5922_v1  ;;  %5911 = vmatpush1.bf16.msra.mxu1 %v5922_v1  ;;  %v5925_v4 = vld [vmem:[%s8282_s1 + $0x18] sm:$0xff]   ;;  %v5934_v5 = vld [vmem:[%s8283_s0 + $0x4] ss:$8 sps:$4 sm:$0xff]   ;;  %v5928_v9 = vld [vmem:[%s8282_s1 + $0x30] sm:$0xff]  }
   0x3   :  { %1887 = vmatprep.subr.bf16.mxu0 %v6316_v0  ;;  %5902 = vmatprep.subr.bf16.mxu1 %v6316_v0  ;;  %v5937_v6 = vld [vmem:[%s8283_s0 + $0x404] ss:$8 sps:$4 sm:$0xff]   ;;  %v5929_v10 = vld [vmem:[%s8282_s1 + $0x38] sm:$0xff]   ;;  %v5932_v13 = vld [vmem:[%s8283_s0] ss:$8 sps:$4 sm:$0xff]  }
   0x4   :  { %5261 = vmatprep.mubr.msk.bf16.mxu0 %vm1500_vm0, %v5934_v5  ;;  %v5926_v7 = vld [vmem:[%s8282_s1 + $0x20] sm:$0xff]   ;;  %5325 = vmatprep.mubr.msk.bf16.mxu1 %vm1500_vm0, %v5937_v6  ;;  %v5927_v8 = vld [vmem:[%s8282_s1 + $0x28] sm:$0xff]   ;;  %v5938_v15 = vld [vmem:[%s8283_s0 + $0x14] ss:$8 sps:$4 sm:$0xff]  }
   0x5   :  { %v5930_v11 = vld [vmem:[%s8282_s1 + $0x40] sm:$0xff]   ;;  %v5931_v12 = vld [vmem:[%s8282_s1 + $0x48] sm:$0xff]   ;;  %v5940_v16 = vld [vmem:[%s8283_s0 + $0x414] ss:$8 sps:$4 sm:$0xff]  }
   0x6   :  { %1888 = vmatpush1.bf16.msra.mxu0 %v5923_v2  ;;  %5912 = vmatpush1.bf16.msra.mxu1 %v5923_v2  ;;  %v5935_v14 = vld [vmem:[%s8283_s0 + $0x400] ss:$8 sps:$4 sm:$0xff]   ;;  %v5942_v17 = vld [vmem:[%s8283_s0 + $0x10] ss:$8 sps:$4 sm:$0xff]   ;;  %v5944_v19 = vld [vmem:[%s8283_s0 + $0x24] ss:$8 sps:$4 sm:$0xff]  }
   0x7   :  { %1889 = vmatprep.subr.bf16.mxu0 %v6316_v0  ;;  %5903 = vmatprep.subr.bf16.mxu1 %v6316_v0  ;;  %v5943_v18 = vld [vmem:[%s8283_s0 + $0x410] ss:$8 sps:$4 sm:$0xff]   ;;  %v5946_v20 = vld [vmem:[%s8283_s0 + $0x424] ss:$8 sps:$4 sm:$0xff]   ;;  %v5948_v21 = vld [vmem:[%s8283_s0 + $0x20] ss:$8 sps:$4 sm:$0xff]  }
   0x8   :  { %v5949_v22 = vld [vmem:[%s8283_s0 + $0x420] ss:$8 sps:$4 sm:$0xff]   ;;  %v5950_v23 = vld [vmem:[%s8283_s0 + $0x34] ss:$8 sps:$4 sm:$0xff]   ;;  %v5954_v25 = vld [vmem:[%s8283_s0 + $0x30] ss:$8 sps:$4 sm:$0xff]  }
   0x9   :  { %v5952_v24 = vld [vmem:[%s8283_s0 + $0x434] ss:$8 sps:$4 sm:$0xff]   ;;  %v5955_v26 = vld [vmem:[%s8283_s0 + $0x430] ss:$8 sps:$4 sm:$0xff]   ;;  %v5956_v27 = vld [vmem:[%s8283_s0 + $0x44] ss:$8 sps:$4 sm:$0xff]  }
   0xa   :  { %1890 = vmatpush1.bf16.msra.mxu0 %v5924_v3  ;;  %5913 = vmatpush1.bf16.msra.mxu1 %v5924_v3  ;;  %v5958_v28 = vld [vmem:[%s8283_s0 + $0x444] ss:$8 sps:$4 sm:$0xff]   ;;  %v5960_v29 = vld [vmem:[%s8283_s0 + $0x40] ss:$8 sps:$4 sm:$0xff]   ;;  %v5962_v31 = vld [vmem:[%s8283_s0 + $0x54] ss:$8 sps:$4 sm:$0xff]  }
   0xb   :  { %1891 = vmatprep.subr.bf16.mxu0 %v6316_v0  ;;  %5904 = vmatprep.subr.bf16.mxu1 %v6316_v0  ;;  %v5961_v30 = vld [vmem:[%s8283_s0 + $0x440] ss:$8 sps:$4 sm:$0xff]   ;;  %v5964_v32 = vld [vmem:[%s8283_s0 + $0x454] ss:$8 sps:$4 sm:$0xff]   ;;  %v5966_v33 = vld [vmem:[%s8283_s0 + $0x50] ss:$8 sps:$4 sm:$0xff]  }
   0xc   :  { %v5967_v34 = vld [vmem:[%s8283_s0 + $0x450] ss:$8 sps:$4 sm:$0xff]   ;;  %v5968_v35 = vld [vmem:[%s8283_s0 + $0x64] ss:$8 sps:$4 sm:$0xff]   ;;  %v5972_v37 = vld [vmem:[%s8283_s0 + $0x60] ss:$8 sps:$4 sm:$0xff]  }
   0xd   :  { %v5970_v36 = vld [vmem:[%s8283_s0 + $0x464] ss:$8 sps:$4 sm:$0xff]   ;;  %v5973_v38 = vld [vmem:[%s8283_s0 + $0x460] ss:$8 sps:$4 sm:$0xff]   ;;  %v5974_v39 = vld [vmem:[%s8283_s0 + $0x74] ss:$8 sps:$4 sm:$0xff]  }
   0xe   :  { %1892 = vmatpush1.bf16.msra.mxu0 %v5925_v4  ;;  %5914 = vmatpush1.bf16.msra.mxu1 %v5925_v4  ;;  %v5976_v40 = vld [vmem:[%s8283_s0 + $0x474] ss:$8 sps:$4 sm:$0xff]   ;;  %v5978_v41 = vld [vmem:[%s8283_s0 + $0x70] ss:$8 sps:$4 sm:$0xff]   ;;  %v5980_v43 = vld [vmem:[%s8283_s0 + $0x84] ss:$8 sps:$4 sm:$0xff]  }
   0xf   :  { %1893 = vmatprep.subr.bf16.mxu0 %v6316_v0  ;;  %5905 = vmatprep.subr.bf16.mxu1 %v6316_v0  ;;  %v5979_v42 = vld [vmem:[%s8283_s0 + $0x470] ss:$8 sps:$4 sm:$0xff]   ;;  %v5982_v44 = vld [vmem:[%s8283_s0 + $0x484] ss:$8 sps:$4 sm:$0xff]   ;;  %v5984_v45 = vld [vmem:[%s8283_s0 + $0x80] ss:$8 sps:$4 sm:$0xff]  }
  0x10   :  { %v5985_v46 = vld [vmem:[%s8283_s0 + $0x480] ss:$8 sps:$4 sm:$0xff]   ;;  %v5986_v47 = vld [vmem:[%s8283_s0 + $0x94] ss:$8 sps:$4 sm:$0xff]   ;;  %v5990_v49 = vld [vmem:[%s8283_s0 + $0x90] ss:$8 sps:$4 sm:$0xff]  }
  0x11   :  { %v5988_v48 = vld [vmem:[%s8283_s0 + $0x494] ss:$8 sps:$4 sm:$0xff]   ;;  %v5991_v50 = vld [vmem:[%s8283_s0 + $0x490] ss:$8 sps:$4 sm:$0xff]   ;;  %v5992_v51 = vld [vmem:[%s8283_s0 + $0xa4] ss:$8 sps:$4 sm:$0xff]  }
  0x12   :  { %1894 = vmatpush1.bf16.msra.mxu0 %v5926_v7  ;;  %5915 = vmatpush1.bf16.msra.mxu1 %v5926_v7  ;;  %v5994_v52 = vld [vmem:[%s8283_s0 + $0x4a4] ss:$8 sps:$4 sm:$0xff]   ;;  %v5996_v53 = vld [vmem:[%s8283_s0 + $0xa0] ss:$8 sps:$4 sm:$0xff]   ;;  %v5998_v55 = vld [vmem:[%s8283_s0 + $0xb4] ss:$8 sps:$4 sm:$0xff]  }
  0x13   :  { %1895 = vmatprep.subr.bf16.mxu0 %v6316_v0  ;;  %5906 = vmatprep.subr.bf16.mxu1 %v6316_v0  ;;  %v5997_v54 = vld [vmem:[%s8283_s0 + $0x4a0] ss:$8 sps:$4 sm:$0xff]   ;;  %v6000_v56 = vld [vmem:[%s8283_s0 + $0x4b4] ss:$8 sps:$4 sm:$0xff]   ;;  %v6002_v57 = vld [vmem:[%s8283_s0 + $0xb0] ss:$8 sps:$4 sm:$0xff]  }
  0x14   :  { %v6003_v58 = vld [vmem:[%s8283_s0 + $0x4b0] ss:$8 sps:$4 sm:$0xff]   ;;  %v6004_v59 = vld [vmem:[%s8283_s0 + $0xc4] ss:$8 sps:$4 sm:$0xff]   ;;  %v6008_v61 = vld [vmem:[%s8283_s0 + $0xc0] ss:$8 sps:$4 sm:$0xff]  }
  0x15   :  { %v6006_v60 = vld [vmem:[%s8283_s0 + $0x4c4] ss:$8 sps:$4 sm:$0xff]   ;;  %v6009_v62 = vld [vmem:[%s8283_s0 + $0x4c0] ss:$8 sps:$4 sm:$0xff]   ;;  %v6010_v63 = vld [vmem:[%s8283_s0 + $0xd4] ss:$8 sps:$4 sm:$0xff]  }
  0x16   :  { %1896 = vmatpush1.bf16.msra.mxu0 %v5927_v8  ;;  %5916 = vmatpush1.bf16.msra.mxu1 %v5927_v8  ;;  %v6014_v1 = vld [vmem:[%s8283_s0 + $0xd0] ss:$8 sps:$4 sm:$0xff]   ;;  %v6016_v3 = vld [vmem:[%s8283_s0 + $0xe4] ss:$8 sps:$4 sm:$0xff]   ;;  %v6020_v5 = vld [vmem:[%s8283_s0 + $0xe0] ss:$8 sps:$4 sm:$0xff]  }
  0x17   :  { %1897 = vmatprep.subr.bf16.mxu0 %v6316_v0  ;;  %5907 = vmatprep.subr.bf16.mxu1 %v6316_v0  ;;  %v6015_v2 = vld [vmem:[%s8283_s0 + $0x4d0] ss:$8 sps:$4 sm:$0xff]   ;;  %v6018_v4 = vld [vmem:[%s8283_s0 + $0x4e4] ss:$8 sps:$4 sm:$0xff]   ;;  %v6021_v6 = vld [vmem:[%s8283_s0 + $0x4e0] ss:$8 sps:$4 sm:$0xff]  }
  0x18   :  { %v6022_v7 = vld [vmem:[%s8283_s0 + $0xf4] ss:$8 sps:$4 sm:$0xff]  }
  0x19   :  { %v6024_v8 = vld [vmem:[%s8283_s0 + $0x4f4] ss:$8 sps:$4 sm:$0xff]  }
  0x1a   :  { %1898 = vmatpush1.bf16.msra.mxu0 %v5928_v9  ;;  %5917 = vmatpush1.bf16.msra.mxu1 %v5928_v9  ;;  %v6026_v9 = vld [vmem:[%s8283_s0 + $0xf0] ss:$8 sps:$4 sm:$0xff]  }
  0x1b   :  { %1899 = vmatprep.subr.bf16.mxu0 %v6316_v0  ;;  %5908 = vmatprep.subr.bf16.mxu1 %v6316_v0 }
  0x1e   :  { %1900 = vmatpush1.bf16.msra.mxu0 %v5929_v10  ;;  %5918 = vmatpush1.bf16.msra.mxu1 %v5929_v10  ;;  %v6027_v10 = vld [vmem:[%s8283_s0 + $0x4f0] ss:$8 sps:$4 sm:$0xff]  }
  0x1f   :  { %1901 = vmatprep.subr.bf16.mxu0 %v6316_v0  ;;  %5909 = vmatprep.subr.bf16.mxu1 %v6316_v0 }
  0x22   :  { %1902 = vmatpush1.bf16.msra.mxu0 %v5930_v11  ;;  %5919 = vmatpush1.bf16.msra.mxu1 %v5930_v11  ;;  %v6028_v11 = vld [vmem:[%s8283_s0 + $0x104] ss:$8 sps:$4 sm:$0xff]  }
  0x23   :  { %1903 = vmatprep.subr.bf16.mxu0 %v6316_v0  ;;  %5910 = vmatprep.subr.bf16.mxu1 %v6316_v0  ;;  %v6012_v0 = vld [vmem:[%s8283_s0 + $0x4d4] ss:$8 sps:$4 sm:$0xff]  }
  0x26   :  { %1904 = vmatpush1.bf16.msra.mxu0 %v5931_v12  ;;  %5920 = vmatpush1.bf16.msra.mxu1 %v5931_v12  ;;  %v6030_v12 = vld [vmem:[%s8283_s0 + $0x504] ss:$8 sps:$4 sm:$0xff]  }
  0x29   :  { %1918 = vmatmul.mubr.bf16.vlgmr.msra.gmra.mrb[0].mxu0 %v5932_v13  ;;  %2430 = vmatmul.mubr.bf16.vlgmr.msra.gmra.mrb[0].mxu1 %v5935_v14  ;;  %v6032_v13 = vld [vmem:[%s8283_s0 + $0x100] ss:$8 sps:$4 sm:$0xff]  }
  0x2a   :  { %5262 = vmatprep.mubr.msk.bf16.mxu0 %vm1500_vm0, %v5938_v15  ;;  %5326 = vmatprep.mubr.msk.bf16.mxu1 %vm1500_vm0, %v5940_v16  ;;  %v6033_v14 = vld [vmem:[%s8283_s0 + $0x500] ss:$8 sps:$4 sm:$0xff]   ;;  %v6034_v15 = vld [vmem:[%s8283_s0 + $0x114] ss:$8 sps:$4 sm:$0xff]  }
  0x2b   :  { %v6036_v16 = vld [vmem:[%s8283_s0 + $0x514] ss:$8 sps:$4 sm:$0xff]  }
  0x31   :  { %1926 = vmatmul.mubr.bf16.gmra.mrb[4].mxu0 %v5942_v17  ;;  %2438 = vmatmul.mubr.bf16.gmra.mrb[4].mxu1 %v5943_v18  ;;  %v6038_v17 = vld [vmem:[%s8283_s0 + $0x110] ss:$8 sps:$4 sm:$0xff]  }
  0x32   :  { %5263 = vmatprep.mubr.msk.bf16.mxu0 %vm1500_vm0, %v5944_v19  ;;  %5327 = vmatprep.mubr.msk.bf16.mxu1 %vm1500_vm0, %v5946_v20  ;;  %v6039_v18 = vld [vmem:[%s8283_s0 + $0x510] ss:$8 sps:$4 sm:$0xff]   ;;  %v6040_v19 = vld [vmem:[%s8283_s0 + $0x124] ss:$8 sps:$4 sm:$0xff]  }
  0x33   :  { %v6042_v20 = vld [vmem:[%s8283_s0 + $0x524] ss:$8 sps:$4 sm:$0xff]  }
  0x39   :  { %1934 = vmatmul.mubr.bf16.gmra.mrb[8].mxu0 %v5948_v21  ;;  %2446 = vmatmul.mubr.bf16.gmra.mrb[8].mxu1 %v5949_v22  ;;  %v6044_v21 = vld [vmem:[%s8283_s0 + $0x120] ss:$8 sps:$4 sm:$0xff]  }
  0x3a   :  { %5264 = vmatprep.mubr.msk.bf16.mxu0 %vm1500_vm0, %v5950_v23  ;;  %5328 = vmatprep.mubr.msk.bf16.mxu1 %vm1500_vm0, %v5952_v24  ;;  %v6045_v22 = vld [vmem:[%s8283_s0 + $0x520] ss:$8 sps:$4 sm:$0xff]   ;;  %v6046_v23 = vld [vmem:[%s8283_s0 + $0x134] ss:$8 sps:$4 sm:$0xff]  }
  0x3b   :  { %v6048_v24 = vld [vmem:[%s8283_s0 + $0x534] ss:$8 sps:$4 sm:$0xff]  }
  0x41   :  { %1942 = vmatmul.mubr.bf16.gmra.mrb[12].mxu0 %v5954_v25  ;;  %2454 = vmatmul.mubr.bf16.gmra.mrb[12].mxu1 %v5955_v26  ;;  %v6050_v25 = vld [vmem:[%s8283_s0 + $0x130] ss:$8 sps:$4 sm:$0xff]  }
  0x42   :  { %5265 = vmatprep.mubr.msk.bf16.mxu0 %vm1500_vm0, %v5956_v27  ;;  %5329 = vmatprep.mubr.msk.bf16.mxu1 %vm1500_vm0, %v5958_v28  ;;  %v6051_v26 = vld [vmem:[%s8283_s0 + $0x530] ss:$8 sps:$4 sm:$0xff]   ;;  %v6052_v27 = vld [vmem:[%s8283_s0 + $0x144] ss:$8 sps:$4 sm:$0xff]  }
  0x43   :  { %v6054_v28 = vld [vmem:[%s8283_s0 + $0x544] ss:$8 sps:$4 sm:$0xff]  }
  0x49   :  { %1950 = vmatmul.mubr.bf16.gmra.mrb[16].mxu0 %v5960_v29  ;;  %2462 = vmatmul.mubr.bf16.gmra.mrb[16].mxu1 %v5961_v30  ;;  %v6056_v29 = vld [vmem:[%s8283_s0 + $0x140] ss:$8 sps:$4 sm:$0xff]  }
  0x4a   :  { %5266 = vmatprep.mubr.msk.bf16.mxu0 %vm1500_vm0, %v5962_v31  ;;  %5330 = vmatprep.mubr.msk.bf16.mxu1 %vm1500_vm0, %v5964_v32  ;;  %v6057_v30 = vld [vmem:[%s8283_s0 + $0x540] ss:$8 sps:$4 sm:$0xff]   ;;  %v6058_v31 = vld [vmem:[%s8283_s0 + $0x154] ss:$8 sps:$4 sm:$0xff]  }
  0x4b   :  { %v6060_v32 = vld [vmem:[%s8283_s0 + $0x554] ss:$8 sps:$4 sm:$0xff]  }
  0x51   :  { %1958 = vmatmul.mubr.bf16.gmra.mrb[20].mxu0 %v5966_v33  ;;  %2470 = vmatmul.mubr.bf16.gmra.mrb[20].mxu1 %v5967_v34  ;;  %v6062_v33 = vld [vmem:[%s8283_s0 + $0x150] ss:$8 sps:$4 sm:$0xff]  }
  0x52   :  { %5267 = vmatprep.mubr.msk.bf16.mxu0 %vm1500_vm0, %v5968_v35  ;;  %5331 = vmatprep.mubr.msk.bf16.mxu1 %vm1500_vm0, %v5970_v36  ;;  %v6063_v34 = vld [vmem:[%s8283_s0 + $0x550] ss:$8 sps:$4 sm:$0xff]   ;;  %v6064_v35 = vld [vmem:[%s8283_s0 + $0x164] ss:$8 sps:$4 sm:$0xff]  }
  0x53   :  { %v6066_v36 = vld [vmem:[%s8283_s0 + $0x564] ss:$8 sps:$4 sm:$0xff]  }
  0x59   :  { %1966 = vmatmul.mubr.bf16.gmra.mrb[24].mxu0 %v5972_v37  ;;  %2478 = vmatmul.mubr.bf16.gmra.mrb[24].mxu1 %v5973_v38  ;;  %v6068_v37 = vld [vmem:[%s8283_s0 + $0x160] ss:$8 sps:$4 sm:$0xff]  }
  0x5a   :  { %5268 = vmatprep.mubr.msk.bf16.mxu0 %vm1500_vm0, %v5974_v39  ;;  %5332 = vmatprep.mubr.msk.bf16.mxu1 %vm1500_vm0, %v5976_v40  ;;  %v6069_v38 = vld [vmem:[%s8283_s0 + $0x560] ss:$8 sps:$4 sm:$0xff]   ;;  %v6070_v39 = vld [vmem:[%s8283_s0 + $0x174] ss:$8 sps:$4 sm:$0xff]  }
  0x5b   :  { %v6072_v40 = vld [vmem:[%s8283_s0 + $0x574] ss:$8 sps:$4 sm:$0xff]  }
  0x61   :  { %1974 = vmatmul.mubr.bf16.gmra.mrb[28].mxu0 %v5978_v41  ;;  %2486 = vmatmul.mubr.bf16.gmra.mrb[28].mxu1 %v5979_v42  ;;  %v6074_v41 = vld [vmem:[%s8283_s0 + $0x170] ss:$8 sps:$4 sm:$0xff]  }
  0x62   :  { %5269 = vmatprep.mubr.msk.bf16.mxu0 %vm1500_vm0, %v5980_v43  ;;  %5333 = vmatprep.mubr.msk.bf16.mxu1 %vm1500_vm0, %v5982_v44  ;;  %v6075_v42 = vld [vmem:[%s8283_s0 + $0x570] ss:$8 sps:$4 sm:$0xff]   ;;  %v6076_v43 = vld [vmem:[%s8283_s0 + $0x184] ss:$8 sps:$4 sm:$0xff]  }
  0x63   :  { %v6078_v44 = vld [vmem:[%s8283_s0 + $0x584] ss:$8 sps:$4 sm:$0xff]  }
  0x69   :  { %1982 = vmatmul.mubr.bf16.gmra.mrb[32].mxu0 %v5984_v45  ;;  %2494 = vmatmul.mubr.bf16.gmra.mrb[32].mxu1 %v5985_v46  ;;  %v6080_v45 = vld [vmem:[%s8283_s0 + $0x180] ss:$8 sps:$4 sm:$0xff]  }
  0x6a   :  { %5270 = vmatprep.mubr.msk.bf16.mxu0 %vm1500_vm0, %v5986_v47  ;;  %5334 = vmatprep.mubr.msk.bf16.mxu1 %vm1500_vm0, %v5988_v48  ;;  %v6081_v46 = vld [vmem:[%s8283_s0 + $0x580] ss:$8 sps:$4 sm:$0xff]   ;;  %v6082_v47 = vld [vmem:[%s8283_s0 + $0x194] ss:$8 sps:$4 sm:$0xff]  }
  0x6b   :  { %v6084_v48 = vld [vmem:[%s8283_s0 + $0x594] ss:$8 sps:$4 sm:$0xff]  }
  0x71   :  { %1990 = vmatmul.mubr.bf16.gmra.mrb[36].mxu0 %v5990_v49  ;;  %2502 = vmatmul.mubr.bf16.gmra.mrb[36].mxu1 %v5991_v50  ;;  %v6086_v49 = vld [vmem:[%s8283_s0 + $0x190] ss:$8 sps:$4 sm:$0xff]  }
  0x72   :  { %5271 = vmatprep.mubr.msk.bf16.mxu0 %vm1500_vm0, %v5992_v51  ;;  %5335 = vmatprep.mubr.msk.bf16.mxu1 %vm1500_vm0, %v5994_v52  ;;  %v6087_v50 = vld [vmem:[%s8283_s0 + $0x590] ss:$8 sps:$4 sm:$0xff]   ;;  %v6088_v51 = vld [vmem:[%s8283_s0 + $0x1a4] ss:$8 sps:$4 sm:$0xff]  }
  0x73   :  { %v6090_v52 = vld [vmem:[%s8283_s0 + $0x5a4] ss:$8 sps:$4 sm:$0xff]  }
  0x79   :  { %1998 = vmatmul.mubr.bf16.gmra.mrb[40].mxu0 %v5996_v53  ;;  %2510 = vmatmul.mubr.bf16.gmra.mrb[40].mxu1 %v5997_v54  ;;  %v6092_v53 = vld [vmem:[%s8283_s0 + $0x1a0] ss:$8 sps:$4 sm:$0xff]  }
  0x7a   :  { %5272 = vmatprep.mubr.msk.bf16.mxu0 %vm1500_vm0, %v5998_v55  ;;  %5336 = vmatprep.mubr.msk.bf16.mxu1 %vm1500_vm0, %v6000_v56  ;;  %v6093_v54 = vld [vmem:[%s8283_s0 + $0x5a0] ss:$8 sps:$4 sm:$0xff]   ;;  %v6094_v55 = vld [vmem:[%s8283_s0 + $0x1b4] ss:$8 sps:$4 sm:$0xff]  }
  0x7b   :  { %v6096_v56 = vld [vmem:[%s8283_s0 + $0x5b4] ss:$8 sps:$4 sm:$0xff]  }
  0x81   :  { %2006 = vmatmul.mubr.bf16.gmra.mrb[44].mxu0 %v6002_v57  ;;  %2518 = vmatmul.mubr.bf16.gmra.mrb[44].mxu1 %v6003_v58 }
  0x82   :  { %5273 = vmatprep.mubr.msk.bf16.mxu0 %vm1500_vm0, %v6004_v59  ;;  %5337 = vmatprep.mubr.msk.bf16.mxu1 %vm1500_vm0, %v6006_v60  ;;  %v6098_v59 = vld [vmem:[%s8283_s0 + $0x1b0] ss:$8 sps:$4 sm:$0xff]  }
  0x83   :  { %v6099_v60 = vld [vmem:[%s8283_s0 + $0x5b0] ss:$8 sps:$4 sm:$0xff]  }
  0x89   :  { %2014 = vmatmul.mubr.bf16.gmra.mrb[48].mxu0 %v6008_v61  ;;  %2526 = vmatmul.mubr.bf16.gmra.mrb[48].mxu1 %v6009_v62 }
  0x8a   :  { %5274 = vmatprep.mubr.msk.bf16.mxu0 %vm1500_vm0, %v6010_v63  ;;  %5338 = vmatprep.mubr.msk.bf16.mxu1 %vm1500_vm0, %v6012_v0 }
  0x91   :  { %2022 = vmatmul.mubr.bf16.gmra.mrb[52].mxu0 %v6014_v1  ;;  %2534 = vmatmul.mubr.bf16.gmra.mrb[52].mxu1 %v6015_v2  ;;  %v6100_v1 = vld [vmem:[%s8283_s0 + $0x1c4] ss:$8 sps:$4 sm:$0xff]  }
  0x92   :  { %5275 = vmatprep.mubr.msk.bf16.mxu0 %vm1500_vm0, %v6016_v3  ;;  %5339 = vmatprep.mubr.msk.bf16.mxu1 %vm1500_vm0, %v6018_v4  ;;  %v6102_v2 = vld [vmem:[%s8283_s0 + $0x5c4] ss:$8 sps:$4 sm:$0xff]  }
  0x99   :  { %2030 = vmatmul.mubr.bf16.gmra.mrb[56].mxu0 %v6020_v5  ;;  %2542 = vmatmul.mubr.bf16.gmra.mrb[56].mxu1 %v6021_v6 }
  0x9a   :  { %5276 = vmatprep.mubr.msk.bf16.mxu0 %vm1500_vm0, %v6022_v7  ;;  %5340 = vmatprep.mubr.msk.bf16.mxu1 %vm1500_vm0, %v6024_v8 }
  0xa1   :  { %2038 = vmatmul.mubr.bf16.gmra.mrb[60].mxu0 %v6026_v9  ;;  %2550 = vmatmul.mubr.bf16.gmra.mrb[60].mxu1 %v6027_v10 }
  0xa2   :  { %5277 = vmatprep.mubr.msk.bf16.mxu0 %vm1500_vm0, %v6028_v11  ;;  %5341 = vmatprep.mubr.msk.bf16.mxu1 %vm1500_vm0, %v6030_v12 }
  0xa9   :  { %2046 = vmatmul.mubr.bf16.gmra.mrb[64].mxu0 %v6032_v13  ;;  %2558 = vmatmul.mubr.bf16.gmra.mrb[64].mxu1 %v6033_v14 }
  0xaa   :  { %5278 = vmatprep.mubr.msk.bf16.mxu0 %vm1500_vm0, %v6034_v15  ;;  %5342 = vmatprep.mubr.msk.bf16.mxu1 %vm1500_vm0, %v6036_v16 }
  0xb1   :  { %2054 = vmatmul.mubr.bf16.gmra.mrb[68].mxu0 %v6038_v17  ;;  %2566 = vmatmul.mubr.bf16.gmra.mrb[68].mxu1 %v6039_v18 }
  0xb2   :  { %5279 = vmatprep.mubr.msk.bf16.mxu0 %vm1500_vm0, %v6040_v19  ;;  %5343 = vmatprep.mubr.msk.bf16.mxu1 %vm1500_vm0, %v6042_v20  ;;  %v6104_v19 = vld [vmem:[%s8283_s0 + $0x1c0] ss:$8 sps:$4 sm:$0xff]  }
  0xb3   :  { %v6105_v20 = vld [vmem:[%s8283_s0 + $0x5c0] ss:$8 sps:$4 sm:$0xff]  }
  0xb9   :  { %2062 = vmatmul.mubr.bf16.gmra.mrb[72].mxu0 %v6044_v21  ;;  %2574 = vmatmul.mubr.bf16.gmra.mrb[72].mxu1 %v6045_v22 }
  0xba   :  { %5280 = vmatprep.mubr.msk.bf16.mxu0 %vm1500_vm0, %v6046_v23  ;;  %5344 = vmatprep.mubr.msk.bf16.mxu1 %vm1500_vm0, %v6048_v24 }
  0xc1   :  { %2070 = vmatmul.mubr.bf16.gmra.mrb[76].mxu0 %v6050_v25  ;;  %2582 = vmatmul.mubr.bf16.gmra.mrb[76].mxu1 %v6051_v26  ;;  %v6106_v25 = vld [vmem:[%s8283_s0 + $0x1d4] ss:$8 sps:$4 sm:$0xff]  }
  0xc2   :  { %5281 = vmatprep.mubr.msk.bf16.mxu0 %vm1500_vm0, %v6052_v27  ;;  %5345 = vmatprep.mubr.msk.bf16.mxu1 %vm1500_vm0, %v6054_v28  ;;  %v6108_v26 = vld [vmem:[%s8283_s0 + $0x5d4] ss:$8 sps:$4 sm:$0xff]  }
  0xc9   :  { %2078 = vmatmul.mubr.bf16.gmra.mrb[80].mxu0 %v6056_v29  ;;  %2590 = vmatmul.mubr.bf16.gmra.mrb[80].mxu1 %v6057_v30 }
  0xca   :  { %5282 = vmatprep.mubr.msk.bf16.mxu0 %vm1500_vm0, %v6058_v31  ;;  %5346 = vmatprep.mubr.msk.bf16.mxu1 %vm1500_vm0, %v6060_v32 }
  0xd1   :  { %2086 = vmatmul.mubr.bf16.gmra.mrb[84].mxu0 %v6062_v33  ;;  %2598 = vmatmul.mubr.bf16.gmra.mrb[84].mxu1 %v6063_v34 }
  0xd2   :  { %5283 = vmatprep.mubr.msk.bf16.mxu0 %vm1500_vm0, %v6064_v35  ;;  %5347 = vmatprep.mubr.msk.bf16.mxu1 %vm1500_vm0, %v6066_v36 }
  0xd9   :  { %2094 = vmatmul.mubr.bf16.gmra.mrb[88].mxu0 %v6068_v37  ;;  %2606 = vmatmul.mubr.bf16.gmra.mrb[88].mxu1 %v6069_v38 }
  0xda   :  { %5284 = vmatprep.mubr.msk.bf16.mxu0 %vm1500_vm0, %v6070_v39  ;;  %5348 = vmatprep.mubr.msk.bf16.mxu1 %vm1500_vm0, %v6072_v40 }
  0xe1   :  { %2102 = vmatmul.mubr.bf16.gmra.mrb[92].mxu0 %v6074_v41  ;;  %2614 = vmatmul.mubr.bf16.gmra.mrb[92].mxu1 %v6075_v42 }
  0xe2   :  { %5285 = vmatprep.mubr.msk.bf16.mxu0 %vm1500_vm0, %v6076_v43  ;;  %5349 = vmatprep.mubr.msk.bf16.mxu1 %vm1500_vm0, %v6078_v44  ;;  %v6110_v43 = vld [vmem:[%s8283_s0 + $0x1d0] ss:$8 sps:$4 sm:$0xff]  }
  0xe3   :  { %v6111_v44 = vld [vmem:[%s8283_s0 + $0x5d0] ss:$8 sps:$4 sm:$0xff]  }
  0xe9   :  { %2110 = vmatmul.mubr.bf16.gmra.mrb[96].mxu0 %v6080_v45  ;;  %2622 = vmatmul.mubr.bf16.gmra.mrb[96].mxu1 %v6081_v46 }
  0xea   :  { %5286 = vmatprep.mubr.msk.bf16.mxu0 %vm1500_vm0, %v6082_v47  ;;  %5350 = vmatprep.mubr.msk.bf16.mxu1 %vm1500_vm0, %v6084_v48 }
  0xf1   :  { %2118 = vmatmul.mubr.bf16.gmra.mrb[100].mxu0 %v6086_v49  ;;  %2630 = vmatmul.mubr.bf16.gmra.mrb[100].mxu1 %v6087_v50  ;;  %v6112_v49 = vld [vmem:[%s8283_s0 + $0x1e4] ss:$8 sps:$4 sm:$0xff]  }
  0xf2   :  { %5287 = vmatprep.mubr.msk.bf16.mxu0 %vm1500_vm0, %v6088_v51  ;;  %5351 = vmatprep.mubr.msk.bf16.mxu1 %vm1500_vm0, %v6090_v52  ;;  %v6114_v50 = vld [vmem:[%s8283_s0 + $0x5e4] ss:$8 sps:$4 sm:$0xff]  }
  0xf9   :  { %2126 = vmatmul.mubr.bf16.gmra.mrb[104].mxu0 %v6092_v53  ;;  %2638 = vmatmul.mubr.bf16.gmra.mrb[104].mxu1 %v6093_v54 }
  0xfa   :  { %5288 = vmatprep.mubr.msk.bf16.mxu0 %vm1500_vm0, %v6094_v55  ;;  %5352 = vmatprep.mubr.msk.bf16.mxu1 %vm1500_vm0, %v6096_v56 }
  0xfc   :  { %v1919_v57 = vpop.f32.mrb[0].mxu0  ;;  %v2431_v58 = vpop.f32.mrb[0].mxu1 }
  0xfd   :  { %vm2942_vm1 = vcmp.gt.f32.partialorder %v1919_v57, 0.0  ;;  %v3198_v61 = vmul.f32 0.2, %v1919_v57  ;;  %vm3070_vm2 = vcmp.gt.f32.partialorder %v2431_v58, 0.0  ;;  %v3326_v62 = vmul.f32 0.2, %v2431_v58 }
  0xfe   :  { %v1921_v63 = vpop.f32.mrb[1].mxu0  ;;  %v2433_v0 = vpop.f32.mrb[1].mxu1 }
  0xff   :  { %v3454_v3 = vsel %vm2942_vm1, %v1919_v57, %v3198_v61  ;;  %v3582_v4 = vsel %vm3070_vm2, %v2431_v58, %v3326_v62  ;;  %v1922_v5 = vpop.f32.mrb[2].mxu0  ;;  %v2434_v6 = vpop.f32.mrb[2].mxu1 }
 0x100   :  { %v5645_v7 = vpack.c.bf16 %v3454_v3, %v3454_v3  ;;  %v5773_v8 = vpack.c.bf16 %v3582_v4, %v3582_v4  ;;  %vm2943_vm4 = vcmp.gt.f32.partialorder %v1922_v5, 0.0  ;;  %v3199_v9 = vmul.f32 0.2, %v1922_v5  ;;  %v1924_v10 = vpop.f32.mrb[3].mxu0  ;;  %v2436_v11 = vpop.f32.mrb[3].mxu1 }
 0x101   :  { %vm3071_vm5 = vcmp.gt.f32.partialorder %v2434_v6, 0.0  ;;  %v3327_v12 = vmul.f32 0.2, %v2434_v6  ;;  %2134 = vmatmul.mubr.bf16.gmra.mrb[108].mxu0 %v6098_v59  ;;  %2646 = vmatmul.mubr.bf16.gmra.mrb[108].mxu1 %v6099_v60  ;;  %v6116_v3 = vld [vmem:[%s8283_s0 + $0x1e0] ss:$8 sps:$4 sm:$0xff]  }
 0x102   :  { %4735 = vst.msk [vmem:[%s8284_s2] sm:$0xf] %vm4734_vm3, %v5645_v7  ;;  %4863 = vst.msk [vmem:[%s8284_s2 + $0x200] sm:$0xf] %vm4734_vm3, %v5773_v8  ;;  %v3455_v13 = vsel %vm2943_vm4, %v1922_v5, %v3199_v9  ;;  %5289 = vmatprep.mubr.msk.bf16.mxu0 %vm1500_vm0, %v6100_v1  ;;  %5353 = vmatprep.mubr.msk.bf16.mxu1 %vm1500_vm0, %v6102_v2  ;;  %v6117_v4 = vld [vmem:[%s8283_s0 + $0x5e0] ss:$8 sps:$4 sm:$0xff]  }
 0x103   :  { %v5646_v14 = vpack.c.bf16 %v3455_v13, %v3455_v13  ;;  %v3583_v15 = vsel %vm3071_vm5, %v2434_v6, %v3327_v12  ;;  %v6118_v9 = vld [vmem:[%s8283_s0 + $0x1f4] ss:$8 sps:$4 sm:$0xff]  }
 0x104   :  { %v5774_v16 = vpack.c.bf16 %v3583_v15, %v3583_v15  ;;  %v1927_v17 = vpop.f32.mrb[4].mxu0  ;;  %v2439_v18 = vpop.f32.mrb[4].mxu1  ;;  %v6120_v10 = vld [vmem:[%s8283_s0 + $0x5f4] ss:$8 sps:$4 sm:$0xff]  }
 0x105   :  { %4736 = vst.msk [vmem:[%s8284_s2 + $0x4] sm:$0xf] %vm4734_vm3, %v5646_v14  ;;  %vm2944_vm6 = vcmp.gt.f32.partialorder %v1927_v17, 0.0  ;;  %v3200_v21 = vmul.f32 0.2, %v1927_v17  ;;  %vm3072_vm7 = vcmp.gt.f32.partialorder %v2439_v18, 0.0 }
 0x106   :  { %v3328_v22 = vmul.f32 0.2, %v2439_v18  ;;  %4864 = vst.msk [vmem:[%s8284_s2 + $0x204] sm:$0xf] %vm4734_vm3, %v5774_v16  ;;  %v1929_v23 = vpop.f32.mrb[5].mxu0  ;;  %v2441_v24 = vpop.f32.mrb[5].mxu1 }
 0x107   :  { %v3456_v27 = vsel %vm2944_vm6, %v1927_v17, %v3200_v21  ;;  %v1930_v29 = vpop.f32.mrb[6].mxu0  ;;  %v2442_v30 = vpop.f32.mrb[6].mxu1 }
 0x108   :  { %v3584_v28 = vsel %vm3072_vm7, %v2439_v18, %v3328_v22  ;;  %v5647_v31 = vpack.c.bf16 %v3456_v27, %v3456_v27  ;;  %vm2945_vm8 = vcmp.gt.f32.partialorder %v1930_v29, 0.0  ;;  %v3201_v33 = vmul.f32 0.2, %v1930_v29  ;;  %v1932_v34 = vpop.f32.mrb[7].mxu0  ;;  %v2444_v35 = vpop.f32.mrb[7].mxu1 }
 0x109   :  { %v5775_v32 = vpack.c.bf16 %v3584_v28, %v3584_v28  ;;  %vm3073_vm9 = vcmp.gt.f32.partialorder %v2442_v30, 0.0  ;;  %v3329_v36 = vmul.f32 0.2, %v2442_v30  ;;  %2142 = vmatmul.mubr.bf16.gmra.mrb[112].mxu0 %v6104_v19  ;;  %2654 = vmatmul.mubr.bf16.gmra.mrb[112].mxu1 %v6105_v20  ;;  %v6122_v27 = vld [vmem:[%s8283_s0 + $0x1f0] ss:$8 sps:$4 sm:$0xff]  }
 0x10a   :  { %4737 = vst.msk [vmem:[%s8284_s2 + $0x8] sm:$0xf] %vm4734_vm3, %v5647_v31  ;;  %v3457_v37 = vsel %vm2945_vm8, %v1930_v29, %v3201_v33  ;;  %5290 = vmatprep.mubr.msk.bf16.mxu0 %vm1500_vm0, %v6106_v25  ;;  %5354 = vmatprep.mubr.msk.bf16.mxu1 %vm1500_vm0, %v6108_v26  ;;  %v6123_v28 = vld [vmem:[%s8283_s0 + $0x5f0] ss:$8 sps:$4 sm:$0xff]   ;;  %v6124_v33 = vld [vmem:[%s8283_s0 + $0x204] ss:$8 sps:$4 sm:$0xff]  }
 0x10b   :  { %4865 = vst.msk [vmem:[%s8284_s2 + $0x208] sm:$0xf] %vm4734_vm3, %v5775_v32  ;;  %v5648_v38 = vpack.c.bf16 %v3457_v37, %v3457_v37  ;;  %v3585_v39 = vsel %vm3073_vm9, %v2442_v30, %v3329_v36  ;;  %v6126_v34 = vld [vmem:[%s8283_s0 + $0x604] ss:$8 sps:$4 sm:$0xff]  }
 0x10c   :  { %v5776_v40 = vpack.c.bf16 %v3585_v39, %v3585_v39  ;;  %v1935_v41 = vpop.f32.mrb[8].mxu0  ;;  %v2447_v42 = vpop.f32.mrb[8].mxu1 }
 0x10d   :  { %4738 = vst.msk [vmem:[%s8284_s2 + $0xc] sm:$0xf] %vm4734_vm3, %v5648_v38  ;;  %vm2946_vm10 = vcmp.gt.f32.partialorder %v1935_v41, 0.0  ;;  %v3202_v45 = vmul.f32 0.2, %v1935_v41  ;;  %vm3074_vm11 = vcmp.gt.f32.partialorder %v2447_v42, 0.0 }
 0x10e   :  { %v3330_v46 = vmul.f32 0.2, %v2447_v42  ;;  %4866 = vst.msk [vmem:[%s8284_s2 + $0x20c] sm:$0xf] %vm4734_vm3, %v5776_v40  ;;  %v1937_v47 = vpop.f32.mrb[9].mxu0  ;;  %v2449_v48 = vpop.f32.mrb[9].mxu1 }
 0x10f   :  { %v3458_v51 = vsel %vm2946_vm10, %v1935_v41, %v3202_v45  ;;  %v1938_v53 = vpop.f32.mrb[10].mxu0  ;;  %v2450_v54 = vpop.f32.mrb[10].mxu1 }
 0x110   :  { %v3586_v52 = vsel %vm3074_vm11, %v2447_v42, %v3330_v46  ;;  %v5649_v55 = vpack.c.bf16 %v3458_v51, %v3458_v51  ;;  %vm2947_vm12 = vcmp.gt.f32.partialorder %v1938_v53, 0.0  ;;  %v3203_v57 = vmul.f32 0.2, %v1938_v53  ;;  %v1940_v58 = vpop.f32.mrb[11].mxu0  ;;  %v2452_v59 = vpop.f32.mrb[11].mxu1 }
 0x111   :  { %v5777_v56 = vpack.c.bf16 %v3586_v52, %v3586_v52  ;;  %vm3075_vm13 = vcmp.gt.f32.partialorder %v2450_v54, 0.0  ;;  %v3331_v60 = vmul.f32 0.2, %v2450_v54  ;;  %2150 = vmatmul.mubr.bf16.gmra.mrb[116].mxu0 %v6110_v43  ;;  %2662 = vmatmul.mubr.bf16.gmra.mrb[116].mxu1 %v6111_v44  ;;  %v6128_v51 = vld [vmem:[%s8283_s0 + $0x200] ss:$8 sps:$4 sm:$0xff]  }
 0x112   :  { %4739 = vst.msk [vmem:[%s8284_s2 + $0x10] sm:$0xf] %vm4734_vm3, %v5649_v55  ;;  %v3459_v61 = vsel %vm2947_vm12, %v1938_v53, %v3203_v57  ;;  %5291 = vmatprep.mubr.msk.bf16.mxu0 %vm1500_vm0, %v6112_v49  ;;  %5355 = vmatprep.mubr.msk.bf16.mxu1 %vm1500_vm0, %v6114_v50  ;;  %v6129_v52 = vld [vmem:[%s8283_s0 + $0x600] ss:$8 sps:$4 sm:$0xff]   ;;  %v6130_v57 = vld [vmem:[%s8283_s0 + $0x214] ss:$8 sps:$4 sm:$0xff]  }
 0x113   :  { %4867 = vst.msk [vmem:[%s8284_s2 + $0x210] sm:$0xf] %vm4734_vm3, %v5777_v56  ;;  %v5650_v62 = vpack.c.bf16 %v3459_v61, %v3459_v61  ;;  %v3587_v63 = vsel %vm3075_vm13, %v2450_v54, %v3331_v60  ;;  %v6132_v58 = vld [vmem:[%s8283_s0 + $0x614] ss:$8 sps:$4 sm:$0xff]  }
 0x114   :  { %v5778_v0 = vpack.c.bf16 %v3587_v63, %v3587_v63  ;;  %v1943_v1 = vpop.f32.mrb[12].mxu0  ;;  %v2455_v2 = vpop.f32.mrb[12].mxu1 }
 0x115   :  { %4740 = vst.msk [vmem:[%s8284_s2 + $0x14] sm:$0xf] %vm4734_vm3, %v5650_v62  ;;  %vm2948_vm14 = vcmp.gt.f32.partialorder %v1943_v1, 0.0  ;;  %v3204_v5 = vmul.f32 0.2, %v1943_v1  ;;  %vm3076_vm15 = vcmp.gt.f32.partialorder %v2455_v2, 0.0 }
 0x116   :  { %v3332_v6 = vmul.f32 0.2, %v2455_v2  ;;  %4868 = vst.msk [vmem:[%s8284_s2 + $0x214] sm:$0xf] %vm4734_vm3, %v5778_v0  ;;  %v1945_v7 = vpop.f32.mrb[13].mxu0  ;;  %v2457_v8 = vpop.f32.mrb[13].mxu1 }
 0x117   :  { %v3460_v11 = vsel %vm2948_vm14, %v1943_v1, %v3204_v5  ;;  %v1946_v13 = vpop.f32.mrb[14].mxu0  ;;  %v2458_v14 = vpop.f32.mrb[14].mxu1 }
 0x118   :  { %v3588_v12 = vsel %vm3076_vm15, %v2455_v2, %v3332_v6  ;;  %v5651_v15 = vpack.c.bf16 %v3460_v11, %v3460_v11  ;;  %vm2949_vm1 = vcmp.gt.f32.partialorder %v1946_v13, 0.0  ;;  %v3205_v17 = vmul.f32 0.2, %v1946_v13  ;;  %v1948_v18 = vpop.f32.mrb[15].mxu0  ;;  %v2460_v19 = vpop.f32.mrb[15].mxu1 }
 0x119   :  { %v5779_v16 = vpack.c.bf16 %v3588_v12, %v3588_v12  ;;  %vm3077_vm2 = vcmp.gt.f32.partialorder %v2458_v14, 0.0  ;;  %v3333_v20 = vmul.f32 0.2, %v2458_v14  ;;  %2158 = vmatmul.mubr.bf16.gmra.mrb[120].mxu0 %v6116_v3  ;;  %2670 = vmatmul.mubr.bf16.gmra.mrb[120].mxu1 %v6117_v4  ;;  %v6134_v11 = vld [vmem:[%s8283_s0 + $0x210] ss:$8 sps:$4 sm:$0xff]  }
 0x11a   :  { %4741 = vst.msk [vmem:[%s8284_s2 + $0x18] sm:$0xf] %vm4734_vm3, %v5651_v15  ;;  %v3461_v21 = vsel %vm2949_vm1, %v1946_v13, %v3205_v17  ;;  %5292 = vmatprep.mubr.msk.bf16.mxu0 %vm1500_vm0, %v6118_v9  ;;  %5356 = vmatprep.mubr.msk.bf16.mxu1 %vm1500_vm0, %v6120_v10  ;;  %v6135_v12 = vld [vmem:[%s8283_s0 + $0x610] ss:$8 sps:$4 sm:$0xff]   ;;  %v6136_v17 = vld [vmem:[%s8283_s0 + $0x224] ss:$8 sps:$4 sm:$0xff]  }
 0x11b   :  { %4869 = vst.msk [vmem:[%s8284_s2 + $0x218] sm:$0xf] %vm4734_vm3, %v5779_v16  ;;  %v5652_v22 = vpack.c.bf16 %v3461_v21, %v3461_v21  ;;  %v3589_v23 = vsel %vm3077_vm2, %v2458_v14, %v3333_v20  ;;  %v6138_v18 = vld [vmem:[%s8283_s0 + $0x624] ss:$8 sps:$4 sm:$0xff]  }
 0x11c   :  { %v5780_v24 = vpack.c.bf16 %v3589_v23, %v3589_v23  ;;  %v1951_v25 = vpop.f32.mrb[16].mxu0  ;;  %v2463_v26 = vpop.f32.mrb[16].mxu1 }
 0x11d   :  { %4742 = vst.msk [vmem:[%s8284_s2 + $0x1c] sm:$0xf] %vm4734_vm3, %v5652_v22  ;;  %vm2950_vm4 = vcmp.gt.f32.partialorder %v1951_v25, 0.0  ;;  %v3206_v29 = vmul.f32 0.2, %v1951_v25  ;;  %vm3078_vm5 = vcmp.gt.f32.partialorder %v2463_v26, 0.0 }
 0x11e   :  { %v3334_v30 = vmul.f32 0.2, %v2463_v26  ;;  %4870 = vst.msk [vmem:[%s8284_s2 + $0x21c] sm:$0xf] %vm4734_vm3, %v5780_v24  ;;  %v1953_v31 = vpop.f32.mrb[17].mxu0  ;;  %v2465_v32 = vpop.f32.mrb[17].mxu1 }
 0x11f   :  { %v3462_v35 = vsel %vm2950_vm4, %v1951_v25, %v3206_v29  ;;  %v1954_v37 = vpop.f32.mrb[18].mxu0  ;;  %v2466_v38 = vpop.f32.mrb[18].mxu1 }
 0x120   :  { %v3590_v36 = vsel %vm3078_vm5, %v2463_v26, %v3334_v30  ;;  %v5653_v39 = vpack.c.bf16 %v3462_v35, %v3462_v35  ;;  %vm2951_vm6 = vcmp.gt.f32.partialorder %v1954_v37, 0.0  ;;  %v3207_v41 = vmul.f32 0.2, %v1954_v37  ;;  %v1956_v42 = vpop.f32.mrb[19].mxu0  ;;  %v2468_v43 = vpop.f32.mrb[19].mxu1 }
 0x121   :  { %v5781_v40 = vpack.c.bf16 %v3590_v36, %v3590_v36  ;;  %vm3079_vm7 = vcmp.gt.f32.partialorder %v2466_v38, 0.0  ;;  %v3335_v44 = vmul.f32 0.2, %v2466_v38  ;;  %2166 = vmatmul.mubr.bf16.gmra.mrb[124].mxu0 %v6122_v27  ;;  %2678 = vmatmul.mubr.bf16.gmra.mrb[124].mxu1 %v6123_v28  ;;  %v6140_v35 = vld [vmem:[%s8283_s0 + $0x220] ss:$8 sps:$4 sm:$0xff]  }
 0x122   :  { %4743 = vst.msk [vmem:[%s8284_s2 + $0x20] sm:$0xf] %vm4734_vm3, %v5653_v39  ;;  %v3463_v45 = vsel %vm2951_vm6, %v1954_v37, %v3207_v41  ;;  %5293 = vmatprep.mubr.msk.bf16.mxu0 %vm1500_vm0, %v6124_v33  ;;  %5357 = vmatprep.mubr.msk.bf16.mxu1 %vm1500_vm0, %v6126_v34  ;;  %v6141_v36 = vld [vmem:[%s8283_s0 + $0x620] ss:$8 sps:$4 sm:$0xff]   ;;  %v6142_v41 = vld [vmem:[%s8283_s0 + $0x234] ss:$8 sps:$4 sm:$0xff]  }
 0x123   :  { %4871 = vst.msk [vmem:[%s8284_s2 + $0x220] sm:$0xf] %vm4734_vm3, %v5781_v40  ;;  %v5654_v46 = vpack.c.bf16 %v3463_v45, %v3463_v45  ;;  %v3591_v47 = vsel %vm3079_vm7, %v2466_v38, %v3335_v44  ;;  %v6144_v42 = vld [vmem:[%s8283_s0 + $0x634] ss:$8 sps:$4 sm:$0xff]  }
 0x124   :  { %v5782_v48 = vpack.c.bf16 %v3591_v47, %v3591_v47  ;;  %v1959_v49 = vpop.f32.mrb[20].mxu0  ;;  %v2471_v50 = vpop.f32.mrb[20].mxu1 }
 0x125   :  { %4744 = vst.msk [vmem:[%s8284_s2 + $0x24] sm:$0xf] %vm4734_vm3, %v5654_v46  ;;  %vm2952_vm8 = vcmp.gt.f32.partialorder %v1959_v49, 0.0  ;;  %v3208_v53 = vmul.f32 0.2, %v1959_v49  ;;  %vm3080_vm9 = vcmp.gt.f32.partialorder %v2471_v50, 0.0 }
 0x126   :  { %v3336_v54 = vmul.f32 0.2, %v2471_v50  ;;  %4872 = vst.msk [vmem:[%s8284_s2 + $0x224] sm:$0xf] %vm4734_vm3, %v5782_v48  ;;  %v1961_v55 = vpop.f32.mrb[21].mxu0  ;;  %v2473_v56 = vpop.f32.mrb[21].mxu1 }
 0x127   :  { %v3464_v59 = vsel %vm2952_vm8, %v1959_v49, %v3208_v53  ;;  %v1962_v61 = vpop.f32.mrb[22].mxu0  ;;  %v2474_v62 = vpop.f32.mrb[22].mxu1 }
 0x128   :  { %v3592_v60 = vsel %vm3080_vm9, %v2471_v50, %v3336_v54  ;;  %v5655_v63 = vpack.c.bf16 %v3464_v59, %v3464_v59  ;;  %vm2953_vm10 = vcmp.gt.f32.partialorder %v1962_v61, 0.0  ;;  %v3209_v1 = vmul.f32 0.2, %v1962_v61  ;;  %v1964_v2 = vpop.f32.mrb[23].mxu0  ;;  %v2476_v3 = vpop.f32.mrb[23].mxu1 }
 0x129   :  { %v5783_v0 = vpack.c.bf16 %v3592_v60, %v3592_v60  ;;  %vm3081_vm11 = vcmp.gt.f32.partialorder %v2474_v62, 0.0  ;;  %v3337_v4 = vmul.f32 0.2, %v2474_v62  ;;  %2174 = vmatmul.mubr.bf16.gmra.mrb[128].mxu0 %v6128_v51  ;;  %2686 = vmatmul.mubr.bf16.gmra.mrb[128].mxu1 %v6129_v52  ;;  %v6146_v59 = vld [vmem:[%s8283_s0 + $0x230] ss:$8 sps:$4 sm:$0xff]  }
 0x12a   :  { %4745 = vst.msk [vmem:[%s8284_s2 + $0x28] sm:$0xf] %vm4734_vm3, %v5655_v63  ;;  %v3465_v5 = vsel %vm2953_vm10, %v1962_v61, %v3209_v1  ;;  %5294 = vmatprep.mubr.msk.bf16.mxu0 %vm1500_vm0, %v6130_v57  ;;  %5358 = vmatprep.mubr.msk.bf16.mxu1 %vm1500_vm0, %v6132_v58  ;;  %v6147_v60 = vld [vmem:[%s8283_s0 + $0x630] ss:$8 sps:$4 sm:$0xff]   ;;  %v6148_v1 = vld [vmem:[%s8283_s0 + $0x244] ss:$8 sps:$4 sm:$0xff]  }
 0x12b   :  { %4873 = vst.msk [vmem:[%s8284_s2 + $0x228] sm:$0xf] %vm4734_vm3, %v5783_v0  ;;  %v5656_v6 = vpack.c.bf16 %v3465_v5, %v3465_v5  ;;  %v3593_v7 = vsel %vm3081_vm11, %v2474_v62, %v3337_v4  ;;  %v6150_v2 = vld [vmem:[%s8283_s0 + $0x644] ss:$8 sps:$4 sm:$0xff]  }
 0x12c   :  { %v5784_v8 = vpack.c.bf16 %v3593_v7, %v3593_v7  ;;  %v1967_v9 = vpop.f32.mrb[24].mxu0  ;;  %v2479_v10 = vpop.f32.mrb[24].mxu1 }
 0x12d   :  { %4746 = vst.msk [vmem:[%s8284_s2 + $0x2c] sm:$0xf] %vm4734_vm3, %v5656_v6  ;;  %vm2954_vm12 = vcmp.gt.f32.partialorder %v1967_v9, 0.0  ;;  %v3210_v13 = vmul.f32 0.2, %v1967_v9  ;;  %vm3082_vm13 = vcmp.gt.f32.partialorder %v2479_v10, 0.0 }
 0x12e   :  { %v3338_v14 = vmul.f32 0.2, %v2479_v10  ;;  %4874 = vst.msk [vmem:[%s8284_s2 + $0x22c] sm:$0xf] %vm4734_vm3, %v5784_v8  ;;  %v1969_v15 = vpop.f32.mrb[25].mxu0  ;;  %v2481_v16 = vpop.f32.mrb[25].mxu1 }
 0x12f   :  { %v3466_v19 = vsel %vm2954_vm12, %v1967_v9, %v3210_v13  ;;  %v1970_v21 = vpop.f32.mrb[26].mxu0  ;;  %v2482_v22 = vpop.f32.mrb[26].mxu1 }
 0x130   :  { %v3594_v20 = vsel %vm3082_vm13, %v2479_v10, %v3338_v14  ;;  %v5657_v23 = vpack.c.bf16 %v3466_v19, %v3466_v19  ;;  %vm2955_vm14 = vcmp.gt.f32.partialorder %v1970_v21, 0.0  ;;  %v3211_v25 = vmul.f32 0.2, %v1970_v21  ;;  %v1972_v26 = vpop.f32.mrb[27].mxu0  ;;  %v2484_v27 = vpop.f32.mrb[27].mxu1 }
 0x131   :  { %v5785_v24 = vpack.c.bf16 %v3594_v20, %v3594_v20  ;;  %vm3083_vm15 = vcmp.gt.f32.partialorder %v2482_v22, 0.0  ;;  %v3339_v28 = vmul.f32 0.2, %v2482_v22  ;;  %2182 = vmatmul.mubr.bf16.gmra.mrb[132].mxu0 %v6134_v11  ;;  %2694 = vmatmul.mubr.bf16.gmra.mrb[132].mxu1 %v6135_v12  ;;  %v6152_v19 = vld [vmem:[%s8283_s0 + $0x240] ss:$8 sps:$4 sm:$0xff]  }
 0x132   :  { %4747 = vst.msk [vmem:[%s8284_s2 + $0x30] sm:$0xf] %vm4734_vm3, %v5657_v23  ;;  %v3467_v29 = vsel %vm2955_vm14, %v1970_v21, %v3211_v25  ;;  %5295 = vmatprep.mubr.msk.bf16.mxu0 %vm1500_vm0, %v6136_v17  ;;  %5359 = vmatprep.mubr.msk.bf16.mxu1 %vm1500_vm0, %v6138_v18  ;;  %v6153_v20 = vld [vmem:[%s8283_s0 + $0x640] ss:$8 sps:$4 sm:$0xff]   ;;  %v6154_v25 = vld [vmem:[%s8283_s0 + $0x254] ss:$8 sps:$4 sm:$0xff]  }
 0x133   :  { %4875 = vst.msk [vmem:[%s8284_s2 + $0x230] sm:$0xf] %vm4734_vm3, %v5785_v24  ;;  %v5658_v30 = vpack.c.bf16 %v3467_v29, %v3467_v29  ;;  %v3595_v31 = vsel %vm3083_vm15, %v2482_v22, %v3339_v28  ;;  %v6156_v26 = vld [vmem:[%s8283_s0 + $0x654] ss:$8 sps:$4 sm:$0xff]  }
 0x134   :  { %v5786_v32 = vpack.c.bf16 %v3595_v31, %v3595_v31  ;;  %v1975_v33 = vpop.f32.mrb[28].mxu0  ;;  %v2487_v34 = vpop.f32.mrb[28].mxu1 }
 0x135   :  { %4748 = vst.msk [vmem:[%s8284_s2 + $0x34] sm:$0xf] %vm4734_vm3, %v5658_v30  ;;  %vm2956_vm1 = vcmp.gt.f32.partialorder %v1975_v33, 0.0  ;;  %v3212_v37 = vmul.f32 0.2, %v1975_v33  ;;  %vm3084_vm2 = vcmp.gt.f32.partialorder %v2487_v34, 0.0 }
 0x136   :  { %v3340_v38 = vmul.f32 0.2, %v2487_v34  ;;  %4876 = vst.msk [vmem:[%s8284_s2 + $0x234] sm:$0xf] %vm4734_vm3, %v5786_v32  ;;  %v1977_v39 = vpop.f32.mrb[29].mxu0  ;;  %v2489_v40 = vpop.f32.mrb[29].mxu1 }
 0x137   :  { %v3468_v43 = vsel %vm2956_vm1, %v1975_v33, %v3212_v37  ;;  %v1978_v45 = vpop.f32.mrb[30].mxu0  ;;  %v2490_v46 = vpop.f32.mrb[30].mxu1 }
 0x138   :  { %v3596_v44 = vsel %vm3084_vm2, %v2487_v34, %v3340_v38  ;;  %v5659_v47 = vpack.c.bf16 %v3468_v43, %v3468_v43  ;;  %vm2957_vm4 = vcmp.gt.f32.partialorder %v1978_v45, 0.0  ;;  %v3213_v49 = vmul.f32 0.2, %v1978_v45  ;;  %v1980_v50 = vpop.f32.mrb[31].mxu0  ;;  %v2492_v51 = vpop.f32.mrb[31].mxu1 }
 0x139   :  { %v5787_v48 = vpack.c.bf16 %v3596_v44, %v3596_v44  ;;  %vm3085_vm5 = vcmp.gt.f32.partialorder %v2490_v46, 0.0  ;;  %v3341_v52 = vmul.f32 0.2, %v2490_v46  ;;  %2190 = vmatmul.mubr.bf16.gmra.mrb[136].mxu0 %v6140_v35  ;;  %2702 = vmatmul.mubr.bf16.gmra.mrb[136].mxu1 %v6141_v36  ;;  %v6158_v43 = vld [vmem:[%s8283_s0 + $0x250] ss:$8 sps:$4 sm:$0xff]  }
 0x13a   :  { %4749 = vst.msk [vmem:[%s8284_s2 + $0x38] sm:$0xf] %vm4734_vm3, %v5659_v47  ;;  %v3469_v53 = vsel %vm2957_vm4, %v1978_v45, %v3213_v49  ;;  %5296 = vmatprep.mubr.msk.bf16.mxu0 %vm1500_vm0, %v6142_v41  ;;  %5360 = vmatprep.mubr.msk.bf16.mxu1 %vm1500_vm0, %v6144_v42  ;;  %v6159_v44 = vld [vmem:[%s8283_s0 + $0x650] ss:$8 sps:$4 sm:$0xff]   ;;  %v6160_v49 = vld [vmem:[%s8283_s0 + $0x264] ss:$8 sps:$4 sm:$0xff]  }
 0x13b   :  { %4877 = vst.msk [vmem:[%s8284_s2 + $0x238] sm:$0xf] %vm4734_vm3, %v5787_v48  ;;  %v5660_v54 = vpack.c.bf16 %v3469_v53, %v3469_v53  ;;  %v3597_v55 = vsel %vm3085_vm5, %v2490_v46, %v3341_v52  ;;  %v6162_v50 = vld [vmem:[%s8283_s0 + $0x664] ss:$8 sps:$4 sm:$0xff]  }
 0x13c   :  { %v5788_v56 = vpack.c.bf16 %v3597_v55, %v3597_v55  ;;  %v1983_v57 = vpop.f32.mrb[32].mxu0  ;;  %v2495_v58 = vpop.f32.mrb[32].mxu1 }
 0x13d   :  { %4750 = vst.msk [vmem:[%s8284_s2 + $0x3c] sm:$0xf] %vm4734_vm3, %v5660_v54  ;;  %vm2958_vm6 = vcmp.gt.f32.partialorder %v1983_v57, 0.0  ;;  %v3214_v61 = vmul.f32 0.2, %v1983_v57  ;;  %vm3086_vm7 = vcmp.gt.f32.partialorder %v2495_v58, 0.0 }
 0x13e   :  { %v3342_v62 = vmul.f32 0.2, %v2495_v58  ;;  %4878 = vst.msk [vmem:[%s8284_s2 + $0x23c] sm:$0xf] %vm4734_vm3, %v5788_v56  ;;  %v1985_v63 = vpop.f32.mrb[33].mxu0  ;;  %v2497_v0 = vpop.f32.mrb[33].mxu1 }
 0x13f   :  { %v3470_v3 = vsel %vm2958_vm6, %v1983_v57, %v3214_v61  ;;  %v1986_v5 = vpop.f32.mrb[34].mxu0  ;;  %v2498_v6 = vpop.f32.mrb[34].mxu1 }
 0x140   :  { %v3598_v4 = vsel %vm3086_vm7, %v2495_v58, %v3342_v62  ;;  %v5661_v7 = vpack.c.bf16 %v3470_v3, %v3470_v3  ;;  %vm2959_vm8 = vcmp.gt.f32.partialorder %v1986_v5, 0.0  ;;  %v3215_v9 = vmul.f32 0.2, %v1986_v5  ;;  %v1988_v10 = vpop.f32.mrb[35].mxu0  ;;  %v2500_v11 = vpop.f32.mrb[35].mxu1 }
 0x141   :  { %v5789_v8 = vpack.c.bf16 %v3598_v4, %v3598_v4  ;;  %vm3087_vm9 = vcmp.gt.f32.partialorder %v2498_v6, 0.0  ;;  %v3343_v12 = vmul.f32 0.2, %v2498_v6  ;;  %2198 = vmatmul.mubr.bf16.gmra.mrb[140].mxu0 %v6146_v59  ;;  %2710 = vmatmul.mubr.bf16.gmra.mrb[140].mxu1 %v6147_v60  ;;  %v6164_v3 = vld [vmem:[%s8283_s0 + $0x260] ss:$8 sps:$4 sm:$0xff]  }
 0x142   :  { %4751 = vst.msk [vmem:[%s8284_s2 + $0x40] sm:$0xf] %vm4734_vm3, %v5661_v7  ;;  %v3471_v13 = vsel %vm2959_vm8, %v1986_v5, %v3215_v9  ;;  %5297 = vmatprep.mubr.msk.bf16.mxu0 %vm1500_vm0, %v6148_v1  ;;  %5361 = vmatprep.mubr.msk.bf16.mxu1 %vm1500_vm0, %v6150_v2  ;;  %v6165_v4 = vld [vmem:[%s8283_s0 + $0x660] ss:$8 sps:$4 sm:$0xff]   ;;  %v6166_v9 = vld [vmem:[%s8283_s0 + $0x274] ss:$8 sps:$4 sm:$0xff]  }
 0x143   :  { %4879 = vst.msk [vmem:[%s8284_s2 + $0x240] sm:$0xf] %vm4734_vm3, %v5789_v8  ;;  %v5662_v14 = vpack.c.bf16 %v3471_v13, %v3471_v13  ;;  %v3599_v15 = vsel %vm3087_vm9, %v2498_v6, %v3343_v12  ;;  %v6168_v10 = vld [vmem:[%s8283_s0 + $0x674] ss:$8 sps:$4 sm:$0xff]  }
 0x144   :  { %v5790_v16 = vpack.c.bf16 %v3599_v15, %v3599_v15  ;;  %v1991_v17 = vpop.f32.mrb[36].mxu0  ;;  %v2503_v18 = vpop.f32.mrb[36].mxu1 }
 0x145   :  { %4752 = vst.msk [vmem:[%s8284_s2 + $0x44] sm:$0xf] %vm4734_vm3, %v5662_v14  ;;  %vm2960_vm10 = vcmp.gt.f32.partialorder %v1991_v17, 0.0  ;;  %v3216_v21 = vmul.f32 0.2, %v1991_v17  ;;  %vm3088_vm11 = vcmp.gt.f32.partialorder %v2503_v18, 0.0 }
 0x146   :  { %v3344_v22 = vmul.f32 0.2, %v2503_v18  ;;  %4880 = vst.msk [vmem:[%s8284_s2 + $0x244] sm:$0xf] %vm4734_vm3, %v5790_v16  ;;  %v1993_v23 = vpop.f32.mrb[37].mxu0  ;;  %v2505_v24 = vpop.f32.mrb[37].mxu1 }
 0x147   :  { %v3472_v27 = vsel %vm2960_vm10, %v1991_v17, %v3216_v21  ;;  %v1994_v29 = vpop.f32.mrb[38].mxu0  ;;  %v2506_v30 = vpop.f32.mrb[38].mxu1 }
 0x148   :  { %v3600_v28 = vsel %vm3088_vm11, %v2503_v18, %v3344_v22  ;;  %v5663_v31 = vpack.c.bf16 %v3472_v27, %v3472_v27  ;;  %vm2961_vm12 = vcmp.gt.f32.partialorder %v1994_v29, 0.0  ;;  %v3217_v33 = vmul.f32 0.2, %v1994_v29  ;;  %v1996_v34 = vpop.f32.mrb[39].mxu0  ;;  %v2508_v35 = vpop.f32.mrb[39].mxu1 }
 0x149   :  { %v5791_v32 = vpack.c.bf16 %v3600_v28, %v3600_v28  ;;  %vm3089_vm13 = vcmp.gt.f32.partialorder %v2506_v30, 0.0  ;;  %v3345_v36 = vmul.f32 0.2, %v2506_v30  ;;  %2206 = vmatmul.mubr.bf16.gmra.mrb[144].mxu0 %v6152_v19  ;;  %2718 = vmatmul.mubr.bf16.gmra.mrb[144].mxu1 %v6153_v20  ;;  %v6170_v27 = vld [vmem:[%s8283_s0 + $0x270] ss:$8 sps:$4 sm:$0xff]  }
 0x14a   :  { %4753 = vst.msk [vmem:[%s8284_s2 + $0x48] sm:$0xf] %vm4734_vm3, %v5663_v31  ;;  %v3473_v37 = vsel %vm2961_vm12, %v1994_v29, %v3217_v33  ;;  %5298 = vmatprep.mubr.msk.bf16.mxu0 %vm1500_vm0, %v6154_v25  ;;  %5362 = vmatprep.mubr.msk.bf16.mxu1 %vm1500_vm0, %v6156_v26  ;;  %v6171_v28 = vld [vmem:[%s8283_s0 + $0x670] ss:$8 sps:$4 sm:$0xff]   ;;  %v6172_v33 = vld [vmem:[%s8283_s0 + $0x284] ss:$8 sps:$4 sm:$0xff]  }
 0x14b   :  { %4881 = vst.msk [vmem:[%s8284_s2 + $0x248] sm:$0xf] %vm4734_vm3, %v5791_v32  ;;  %v5664_v38 = vpack.c.bf16 %v3473_v37, %v3473_v37  ;;  %v3601_v39 = vsel %vm3089_vm13, %v2506_v30, %v3345_v36  ;;  %v6174_v34 = vld [vmem:[%s8283_s0 + $0x684] ss:$8 sps:$4 sm:$0xff]  }
 0x14c   :  { %v5792_v40 = vpack.c.bf16 %v3601_v39, %v3601_v39  ;;  %v1999_v41 = vpop.f32.mrb[40].mxu0  ;;  %v2511_v42 = vpop.f32.mrb[40].mxu1 }
 0x14d   :  { %4754 = vst.msk [vmem:[%s8284_s2 + $0x4c] sm:$0xf] %vm4734_vm3, %v5664_v38  ;;  %vm2962_vm14 = vcmp.gt.f32.partialorder %v1999_v41, 0.0  ;;  %v3218_v45 = vmul.f32 0.2, %v1999_v41  ;;  %vm3090_vm15 = vcmp.gt.f32.partialorder %v2511_v42, 0.0 }
 0x14e   :  { %v3346_v46 = vmul.f32 0.2, %v2511_v42  ;;  %4882 = vst.msk [vmem:[%s8284_s2 + $0x24c] sm:$0xf] %vm4734_vm3, %v5792_v40  ;;  %v2001_v47 = vpop.f32.mrb[41].mxu0  ;;  %v2513_v48 = vpop.f32.mrb[41].mxu1 }
 0x14f   :  { %v3474_v51 = vsel %vm2962_vm14, %v1999_v41, %v3218_v45  ;;  %v2002_v53 = vpop.f32.mrb[42].mxu0  ;;  %v2514_v54 = vpop.f32.mrb[42].mxu1 }
 0x150   :  { %v3602_v52 = vsel %vm3090_vm15, %v2511_v42, %v3346_v46  ;;  %v5665_v55 = vpack.c.bf16 %v3474_v51, %v3474_v51  ;;  %vm2963_vm1 = vcmp.gt.f32.partialorder %v2002_v53, 0.0  ;;  %v3219_v57 = vmul.f32 0.2, %v2002_v53  ;;  %v2004_v58 = vpop.f32.mrb[43].mxu0  ;;  %v2516_v59 = vpop.f32.mrb[43].mxu1 }
 0x151   :  { %v5793_v56 = vpack.c.bf16 %v3602_v52, %v3602_v52  ;;  %vm3091_vm2 = vcmp.gt.f32.partialorder %v2514_v54, 0.0  ;;  %v3347_v60 = vmul.f32 0.2, %v2514_v54  ;;  %2214 = vmatmul.mubr.bf16.gmra.mrb[148].mxu0 %v6158_v43  ;;  %2726 = vmatmul.mubr.bf16.gmra.mrb[148].mxu1 %v6159_v44  ;;  %v6176_v51 = vld [vmem:[%s8283_s0 + $0x280] ss:$8 sps:$4 sm:$0xff]  }
 0x152   :  { %4755 = vst.msk [vmem:[%s8284_s2 + $0x50] sm:$0xf] %vm4734_vm3, %v5665_v55  ;;  %v3475_v61 = vsel %vm2963_vm1, %v2002_v53, %v3219_v57  ;;  %5299 = vmatprep.mubr.msk.bf16.mxu0 %vm1500_vm0, %v6160_v49  ;;  %5363 = vmatprep.mubr.msk.bf16.mxu1 %vm1500_vm0, %v6162_v50  ;;  %v6177_v52 = vld [vmem:[%s8283_s0 + $0x680] ss:$8 sps:$4 sm:$0xff]   ;;  %v6178_v57 = vld [vmem:[%s8283_s0 + $0x294] ss:$8 sps:$4 sm:$0xff]  }
 0x153   :  { %4883 = vst.msk [vmem:[%s8284_s2 + $0x250] sm:$0xf] %vm4734_vm3, %v5793_v56  ;;  %v5666_v62 = vpack.c.bf16 %v3475_v61, %v3475_v61  ;;  %v3603_v63 = vsel %vm3091_vm2, %v2514_v54, %v3347_v60  ;;  %v6180_v58 = vld [vmem:[%s8283_s0 + $0x694] ss:$8 sps:$4 sm:$0xff]  }
 0x154   :  { %v5794_v0 = vpack.c.bf16 %v3603_v63, %v3603_v63  ;;  %v2007_v1 = vpop.f32.mrb[44].mxu0  ;;  %v2519_v2 = vpop.f32.mrb[44].mxu1 }
 0x155   :  { %4756 = vst.msk [vmem:[%s8284_s2 + $0x54] sm:$0xf] %vm4734_vm3, %v5666_v62  ;;  %vm2964_vm4 = vcmp.gt.f32.partialorder %v2007_v1, 0.0  ;;  %v3220_v5 = vmul.f32 0.2, %v2007_v1  ;;  %vm3092_vm5 = vcmp.gt.f32.partialorder %v2519_v2, 0.0 }
 0x156   :  { %v3348_v6 = vmul.f32 0.2, %v2519_v2  ;;  %4884 = vst.msk [vmem:[%s8284_s2 + $0x254] sm:$0xf] %vm4734_vm3, %v5794_v0  ;;  %v2009_v7 = vpop.f32.mrb[45].mxu0  ;;  %v2521_v8 = vpop.f32.mrb[45].mxu1 }
 0x157   :  { %v3476_v11 = vsel %vm2964_vm4, %v2007_v1, %v3220_v5  ;;  %v2010_v13 = vpop.f32.mrb[46].mxu0  ;;  %v2522_v14 = vpop.f32.mrb[46].mxu1 }
 0x158   :  { %v3604_v12 = vsel %vm3092_vm5, %v2519_v2, %v3348_v6  ;;  %v5667_v15 = vpack.c.bf16 %v3476_v11, %v3476_v11  ;;  %vm2965_vm6 = vcmp.gt.f32.partialorder %v2010_v13, 0.0  ;;  %v3221_v17 = vmul.f32 0.2, %v2010_v13  ;;  %v2012_v18 = vpop.f32.mrb[47].mxu0  ;;  %v2524_v19 = vpop.f32.mrb[47].mxu1 }
 0x159   :  { %v5795_v16 = vpack.c.bf16 %v3604_v12, %v3604_v12  ;;  %vm3093_vm7 = vcmp.gt.f32.partialorder %v2522_v14, 0.0  ;;  %v3349_v20 = vmul.f32 0.2, %v2522_v14  ;;  %2222 = vmatmul.mubr.bf16.gmra.mrb[152].mxu0 %v6164_v3  ;;  %2734 = vmatmul.mubr.bf16.gmra.mrb[152].mxu1 %v6165_v4  ;;  %v6182_v11 = vld [vmem:[%s8283_s0 + $0x290] ss:$8 sps:$4 sm:$0xff]  }
 0x15a   :  { %4757 = vst.msk [vmem:[%s8284_s2 + $0x58] sm:$0xf] %vm4734_vm3, %v5667_v15  ;;  %v3477_v21 = vsel %vm2965_vm6, %v2010_v13, %v3221_v17  ;;  %5300 = vmatprep.mubr.msk.bf16.mxu0 %vm1500_vm0, %v6166_v9  ;;  %5364 = vmatprep.mubr.msk.bf16.mxu1 %vm1500_vm0, %v6168_v10  ;;  %v6183_v12 = vld [vmem:[%s8283_s0 + $0x690] ss:$8 sps:$4 sm:$0xff]   ;;  %v6184_v17 = vld [vmem:[%s8283_s0 + $0x2a4] ss:$8 sps:$4 sm:$0xff]  }
 0x15b   :  { %4885 = vst.msk [vmem:[%s8284_s2 + $0x258] sm:$0xf] %vm4734_vm3, %v5795_v16  ;;  %v5668_v22 = vpack.c.bf16 %v3477_v21, %v3477_v21  ;;  %v3605_v23 = vsel %vm3093_vm7, %v2522_v14, %v3349_v20  ;;  %v6186_v18 = vld [vmem:[%s8283_s0 + $0x6a4] ss:$8 sps:$4 sm:$0xff]  }
 0x15c   :  { %v5796_v24 = vpack.c.bf16 %v3605_v23, %v3605_v23  ;;  %v2015_v25 = vpop.f32.mrb[48].mxu0  ;;  %v2527_v26 = vpop.f32.mrb[48].mxu1 }
 0x15d   :  { %4758 = vst.msk [vmem:[%s8284_s2 + $0x5c] sm:$0xf] %vm4734_vm3, %v5668_v22  ;;  %vm2966_vm8 = vcmp.gt.f32.partialorder %v2015_v25, 0.0  ;;  %v3222_v29 = vmul.f32 0.2, %v2015_v25  ;;  %vm3094_vm9 = vcmp.gt.f32.partialorder %v2527_v26, 0.0 }
 0x15e   :  { %v3350_v30 = vmul.f32 0.2, %v2527_v26  ;;  %4886 = vst.msk [vmem:[%s8284_s2 + $0x25c] sm:$0xf] %vm4734_vm3, %v5796_v24  ;;  %v2017_v31 = vpop.f32.mrb[49].mxu0  ;;  %v2529_v32 = vpop.f32.mrb[49].mxu1 }
 0x15f   :  { %v3478_v35 = vsel %vm2966_vm8, %v2015_v25, %v3222_v29  ;;  %v2018_v37 = vpop.f32.mrb[50].mxu0  ;;  %v2530_v38 = vpop.f32.mrb[50].mxu1 }
 0x160   :  { %v3606_v36 = vsel %vm3094_vm9, %v2527_v26, %v3350_v30  ;;  %v5669_v39 = vpack.c.bf16 %v3478_v35, %v3478_v35  ;;  %vm2967_vm10 = vcmp.gt.f32.partialorder %v2018_v37, 0.0  ;;  %v3223_v41 = vmul.f32 0.2, %v2018_v37  ;;  %v2020_v42 = vpop.f32.mrb[51].mxu0  ;;  %v2532_v43 = vpop.f32.mrb[51].mxu1 }
 0x161   :  { %v5797_v40 = vpack.c.bf16 %v3606_v36, %v3606_v36  ;;  %vm3095_vm11 = vcmp.gt.f32.partialorder %v2530_v38, 0.0  ;;  %v3351_v44 = vmul.f32 0.2, %v2530_v38  ;;  %2230 = vmatmul.mubr.bf16.gmra.mrb[156].mxu0 %v6170_v27  ;;  %2742 = vmatmul.mubr.bf16.gmra.mrb[156].mxu1 %v6171_v28  ;;  %v6188_v35 = vld [vmem:[%s8283_s0 + $0x2a0] ss:$8 sps:$4 sm:$0xff]  }
 0x162   :  { %4759 = vst.msk [vmem:[%s8284_s2 + $0x60] sm:$0xf] %vm4734_vm3, %v5669_v39  ;;  %v3479_v45 = vsel %vm2967_vm10, %v2018_v37, %v3223_v41  ;;  %5301 = vmatprep.mubr.msk.bf16.mxu0 %vm1500_vm0, %v6172_v33  ;;  %5365 = vmatprep.mubr.msk.bf16.mxu1 %vm1500_vm0, %v6174_v34  ;;  %v6189_v36 = vld [vmem:[%s8283_s0 + $0x6a0] ss:$8 sps:$4 sm:$0xff]   ;;  %v6190_v41 = vld [vmem:[%s8283_s0 + $0x2b4] ss:$8 sps:$4 sm:$0xff]  }
 0x163   :  { %4887 = vst.msk [vmem:[%s8284_s2 + $0x260] sm:$0xf] %vm4734_vm3, %v5797_v40  ;;  %v5670_v46 = vpack.c.bf16 %v3479_v45, %v3479_v45  ;;  %v3607_v47 = vsel %vm3095_vm11, %v2530_v38, %v3351_v44  ;;  %v6192_v42 = vld [vmem:[%s8283_s0 + $0x6b4] ss:$8 sps:$4 sm:$0xff]  }
 0x164   :  { %v5798_v48 = vpack.c.bf16 %v3607_v47, %v3607_v47  ;;  %v2023_v49 = vpop.f32.mrb[52].mxu0  ;;  %v2535_v50 = vpop.f32.mrb[52].mxu1 }
 0x165   :  { %4760 = vst.msk [vmem:[%s8284_s2 + $0x64] sm:$0xf] %vm4734_vm3, %v5670_v46  ;;  %vm2968_vm12 = vcmp.gt.f32.partialorder %v2023_v49, 0.0  ;;  %v3224_v53 = vmul.f32 0.2, %v2023_v49  ;;  %vm3096_vm13 = vcmp.gt.f32.partialorder %v2535_v50, 0.0 }
 0x166   :  { %v3352_v54 = vmul.f32 0.2, %v2535_v50  ;;  %4888 = vst.msk [vmem:[%s8284_s2 + $0x264] sm:$0xf] %vm4734_vm3, %v5798_v48  ;;  %v2025_v55 = vpop.f32.mrb[53].mxu0  ;;  %v2537_v56 = vpop.f32.mrb[53].mxu1 }
 0x167   :  { %v3480_v59 = vsel %vm2968_vm12, %v2023_v49, %v3224_v53  ;;  %v2026_v61 = vpop.f32.mrb[54].mxu0  ;;  %v2538_v62 = vpop.f32.mrb[54].mxu1 }
 0x168   :  { %v3608_v60 = vsel %vm3096_vm13, %v2535_v50, %v3352_v54  ;;  %v5671_v63 = vpack.c.bf16 %v3480_v59, %v3480_v59  ;;  %vm2969_vm14 = vcmp.gt.f32.partialorder %v2026_v61, 0.0  ;;  %v3225_v1 = vmul.f32 0.2, %v2026_v61  ;;  %v2028_v2 = vpop.f32.mrb[55].mxu0  ;;  %v2540_v3 = vpop.f32.mrb[55].mxu1 }
 0x169   :  { %v5799_v0 = vpack.c.bf16 %v3608_v60, %v3608_v60  ;;  %vm3097_vm15 = vcmp.gt.f32.partialorder %v2538_v62, 0.0  ;;  %v3353_v4 = vmul.f32 0.2, %v2538_v62  ;;  %2238 = vmatmul.mubr.bf16.gmra.mrb[160].mxu0 %v6176_v51  ;;  %2750 = vmatmul.mubr.bf16.gmra.mrb[160].mxu1 %v6177_v52  ;;  %v6194_v59 = vld [vmem:[%s8283_s0 + $0x2b0] ss:$8 sps:$4 sm:$0xff]  }
 0x16a   :  { %4761 = vst.msk [vmem:[%s8284_s2 + $0x68] sm:$0xf] %vm4734_vm3, %v5671_v63  ;;  %v3481_v5 = vsel %vm2969_vm14, %v2026_v61, %v3225_v1  ;;  %5302 = vmatprep.mubr.msk.bf16.mxu0 %vm1500_vm0, %v6178_v57  ;;  %5366 = vmatprep.mubr.msk.bf16.mxu1 %vm1500_vm0, %v6180_v58  ;;  %v6195_v60 = vld [vmem:[%s8283_s0 + $0x6b0] ss:$8 sps:$4 sm:$0xff]   ;;  %v6196_v1 = vld [vmem:[%s8283_s0 + $0x2c4] ss:$8 sps:$4 sm:$0xff]  }
 0x16b   :  { %4889 = vst.msk [vmem:[%s8284_s2 + $0x268] sm:$0xf] %vm4734_vm3, %v5799_v0  ;;  %v5672_v6 = vpack.c.bf16 %v3481_v5, %v3481_v5  ;;  %v3609_v7 = vsel %vm3097_vm15, %v2538_v62, %v3353_v4  ;;  %v6198_v2 = vld [vmem:[%s8283_s0 + $0x6c4] ss:$8 sps:$4 sm:$0xff]  }
 0x16c   :  { %v5800_v8 = vpack.c.bf16 %v3609_v7, %v3609_v7  ;;  %v2031_v9 = vpop.f32.mrb[56].mxu0  ;;  %v2543_v10 = vpop.f32.mrb[56].mxu1 }
 0x16d   :  { %4762 = vst.msk [vmem:[%s8284_s2 + $0x6c] sm:$0xf] %vm4734_vm3, %v5672_v6  ;;  %vm2970_vm1 = vcmp.gt.f32.partialorder %v2031_v9, 0.0  ;;  %v3226_v13 = vmul.f32 0.2, %v2031_v9  ;;  %vm3098_vm2 = vcmp.gt.f32.partialorder %v2543_v10, 0.0 }
 0x16e   :  { %v3354_v14 = vmul.f32 0.2, %v2543_v10  ;;  %4890 = vst.msk [vmem:[%s8284_s2 + $0x26c] sm:$0xf] %vm4734_vm3, %v5800_v8  ;;  %v2033_v15 = vpop.f32.mrb[57].mxu0  ;;  %v2545_v16 = vpop.f32.mrb[57].mxu1 }
 0x16f   :  { %v3482_v19 = vsel %vm2970_vm1, %v2031_v9, %v3226_v13  ;;  %v2034_v21 = vpop.f32.mrb[58].mxu0  ;;  %v2546_v22 = vpop.f32.mrb[58].mxu1 }
 0x170   :  { %v3610_v20 = vsel %vm3098_vm2, %v2543_v10, %v3354_v14  ;;  %v5673_v23 = vpack.c.bf16 %v3482_v19, %v3482_v19  ;;  %vm2971_vm4 = vcmp.gt.f32.partialorder %v2034_v21, 0.0  ;;  %v3227_v25 = vmul.f32 0.2, %v2034_v21  ;;  %v2036_v26 = vpop.f32.mrb[59].mxu0  ;;  %v2548_v27 = vpop.f32.mrb[59].mxu1 }
 0x171   :  { %v5801_v24 = vpack.c.bf16 %v3610_v20, %v3610_v20  ;;  %vm3099_vm5 = vcmp.gt.f32.partialorder %v2546_v22, 0.0  ;;  %v3355_v28 = vmul.f32 0.2, %v2546_v22  ;;  %2246 = vmatmul.mubr.bf16.gmra.mrb[164].mxu0 %v6182_v11  ;;  %2758 = vmatmul.mubr.bf16.gmra.mrb[164].mxu1 %v6183_v12  ;;  %v6200_v19 = vld [vmem:[%s8283_s0 + $0x2c0] ss:$8 sps:$4 sm:$0xff]  }
 0x172   :  { %4763 = vst.msk [vmem:[%s8284_s2 + $0x70] sm:$0xf] %vm4734_vm3, %v5673_v23  ;;  %v3483_v29 = vsel %vm2971_vm4, %v2034_v21, %v3227_v25  ;;  %5303 = vmatprep.mubr.msk.bf16.mxu0 %vm1500_vm0, %v6184_v17  ;;  %5367 = vmatprep.mubr.msk.bf16.mxu1 %vm1500_vm0, %v6186_v18  ;;  %v6201_v20 = vld [vmem:[%s8283_s0 + $0x6c0] ss:$8 sps:$4 sm:$0xff]   ;;  %v6202_v25 = vld [vmem:[%s8283_s0 + $0x2d4] ss:$8 sps:$4 sm:$0xff]  }
 0x173   :  { %4891 = vst.msk [vmem:[%s8284_s2 + $0x270] sm:$0xf] %vm4734_vm3, %v5801_v24  ;;  %v5674_v30 = vpack.c.bf16 %v3483_v29, %v3483_v29  ;;  %v3611_v31 = vsel %vm3099_vm5, %v2546_v22, %v3355_v28  ;;  %v6204_v26 = vld [vmem:[%s8283_s0 + $0x6d4] ss:$8 sps:$4 sm:$0xff]  }
 0x174   :  { %v5802_v32 = vpack.c.bf16 %v3611_v31, %v3611_v31  ;;  %v2039_v33 = vpop.f32.mrb[60].mxu0  ;;  %v2551_v34 = vpop.f32.mrb[60].mxu1 }
 0x175   :  { %4764 = vst.msk [vmem:[%s8284_s2 + $0x74] sm:$0xf] %vm4734_vm3, %v5674_v30  ;;  %vm2972_vm6 = vcmp.gt.f32.partialorder %v2039_v33, 0.0  ;;  %v3228_v37 = vmul.f32 0.2, %v2039_v33  ;;  %vm3100_vm7 = vcmp.gt.f32.partialorder %v2551_v34, 0.0 }
 0x176   :  { %v3356_v38 = vmul.f32 0.2, %v2551_v34  ;;  %4892 = vst.msk [vmem:[%s8284_s2 + $0x274] sm:$0xf] %vm4734_vm3, %v5802_v32  ;;  %v2041_v39 = vpop.f32.mrb[61].mxu0  ;;  %v2553_v40 = vpop.f32.mrb[61].mxu1 }
 0x177   :  { %v3484_v43 = vsel %vm2972_vm6, %v2039_v33, %v3228_v37  ;;  %v2042_v45 = vpop.f32.mrb[62].mxu0  ;;  %v2554_v46 = vpop.f32.mrb[62].mxu1 }
 0x178   :  { %v3612_v44 = vsel %vm3100_vm7, %v2551_v34, %v3356_v38  ;;  %v5675_v47 = vpack.c.bf16 %v3484_v43, %v3484_v43  ;;  %vm2973_vm8 = vcmp.gt.f32.partialorder %v2042_v45, 0.0  ;;  %v3229_v49 = vmul.f32 0.2, %v2042_v45  ;;  %v2044_v50 = vpop.f32.mrb[63].mxu0  ;;  %v2556_v51 = vpop.f32.mrb[63].mxu1 }
 0x179   :  { %v5803_v48 = vpack.c.bf16 %v3612_v44, %v3612_v44  ;;  %vm3101_vm9 = vcmp.gt.f32.partialorder %v2554_v46, 0.0  ;;  %v3357_v52 = vmul.f32 0.2, %v2554_v46  ;;  %2254 = vmatmul.mubr.bf16.gmra.mrb[168].mxu0 %v6188_v35  ;;  %2766 = vmatmul.mubr.bf16.gmra.mrb[168].mxu1 %v6189_v36  ;;  %v6206_v43 = vld [vmem:[%s8283_s0 + $0x2d0] ss:$8 sps:$4 sm:$0xff]  }
 0x17a   :  { %4765 = vst.msk [vmem:[%s8284_s2 + $0x78] sm:$0xf] %vm4734_vm3, %v5675_v47  ;;  %v3485_v53 = vsel %vm2973_vm8, %v2042_v45, %v3229_v49  ;;  %5304 = vmatprep.mubr.msk.bf16.mxu0 %vm1500_vm0, %v6190_v41  ;;  %5368 = vmatprep.mubr.msk.bf16.mxu1 %vm1500_vm0, %v6192_v42  ;;  %v6207_v44 = vld [vmem:[%s8283_s0 + $0x6d0] ss:$8 sps:$4 sm:$0xff]   ;;  %v6208_v49 = vld [vmem:[%s8283_s0 + $0x2e4] ss:$8 sps:$4 sm:$0xff]  }
 0x17b   :  { %4893 = vst.msk [vmem:[%s8284_s2 + $0x278] sm:$0xf] %vm4734_vm3, %v5803_v48  ;;  %v5676_v54 = vpack.c.bf16 %v3485_v53, %v3485_v53  ;;  %v3613_v55 = vsel %vm3101_vm9, %v2554_v46, %v3357_v52  ;;  %v6210_v50 = vld [vmem:[%s8283_s0 + $0x6e4] ss:$8 sps:$4 sm:$0xff]  }
 0x17c   :  { %v5804_v56 = vpack.c.bf16 %v3613_v55, %v3613_v55  ;;  %v2047_v57 = vpop.f32.mrb[64].mxu0  ;;  %v2559_v58 = vpop.f32.mrb[64].mxu1 }
 0x17d   :  { %4766 = vst.msk [vmem:[%s8284_s2 + $0x7c] sm:$0xf] %vm4734_vm3, %v5676_v54  ;;  %vm2974_vm10 = vcmp.gt.f32.partialorder %v2047_v57, 0.0  ;;  %v3230_v61 = vmul.f32 0.2, %v2047_v57  ;;  %vm3102_vm11 = vcmp.gt.f32.partialorder %v2559_v58, 0.0 }
 0x17e   :  { %v3358_v62 = vmul.f32 0.2, %v2559_v58  ;;  %4894 = vst.msk [vmem:[%s8284_s2 + $0x27c] sm:$0xf] %vm4734_vm3, %v5804_v56  ;;  %v2049_v63 = vpop.f32.mrb[65].mxu0  ;;  %v2561_v0 = vpop.f32.mrb[65].mxu1 }
 0x17f   :  { %v3486_v3 = vsel %vm2974_vm10, %v2047_v57, %v3230_v61  ;;  %v2050_v5 = vpop.f32.mrb[66].mxu0  ;;  %v2562_v6 = vpop.f32.mrb[66].mxu1 }
 0x180   :  { %v3614_v4 = vsel %vm3102_vm11, %v2559_v58, %v3358_v62  ;;  %v5677_v7 = vpack.c.bf16 %v3486_v3, %v3486_v3  ;;  %vm2975_vm12 = vcmp.gt.f32.partialorder %v2050_v5, 0.0  ;;  %v3231_v9 = vmul.f32 0.2, %v2050_v5  ;;  %v2052_v10 = vpop.f32.mrb[67].mxu0  ;;  %v2564_v11 = vpop.f32.mrb[67].mxu1 }
 0x181   :  { %v5805_v8 = vpack.c.bf16 %v3614_v4, %v3614_v4  ;;  %vm3103_vm13 = vcmp.gt.f32.partialorder %v2562_v6, 0.0  ;;  %v3359_v12 = vmul.f32 0.2, %v2562_v6  ;;  %2262 = vmatmul.mubr.bf16.gmra.mrb[172].mxu0 %v6194_v59  ;;  %2774 = vmatmul.mubr.bf16.gmra.mrb[172].mxu1 %v6195_v60  ;;  %v6212_v3 = vld [vmem:[%s8283_s0 + $0x2e0] ss:$8 sps:$4 sm:$0xff]  }
 0x182   :  { %4767 = vst.msk [vmem:[%s8284_s2 + $0x80] sm:$0xf] %vm4734_vm3, %v5677_v7  ;;  %v3487_v13 = vsel %vm2975_vm12, %v2050_v5, %v3231_v9  ;;  %5305 = vmatprep.mubr.msk.bf16.mxu0 %vm1500_vm0, %v6196_v1  ;;  %5369 = vmatprep.mubr.msk.bf16.mxu1 %vm1500_vm0, %v6198_v2  ;;  %v6213_v4 = vld [vmem:[%s8283_s0 + $0x6e0] ss:$8 sps:$4 sm:$0xff]   ;;  %v6214_v9 = vld [vmem:[%s8283_s0 + $0x2f4] ss:$8 sps:$4 sm:$0xff]  }
 0x183   :  { %4895 = vst.msk [vmem:[%s8284_s2 + $0x280] sm:$0xf] %vm4734_vm3, %v5805_v8  ;;  %v5678_v14 = vpack.c.bf16 %v3487_v13, %v3487_v13  ;;  %v3615_v15 = vsel %vm3103_vm13, %v2562_v6, %v3359_v12  ;;  %v6216_v10 = vld [vmem:[%s8283_s0 + $0x6f4] ss:$8 sps:$4 sm:$0xff]  }
 0x184   :  { %v5806_v16 = vpack.c.bf16 %v3615_v15, %v3615_v15  ;;  %v2055_v17 = vpop.f32.mrb[68].mxu0  ;;  %v2567_v18 = vpop.f32.mrb[68].mxu1 }
 0x185   :  { %4768 = vst.msk [vmem:[%s8284_s2 + $0x84] sm:$0xf] %vm4734_vm3, %v5678_v14  ;;  %vm2976_vm14 = vcmp.gt.f32.partialorder %v2055_v17, 0.0  ;;  %v3232_v21 = vmul.f32 0.2, %v2055_v17  ;;  %vm3104_vm15 = vcmp.gt.f32.partialorder %v2567_v18, 0.0 }
 0x186   :  { %v3360_v22 = vmul.f32 0.2, %v2567_v18  ;;  %4896 = vst.msk [vmem:[%s8284_s2 + $0x284] sm:$0xf] %vm4734_vm3, %v5806_v16  ;;  %v2057_v23 = vpop.f32.mrb[69].mxu0  ;;  %v2569_v24 = vpop.f32.mrb[69].mxu1 }
 0x187   :  { %v3488_v27 = vsel %vm2976_vm14, %v2055_v17, %v3232_v21  ;;  %v2058_v29 = vpop.f32.mrb[70].mxu0  ;;  %v2570_v30 = vpop.f32.mrb[70].mxu1 }
 0x188   :  { %v3616_v28 = vsel %vm3104_vm15, %v2567_v18, %v3360_v22  ;;  %v5679_v31 = vpack.c.bf16 %v3488_v27, %v3488_v27  ;;  %vm2977_vm1 = vcmp.gt.f32.partialorder %v2058_v29, 0.0  ;;  %v3233_v33 = vmul.f32 0.2, %v2058_v29  ;;  %v2060_v34 = vpop.f32.mrb[71].mxu0  ;;  %v2572_v35 = vpop.f32.mrb[71].mxu1 }
 0x189   :  { %v5807_v32 = vpack.c.bf16 %v3616_v28, %v3616_v28  ;;  %vm3105_vm2 = vcmp.gt.f32.partialorder %v2570_v30, 0.0  ;;  %v3361_v36 = vmul.f32 0.2, %v2570_v30  ;;  %2270 = vmatmul.mubr.bf16.gmra.mrb[176].mxu0 %v6200_v19  ;;  %2782 = vmatmul.mubr.bf16.gmra.mrb[176].mxu1 %v6201_v20  ;;  %v6218_v27 = vld [vmem:[%s8283_s0 + $0x2f0] ss:$8 sps:$4 sm:$0xff]  }
 0x18a   :  { %4769 = vst.msk [vmem:[%s8284_s2 + $0x88] sm:$0xf] %vm4734_vm3, %v5679_v31  ;;  %v3489_v37 = vsel %vm2977_vm1, %v2058_v29, %v3233_v33  ;;  %5306 = vmatprep.mubr.msk.bf16.mxu0 %vm1500_vm0, %v6202_v25  ;;  %5370 = vmatprep.mubr.msk.bf16.mxu1 %vm1500_vm0, %v6204_v26  ;;  %v6219_v28 = vld [vmem:[%s8283_s0 + $0x6f0] ss:$8 sps:$4 sm:$0xff]   ;;  %v6220_v33 = vld [vmem:[%s8283_s0 + $0x304] ss:$8 sps:$4 sm:$0xff]  }
 0x18b   :  { %4897 = vst.msk [vmem:[%s8284_s2 + $0x288] sm:$0xf] %vm4734_vm3, %v5807_v32  ;;  %v5680_v38 = vpack.c.bf16 %v3489_v37, %v3489_v37  ;;  %v3617_v39 = vsel %vm3105_vm2, %v2570_v30, %v3361_v36  ;;  %v6222_v34 = vld [vmem:[%s8283_s0 + $0x704] ss:$8 sps:$4 sm:$0xff]  }
 0x18c   :  { %v5808_v40 = vpack.c.bf16 %v3617_v39, %v3617_v39  ;;  %v2063_v41 = vpop.f32.mrb[72].mxu0  ;;  %v2575_v42 = vpop.f32.mrb[72].mxu1 }
 0x18d   :  { %4770 = vst.msk [vmem:[%s8284_s2 + $0x8c] sm:$0xf] %vm4734_vm3, %v5680_v38  ;;  %vm2978_vm4 = vcmp.gt.f32.partialorder %v2063_v41, 0.0  ;;  %v3234_v45 = vmul.f32 0.2, %v2063_v41  ;;  %vm3106_vm5 = vcmp.gt.f32.partialorder %v2575_v42, 0.0 }
 0x18e   :  { %v3362_v46 = vmul.f32 0.2, %v2575_v42  ;;  %4898 = vst.msk [vmem:[%s8284_s2 + $0x28c] sm:$0xf] %vm4734_vm3, %v5808_v40  ;;  %v2065_v47 = vpop.f32.mrb[73].mxu0  ;;  %v2577_v48 = vpop.f32.mrb[73].mxu1 }
 0x18f   :  { %v3490_v51 = vsel %vm2978_vm4, %v2063_v41, %v3234_v45  ;;  %v2066_v53 = vpop.f32.mrb[74].mxu0  ;;  %v2578_v54 = vpop.f32.mrb[74].mxu1 }
 0x190   :  { %v3618_v52 = vsel %vm3106_vm5, %v2575_v42, %v3362_v46  ;;  %v5681_v55 = vpack.c.bf16 %v3490_v51, %v3490_v51  ;;  %vm2979_vm6 = vcmp.gt.f32.partialorder %v2066_v53, 0.0  ;;  %v3235_v57 = vmul.f32 0.2, %v2066_v53  ;;  %v2068_v58 = vpop.f32.mrb[75].mxu0  ;;  %v2580_v59 = vpop.f32.mrb[75].mxu1 }
 0x191   :  { %v5809_v56 = vpack.c.bf16 %v3618_v52, %v3618_v52  ;;  %vm3107_vm7 = vcmp.gt.f32.partialorder %v2578_v54, 0.0  ;;  %v3363_v60 = vmul.f32 0.2, %v2578_v54  ;;  %2278 = vmatmul.mubr.bf16.gmra.mrb[180].mxu0 %v6206_v43  ;;  %2790 = vmatmul.mubr.bf16.gmra.mrb[180].mxu1 %v6207_v44  ;;  %v6224_v51 = vld [vmem:[%s8283_s0 + $0x300] ss:$8 sps:$4 sm:$0xff]  }
 0x192   :  { %4771 = vst.msk [vmem:[%s8284_s2 + $0x90] sm:$0xf] %vm4734_vm3, %v5681_v55  ;;  %v3491_v61 = vsel %vm2979_vm6, %v2066_v53, %v3235_v57  ;;  %5307 = vmatprep.mubr.msk.bf16.mxu0 %vm1500_vm0, %v6208_v49  ;;  %5371 = vmatprep.mubr.msk.bf16.mxu1 %vm1500_vm0, %v6210_v50  ;;  %v6225_v52 = vld [vmem:[%s8283_s0 + $0x700] ss:$8 sps:$4 sm:$0xff]   ;;  %v6226_v57 = vld [vmem:[%s8283_s0 + $0x314] ss:$8 sps:$4 sm:$0xff]  }
 0x193   :  { %4899 = vst.msk [vmem:[%s8284_s2 + $0x290] sm:$0xf] %vm4734_vm3, %v5809_v56  ;;  %v5682_v62 = vpack.c.bf16 %v3491_v61, %v3491_v61  ;;  %v3619_v63 = vsel %vm3107_vm7, %v2578_v54, %v3363_v60  ;;  %v6228_v58 = vld [vmem:[%s8283_s0 + $0x714] ss:$8 sps:$4 sm:$0xff]  }
 0x194   :  { %v5810_v0 = vpack.c.bf16 %v3619_v63, %v3619_v63  ;;  %v2071_v1 = vpop.f32.mrb[76].mxu0  ;;  %v2583_v2 = vpop.f32.mrb[76].mxu1 }
 0x195   :  { %4772 = vst.msk [vmem:[%s8284_s2 + $0x94] sm:$0xf] %vm4734_vm3, %v5682_v62  ;;  %vm2980_vm8 = vcmp.gt.f32.partialorder %v2071_v1, 0.0  ;;  %v3236_v5 = vmul.f32 0.2, %v2071_v1  ;;  %vm3108_vm9 = vcmp.gt.f32.partialorder %v2583_v2, 0.0 }
 0x196   :  { %v3364_v6 = vmul.f32 0.2, %v2583_v2  ;;  %4900 = vst.msk [vmem:[%s8284_s2 + $0x294] sm:$0xf] %vm4734_vm3, %v5810_v0  ;;  %v2073_v7 = vpop.f32.mrb[77].mxu0  ;;  %v2585_v8 = vpop.f32.mrb[77].mxu1 }
 0x197   :  { %v3492_v11 = vsel %vm2980_vm8, %v2071_v1, %v3236_v5  ;;  %v2074_v13 = vpop.f32.mrb[78].mxu0  ;;  %v2586_v14 = vpop.f32.mrb[78].mxu1 }
 0x198   :  { %v3620_v12 = vsel %vm3108_vm9, %v2583_v2, %v3364_v6  ;;  %v5683_v15 = vpack.c.bf16 %v3492_v11, %v3492_v11  ;;  %vm2981_vm10 = vcmp.gt.f32.partialorder %v2074_v13, 0.0  ;;  %v3237_v17 = vmul.f32 0.2, %v2074_v13  ;;  %v2076_v18 = vpop.f32.mrb[79].mxu0  ;;  %v2588_v19 = vpop.f32.mrb[79].mxu1 }
 0x199   :  { %v5811_v16 = vpack.c.bf16 %v3620_v12, %v3620_v12  ;;  %vm3109_vm11 = vcmp.gt.f32.partialorder %v2586_v14, 0.0  ;;  %v3365_v20 = vmul.f32 0.2, %v2586_v14  ;;  %2286 = vmatmul.mubr.bf16.gmra.mrb[184].mxu0 %v6212_v3  ;;  %2798 = vmatmul.mubr.bf16.gmra.mrb[184].mxu1 %v6213_v4  ;;  %v6230_v11 = vld [vmem:[%s8283_s0 + $0x310] ss:$8 sps:$4 sm:$0xff]  }
 0x19a   :  { %4773 = vst.msk [vmem:[%s8284_s2 + $0x98] sm:$0xf] %vm4734_vm3, %v5683_v15  ;;  %v3493_v21 = vsel %vm2981_vm10, %v2074_v13, %v3237_v17  ;;  %5308 = vmatprep.mubr.msk.bf16.mxu0 %vm1500_vm0, %v6214_v9  ;;  %5372 = vmatprep.mubr.msk.bf16.mxu1 %vm1500_vm0, %v6216_v10  ;;  %v6231_v12 = vld [vmem:[%s8283_s0 + $0x710] ss:$8 sps:$4 sm:$0xff]   ;;  %v6232_v17 = vld [vmem:[%s8283_s0 + $0x324] ss:$8 sps:$4 sm:$0xff]  }
 0x19b   :  { %4901 = vst.msk [vmem:[%s8284_s2 + $0x298] sm:$0xf] %vm4734_vm3, %v5811_v16  ;;  %v5684_v22 = vpack.c.bf16 %v3493_v21, %v3493_v21  ;;  %v3621_v23 = vsel %vm3109_vm11, %v2586_v14, %v3365_v20  ;;  %v6234_v18 = vld [vmem:[%s8283_s0 + $0x724] ss:$8 sps:$4 sm:$0xff]  }
 0x19c   :  { %v5812_v24 = vpack.c.bf16 %v3621_v23, %v3621_v23  ;;  %v2079_v25 = vpop.f32.mrb[80].mxu0  ;;  %v2591_v26 = vpop.f32.mrb[80].mxu1 }
 0x19d   :  { %4774 = vst.msk [vmem:[%s8284_s2 + $0x9c] sm:$0xf] %vm4734_vm3, %v5684_v22  ;;  %vm2982_vm12 = vcmp.gt.f32.partialorder %v2079_v25, 0.0  ;;  %v3238_v29 = vmul.f32 0.2, %v2079_v25  ;;  %vm3110_vm13 = vcmp.gt.f32.partialorder %v2591_v26, 0.0 }
 0x19e   :  { %v3366_v30 = vmul.f32 0.2, %v2591_v26  ;;  %4902 = vst.msk [vmem:[%s8284_s2 + $0x29c] sm:$0xf] %vm4734_vm3, %v5812_v24  ;;  %v2081_v31 = vpop.f32.mrb[81].mxu0  ;;  %v2593_v32 = vpop.f32.mrb[81].mxu1 }
 0x19f   :  { %v3494_v35 = vsel %vm2982_vm12, %v2079_v25, %v3238_v29  ;;  %v2082_v37 = vpop.f32.mrb[82].mxu0  ;;  %v2594_v38 = vpop.f32.mrb[82].mxu1 }
 0x1a0   :  { %v3622_v36 = vsel %vm3110_vm13, %v2591_v26, %v3366_v30  ;;  %v5685_v39 = vpack.c.bf16 %v3494_v35, %v3494_v35  ;;  %vm2983_vm14 = vcmp.gt.f32.partialorder %v2082_v37, 0.0  ;;  %v3239_v41 = vmul.f32 0.2, %v2082_v37  ;;  %v2084_v42 = vpop.f32.mrb[83].mxu0  ;;  %v2596_v43 = vpop.f32.mrb[83].mxu1 }
 0x1a1   :  { %v5813_v40 = vpack.c.bf16 %v3622_v36, %v3622_v36  ;;  %vm3111_vm15 = vcmp.gt.f32.partialorder %v2594_v38, 0.0  ;;  %v3367_v44 = vmul.f32 0.2, %v2594_v38  ;;  %2294 = vmatmul.mubr.bf16.gmra.mrb[188].mxu0 %v6218_v27  ;;  %2806 = vmatmul.mubr.bf16.gmra.mrb[188].mxu1 %v6219_v28  ;;  %v6236_v35 = vld [vmem:[%s8283_s0 + $0x320] ss:$8 sps:$4 sm:$0xff]  }
 0x1a2   :  { %4775 = vst.msk [vmem:[%s8284_s2 + $0xa0] sm:$0xf] %vm4734_vm3, %v5685_v39  ;;  %v3495_v45 = vsel %vm2983_vm14, %v2082_v37, %v3239_v41  ;;  %5309 = vmatprep.mubr.msk.bf16.mxu0 %vm1500_vm0, %v6220_v33  ;;  %5373 = vmatprep.mubr.msk.bf16.mxu1 %vm1500_vm0, %v6222_v34  ;;  %v6237_v36 = vld [vmem:[%s8283_s0 + $0x720] ss:$8 sps:$4 sm:$0xff]   ;;  %v6238_v41 = vld [vmem:[%s8283_s0 + $0x334] ss:$8 sps:$4 sm:$0xff]  }
 0x1a3   :  { %4903 = vst.msk [vmem:[%s8284_s2 + $0x2a0] sm:$0xf] %vm4734_vm3, %v5813_v40  ;;  %v5686_v46 = vpack.c.bf16 %v3495_v45, %v3495_v45  ;;  %v3623_v47 = vsel %vm3111_vm15, %v2594_v38, %v3367_v44  ;;  %v6240_v42 = vld [vmem:[%s8283_s0 + $0x734] ss:$8 sps:$4 sm:$0xff]  }
 0x1a4   :  { %v5814_v48 = vpack.c.bf16 %v3623_v47, %v3623_v47  ;;  %v2087_v49 = vpop.f32.mrb[84].mxu0  ;;  %v2599_v50 = vpop.f32.mrb[84].mxu1 }
 0x1a5   :  { %4776 = vst.msk [vmem:[%s8284_s2 + $0xa4] sm:$0xf] %vm4734_vm3, %v5686_v46  ;;  %vm2984_vm1 = vcmp.gt.f32.partialorder %v2087_v49, 0.0  ;;  %v3240_v53 = vmul.f32 0.2, %v2087_v49  ;;  %vm3112_vm2 = vcmp.gt.f32.partialorder %v2599_v50, 0.0 }
 0x1a6   :  { %v3368_v54 = vmul.f32 0.2, %v2599_v50  ;;  %4904 = vst.msk [vmem:[%s8284_s2 + $0x2a4] sm:$0xf] %vm4734_vm3, %v5814_v48  ;;  %v2089_v55 = vpop.f32.mrb[85].mxu0  ;;  %v2601_v56 = vpop.f32.mrb[85].mxu1 }
 0x1a7   :  { %v3496_v59 = vsel %vm2984_vm1, %v2087_v49, %v3240_v53  ;;  %v2090_v61 = vpop.f32.mrb[86].mxu0  ;;  %v2602_v62 = vpop.f32.mrb[86].mxu1 }
 0x1a8   :  { %v3624_v60 = vsel %vm3112_vm2, %v2599_v50, %v3368_v54  ;;  %v5687_v63 = vpack.c.bf16 %v3496_v59, %v3496_v59  ;;  %vm2985_vm4 = vcmp.gt.f32.partialorder %v2090_v61, 0.0  ;;  %v3241_v1 = vmul.f32 0.2, %v2090_v61  ;;  %v2092_v2 = vpop.f32.mrb[87].mxu0  ;;  %v2604_v3 = vpop.f32.mrb[87].mxu1 }
 0x1a9   :  { %v5815_v0 = vpack.c.bf16 %v3624_v60, %v3624_v60  ;;  %vm3113_vm5 = vcmp.gt.f32.partialorder %v2602_v62, 0.0  ;;  %v3369_v4 = vmul.f32 0.2, %v2602_v62  ;;  %2302 = vmatmul.mubr.bf16.gmra.mrb[192].mxu0 %v6224_v51  ;;  %2814 = vmatmul.mubr.bf16.gmra.mrb[192].mxu1 %v6225_v52  ;;  %v6242_v59 = vld [vmem:[%s8283_s0 + $0x330] ss:$8 sps:$4 sm:$0xff]  }
 0x1aa   :  { %4777 = vst.msk [vmem:[%s8284_s2 + $0xa8] sm:$0xf] %vm4734_vm3, %v5687_v63  ;;  %v3497_v5 = vsel %vm2985_vm4, %v2090_v61, %v3241_v1  ;;  %5310 = vmatprep.mubr.msk.bf16.mxu0 %vm1500_vm0, %v6226_v57  ;;  %5374 = vmatprep.mubr.msk.bf16.mxu1 %vm1500_vm0, %v6228_v58  ;;  %v6243_v60 = vld [vmem:[%s8283_s0 + $0x730] ss:$8 sps:$4 sm:$0xff]   ;;  %v6244_v1 = vld [vmem:[%s8283_s0 + $0x344] ss:$8 sps:$4 sm:$0xff]  }
 0x1ab   :  { %4905 = vst.msk [vmem:[%s8284_s2 + $0x2a8] sm:$0xf] %vm4734_vm3, %v5815_v0  ;;  %v5688_v6 = vpack.c.bf16 %v3497_v5, %v3497_v5  ;;  %v3625_v7 = vsel %vm3113_vm5, %v2602_v62, %v3369_v4  ;;  %v6246_v2 = vld [vmem:[%s8283_s0 + $0x744] ss:$8 sps:$4 sm:$0xff]  }
 0x1ac   :  { %v5816_v8 = vpack.c.bf16 %v3625_v7, %v3625_v7  ;;  %v2095_v9 = vpop.f32.mrb[88].mxu0  ;;  %v2607_v10 = vpop.f32.mrb[88].mxu1 }
 0x1ad   :  { %4778 = vst.msk [vmem:[%s8284_s2 + $0xac] sm:$0xf] %vm4734_vm3, %v5688_v6  ;;  %vm2986_vm6 = vcmp.gt.f32.partialorder %v2095_v9, 0.0  ;;  %v3242_v13 = vmul.f32 0.2, %v2095_v9  ;;  %vm3114_vm7 = vcmp.gt.f32.partialorder %v2607_v10, 0.0 }
 0x1ae   :  { %v3370_v14 = vmul.f32 0.2, %v2607_v10  ;;  %4906 = vst.msk [vmem:[%s8284_s2 + $0x2ac] sm:$0xf] %vm4734_vm3, %v5816_v8  ;;  %v2097_v15 = vpop.f32.mrb[89].mxu0  ;;  %v2609_v16 = vpop.f32.mrb[89].mxu1 }
 0x1af   :  { %v3498_v19 = vsel %vm2986_vm6, %v2095_v9, %v3242_v13  ;;  %v2098_v21 = vpop.f32.mrb[90].mxu0  ;;  %v2610_v22 = vpop.f32.mrb[90].mxu1 }
 0x1b0   :  { %v3626_v20 = vsel %vm3114_vm7, %v2607_v10, %v3370_v14  ;;  %v5689_v23 = vpack.c.bf16 %v3498_v19, %v3498_v19  ;;  %vm2987_vm8 = vcmp.gt.f32.partialorder %v2098_v21, 0.0  ;;  %v3243_v25 = vmul.f32 0.2, %v2098_v21  ;;  %v2100_v26 = vpop.f32.mrb[91].mxu0  ;;  %v2612_v27 = vpop.f32.mrb[91].mxu1 }
 0x1b1   :  { %v5817_v24 = vpack.c.bf16 %v3626_v20, %v3626_v20  ;;  %vm3115_vm9 = vcmp.gt.f32.partialorder %v2610_v22, 0.0  ;;  %v3371_v28 = vmul.f32 0.2, %v2610_v22  ;;  %2310 = vmatmul.mubr.bf16.gmra.mrb[196].mxu0 %v6230_v11  ;;  %2822 = vmatmul.mubr.bf16.gmra.mrb[196].mxu1 %v6231_v12  ;;  %v6248_v19 = vld [vmem:[%s8283_s0 + $0x340] ss:$8 sps:$4 sm:$0xff]  }
 0x1b2   :  { %4779 = vst.msk [vmem:[%s8284_s2 + $0xb0] sm:$0xf] %vm4734_vm3, %v5689_v23  ;;  %v3499_v29 = vsel %vm2987_vm8, %v2098_v21, %v3243_v25  ;;  %5311 = vmatprep.mubr.msk.bf16.mxu0 %vm1500_vm0, %v6232_v17  ;;  %5375 = vmatprep.mubr.msk.bf16.mxu1 %vm1500_vm0, %v6234_v18  ;;  %v6249_v20 = vld [vmem:[%s8283_s0 + $0x740] ss:$8 sps:$4 sm:$0xff]   ;;  %v6250_v25 = vld [vmem:[%s8283_s0 + $0x354] ss:$8 sps:$4 sm:$0xff]  }
 0x1b3   :  { %4907 = vst.msk [vmem:[%s8284_s2 + $0x2b0] sm:$0xf] %vm4734_vm3, %v5817_v24  ;;  %v5690_v30 = vpack.c.bf16 %v3499_v29, %v3499_v29  ;;  %v3627_v31 = vsel %vm3115_vm9, %v2610_v22, %v3371_v28  ;;  %v6252_v26 = vld [vmem:[%s8283_s0 + $0x754] ss:$8 sps:$4 sm:$0xff]  }
 0x1b4   :  { %v5818_v32 = vpack.c.bf16 %v3627_v31, %v3627_v31  ;;  %v2103_v33 = vpop.f32.mrb[92].mxu0  ;;  %v2615_v34 = vpop.f32.mrb[92].mxu1 }
 0x1b5   :  { %4780 = vst.msk [vmem:[%s8284_s2 + $0xb4] sm:$0xf] %vm4734_vm3, %v5690_v30  ;;  %vm2988_vm10 = vcmp.gt.f32.partialorder %v2103_v33, 0.0  ;;  %v3244_v37 = vmul.f32 0.2, %v2103_v33  ;;  %vm3116_vm11 = vcmp.gt.f32.partialorder %v2615_v34, 0.0 }
 0x1b6   :  { %v3372_v38 = vmul.f32 0.2, %v2615_v34  ;;  %4908 = vst.msk [vmem:[%s8284_s2 + $0x2b4] sm:$0xf] %vm4734_vm3, %v5818_v32  ;;  %v2105_v39 = vpop.f32.mrb[93].mxu0  ;;  %v2617_v40 = vpop.f32.mrb[93].mxu1 }
 0x1b7   :  { %v3500_v43 = vsel %vm2988_vm10, %v2103_v33, %v3244_v37  ;;  %v2106_v45 = vpop.f32.mrb[94].mxu0  ;;  %v2618_v46 = vpop.f32.mrb[94].mxu1 }
 0x1b8   :  { %v3628_v44 = vsel %vm3116_vm11, %v2615_v34, %v3372_v38  ;;  %v5691_v47 = vpack.c.bf16 %v3500_v43, %v3500_v43  ;;  %vm2989_vm12 = vcmp.gt.f32.partialorder %v2106_v45, 0.0  ;;  %v3245_v49 = vmul.f32 0.2, %v2106_v45  ;;  %v2108_v50 = vpop.f32.mrb[95].mxu0  ;;  %v2620_v51 = vpop.f32.mrb[95].mxu1 }
 0x1b9   :  { %v5819_v48 = vpack.c.bf16 %v3628_v44, %v3628_v44  ;;  %vm3117_vm13 = vcmp.gt.f32.partialorder %v2618_v46, 0.0  ;;  %v3373_v52 = vmul.f32 0.2, %v2618_v46  ;;  %2318 = vmatmul.mubr.bf16.gmra.mrb[200].mxu0 %v6236_v35  ;;  %2830 = vmatmul.mubr.bf16.gmra.mrb[200].mxu1 %v6237_v36  ;;  %v6254_v43 = vld [vmem:[%s8283_s0 + $0x350] ss:$8 sps:$4 sm:$0xff]  }
 0x1ba   :  { %4781 = vst.msk [vmem:[%s8284_s2 + $0xb8] sm:$0xf] %vm4734_vm3, %v5691_v47  ;;  %v3501_v53 = vsel %vm2989_vm12, %v2106_v45, %v3245_v49  ;;  %5312 = vmatprep.mubr.msk.bf16.mxu0 %vm1500_vm0, %v6238_v41  ;;  %5376 = vmatprep.mubr.msk.bf16.mxu1 %vm1500_vm0, %v6240_v42  ;;  %v6255_v44 = vld [vmem:[%s8283_s0 + $0x750] ss:$8 sps:$4 sm:$0xff]   ;;  %v6256_v49 = vld [vmem:[%s8283_s0 + $0x364] ss:$8 sps:$4 sm:$0xff]  }
 0x1bb   :  { %4909 = vst.msk [vmem:[%s8284_s2 + $0x2b8] sm:$0xf] %vm4734_vm3, %v5819_v48  ;;  %v5692_v54 = vpack.c.bf16 %v3501_v53, %v3501_v53  ;;  %v3629_v55 = vsel %vm3117_vm13, %v2618_v46, %v3373_v52  ;;  %v6258_v50 = vld [vmem:[%s8283_s0 + $0x764] ss:$8 sps:$4 sm:$0xff]  }
 0x1bc   :  { %v5820_v56 = vpack.c.bf16 %v3629_v55, %v3629_v55  ;;  %v2111_v57 = vpop.f32.mrb[96].mxu0  ;;  %v2623_v58 = vpop.f32.mrb[96].mxu1 }
 0x1bd   :  { %4782 = vst.msk [vmem:[%s8284_s2 + $0xbc] sm:$0xf] %vm4734_vm3, %v5692_v54  ;;  %vm2990_vm14 = vcmp.gt.f32.partialorder %v2111_v57, 0.0  ;;  %v3246_v61 = vmul.f32 0.2, %v2111_v57  ;;  %vm3118_vm15 = vcmp.gt.f32.partialorder %v2623_v58, 0.0 }
 0x1be   :  { %v3374_v62 = vmul.f32 0.2, %v2623_v58  ;;  %4910 = vst.msk [vmem:[%s8284_s2 + $0x2bc] sm:$0xf] %vm4734_vm3, %v5820_v56  ;;  %v2113_v63 = vpop.f32.mrb[97].mxu0  ;;  %v2625_v0 = vpop.f32.mrb[97].mxu1 }
 0x1bf   :  { %v3502_v3 = vsel %vm2990_vm14, %v2111_v57, %v3246_v61  ;;  %v2114_v5 = vpop.f32.mrb[98].mxu0  ;;  %v2626_v6 = vpop.f32.mrb[98].mxu1 }
 0x1c0   :  { %v3630_v4 = vsel %vm3118_vm15, %v2623_v58, %v3374_v62  ;;  %v5693_v7 = vpack.c.bf16 %v3502_v3, %v3502_v3  ;;  %vm2991_vm1 = vcmp.gt.f32.partialorder %v2114_v5, 0.0  ;;  %v3247_v9 = vmul.f32 0.2, %v2114_v5  ;;  %v2116_v10 = vpop.f32.mrb[99].mxu0  ;;  %v2628_v11 = vpop.f32.mrb[99].mxu1 }
 0x1c1   :  { %v5821_v8 = vpack.c.bf16 %v3630_v4, %v3630_v4  ;;  %vm3119_vm2 = vcmp.gt.f32.partialorder %v2626_v6, 0.0  ;;  %v3375_v12 = vmul.f32 0.2, %v2626_v6  ;;  %2326 = vmatmul.mubr.bf16.gmra.mrb[204].mxu0 %v6242_v59  ;;  %2838 = vmatmul.mubr.bf16.gmra.mrb[204].mxu1 %v6243_v60  ;;  %v6260_v3 = vld [vmem:[%s8283_s0 + $0x360] ss:$8 sps:$4 sm:$0xff]  }
 0x1c2   :  { %4783 = vst.msk [vmem:[%s8284_s2 + $0xc0] sm:$0xf] %vm4734_vm3, %v5693_v7  ;;  %v3503_v13 = vsel %vm2991_vm1, %v2114_v5, %v3247_v9  ;;  %5313 = vmatprep.mubr.msk.bf16.mxu0 %vm1500_vm0, %v6244_v1  ;;  %5377 = vmatprep.mubr.msk.bf16.mxu1 %vm1500_vm0, %v6246_v2  ;;  %v6261_v4 = vld [vmem:[%s8283_s0 + $0x760] ss:$8 sps:$4 sm:$0xff]   ;;  %v6262_v9 = vld [vmem:[%s8283_s0 + $0x374] ss:$8 sps:$4 sm:$0xff]  }
 0x1c3   :  { %4911 = vst.msk [vmem:[%s8284_s2 + $0x2c0] sm:$0xf] %vm4734_vm3, %v5821_v8  ;;  %v5694_v14 = vpack.c.bf16 %v3503_v13, %v3503_v13  ;;  %v3631_v15 = vsel %vm3119_vm2, %v2626_v6, %v3375_v12  ;;  %v6264_v10 = vld [vmem:[%s8283_s0 + $0x774] ss:$8 sps:$4 sm:$0xff]  }
 0x1c4   :  { %v5822_v16 = vpack.c.bf16 %v3631_v15, %v3631_v15  ;;  %v2119_v17 = vpop.f32.mrb[100].mxu0  ;;  %v2631_v18 = vpop.f32.mrb[100].mxu1 }
 0x1c5   :  { %4784 = vst.msk [vmem:[%s8284_s2 + $0xc4] sm:$0xf] %vm4734_vm3, %v5694_v14  ;;  %vm2992_vm4 = vcmp.gt.f32.partialorder %v2119_v17, 0.0  ;;  %v3248_v21 = vmul.f32 0.2, %v2119_v17  ;;  %vm3120_vm5 = vcmp.gt.f32.partialorder %v2631_v18, 0.0 }
 0x1c6   :  { %v3376_v22 = vmul.f32 0.2, %v2631_v18  ;;  %4912 = vst.msk [vmem:[%s8284_s2 + $0x2c4] sm:$0xf] %vm4734_vm3, %v5822_v16  ;;  %v2121_v23 = vpop.f32.mrb[101].mxu0  ;;  %v2633_v24 = vpop.f32.mrb[101].mxu1 }
 0x1c7   :  { %v3504_v27 = vsel %vm2992_vm4, %v2119_v17, %v3248_v21  ;;  %v2122_v29 = vpop.f32.mrb[102].mxu0  ;;  %v2634_v30 = vpop.f32.mrb[102].mxu1 }
 0x1c8   :  { %v3632_v28 = vsel %vm3120_vm5, %v2631_v18, %v3376_v22  ;;  %v5695_v31 = vpack.c.bf16 %v3504_v27, %v3504_v27  ;;  %vm2993_vm6 = vcmp.gt.f32.partialorder %v2122_v29, 0.0  ;;  %v3249_v33 = vmul.f32 0.2, %v2122_v29  ;;  %v2124_v34 = vpop.f32.mrb[103].mxu0  ;;  %v2636_v35 = vpop.f32.mrb[103].mxu1 }
 0x1c9   :  { %v5823_v32 = vpack.c.bf16 %v3632_v28, %v3632_v28  ;;  %vm3121_vm7 = vcmp.gt.f32.partialorder %v2634_v30, 0.0  ;;  %v3377_v36 = vmul.f32 0.2, %v2634_v30  ;;  %2334 = vmatmul.mubr.bf16.gmra.mrb[208].mxu0 %v6248_v19  ;;  %2846 = vmatmul.mubr.bf16.gmra.mrb[208].mxu1 %v6249_v20  ;;  %v6266_v27 = vld [vmem:[%s8283_s0 + $0x370] ss:$8 sps:$4 sm:$0xff]  }
 0x1ca   :  { %4785 = vst.msk [vmem:[%s8284_s2 + $0xc8] sm:$0xf] %vm4734_vm3, %v5695_v31  ;;  %v3505_v37 = vsel %vm2993_vm6, %v2122_v29, %v3249_v33  ;;  %5314 = vmatprep.mubr.msk.bf16.mxu0 %vm1500_vm0, %v6250_v25  ;;  %5378 = vmatprep.mubr.msk.bf16.mxu1 %vm1500_vm0, %v6252_v26  ;;  %v6267_v28 = vld [vmem:[%s8283_s0 + $0x770] ss:$8 sps:$4 sm:$0xff]   ;;  %v6268_v33 = vld [vmem:[%s8283_s0 + $0x384] ss:$8 sps:$4 sm:$0xff]  }
 0x1cb   :  { %4913 = vst.msk [vmem:[%s8284_s2 + $0x2c8] sm:$0xf] %vm4734_vm3, %v5823_v32  ;;  %v5696_v38 = vpack.c.bf16 %v3505_v37, %v3505_v37  ;;  %v3633_v39 = vsel %vm3121_vm7, %v2634_v30, %v3377_v36  ;;  %v6270_v34 = vld [vmem:[%s8283_s0 + $0x784] ss:$8 sps:$4 sm:$0xff]  }
 0x1cc   :  { %v5824_v40 = vpack.c.bf16 %v3633_v39, %v3633_v39  ;;  %v2127_v41 = vpop.f32.mrb[104].mxu0  ;;  %v2639_v42 = vpop.f32.mrb[104].mxu1 }
 0x1cd   :  { %4786 = vst.msk [vmem:[%s8284_s2 + $0xcc] sm:$0xf] %vm4734_vm3, %v5696_v38  ;;  %vm2994_vm8 = vcmp.gt.f32.partialorder %v2127_v41, 0.0  ;;  %v3250_v45 = vmul.f32 0.2, %v2127_v41  ;;  %vm3122_vm9 = vcmp.gt.f32.partialorder %v2639_v42, 0.0 }
 0x1ce   :  { %v3378_v46 = vmul.f32 0.2, %v2639_v42  ;;  %4914 = vst.msk [vmem:[%s8284_s2 + $0x2cc] sm:$0xf] %vm4734_vm3, %v5824_v40  ;;  %v2129_v47 = vpop.f32.mrb[105].mxu0  ;;  %v2641_v48 = vpop.f32.mrb[105].mxu1 }
 0x1cf   :  { %v3506_v51 = vsel %vm2994_vm8, %v2127_v41, %v3250_v45  ;;  %v2130_v53 = vpop.f32.mrb[106].mxu0  ;;  %v2642_v54 = vpop.f32.mrb[106].mxu1 }
 0x1d0   :  { %v3634_v52 = vsel %vm3122_vm9, %v2639_v42, %v3378_v46  ;;  %v5697_v55 = vpack.c.bf16 %v3506_v51, %v3506_v51  ;;  %vm2995_vm10 = vcmp.gt.f32.partialorder %v2130_v53, 0.0  ;;  %v3251_v57 = vmul.f32 0.2, %v2130_v53  ;;  %v2132_v58 = vpop.f32.mrb[107].mxu0  ;;  %v2644_v59 = vpop.f32.mrb[107].mxu1 }
 0x1d1   :  { %v5825_v56 = vpack.c.bf16 %v3634_v52, %v3634_v52  ;;  %vm3123_vm11 = vcmp.gt.f32.partialorder %v2642_v54, 0.0  ;;  %v3379_v60 = vmul.f32 0.2, %v2642_v54  ;;  %2342 = vmatmul.mubr.bf16.gmra.mrb[212].mxu0 %v6254_v43  ;;  %2854 = vmatmul.mubr.bf16.gmra.mrb[212].mxu1 %v6255_v44  ;;  %v6272_v51 = vld [vmem:[%s8283_s0 + $0x380] ss:$8 sps:$4 sm:$0xff]  }
 0x1d2   :  { %4787 = vst.msk [vmem:[%s8284_s2 + $0xd0] sm:$0xf] %vm4734_vm3, %v5697_v55  ;;  %v3507_v61 = vsel %vm2995_vm10, %v2130_v53, %v3251_v57  ;;  %5315 = vmatprep.mubr.msk.bf16.mxu0 %vm1500_vm0, %v6256_v49  ;;  %5379 = vmatprep.mubr.msk.bf16.mxu1 %vm1500_vm0, %v6258_v50  ;;  %v6273_v52 = vld [vmem:[%s8283_s0 + $0x780] ss:$8 sps:$4 sm:$0xff]   ;;  %v6274_v57 = vld [vmem:[%s8283_s0 + $0x394] ss:$8 sps:$4 sm:$0xff]  }
 0x1d3   :  { %4915 = vst.msk [vmem:[%s8284_s2 + $0x2d0] sm:$0xf] %vm4734_vm3, %v5825_v56  ;;  %v5698_v62 = vpack.c.bf16 %v3507_v61, %v3507_v61  ;;  %v3635_v63 = vsel %vm3123_vm11, %v2642_v54, %v3379_v60  ;;  %v6276_v58 = vld [vmem:[%s8283_s0 + $0x794] ss:$8 sps:$4 sm:$0xff]  }
 0x1d4   :  { %v5826_v0 = vpack.c.bf16 %v3635_v63, %v3635_v63  ;;  %v2135_v1 = vpop.f32.mrb[108].mxu0  ;;  %v2647_v2 = vpop.f32.mrb[108].mxu1 }
 0x1d5   :  { %4788 = vst.msk [vmem:[%s8284_s2 + $0xd4] sm:$0xf] %vm4734_vm3, %v5698_v62  ;;  %vm2996_vm12 = vcmp.gt.f32.partialorder %v2135_v1, 0.0  ;;  %v3252_v5 = vmul.f32 0.2, %v2135_v1  ;;  %vm3124_vm13 = vcmp.gt.f32.partialorder %v2647_v2, 0.0 }
 0x1d6   :  { %v3380_v6 = vmul.f32 0.2, %v2647_v2  ;;  %4916 = vst.msk [vmem:[%s8284_s2 + $0x2d4] sm:$0xf] %vm4734_vm3, %v5826_v0  ;;  %v2137_v7 = vpop.f32.mrb[109].mxu0  ;;  %v2649_v8 = vpop.f32.mrb[109].mxu1 }
 0x1d7   :  { %v3508_v11 = vsel %vm2996_vm12, %v2135_v1, %v3252_v5  ;;  %v2138_v13 = vpop.f32.mrb[110].mxu0  ;;  %v2650_v14 = vpop.f32.mrb[110].mxu1 }
 0x1d8   :  { %v3636_v12 = vsel %vm3124_vm13, %v2647_v2, %v3380_v6  ;;  %v5699_v15 = vpack.c.bf16 %v3508_v11, %v3508_v11  ;;  %vm2997_vm14 = vcmp.gt.f32.partialorder %v2138_v13, 0.0  ;;  %v3253_v17 = vmul.f32 0.2, %v2138_v13  ;;  %v2140_v18 = vpop.f32.mrb[111].mxu0  ;;  %v2652_v19 = vpop.f32.mrb[111].mxu1 }
 0x1d9   :  { %v5827_v16 = vpack.c.bf16 %v3636_v12, %v3636_v12  ;;  %vm3125_vm15 = vcmp.gt.f32.partialorder %v2650_v14, 0.0  ;;  %v3381_v20 = vmul.f32 0.2, %v2650_v14  ;;  %2350 = vmatmul.mubr.bf16.gmra.mrb[216].mxu0 %v6260_v3  ;;  %2862 = vmatmul.mubr.bf16.gmra.mrb[216].mxu1 %v6261_v4  ;;  %v6278_v11 = vld [vmem:[%s8283_s0 + $0x390] ss:$8 sps:$4 sm:$0xff]  }
 0x1da   :  { %4789 = vst.msk [vmem:[%s8284_s2 + $0xd8] sm:$0xf] %vm4734_vm3, %v5699_v15  ;;  %v3509_v21 = vsel %vm2997_vm14, %v2138_v13, %v3253_v17  ;;  %5316 = vmatprep.mubr.msk.bf16.mxu0 %vm1500_vm0, %v6262_v9  ;;  %5380 = vmatprep.mubr.msk.bf16.mxu1 %vm1500_vm0, %v6264_v10  ;;  %v6279_v12 = vld [vmem:[%s8283_s0 + $0x790] ss:$8 sps:$4 sm:$0xff]   ;;  %v6280_v17 = vld [vmem:[%s8283_s0 + $0x3a4] ss:$8 sps:$4 sm:$0xff]  }
 0x1db   :  { %4917 = vst.msk [vmem:[%s8284_s2 + $0x2d8] sm:$0xf] %vm4734_vm3, %v5827_v16  ;;  %v5700_v22 = vpack.c.bf16 %v3509_v21, %v3509_v21  ;;  %v3637_v23 = vsel %vm3125_vm15, %v2650_v14, %v3381_v20  ;;  %v6282_v18 = vld [vmem:[%s8283_s0 + $0x7a4] ss:$8 sps:$4 sm:$0xff]  }
 0x1dc   :  { %v5828_v24 = vpack.c.bf16 %v3637_v23, %v3637_v23  ;;  %v2143_v25 = vpop.f32.mrb[112].mxu0  ;;  %v2655_v26 = vpop.f32.mrb[112].mxu1 }
 0x1dd   :  { %4790 = vst.msk [vmem:[%s8284_s2 + $0xdc] sm:$0xf] %vm4734_vm3, %v5700_v22  ;;  %vm2998_vm1 = vcmp.gt.f32.partialorder %v2143_v25, 0.0  ;;  %v3254_v29 = vmul.f32 0.2, %v2143_v25  ;;  %vm3126_vm2 = vcmp.gt.f32.partialorder %v2655_v26, 0.0 }
 0x1de   :  { %v3382_v30 = vmul.f32 0.2, %v2655_v26  ;;  %4918 = vst.msk [vmem:[%s8284_s2 + $0x2dc] sm:$0xf] %vm4734_vm3, %v5828_v24  ;;  %v2145_v31 = vpop.f32.mrb[113].mxu0  ;;  %v2657_v32 = vpop.f32.mrb[113].mxu1 }
 0x1df   :  { %v3510_v35 = vsel %vm2998_vm1, %v2143_v25, %v3254_v29  ;;  %v2146_v37 = vpop.f32.mrb[114].mxu0  ;;  %v2658_v38 = vpop.f32.mrb[114].mxu1 }
 0x1e0   :  { %v3638_v36 = vsel %vm3126_vm2, %v2655_v26, %v3382_v30  ;;  %v5701_v39 = vpack.c.bf16 %v3510_v35, %v3510_v35  ;;  %vm2999_vm4 = vcmp.gt.f32.partialorder %v2146_v37, 0.0  ;;  %v3255_v41 = vmul.f32 0.2, %v2146_v37  ;;  %v2148_v42 = vpop.f32.mrb[115].mxu0  ;;  %v2660_v43 = vpop.f32.mrb[115].mxu1 }
 0x1e1   :  { %v5829_v40 = vpack.c.bf16 %v3638_v36, %v3638_v36  ;;  %vm3127_vm5 = vcmp.gt.f32.partialorder %v2658_v38, 0.0  ;;  %v3383_v44 = vmul.f32 0.2, %v2658_v38  ;;  %2358 = vmatmul.mubr.bf16.gmra.mrb[220].mxu0 %v6266_v27  ;;  %2870 = vmatmul.mubr.bf16.gmra.mrb[220].mxu1 %v6267_v28  ;;  %v6284_v35 = vld [vmem:[%s8283_s0 + $0x3a0] ss:$8 sps:$4 sm:$0xff]  }
 0x1e2   :  { %4791 = vst.msk [vmem:[%s8284_s2 + $0xe0] sm:$0xf] %vm4734_vm3, %v5701_v39  ;;  %v3511_v45 = vsel %vm2999_vm4, %v2146_v37, %v3255_v41  ;;  %5317 = vmatprep.mubr.msk.bf16.mxu0 %vm1500_vm0, %v6268_v33  ;;  %5381 = vmatprep.mubr.msk.bf16.mxu1 %vm1500_vm0, %v6270_v34  ;;  %v6285_v36 = vld [vmem:[%s8283_s0 + $0x7a0] ss:$8 sps:$4 sm:$0xff]   ;;  %v6286_v41 = vld [vmem:[%s8283_s0 + $0x3b4] ss:$8 sps:$4 sm:$0xff]  }
 0x1e3   :  { %4919 = vst.msk [vmem:[%s8284_s2 + $0x2e0] sm:$0xf] %vm4734_vm3, %v5829_v40  ;;  %v5702_v46 = vpack.c.bf16 %v3511_v45, %v3511_v45  ;;  %v3639_v47 = vsel %vm3127_vm5, %v2658_v38, %v3383_v44  ;;  %v6288_v42 = vld [vmem:[%s8283_s0 + $0x7b4] ss:$8 sps:$4 sm:$0xff]  }
 0x1e4   :  { %v5830_v48 = vpack.c.bf16 %v3639_v47, %v3639_v47  ;;  %v2151_v49 = vpop.f32.mrb[116].mxu0  ;;  %v2663_v50 = vpop.f32.mrb[116].mxu1 }
 0x1e5   :  { %4792 = vst.msk [vmem:[%s8284_s2 + $0xe4] sm:$0xf] %vm4734_vm3, %v5702_v46  ;;  %vm3000_vm6 = vcmp.gt.f32.partialorder %v2151_v49, 0.0  ;;  %v3256_v53 = vmul.f32 0.2, %v2151_v49  ;;  %vm3128_vm7 = vcmp.gt.f32.partialorder %v2663_v50, 0.0 }
 0x1e6   :  { %v3384_v54 = vmul.f32 0.2, %v2663_v50  ;;  %4920 = vst.msk [vmem:[%s8284_s2 + $0x2e4] sm:$0xf] %vm4734_vm3, %v5830_v48  ;;  %v2153_v55 = vpop.f32.mrb[117].mxu0  ;;  %v2665_v56 = vpop.f32.mrb[117].mxu1 }
 0x1e7   :  { %v3512_v59 = vsel %vm3000_vm6, %v2151_v49, %v3256_v53  ;;  %v2154_v61 = vpop.f32.mrb[118].mxu0  ;;  %v2666_v62 = vpop.f32.mrb[118].mxu1 }
 0x1e8   :  { %v3640_v60 = vsel %vm3128_vm7, %v2663_v50, %v3384_v54  ;;  %v5703_v63 = vpack.c.bf16 %v3512_v59, %v3512_v59  ;;  %vm3001_vm8 = vcmp.gt.f32.partialorder %v2154_v61, 0.0  ;;  %v3257_v1 = vmul.f32 0.2, %v2154_v61  ;;  %v2156_v2 = vpop.f32.mrb[119].mxu0  ;;  %v2668_v3 = vpop.f32.mrb[119].mxu1 }
 0x1e9   :  { %v5831_v0 = vpack.c.bf16 %v3640_v60, %v3640_v60  ;;  %vm3129_vm9 = vcmp.gt.f32.partialorder %v2666_v62, 0.0  ;;  %v3385_v4 = vmul.f32 0.2, %v2666_v62  ;;  %2366 = vmatmul.mubr.bf16.gmra.mrb[224].mxu0 %v6272_v51  ;;  %2878 = vmatmul.mubr.bf16.gmra.mrb[224].mxu1 %v6273_v52  ;;  %v6290_v59 = vld [vmem:[%s8283_s0 + $0x3b0] ss:$8 sps:$4 sm:$0xff]  }
 0x1ea   :  { %4793 = vst.msk [vmem:[%s8284_s2 + $0xe8] sm:$0xf] %vm4734_vm3, %v5703_v63  ;;  %v3513_v5 = vsel %vm3001_vm8, %v2154_v61, %v3257_v1  ;;  %5318 = vmatprep.mubr.msk.bf16.mxu0 %vm1500_vm0, %v6274_v57  ;;  %5382 = vmatprep.mubr.msk.bf16.mxu1 %vm1500_vm0, %v6276_v58  ;;  %v6291_v60 = vld [vmem:[%s8283_s0 + $0x7b0] ss:$8 sps:$4 sm:$0xff]   ;;  %v6292_v1 = vld [vmem:[%s8283_s0 + $0x3c4] ss:$8 sps:$4 sm:$0xff]  }
 0x1eb   :  { %4921 = vst.msk [vmem:[%s8284_s2 + $0x2e8] sm:$0xf] %vm4734_vm3, %v5831_v0  ;;  %v5704_v6 = vpack.c.bf16 %v3513_v5, %v3513_v5  ;;  %v3641_v7 = vsel %vm3129_vm9, %v2666_v62, %v3385_v4  ;;  %v6294_v2 = vld [vmem:[%s8283_s0 + $0x7c4] ss:$8 sps:$4 sm:$0xff]  }
 0x1ec   :  { %v5832_v8 = vpack.c.bf16 %v3641_v7, %v3641_v7  ;;  %v2159_v9 = vpop.f32.mrb[120].mxu0  ;;  %v2671_v10 = vpop.f32.mrb[120].mxu1 }
 0x1ed   :  { %4794 = vst.msk [vmem:[%s8284_s2 + $0xec] sm:$0xf] %vm4734_vm3, %v5704_v6  ;;  %vm3002_vm10 = vcmp.gt.f32.partialorder %v2159_v9, 0.0  ;;  %v3258_v13 = vmul.f32 0.2, %v2159_v9  ;;  %vm3130_vm11 = vcmp.gt.f32.partialorder %v2671_v10, 0.0 }
 0x1ee   :  { %v3386_v14 = vmul.f32 0.2, %v2671_v10  ;;  %4922 = vst.msk [vmem:[%s8284_s2 + $0x2ec] sm:$0xf] %vm4734_vm3, %v5832_v8  ;;  %v2161_v15 = vpop.f32.mrb[121].mxu0  ;;  %v2673_v16 = vpop.f32.mrb[121].mxu1 }
 0x1ef   :  { %v3514_v19 = vsel %vm3002_vm10, %v2159_v9, %v3258_v13  ;;  %v2162_v21 = vpop.f32.mrb[122].mxu0  ;;  %v2674_v22 = vpop.f32.mrb[122].mxu1 }
 0x1f0   :  { %v3642_v20 = vsel %vm3130_vm11, %v2671_v10, %v3386_v14  ;;  %v5705_v23 = vpack.c.bf16 %v3514_v19, %v3514_v19  ;;  %vm3003_vm12 = vcmp.gt.f32.partialorder %v2162_v21, 0.0  ;;  %v3259_v25 = vmul.f32 0.2, %v2162_v21  ;;  %v2164_v26 = vpop.f32.mrb[123].mxu0  ;;  %v2676_v27 = vpop.f32.mrb[123].mxu1 }
 0x1f1   :  { %v5833_v24 = vpack.c.bf16 %v3642_v20, %v3642_v20  ;;  %vm3131_vm13 = vcmp.gt.f32.partialorder %v2674_v22, 0.0  ;;  %v3387_v28 = vmul.f32 0.2, %v2674_v22  ;;  %2374 = vmatmul.mubr.bf16.gmra.mrb[228].mxu0 %v6278_v11  ;;  %2886 = vmatmul.mubr.bf16.gmra.mrb[228].mxu1 %v6279_v12  ;;  %v6296_v19 = vld [vmem:[%s8283_s0 + $0x3c0] ss:$8 sps:$4 sm:$0xff]  }
 0x1f2   :  { %4795 = vst.msk [vmem:[%s8284_s2 + $0xf0] sm:$0xf] %vm4734_vm3, %v5705_v23  ;;  %v3515_v29 = vsel %vm3003_vm12, %v2162_v21, %v3259_v25  ;;  %5319 = vmatprep.mubr.msk.bf16.mxu0 %vm1500_vm0, %v6280_v17  ;;  %5383 = vmatprep.mubr.msk.bf16.mxu1 %vm1500_vm0, %v6282_v18  ;;  %v6297_v20 = vld [vmem:[%s8283_s0 + $0x7c0] ss:$8 sps:$4 sm:$0xff]   ;;  %v6298_v25 = vld [vmem:[%s8283_s0 + $0x3d4] ss:$8 sps:$4 sm:$0xff]  }
 0x1f3   :  { %4923 = vst.msk [vmem:[%s8284_s2 + $0x2f0] sm:$0xf] %vm4734_vm3, %v5833_v24  ;;  %v5706_v30 = vpack.c.bf16 %v3515_v29, %v3515_v29  ;;  %v3643_v31 = vsel %vm3131_vm13, %v2674_v22, %v3387_v28  ;;  %v6300_v26 = vld [vmem:[%s8283_s0 + $0x7d4] ss:$8 sps:$4 sm:$0xff]  }
 0x1f4   :  { %v5834_v32 = vpack.c.bf16 %v3643_v31, %v3643_v31  ;;  %v2167_v33 = vpop.f32.mrb[124].mxu0  ;;  %v2679_v34 = vpop.f32.mrb[124].mxu1 }
 0x1f5   :  { %4796 = vst.msk [vmem:[%s8284_s2 + $0xf4] sm:$0xf] %vm4734_vm3, %v5706_v30  ;;  %vm3004_vm14 = vcmp.gt.f32.partialorder %v2167_v33, 0.0  ;;  %v3260_v37 = vmul.f32 0.2, %v2167_v33  ;;  %vm3132_vm15 = vcmp.gt.f32.partialorder %v2679_v34, 0.0 }
 0x1f6   :  { %v3388_v38 = vmul.f32 0.2, %v2679_v34  ;;  %4924 = vst.msk [vmem:[%s8284_s2 + $0x2f4] sm:$0xf] %vm4734_vm3, %v5834_v32  ;;  %v2169_v39 = vpop.f32.mrb[125].mxu0  ;;  %v2681_v40 = vpop.f32.mrb[125].mxu1 }
 0x1f7   :  { %v3516_v43 = vsel %vm3004_vm14, %v2167_v33, %v3260_v37  ;;  %v2170_v45 = vpop.f32.mrb[126].mxu0  ;;  %v2682_v46 = vpop.f32.mrb[126].mxu1 }
 0x1f8   :  { %v3644_v44 = vsel %vm3132_vm15, %v2679_v34, %v3388_v38  ;;  %v5707_v47 = vpack.c.bf16 %v3516_v43, %v3516_v43  ;;  %vm3005_vm1 = vcmp.gt.f32.partialorder %v2170_v45, 0.0  ;;  %v3261_v49 = vmul.f32 0.2, %v2170_v45  ;;  %v2172_v50 = vpop.f32.mrb[127].mxu0  ;;  %v2684_v51 = vpop.f32.mrb[127].mxu1 }
 0x1f9   :  { %v5835_v48 = vpack.c.bf16 %v3644_v44, %v3644_v44  ;;  %vm3133_vm2 = vcmp.gt.f32.partialorder %v2682_v46, 0.0  ;;  %v3389_v52 = vmul.f32 0.2, %v2682_v46  ;;  %2382 = vmatmul.mubr.bf16.gmra.mrb[232].mxu0 %v6284_v35  ;;  %2894 = vmatmul.mubr.bf16.gmra.mrb[232].mxu1 %v6285_v36  ;;  %v6302_v43 = vld [vmem:[%s8283_s0 + $0x3d0] ss:$8 sps:$4 sm:$0xff]  }
 0x1fa   :  { %4797 = vst.msk [vmem:[%s8284_s2 + $0xf8] sm:$0xf] %vm4734_vm3, %v5707_v47  ;;  %v3517_v53 = vsel %vm3005_vm1, %v2170_v45, %v3261_v49  ;;  %5320 = vmatprep.mubr.msk.bf16.mxu0 %vm1500_vm0, %v6286_v41  ;;  %5384 = vmatprep.mubr.msk.bf16.mxu1 %vm1500_vm0, %v6288_v42  ;;  %v6303_v44 = vld [vmem:[%s8283_s0 + $0x7d0] ss:$8 sps:$4 sm:$0xff]   ;;  %v6304_v49 = vld [vmem:[%s8283_s0 + $0x3e4] ss:$8 sps:$4 sm:$0xff]  }
 0x1fb   :  { %4925 = vst.msk [vmem:[%s8284_s2 + $0x2f8] sm:$0xf] %vm4734_vm3, %v5835_v48  ;;  %v5708_v54 = vpack.c.bf16 %v3517_v53, %v3517_v53  ;;  %v3645_v55 = vsel %vm3133_vm2, %v2682_v46, %v3389_v52  ;;  %v6306_v50 = vld [vmem:[%s8283_s0 + $0x7e4] ss:$8 sps:$4 sm:$0xff]  }
 0x1fc   :  { %v5836_v56 = vpack.c.bf16 %v3645_v55, %v3645_v55  ;;  %v2175_v57 = vpop.f32.mrb[128].mxu0  ;;  %v2687_v58 = vpop.f32.mrb[128].mxu1 }
 0x1fd   :  { %4798 = vst.msk [vmem:[%s8284_s2 + $0xfc] sm:$0xf] %vm4734_vm3, %v5708_v54  ;;  %vm3006_vm4 = vcmp.gt.f32.partialorder %v2175_v57, 0.0  ;;  %v3262_v61 = vmul.f32 0.2, %v2175_v57  ;;  %vm3134_vm5 = vcmp.gt.f32.partialorder %v2687_v58, 0.0 }
 0x1fe   :  { %v3390_v62 = vmul.f32 0.2, %v2687_v58  ;;  %4926 = vst.msk [vmem:[%s8284_s2 + $0x2fc] sm:$0xf] %vm4734_vm3, %v5836_v56  ;;  %v2177_v63 = vpop.f32.mrb[129].mxu0  ;;  %v2689_v0 = vpop.f32.mrb[129].mxu1 }
 0x1ff   :  { %v3518_v3 = vsel %vm3006_vm4, %v2175_v57, %v3262_v61  ;;  %v2178_v5 = vpop.f32.mrb[130].mxu0  ;;  %v2690_v6 = vpop.f32.mrb[130].mxu1 }
 0x200   :  { %v3646_v4 = vsel %vm3134_vm5, %v2687_v58, %v3390_v62  ;;  %v5709_v7 = vpack.c.bf16 %v3518_v3, %v3518_v3  ;;  %vm3007_vm6 = vcmp.gt.f32.partialorder %v2178_v5, 0.0  ;;  %v3263_v9 = vmul.f32 0.2, %v2178_v5  ;;  %v2180_v10 = vpop.f32.mrb[131].mxu0  ;;  %v2692_v11 = vpop.f32.mrb[131].mxu1 }
 0x201   :  { %v5837_v8 = vpack.c.bf16 %v3646_v4, %v3646_v4  ;;  %vm3135_vm7 = vcmp.gt.f32.partialorder %v2690_v6, 0.0  ;;  %v3391_v12 = vmul.f32 0.2, %v2690_v6  ;;  %2390 = vmatmul.mubr.bf16.gmra.mrb[236].mxu0 %v6290_v59  ;;  %2902 = vmatmul.mubr.bf16.gmra.mrb[236].mxu1 %v6291_v60  ;;  %v6308_v3 = vld [vmem:[%s8283_s0 + $0x3e0] ss:$8 sps:$4 sm:$0xff]  }
 0x202   :  { %4799 = vst.msk [vmem:[%s8284_s2 + $0x100] sm:$0xf] %vm4734_vm3, %v5709_v7  ;;  %v3519_v13 = vsel %vm3007_vm6, %v2178_v5, %v3263_v9  ;;  %5321 = vmatprep.mubr.msk.bf16.mxu0 %vm1500_vm0, %v6292_v1  ;;  %5385 = vmatprep.mubr.msk.bf16.mxu1 %vm1500_vm0, %v6294_v2  ;;  %v6309_v4 = vld [vmem:[%s8283_s0 + $0x7e0] ss:$8 sps:$4 sm:$0xff]   ;;  %v6310_v9 = vld [vmem:[%s8283_s0 + $0x3f4] ss:$8 sps:$4 sm:$0xff]  }
 0x203   :  { %4927 = vst.msk [vmem:[%s8284_s2 + $0x300] sm:$0xf] %vm4734_vm3, %v5837_v8  ;;  %v5710_v14 = vpack.c.bf16 %v3519_v13, %v3519_v13  ;;  %v3647_v15 = vsel %vm3135_vm7, %v2690_v6, %v3391_v12  ;;  %v6312_v10 = vld [vmem:[%s8283_s0 + $0x7f4] ss:$8 sps:$4 sm:$0xff]  }
 0x204   :  { %v5838_v16 = vpack.c.bf16 %v3647_v15, %v3647_v15  ;;  %v2183_v17 = vpop.f32.mrb[132].mxu0  ;;  %v2695_v18 = vpop.f32.mrb[132].mxu1 }
 0x205   :  { %4800 = vst.msk [vmem:[%s8284_s2 + $0x104] sm:$0xf] %vm4734_vm3, %v5710_v14  ;;  %vm3008_vm8 = vcmp.gt.f32.partialorder %v2183_v17, 0.0  ;;  %v3264_v21 = vmul.f32 0.2, %v2183_v17  ;;  %vm3136_vm9 = vcmp.gt.f32.partialorder %v2695_v18, 0.0 }
 0x206   :  { %v3392_v22 = vmul.f32 0.2, %v2695_v18  ;;  %4928 = vst.msk [vmem:[%s8284_s2 + $0x304] sm:$0xf] %vm4734_vm3, %v5838_v16  ;;  %v2185_v23 = vpop.f32.mrb[133].mxu0  ;;  %v2697_v24 = vpop.f32.mrb[133].mxu1 }
 0x207   :  { %v3520_v27 = vsel %vm3008_vm8, %v2183_v17, %v3264_v21  ;;  %v2186_v29 = vpop.f32.mrb[134].mxu0  ;;  %v2698_v30 = vpop.f32.mrb[134].mxu1 }
 0x208   :  { %v3648_v28 = vsel %vm3136_vm9, %v2695_v18, %v3392_v22  ;;  %v5711_v31 = vpack.c.bf16 %v3520_v27, %v3520_v27  ;;  %vm3009_vm10 = vcmp.gt.f32.partialorder %v2186_v29, 0.0  ;;  %v3265_v33 = vmul.f32 0.2, %v2186_v29  ;;  %v2188_v34 = vpop.f32.mrb[135].mxu0  ;;  %v2700_v35 = vpop.f32.mrb[135].mxu1 }
 0x209   :  { %v5839_v32 = vpack.c.bf16 %v3648_v28, %v3648_v28  ;;  %vm3137_vm11 = vcmp.gt.f32.partialorder %v2698_v30, 0.0  ;;  %v3393_v36 = vmul.f32 0.2, %v2698_v30  ;;  %2398 = vmatmul.mubr.bf16.gmra.mrb[240].mxu0 %v6296_v19  ;;  %2910 = vmatmul.mubr.bf16.gmra.mrb[240].mxu1 %v6297_v20  ;;  %v6314_v27 = vld [vmem:[%s8283_s0 + $0x3f0] ss:$8 sps:$4 sm:$0xff]  }
 0x20a   :  { %4801 = vst.msk [vmem:[%s8284_s2 + $0x108] sm:$0xf] %vm4734_vm3, %v5711_v31  ;;  %v3521_v37 = vsel %vm3009_vm10, %v2186_v29, %v3265_v33  ;;  %5322 = vmatprep.mubr.msk.bf16.mxu0 %vm1500_vm0, %v6298_v25  ;;  %5386 = vmatprep.mubr.msk.bf16.mxu1 %vm1500_vm0, %v6300_v26  ;;  %v6315_v28 = vld [vmem:[%s8283_s0 + $0x7f0] ss:$8 sps:$4 sm:$0xff]  }
 0x20b   :  { %4929 = vst.msk [vmem:[%s8284_s2 + $0x308] sm:$0xf] %vm4734_vm3, %v5839_v32  ;;  %v5712_v38 = vpack.c.bf16 %v3521_v37, %v3521_v37  ;;  %v3649_v39 = vsel %vm3137_vm11, %v2698_v30, %v3393_v36 }
 0x20c   :  { %v5840_v40 = vpack.c.bf16 %v3649_v39, %v3649_v39  ;;  %v2191_v41 = vpop.f32.mrb[136].mxu0  ;;  %v2703_v42 = vpop.f32.mrb[136].mxu1 }
 0x20d   :  { %4802 = vst.msk [vmem:[%s8284_s2 + $0x10c] sm:$0xf] %vm4734_vm3, %v5712_v38  ;;  %vm3010_vm12 = vcmp.gt.f32.partialorder %v2191_v41, 0.0  ;;  %v3266_v45 = vmul.f32 0.2, %v2191_v41  ;;  %vm3138_vm13 = vcmp.gt.f32.partialorder %v2703_v42, 0.0 }
 0x20e   :  { %v3394_v46 = vmul.f32 0.2, %v2703_v42  ;;  %4930 = vst.msk [vmem:[%s8284_s2 + $0x30c] sm:$0xf] %vm4734_vm3, %v5840_v40  ;;  %v2193_v47 = vpop.f32.mrb[137].mxu0  ;;  %v2705_v48 = vpop.f32.mrb[137].mxu1 }
 0x20f   :  { %v3522_v51 = vsel %vm3010_vm12, %v2191_v41, %v3266_v45  ;;  %v2194_v53 = vpop.f32.mrb[138].mxu0  ;;  %v2706_v54 = vpop.f32.mrb[138].mxu1 }
 0x210   :  { %v3650_v52 = vsel %vm3138_vm13, %v2703_v42, %v3394_v46  ;;  %v5713_v55 = vpack.c.bf16 %v3522_v51, %v3522_v51  ;;  %vm3011_vm14 = vcmp.gt.f32.partialorder %v2194_v53, 0.0  ;;  %v3267_v57 = vmul.f32 0.2, %v2194_v53  ;;  %v2196_v58 = vpop.f32.mrb[139].mxu0  ;;  %v2708_v59 = vpop.f32.mrb[139].mxu1 }
 0x211   :  { %v5841_v56 = vpack.c.bf16 %v3650_v52, %v3650_v52  ;;  %vm3139_vm15 = vcmp.gt.f32.partialorder %v2706_v54, 0.0  ;;  %v3395_v60 = vmul.f32 0.2, %v2706_v54  ;;  %2406 = vmatmul.mubr.bf16.gmra.mrb[244].mxu0 %v6302_v43  ;;  %2918 = vmatmul.mubr.bf16.gmra.mrb[244].mxu1 %v6303_v44 }
 0x212   :  { %4803 = vst.msk [vmem:[%s8284_s2 + $0x110] sm:$0xf] %vm4734_vm3, %v5713_v55  ;;  %v3523_v61 = vsel %vm3011_vm14, %v2194_v53, %v3267_v57  ;;  %5323 = vmatprep.mubr.msk.bf16.mxu0 %vm1500_vm0, %v6304_v49  ;;  %5387 = vmatprep.mubr.msk.bf16.mxu1 %vm1500_vm0, %v6306_v50 }
 0x213   :  { %4931 = vst.msk [vmem:[%s8284_s2 + $0x310] sm:$0xf] %vm4734_vm3, %v5841_v56  ;;  %v5714_v62 = vpack.c.bf16 %v3523_v61, %v3523_v61  ;;  %v3651_v63 = vsel %vm3139_vm15, %v2706_v54, %v3395_v60 }
 0x214   :  { %v5842_v0 = vpack.c.bf16 %v3651_v63, %v3651_v63  ;;  %v2199_v1 = vpop.f32.mrb[140].mxu0  ;;  %v2711_v2 = vpop.f32.mrb[140].mxu1 }
 0x215   :  { %4804 = vst.msk [vmem:[%s8284_s2 + $0x114] sm:$0xf] %vm4734_vm3, %v5714_v62  ;;  %vm3012_vm1 = vcmp.gt.f32.partialorder %v2199_v1, 0.0  ;;  %v3268_v5 = vmul.f32 0.2, %v2199_v1  ;;  %vm3140_vm2 = vcmp.gt.f32.partialorder %v2711_v2, 0.0 }
 0x216   :  { %v3396_v6 = vmul.f32 0.2, %v2711_v2  ;;  %4932 = vst.msk [vmem:[%s8284_s2 + $0x314] sm:$0xf] %vm4734_vm3, %v5842_v0  ;;  %v2201_v7 = vpop.f32.mrb[141].mxu0  ;;  %v2713_v8 = vpop.f32.mrb[141].mxu1 }
 0x217   :  { %v3524_v11 = vsel %vm3012_vm1, %v2199_v1, %v3268_v5  ;;  %v2202_v13 = vpop.f32.mrb[142].mxu0  ;;  %v2714_v14 = vpop.f32.mrb[142].mxu1 }
 0x218   :  { %v3652_v12 = vsel %vm3140_vm2, %v2711_v2, %v3396_v6  ;;  %v5715_v15 = vpack.c.bf16 %v3524_v11, %v3524_v11  ;;  %vm3013_vm4 = vcmp.gt.f32.partialorder %v2202_v13, 0.0  ;;  %v3269_v17 = vmul.f32 0.2, %v2202_v13  ;;  %v2204_v18 = vpop.f32.mrb[143].mxu0  ;;  %v2716_v19 = vpop.f32.mrb[143].mxu1 }
 0x219   :  { %v5843_v16 = vpack.c.bf16 %v3652_v12, %v3652_v12  ;;  %vm3141_vm5 = vcmp.gt.f32.partialorder %v2714_v14, 0.0  ;;  %v3397_v20 = vmul.f32 0.2, %v2714_v14  ;;  %2414 = vmatmul.mubr.bf16.gmra.mrb[248].mxu0 %v6308_v3  ;;  %2926 = vmatmul.mubr.bf16.gmra.mrb[248].mxu1 %v6309_v4 }
 0x21a   :  { %4805 = vst.msk [vmem:[%s8284_s2 + $0x118] sm:$0xf] %vm4734_vm3, %v5715_v15  ;;  %v3525_v21 = vsel %vm3013_vm4, %v2202_v13, %v3269_v17  ;;  %5324 = vmatprep.mubr.msk.bf16.mxu0 %vm1500_vm0, %v6310_v9  ;;  %5388 = vmatprep.mubr.msk.bf16.mxu1 %vm1500_vm0, %v6312_v10 }
 0x21b   :  { %4933 = vst.msk [vmem:[%s8284_s2 + $0x318] sm:$0xf] %vm4734_vm3, %v5843_v16  ;;  %v5716_v22 = vpack.c.bf16 %v3525_v21, %v3525_v21  ;;  %v3653_v23 = vsel %vm3141_vm5, %v2714_v14, %v3397_v20 }
 0x21c   :  { %v5844_v24 = vpack.c.bf16 %v3653_v23, %v3653_v23  ;;  %v2207_v25 = vpop.f32.mrb[144].mxu0  ;;  %v2719_v26 = vpop.f32.mrb[144].mxu1 }
 0x21d   :  { %4806 = vst.msk [vmem:[%s8284_s2 + $0x11c] sm:$0xf] %vm4734_vm3, %v5716_v22  ;;  %vm3014_vm6 = vcmp.gt.f32.partialorder %v2207_v25, 0.0  ;;  %v3270_v29 = vmul.f32 0.2, %v2207_v25  ;;  %vm3142_vm0 = vcmp.gt.f32.partialorder %v2719_v26, 0.0 }
 0x21e   :  { %v3398_v30 = vmul.f32 0.2, %v2719_v26  ;;  %4934 = vst.msk [vmem:[%s8284_s2 + $0x31c] sm:$0xf] %vm4734_vm3, %v5844_v24  ;;  %v2209_v31 = vpop.f32.mrb[145].mxu0  ;;  %v2721_v32 = vpop.f32.mrb[145].mxu1 }
 0x21f   :  { %v3526_v33 = vsel %vm3014_vm6, %v2207_v25, %v3270_v29  ;;  %v2210_v35 = vpop.f32.mrb[146].mxu0  ;;  %v2722_v36 = vpop.f32.mrb[146].mxu1 }
 0x220   :  { %v3654_v34 = vsel %vm3142_vm0, %v2719_v26, %v3398_v30  ;;  %v5717_v37 = vpack.c.bf16 %v3526_v33, %v3526_v33  ;;  %vm3015_vm7 = vcmp.gt.f32.partialorder %v2210_v35, 0.0  ;;  %v3271_v39 = vmul.f32 0.2, %v2210_v35  ;;  %v2212_v40 = vpop.f32.mrb[147].mxu0  ;;  %v2724_v41 = vpop.f32.mrb[147].mxu1 }
 0x221   :  { %v5845_v38 = vpack.c.bf16 %v3654_v34, %v3654_v34  ;;  %vm3143_vm8 = vcmp.gt.f32.partialorder %v2722_v36, 0.0  ;;  %v3399_v42 = vmul.f32 0.2, %v2722_v36  ;;  %2422 = vmatmul.mubr.bf16.gmra.mrb[252].mxu0 %v6314_v27  ;;  %2934 = vmatmul.mubr.bf16.gmra.mrb[252].mxu1 %v6315_v28 }
 0x222   :  { %4807 = vst.msk [vmem:[%s8284_s2 + $0x120] sm:$0xf] %vm4734_vm3, %v5717_v37  ;;  %v3527_v43 = vsel %vm3015_vm7, %v2210_v35, %v3271_v39 }
 0x223   :  { %4935 = vst.msk [vmem:[%s8284_s2 + $0x320] sm:$0xf] %vm4734_vm3, %v5845_v38  ;;  %v5718_v44 = vpack.c.bf16 %v3527_v43, %v3527_v43  ;;  %v3655_v45 = vsel %vm3143_vm8, %v2722_v36, %v3399_v42 }
 0x224   :  { %v5846_v46 = vpack.c.bf16 %v3655_v45, %v3655_v45  ;;  %v2215_v47 = vpop.f32.mrb[148].mxu0  ;;  %v2727_v48 = vpop.f32.mrb[148].mxu1 }
 0x225   :  { %4808 = vst.msk [vmem:[%s8284_s2 + $0x124] sm:$0xf] %vm4734_vm3, %v5718_v44  ;;  %vm3016_vm9 = vcmp.gt.f32.partialorder %v2215_v47, 0.0  ;;  %v3272_v49 = vmul.f32 0.2, %v2215_v47  ;;  %vm3144_vm10 = vcmp.gt.f32.partialorder %v2727_v48, 0.0 }
 0x226   :  { %v3400_v50 = vmul.f32 0.2, %v2727_v48  ;;  %4936 = vst.msk [vmem:[%s8284_s2 + $0x324] sm:$0xf] %vm4734_vm3, %v5846_v46  ;;  %v2217_v51 = vpop.f32.mrb[149].mxu0  ;;  %v2729_v52 = vpop.f32.mrb[149].mxu1 }
 0x227   :  { %v3528_v53 = vsel %vm3016_vm9, %v2215_v47, %v3272_v49  ;;  %v2218_v55 = vpop.f32.mrb[150].mxu0  ;;  %v2730_v56 = vpop.f32.mrb[150].mxu1 }
 0x228   :  { %v3656_v54 = vsel %vm3144_vm10, %v2727_v48, %v3400_v50  ;;  %v5719_v57 = vpack.c.bf16 %v3528_v53, %v3528_v53  ;;  %vm3017_vm11 = vcmp.gt.f32.partialorder %v2218_v55, 0.0  ;;  %v3273_v59 = vmul.f32 0.2, %v2218_v55  ;;  %v2220_v60 = vpop.f32.mrb[151].mxu0  ;;  %v2732_v61 = vpop.f32.mrb[151].mxu1 }
 0x229   :  { %v5847_v58 = vpack.c.bf16 %v3656_v54, %v3656_v54  ;;  %vm3145_vm12 = vcmp.gt.f32.partialorder %v2730_v56, 0.0  ;;  %v3401_v62 = vmul.f32 0.2, %v2730_v56 }
 0x22a   :  { %4809 = vst.msk [vmem:[%s8284_s2 + $0x128] sm:$0xf] %vm4734_vm3, %v5719_v57  ;;  %v3529_v63 = vsel %vm3017_vm11, %v2218_v55, %v3273_v59 }
 0x22b   :  { %4937 = vst.msk [vmem:[%s8284_s2 + $0x328] sm:$0xf] %vm4734_vm3, %v5847_v58  ;;  %v5720_v0 = vpack.c.bf16 %v3529_v63, %v3529_v63  ;;  %v3657_v1 = vsel %vm3145_vm12, %v2730_v56, %v3401_v62 }
 0x22c   :  { %v5848_v2 = vpack.c.bf16 %v3657_v1, %v3657_v1  ;;  %v2223_v3 = vpop.f32.mrb[152].mxu0  ;;  %v2735_v4 = vpop.f32.mrb[152].mxu1 }
 0x22d   :  { %4810 = vst.msk [vmem:[%s8284_s2 + $0x12c] sm:$0xf] %vm4734_vm3, %v5720_v0  ;;  %vm3018_vm13 = vcmp.gt.f32.partialorder %v2223_v3, 0.0  ;;  %v3274_v5 = vmul.f32 0.2, %v2223_v3  ;;  %vm3146_vm14 = vcmp.gt.f32.partialorder %v2735_v4, 0.0 }
 0x22e   :  { %v3402_v6 = vmul.f32 0.2, %v2735_v4  ;;  %4938 = vst.msk [vmem:[%s8284_s2 + $0x32c] sm:$0xf] %vm4734_vm3, %v5848_v2  ;;  %v2225_v7 = vpop.f32.mrb[153].mxu0  ;;  %v2737_v8 = vpop.f32.mrb[153].mxu1 }
 0x22f   :  { %v3530_v9 = vsel %vm3018_vm13, %v2223_v3, %v3274_v5  ;;  %v2226_v11 = vpop.f32.mrb[154].mxu0  ;;  %v2738_v12 = vpop.f32.mrb[154].mxu1 }
 0x230   :  { %v3658_v10 = vsel %vm3146_vm14, %v2735_v4, %v3402_v6  ;;  %v5721_v13 = vpack.c.bf16 %v3530_v9, %v3530_v9  ;;  %vm3019_vm15 = vcmp.gt.f32.partialorder %v2226_v11, 0.0  ;;  %v3275_v15 = vmul.f32 0.2, %v2226_v11  ;;  %v2228_v16 = vpop.f32.mrb[155].mxu0  ;;  %v2740_v17 = vpop.f32.mrb[155].mxu1 }
 0x231   :  { %v5849_v14 = vpack.c.bf16 %v3658_v10, %v3658_v10  ;;  %vm3147_vm1 = vcmp.gt.f32.partialorder %v2738_v12, 0.0  ;;  %v3403_v18 = vmul.f32 0.2, %v2738_v12 }
 0x232   :  { %4811 = vst.msk [vmem:[%s8284_s2 + $0x130] sm:$0xf] %vm4734_vm3, %v5721_v13  ;;  %v3531_v19 = vsel %vm3019_vm15, %v2226_v11, %v3275_v15 }
 0x233   :  { %4939 = vst.msk [vmem:[%s8284_s2 + $0x330] sm:$0xf] %vm4734_vm3, %v5849_v14  ;;  %v5722_v20 = vpack.c.bf16 %v3531_v19, %v3531_v19  ;;  %v3659_v21 = vsel %vm3147_vm1, %v2738_v12, %v3403_v18 }
 0x234   :  { %v5850_v22 = vpack.c.bf16 %v3659_v21, %v3659_v21  ;;  %v2231_v23 = vpop.f32.mrb[156].mxu0  ;;  %v2743_v24 = vpop.f32.mrb[156].mxu1 }
 0x235   :  { %4812 = vst.msk [vmem:[%s8284_s2 + $0x134] sm:$0xf] %vm4734_vm3, %v5722_v20  ;;  %vm3020_vm2 = vcmp.gt.f32.partialorder %v2231_v23, 0.0  ;;  %v3276_v25 = vmul.f32 0.2, %v2231_v23  ;;  %vm3148_vm4 = vcmp.gt.f32.partialorder %v2743_v24, 0.0 }
 0x236   :  { %v3404_v26 = vmul.f32 0.2, %v2743_v24  ;;  %4940 = vst.msk [vmem:[%s8284_s2 + $0x334] sm:$0xf] %vm4734_vm3, %v5850_v22  ;;  %v2233_v27 = vpop.f32.mrb[157].mxu0  ;;  %v2745_v28 = vpop.f32.mrb[157].mxu1 }
 0x237   :  { %v3532_v29 = vsel %vm3020_vm2, %v2231_v23, %v3276_v25  ;;  %v2234_v31 = vpop.f32.mrb[158].mxu0  ;;  %v2746_v32 = vpop.f32.mrb[158].mxu1 }
 0x238   :  { %v3660_v30 = vsel %vm3148_vm4, %v2743_v24, %v3404_v26  ;;  %v5723_v33 = vpack.c.bf16 %v3532_v29, %v3532_v29  ;;  %vm3021_vm5 = vcmp.gt.f32.partialorder %v2234_v31, 0.0  ;;  %v3277_v35 = vmul.f32 0.2, %v2234_v31  ;;  %v2236_v36 = vpop.f32.mrb[159].mxu0  ;;  %v2748_v37 = vpop.f32.mrb[159].mxu1 }
 0x239   :  { %v5851_v34 = vpack.c.bf16 %v3660_v30, %v3660_v30  ;;  %vm3149_vm6 = vcmp.gt.f32.partialorder %v2746_v32, 0.0  ;;  %v3405_v38 = vmul.f32 0.2, %v2746_v32 }
 0x23a   :  { %4813 = vst.msk [vmem:[%s8284_s2 + $0x138] sm:$0xf] %vm4734_vm3, %v5723_v33  ;;  %v3533_v39 = vsel %vm3021_vm5, %v2234_v31, %v3277_v35 }
 0x23b   :  { %4941 = vst.msk [vmem:[%s8284_s2 + $0x338] sm:$0xf] %vm4734_vm3, %v5851_v34  ;;  %v5724_v40 = vpack.c.bf16 %v3533_v39, %v3533_v39  ;;  %v3661_v41 = vsel %vm3149_vm6, %v2746_v32, %v3405_v38 }
 0x23c   :  { %v5852_v42 = vpack.c.bf16 %v3661_v41, %v3661_v41  ;;  %v2239_v43 = vpop.f32.mrb[160].mxu0  ;;  %v2751_v44 = vpop.f32.mrb[160].mxu1 }
 0x23d   :  { %4814 = vst.msk [vmem:[%s8284_s2 + $0x13c] sm:$0xf] %vm4734_vm3, %v5724_v40  ;;  %vm3022_vm0 = vcmp.gt.f32.partialorder %v2239_v43, 0.0  ;;  %v3278_v45 = vmul.f32 0.2, %v2239_v43  ;;  %vm3150_vm7 = vcmp.gt.f32.partialorder %v2751_v44, 0.0 }
 0x23e   :  { %v3406_v46 = vmul.f32 0.2, %v2751_v44  ;;  %4942 = vst.msk [vmem:[%s8284_s2 + $0x33c] sm:$0xf] %vm4734_vm3, %v5852_v42  ;;  %v2241_v47 = vpop.f32.mrb[161].mxu0  ;;  %v2753_v48 = vpop.f32.mrb[161].mxu1 }
 0x23f   :  { %v3534_v49 = vsel %vm3022_vm0, %v2239_v43, %v3278_v45  ;;  %v2242_v51 = vpop.f32.mrb[162].mxu0  ;;  %v2754_v52 = vpop.f32.mrb[162].mxu1 }
 0x240   :  { %v3662_v50 = vsel %vm3150_vm7, %v2751_v44, %v3406_v46  ;;  %v5725_v53 = vpack.c.bf16 %v3534_v49, %v3534_v49  ;;  %vm3023_vm8 = vcmp.gt.f32.partialorder %v2242_v51, 0.0  ;;  %v3279_v55 = vmul.f32 0.2, %v2242_v51  ;;  %v2244_v56 = vpop.f32.mrb[163].mxu0  ;;  %v2756_v57 = vpop.f32.mrb[163].mxu1 }
 0x241   :  { %v5853_v54 = vpack.c.bf16 %v3662_v50, %v3662_v50  ;;  %vm3151_vm9 = vcmp.gt.f32.partialorder %v2754_v52, 0.0  ;;  %v3407_v58 = vmul.f32 0.2, %v2754_v52 }
 0x242   :  { %4815 = vst.msk [vmem:[%s8284_s2 + $0x140] sm:$0xf] %vm4734_vm3, %v5725_v53  ;;  %v3535_v59 = vsel %vm3023_vm8, %v2242_v51, %v3279_v55 }
 0x243   :  { %4943 = vst.msk [vmem:[%s8284_s2 + $0x340] sm:$0xf] %vm4734_vm3, %v5853_v54  ;;  %v5726_v60 = vpack.c.bf16 %v3535_v59, %v3535_v59  ;;  %v3663_v61 = vsel %vm3151_vm9, %v2754_v52, %v3407_v58 }
 0x244   :  { %v5854_v62 = vpack.c.bf16 %v3663_v61, %v3663_v61  ;;  %v2247_v63 = vpop.f32.mrb[164].mxu0  ;;  %v2759_v0 = vpop.f32.mrb[164].mxu1 }
 0x245   :  { %4816 = vst.msk [vmem:[%s8284_s2 + $0x144] sm:$0xf] %vm4734_vm3, %v5726_v60  ;;  %vm3024_vm10 = vcmp.gt.f32.partialorder %v2247_v63, 0.0  ;;  %v3280_v1 = vmul.f32 0.2, %v2247_v63  ;;  %vm3152_vm11 = vcmp.gt.f32.partialorder %v2759_v0, 0.0 }
 0x246   :  { %v3408_v2 = vmul.f32 0.2, %v2759_v0  ;;  %4944 = vst.msk [vmem:[%s8284_s2 + $0x344] sm:$0xf] %vm4734_vm3, %v5854_v62  ;;  %v2249_v3 = vpop.f32.mrb[165].mxu0  ;;  %v2761_v4 = vpop.f32.mrb[165].mxu1 }
 0x247   :  { %v3536_v5 = vsel %vm3024_vm10, %v2247_v63, %v3280_v1  ;;  %v2250_v7 = vpop.f32.mrb[166].mxu0  ;;  %v2762_v8 = vpop.f32.mrb[166].mxu1 }
 0x248   :  { %v3664_v6 = vsel %vm3152_vm11, %v2759_v0, %v3408_v2  ;;  %v5727_v9 = vpack.c.bf16 %v3536_v5, %v3536_v5  ;;  %vm3025_vm12 = vcmp.gt.f32.partialorder %v2250_v7, 0.0  ;;  %v3281_v11 = vmul.f32 0.2, %v2250_v7  ;;  %v2252_v12 = vpop.f32.mrb[167].mxu0  ;;  %v2764_v13 = vpop.f32.mrb[167].mxu1 }
 0x249   :  { %v5855_v10 = vpack.c.bf16 %v3664_v6, %v3664_v6  ;;  %vm3153_vm13 = vcmp.gt.f32.partialorder %v2762_v8, 0.0  ;;  %v3409_v14 = vmul.f32 0.2, %v2762_v8 }
 0x24a   :  { %4817 = vst.msk [vmem:[%s8284_s2 + $0x148] sm:$0xf] %vm4734_vm3, %v5727_v9  ;;  %v3537_v15 = vsel %vm3025_vm12, %v2250_v7, %v3281_v11 }
 0x24b   :  { %4945 = vst.msk [vmem:[%s8284_s2 + $0x348] sm:$0xf] %vm4734_vm3, %v5855_v10  ;;  %v5728_v16 = vpack.c.bf16 %v3537_v15, %v3537_v15  ;;  %v3665_v17 = vsel %vm3153_vm13, %v2762_v8, %v3409_v14 }
 0x24c   :  { %v5856_v18 = vpack.c.bf16 %v3665_v17, %v3665_v17  ;;  %v2255_v19 = vpop.f32.mrb[168].mxu0  ;;  %v2767_v20 = vpop.f32.mrb[168].mxu1 }
 0x24d   :  { %4818 = vst.msk [vmem:[%s8284_s2 + $0x14c] sm:$0xf] %vm4734_vm3, %v5728_v16  ;;  %vm3026_vm14 = vcmp.gt.f32.partialorder %v2255_v19, 0.0  ;;  %v3282_v21 = vmul.f32 0.2, %v2255_v19  ;;  %vm3154_vm15 = vcmp.gt.f32.partialorder %v2767_v20, 0.0 }
 0x24e   :  { %v3410_v22 = vmul.f32 0.2, %v2767_v20  ;;  %4946 = vst.msk [vmem:[%s8284_s2 + $0x34c] sm:$0xf] %vm4734_vm3, %v5856_v18  ;;  %v2257_v23 = vpop.f32.mrb[169].mxu0  ;;  %v2769_v24 = vpop.f32.mrb[169].mxu1 }
 0x24f   :  { %v3538_v25 = vsel %vm3026_vm14, %v2255_v19, %v3282_v21  ;;  %v2258_v27 = vpop.f32.mrb[170].mxu0  ;;  %v2770_v28 = vpop.f32.mrb[170].mxu1 }
 0x250   :  { %v3666_v26 = vsel %vm3154_vm15, %v2767_v20, %v3410_v22  ;;  %v5729_v29 = vpack.c.bf16 %v3538_v25, %v3538_v25  ;;  %vm3027_vm1 = vcmp.gt.f32.partialorder %v2258_v27, 0.0  ;;  %v3283_v31 = vmul.f32 0.2, %v2258_v27  ;;  %v2260_v32 = vpop.f32.mrb[171].mxu0  ;;  %v2772_v33 = vpop.f32.mrb[171].mxu1 }
 0x251   :  { %v5857_v30 = vpack.c.bf16 %v3666_v26, %v3666_v26  ;;  %vm3155_vm2 = vcmp.gt.f32.partialorder %v2770_v28, 0.0  ;;  %v3411_v34 = vmul.f32 0.2, %v2770_v28 }
 0x252   :  { %4819 = vst.msk [vmem:[%s8284_s2 + $0x150] sm:$0xf] %vm4734_vm3, %v5729_v29  ;;  %v3539_v35 = vsel %vm3027_vm1, %v2258_v27, %v3283_v31 }
 0x253   :  { %4947 = vst.msk [vmem:[%s8284_s2 + $0x350] sm:$0xf] %vm4734_vm3, %v5857_v30  ;;  %v5730_v36 = vpack.c.bf16 %v3539_v35, %v3539_v35  ;;  %v3667_v37 = vsel %vm3155_vm2, %v2770_v28, %v3411_v34 }
 0x254   :  { %v5858_v38 = vpack.c.bf16 %v3667_v37, %v3667_v37  ;;  %v2263_v39 = vpop.f32.mrb[172].mxu0  ;;  %v2775_v40 = vpop.f32.mrb[172].mxu1 }
 0x255   :  { %4820 = vst.msk [vmem:[%s8284_s2 + $0x154] sm:$0xf] %vm4734_vm3, %v5730_v36  ;;  %vm3028_vm4 = vcmp.gt.f32.partialorder %v2263_v39, 0.0  ;;  %v3284_v41 = vmul.f32 0.2, %v2263_v39  ;;  %vm3156_vm5 = vcmp.gt.f32.partialorder %v2775_v40, 0.0 }
 0x256   :  { %v3412_v42 = vmul.f32 0.2, %v2775_v40  ;;  %4948 = vst.msk [vmem:[%s8284_s2 + $0x354] sm:$0xf] %vm4734_vm3, %v5858_v38  ;;  %v2265_v43 = vpop.f32.mrb[173].mxu0  ;;  %v2777_v44 = vpop.f32.mrb[173].mxu1 }
 0x257   :  { %v3540_v45 = vsel %vm3028_vm4, %v2263_v39, %v3284_v41  ;;  %v2266_v47 = vpop.f32.mrb[174].mxu0  ;;  %v2778_v48 = vpop.f32.mrb[174].mxu1 }
 0x258   :  { %v3668_v46 = vsel %vm3156_vm5, %v2775_v40, %v3412_v42  ;;  %v5731_v49 = vpack.c.bf16 %v3540_v45, %v3540_v45  ;;  %vm3029_vm6 = vcmp.gt.f32.partialorder %v2266_v47, 0.0  ;;  %v3285_v51 = vmul.f32 0.2, %v2266_v47  ;;  %v2268_v52 = vpop.f32.mrb[175].mxu0  ;;  %v2780_v53 = vpop.f32.mrb[175].mxu1 }
 0x259   :  { %v5859_v50 = vpack.c.bf16 %v3668_v46, %v3668_v46  ;;  %vm3157_vm0 = vcmp.gt.f32.partialorder %v2778_v48, 0.0  ;;  %v3413_v54 = vmul.f32 0.2, %v2778_v48 }
 0x25a   :  { %4821 = vst.msk [vmem:[%s8284_s2 + $0x158] sm:$0xf] %vm4734_vm3, %v5731_v49  ;;  %v3541_v55 = vsel %vm3029_vm6, %v2266_v47, %v3285_v51 }
 0x25b   :  { %4949 = vst.msk [vmem:[%s8284_s2 + $0x358] sm:$0xf] %vm4734_vm3, %v5859_v50  ;;  %v5732_v56 = vpack.c.bf16 %v3541_v55, %v3541_v55  ;;  %v3669_v57 = vsel %vm3157_vm0, %v2778_v48, %v3413_v54 }
 0x25c   :  { %v5860_v58 = vpack.c.bf16 %v3669_v57, %v3669_v57  ;;  %v2271_v59 = vpop.f32.mrb[176].mxu0  ;;  %v2783_v60 = vpop.f32.mrb[176].mxu1 }
 0x25d   :  { %4822 = vst.msk [vmem:[%s8284_s2 + $0x15c] sm:$0xf] %vm4734_vm3, %v5732_v56  ;;  %vm3030_vm7 = vcmp.gt.f32.partialorder %v2271_v59, 0.0  ;;  %v3286_v61 = vmul.f32 0.2, %v2271_v59  ;;  %vm3158_vm8 = vcmp.gt.f32.partialorder %v2783_v60, 0.0 }
 0x25e   :  { %v3414_v62 = vmul.f32 0.2, %v2783_v60  ;;  %4950 = vst.msk [vmem:[%s8284_s2 + $0x35c] sm:$0xf] %vm4734_vm3, %v5860_v58  ;;  %v2273_v63 = vpop.f32.mrb[177].mxu0  ;;  %v2785_v0 = vpop.f32.mrb[177].mxu1 }
 0x25f   :  { %v3542_v1 = vsel %vm3030_vm7, %v2271_v59, %v3286_v61  ;;  %v2274_v3 = vpop.f32.mrb[178].mxu0  ;;  %v2786_v4 = vpop.f32.mrb[178].mxu1 }
 0x260   :  { %v3670_v2 = vsel %vm3158_vm8, %v2783_v60, %v3414_v62  ;;  %v5733_v5 = vpack.c.bf16 %v3542_v1, %v3542_v1  ;;  %vm3031_vm9 = vcmp.gt.f32.partialorder %v2274_v3, 0.0  ;;  %v3287_v7 = vmul.f32 0.2, %v2274_v3  ;;  %v2276_v8 = vpop.f32.mrb[179].mxu0  ;;  %v2788_v9 = vpop.f32.mrb[179].mxu1 }
 0x261   :  { %v5861_v6 = vpack.c.bf16 %v3670_v2, %v3670_v2  ;;  %vm3159_vm10 = vcmp.gt.f32.partialorder %v2786_v4, 0.0  ;;  %v3415_v10 = vmul.f32 0.2, %v2786_v4 }
 0x262   :  { %4823 = vst.msk [vmem:[%s8284_s2 + $0x160] sm:$0xf] %vm4734_vm3, %v5733_v5  ;;  %v3543_v11 = vsel %vm3031_vm9, %v2274_v3, %v3287_v7 }
 0x263   :  { %4951 = vst.msk [vmem:[%s8284_s2 + $0x360] sm:$0xf] %vm4734_vm3, %v5861_v6  ;;  %v5734_v12 = vpack.c.bf16 %v3543_v11, %v3543_v11  ;;  %v3671_v13 = vsel %vm3159_vm10, %v2786_v4, %v3415_v10 }
 0x264   :  { %v5862_v14 = vpack.c.bf16 %v3671_v13, %v3671_v13  ;;  %v2279_v15 = vpop.f32.mrb[180].mxu0  ;;  %v2791_v16 = vpop.f32.mrb[180].mxu1 }
 0x265   :  { %4824 = vst.msk [vmem:[%s8284_s2 + $0x164] sm:$0xf] %vm4734_vm3, %v5734_v12  ;;  %vm3032_vm11 = vcmp.gt.f32.partialorder %v2279_v15, 0.0  ;;  %v3288_v17 = vmul.f32 0.2, %v2279_v15  ;;  %vm3160_vm12 = vcmp.gt.f32.partialorder %v2791_v16, 0.0 }
 0x266   :  { %v3416_v18 = vmul.f32 0.2, %v2791_v16  ;;  %4952 = vst.msk [vmem:[%s8284_s2 + $0x364] sm:$0xf] %vm4734_vm3, %v5862_v14  ;;  %v2281_v19 = vpop.f32.mrb[181].mxu0  ;;  %v2793_v20 = vpop.f32.mrb[181].mxu1 }
 0x267   :  { %v3544_v21 = vsel %vm3032_vm11, %v2279_v15, %v3288_v17  ;;  %v2282_v23 = vpop.f32.mrb[182].mxu0  ;;  %v2794_v24 = vpop.f32.mrb[182].mxu1 }
 0x268   :  { %v3672_v22 = vsel %vm3160_vm12, %v2791_v16, %v3416_v18  ;;  %v5735_v25 = vpack.c.bf16 %v3544_v21, %v3544_v21  ;;  %vm3033_vm13 = vcmp.gt.f32.partialorder %v2282_v23, 0.0  ;;  %v3289_v27 = vmul.f32 0.2, %v2282_v23  ;;  %v2284_v28 = vpop.f32.mrb[183].mxu0  ;;  %v2796_v29 = vpop.f32.mrb[183].mxu1 }
 0x269   :  { %v5863_v26 = vpack.c.bf16 %v3672_v22, %v3672_v22  ;;  %vm3161_vm14 = vcmp.gt.f32.partialorder %v2794_v24, 0.0  ;;  %v3417_v30 = vmul.f32 0.2, %v2794_v24 }
 0x26a   :  { %4825 = vst.msk [vmem:[%s8284_s2 + $0x168] sm:$0xf] %vm4734_vm3, %v5735_v25  ;;  %v3545_v31 = vsel %vm3033_vm13, %v2282_v23, %v3289_v27 }
 0x26b   :  { %4953 = vst.msk [vmem:[%s8284_s2 + $0x368] sm:$0xf] %vm4734_vm3, %v5863_v26  ;;  %v5736_v32 = vpack.c.bf16 %v3545_v31, %v3545_v31  ;;  %v3673_v33 = vsel %vm3161_vm14, %v2794_v24, %v3417_v30 }
 0x26c   :  { %v5864_v34 = vpack.c.bf16 %v3673_v33, %v3673_v33  ;;  %v2287_v35 = vpop.f32.mrb[184].mxu0  ;;  %v2799_v36 = vpop.f32.mrb[184].mxu1 }
 0x26d   :  { %4826 = vst.msk [vmem:[%s8284_s2 + $0x16c] sm:$0xf] %vm4734_vm3, %v5736_v32  ;;  %vm3034_vm15 = vcmp.gt.f32.partialorder %v2287_v35, 0.0  ;;  %v3290_v37 = vmul.f32 0.2, %v2287_v35  ;;  %vm3162_vm1 = vcmp.gt.f32.partialorder %v2799_v36, 0.0 }
 0x26e   :  { %v3418_v38 = vmul.f32 0.2, %v2799_v36  ;;  %4954 = vst.msk [vmem:[%s8284_s2 + $0x36c] sm:$0xf] %vm4734_vm3, %v5864_v34  ;;  %v2289_v39 = vpop.f32.mrb[185].mxu0  ;;  %v2801_v40 = vpop.f32.mrb[185].mxu1 }
 0x26f   :  { %v3546_v41 = vsel %vm3034_vm15, %v2287_v35, %v3290_v37  ;;  %v2290_v43 = vpop.f32.mrb[186].mxu0  ;;  %v2802_v44 = vpop.f32.mrb[186].mxu1 }
 0x270   :  { %v3674_v42 = vsel %vm3162_vm1, %v2799_v36, %v3418_v38  ;;  %v5737_v45 = vpack.c.bf16 %v3546_v41, %v3546_v41  ;;  %vm3035_vm2 = vcmp.gt.f32.partialorder %v2290_v43, 0.0  ;;  %v3291_v47 = vmul.f32 0.2, %v2290_v43  ;;  %v2292_v48 = vpop.f32.mrb[187].mxu0  ;;  %v2804_v49 = vpop.f32.mrb[187].mxu1 }
 0x271   :  { %v5865_v46 = vpack.c.bf16 %v3674_v42, %v3674_v42  ;;  %vm3163_vm4 = vcmp.gt.f32.partialorder %v2802_v44, 0.0  ;;  %v3419_v50 = vmul.f32 0.2, %v2802_v44 }
 0x272   :  { %4827 = vst.msk [vmem:[%s8284_s2 + $0x170] sm:$0xf] %vm4734_vm3, %v5737_v45  ;;  %v3547_v51 = vsel %vm3035_vm2, %v2290_v43, %v3291_v47 }
 0x273   :  { %4955 = vst.msk [vmem:[%s8284_s2 + $0x370] sm:$0xf] %vm4734_vm3, %v5865_v46  ;;  %v5738_v52 = vpack.c.bf16 %v3547_v51, %v3547_v51  ;;  %v3675_v53 = vsel %vm3163_vm4, %v2802_v44, %v3419_v50 }
 0x274   :  { %v5866_v54 = vpack.c.bf16 %v3675_v53, %v3675_v53  ;;  %v2295_v55 = vpop.f32.mrb[188].mxu0  ;;  %v2807_v56 = vpop.f32.mrb[188].mxu1 }
 0x275   :  { %4828 = vst.msk [vmem:[%s8284_s2 + $0x174] sm:$0xf] %vm4734_vm3, %v5738_v52  ;;  %vm3036_vm5 = vcmp.gt.f32.partialorder %v2295_v55, 0.0  ;;  %v3292_v57 = vmul.f32 0.2, %v2295_v55  ;;  %vm3164_vm6 = vcmp.gt.f32.partialorder %v2807_v56, 0.0 }
 0x276   :  { %v3420_v58 = vmul.f32 0.2, %v2807_v56  ;;  %4956 = vst.msk [vmem:[%s8284_s2 + $0x374] sm:$0xf] %vm4734_vm3, %v5866_v54  ;;  %v2297_v59 = vpop.f32.mrb[189].mxu0  ;;  %v2809_v60 = vpop.f32.mrb[189].mxu1 }
 0x277   :  { %v3548_v61 = vsel %vm3036_vm5, %v2295_v55, %v3292_v57  ;;  %v2298_v63 = vpop.f32.mrb[190].mxu0  ;;  %v2810_v0 = vpop.f32.mrb[190].mxu1 }
 0x278   :  { %v3676_v62 = vsel %vm3164_vm6, %v2807_v56, %v3420_v58  ;;  %v5739_v1 = vpack.c.bf16 %v3548_v61, %v3548_v61  ;;  %vm3037_vm0 = vcmp.gt.f32.partialorder %v2298_v63, 0.0  ;;  %v3293_v3 = vmul.f32 0.2, %v2298_v63  ;;  %v2300_v4 = vpop.f32.mrb[191].mxu0  ;;  %v2812_v5 = vpop.f32.mrb[191].mxu1 }
 0x279   :  { %v5867_v2 = vpack.c.bf16 %v3676_v62, %v3676_v62  ;;  %vm3165_vm7 = vcmp.gt.f32.partialorder %v2810_v0, 0.0  ;;  %v3421_v6 = vmul.f32 0.2, %v2810_v0 }
 0x27a   :  { %4829 = vst.msk [vmem:[%s8284_s2 + $0x178] sm:$0xf] %vm4734_vm3, %v5739_v1  ;;  %v3549_v7 = vsel %vm3037_vm0, %v2298_v63, %v3293_v3 }
 0x27b   :  { %4957 = vst.msk [vmem:[%s8284_s2 + $0x378] sm:$0xf] %vm4734_vm3, %v5867_v2  ;;  %v5740_v8 = vpack.c.bf16 %v3549_v7, %v3549_v7  ;;  %v3677_v9 = vsel %vm3165_vm7, %v2810_v0, %v3421_v6 }
 0x27c   :  { %v5868_v10 = vpack.c.bf16 %v3677_v9, %v3677_v9  ;;  %v2303_v11 = vpop.f32.mrb[192].mxu0  ;;  %v2815_v12 = vpop.f32.mrb[192].mxu1 }
 0x27d   :  { %4830 = vst.msk [vmem:[%s8284_s2 + $0x17c] sm:$0xf] %vm4734_vm3, %v5740_v8  ;;  %vm3038_vm8 = vcmp.gt.f32.partialorder %v2303_v11, 0.0  ;;  %v3294_v13 = vmul.f32 0.2, %v2303_v11  ;;  %vm3166_vm9 = vcmp.gt.f32.partialorder %v2815_v12, 0.0 }
 0x27e   :  { %v3422_v14 = vmul.f32 0.2, %v2815_v12  ;;  %4958 = vst.msk [vmem:[%s8284_s2 + $0x37c] sm:$0xf] %vm4734_vm3, %v5868_v10  ;;  %v2305_v15 = vpop.f32.mrb[193].mxu0  ;;  %v2817_v16 = vpop.f32.mrb[193].mxu1 }
 0x27f   :  { %v3550_v17 = vsel %vm3038_vm8, %v2303_v11, %v3294_v13  ;;  %v2306_v19 = vpop.f32.mrb[194].mxu0  ;;  %v2818_v20 = vpop.f32.mrb[194].mxu1 }
 0x280   :  { %v3678_v18 = vsel %vm3166_vm9, %v2815_v12, %v3422_v14  ;;  %v5741_v21 = vpack.c.bf16 %v3550_v17, %v3550_v17  ;;  %vm3039_vm10 = vcmp.gt.f32.partialorder %v2306_v19, 0.0  ;;  %v3295_v23 = vmul.f32 0.2, %v2306_v19  ;;  %v2308_v24 = vpop.f32.mrb[195].mxu0  ;;  %v2820_v25 = vpop.f32.mrb[195].mxu1 }
 0x281   :  { %v5869_v22 = vpack.c.bf16 %v3678_v18, %v3678_v18  ;;  %vm3167_vm11 = vcmp.gt.f32.partialorder %v2818_v20, 0.0  ;;  %v3423_v26 = vmul.f32 0.2, %v2818_v20 }
 0x282   :  { %4831 = vst.msk [vmem:[%s8284_s2 + $0x180] sm:$0xf] %vm4734_vm3, %v5741_v21  ;;  %v3551_v27 = vsel %vm3039_vm10, %v2306_v19, %v3295_v23 }
 0x283   :  { %4959 = vst.msk [vmem:[%s8284_s2 + $0x380] sm:$0xf] %vm4734_vm3, %v5869_v22  ;;  %v5742_v28 = vpack.c.bf16 %v3551_v27, %v3551_v27  ;;  %v3679_v29 = vsel %vm3167_vm11, %v2818_v20, %v3423_v26 }
 0x284   :  { %v5870_v30 = vpack.c.bf16 %v3679_v29, %v3679_v29  ;;  %v2311_v31 = vpop.f32.mrb[196].mxu0  ;;  %v2823_v32 = vpop.f32.mrb[196].mxu1 }
 0x285   :  { %4832 = vst.msk [vmem:[%s8284_s2 + $0x184] sm:$0xf] %vm4734_vm3, %v5742_v28  ;;  %vm3040_vm12 = vcmp.gt.f32.partialorder %v2311_v31, 0.0  ;;  %v3296_v33 = vmul.f32 0.2, %v2311_v31  ;;  %vm3168_vm13 = vcmp.gt.f32.partialorder %v2823_v32, 0.0 }
 0x286   :  { %v3424_v34 = vmul.f32 0.2, %v2823_v32  ;;  %4960 = vst.msk [vmem:[%s8284_s2 + $0x384] sm:$0xf] %vm4734_vm3, %v5870_v30  ;;  %v2313_v35 = vpop.f32.mrb[197].mxu0  ;;  %v2825_v36 = vpop.f32.mrb[197].mxu1 }
 0x287   :  { %v3552_v37 = vsel %vm3040_vm12, %v2311_v31, %v3296_v33  ;;  %v2314_v39 = vpop.f32.mrb[198].mxu0  ;;  %v2826_v40 = vpop.f32.mrb[198].mxu1 }
 0x288   :  { %v3680_v38 = vsel %vm3168_vm13, %v2823_v32, %v3424_v34  ;;  %v5743_v41 = vpack.c.bf16 %v3552_v37, %v3552_v37  ;;  %vm3041_vm14 = vcmp.gt.f32.partialorder %v2314_v39, 0.0  ;;  %v3297_v43 = vmul.f32 0.2, %v2314_v39  ;;  %v2316_v44 = vpop.f32.mrb[199].mxu0  ;;  %v2828_v45 = vpop.f32.mrb[199].mxu1 }
 0x289   :  { %v5871_v42 = vpack.c.bf16 %v3680_v38, %v3680_v38  ;;  %vm3169_vm15 = vcmp.gt.f32.partialorder %v2826_v40, 0.0  ;;  %v3425_v46 = vmul.f32 0.2, %v2826_v40 }
 0x28a   :  { %4833 = vst.msk [vmem:[%s8284_s2 + $0x188] sm:$0xf] %vm4734_vm3, %v5743_v41  ;;  %v3553_v47 = vsel %vm3041_vm14, %v2314_v39, %v3297_v43 }
 0x28b   :  { %4961 = vst.msk [vmem:[%s8284_s2 + $0x388] sm:$0xf] %vm4734_vm3, %v5871_v42  ;;  %v5744_v48 = vpack.c.bf16 %v3553_v47, %v3553_v47  ;;  %v3681_v49 = vsel %vm3169_vm15, %v2826_v40, %v3425_v46 }
 0x28c   :  { %v5872_v50 = vpack.c.bf16 %v3681_v49, %v3681_v49  ;;  %v2319_v51 = vpop.f32.mrb[200].mxu0  ;;  %v2831_v52 = vpop.f32.mrb[200].mxu1 }
 0x28d   :  { %4834 = vst.msk [vmem:[%s8284_s2 + $0x18c] sm:$0xf] %vm4734_vm3, %v5744_v48  ;;  %vm3042_vm1 = vcmp.gt.f32.partialorder %v2319_v51, 0.0  ;;  %v3298_v53 = vmul.f32 0.2, %v2319_v51  ;;  %vm3170_vm2 = vcmp.gt.f32.partialorder %v2831_v52, 0.0 }
 0x28e   :  { %v3426_v54 = vmul.f32 0.2, %v2831_v52  ;;  %4962 = vst.msk [vmem:[%s8284_s2 + $0x38c] sm:$0xf] %vm4734_vm3, %v5872_v50  ;;  %v2321_v55 = vpop.f32.mrb[201].mxu0  ;;  %v2833_v56 = vpop.f32.mrb[201].mxu1 }
 0x28f   :  { %v3554_v57 = vsel %vm3042_vm1, %v2319_v51, %v3298_v53  ;;  %v2322_v59 = vpop.f32.mrb[202].mxu0  ;;  %v2834_v60 = vpop.f32.mrb[202].mxu1 }
 0x290   :  { %v3682_v58 = vsel %vm3170_vm2, %v2831_v52, %v3426_v54  ;;  %v5745_v61 = vpack.c.bf16 %v3554_v57, %v3554_v57  ;;  %vm3043_vm4 = vcmp.gt.f32.partialorder %v2322_v59, 0.0  ;;  %v3299_v63 = vmul.f32 0.2, %v2322_v59  ;;  %v2324_v0 = vpop.f32.mrb[203].mxu0  ;;  %v2836_v1 = vpop.f32.mrb[203].mxu1 }
 0x291   :  { %v5873_v62 = vpack.c.bf16 %v3682_v58, %v3682_v58  ;;  %vm3171_vm5 = vcmp.gt.f32.partialorder %v2834_v60, 0.0  ;;  %v3427_v2 = vmul.f32 0.2, %v2834_v60 }
 0x292   :  { %4835 = vst.msk [vmem:[%s8284_s2 + $0x190] sm:$0xf] %vm4734_vm3, %v5745_v61  ;;  %v3555_v3 = vsel %vm3043_vm4, %v2322_v59, %v3299_v63 }
 0x293   :  { %4963 = vst.msk [vmem:[%s8284_s2 + $0x390] sm:$0xf] %vm4734_vm3, %v5873_v62  ;;  %v5746_v4 = vpack.c.bf16 %v3555_v3, %v3555_v3  ;;  %v3683_v5 = vsel %vm3171_vm5, %v2834_v60, %v3427_v2 }
 0x294   :  { %v5874_v6 = vpack.c.bf16 %v3683_v5, %v3683_v5  ;;  %v2327_v7 = vpop.f32.mrb[204].mxu0  ;;  %v2839_v8 = vpop.f32.mrb[204].mxu1 }
 0x295   :  { %4836 = vst.msk [vmem:[%s8284_s2 + $0x194] sm:$0xf] %vm4734_vm3, %v5746_v4  ;;  %vm3044_vm6 = vcmp.gt.f32.partialorder %v2327_v7, 0.0  ;;  %v3300_v9 = vmul.f32 0.2, %v2327_v7  ;;  %vm3172_vm0 = vcmp.gt.f32.partialorder %v2839_v8, 0.0 }
 0x296   :  { %v3428_v10 = vmul.f32 0.2, %v2839_v8  ;;  %4964 = vst.msk [vmem:[%s8284_s2 + $0x394] sm:$0xf] %vm4734_vm3, %v5874_v6  ;;  %v2329_v11 = vpop.f32.mrb[205].mxu0  ;;  %v2841_v12 = vpop.f32.mrb[205].mxu1 }
 0x297   :  { %v3556_v13 = vsel %vm3044_vm6, %v2327_v7, %v3300_v9  ;;  %v2330_v15 = vpop.f32.mrb[206].mxu0  ;;  %v2842_v16 = vpop.f32.mrb[206].mxu1 }
 0x298   :  { %v3684_v14 = vsel %vm3172_vm0, %v2839_v8, %v3428_v10  ;;  %v5747_v17 = vpack.c.bf16 %v3556_v13, %v3556_v13  ;;  %vm3045_vm7 = vcmp.gt.f32.partialorder %v2330_v15, 0.0  ;;  %v3301_v19 = vmul.f32 0.2, %v2330_v15  ;;  %v2332_v20 = vpop.f32.mrb[207].mxu0  ;;  %v2844_v21 = vpop.f32.mrb[207].mxu1 }
 0x299   :  { %v5875_v18 = vpack.c.bf16 %v3684_v14, %v3684_v14  ;;  %vm3173_vm8 = vcmp.gt.f32.partialorder %v2842_v16, 0.0  ;;  %v3429_v22 = vmul.f32 0.2, %v2842_v16 }
 0x29a   :  { %4837 = vst.msk [vmem:[%s8284_s2 + $0x198] sm:$0xf] %vm4734_vm3, %v5747_v17  ;;  %v3557_v23 = vsel %vm3045_vm7, %v2330_v15, %v3301_v19 }
 0x29b   :  { %4965 = vst.msk [vmem:[%s8284_s2 + $0x398] sm:$0xf] %vm4734_vm3, %v5875_v18  ;;  %v5748_v24 = vpack.c.bf16 %v3557_v23, %v3557_v23  ;;  %v3685_v25 = vsel %vm3173_vm8, %v2842_v16, %v3429_v22 }
 0x29c   :  { %v5876_v26 = vpack.c.bf16 %v3685_v25, %v3685_v25  ;;  %v2335_v27 = vpop.f32.mrb[208].mxu0  ;;  %v2847_v28 = vpop.f32.mrb[208].mxu1 }
 0x29d   :  { %4838 = vst.msk [vmem:[%s8284_s2 + $0x19c] sm:$0xf] %vm4734_vm3, %v5748_v24  ;;  %vm3046_vm9 = vcmp.gt.f32.partialorder %v2335_v27, 0.0  ;;  %v3302_v29 = vmul.f32 0.2, %v2335_v27  ;;  %vm3174_vm10 = vcmp.gt.f32.partialorder %v2847_v28, 0.0 }
 0x29e   :  { %v3430_v30 = vmul.f32 0.2, %v2847_v28  ;;  %4966 = vst.msk [vmem:[%s8284_s2 + $0x39c] sm:$0xf] %vm4734_vm3, %v5876_v26  ;;  %v2337_v31 = vpop.f32.mrb[209].mxu0  ;;  %v2849_v32 = vpop.f32.mrb[209].mxu1 }
 0x29f   :  { %v3558_v33 = vsel %vm3046_vm9, %v2335_v27, %v3302_v29  ;;  %v2338_v35 = vpop.f32.mrb[210].mxu0  ;;  %v2850_v36 = vpop.f32.mrb[210].mxu1 }
 0x2a0   :  { %v3686_v34 = vsel %vm3174_vm10, %v2847_v28, %v3430_v30  ;;  %v5749_v37 = vpack.c.bf16 %v3558_v33, %v3558_v33  ;;  %vm3047_vm11 = vcmp.gt.f32.partialorder %v2338_v35, 0.0  ;;  %v3303_v39 = vmul.f32 0.2, %v2338_v35  ;;  %v2340_v40 = vpop.f32.mrb[211].mxu0  ;;  %v2852_v41 = vpop.f32.mrb[211].mxu1 }
 0x2a1   :  { %v5877_v38 = vpack.c.bf16 %v3686_v34, %v3686_v34  ;;  %vm3175_vm12 = vcmp.gt.f32.partialorder %v2850_v36, 0.0  ;;  %v3431_v42 = vmul.f32 0.2, %v2850_v36 }
 0x2a2   :  { %4839 = vst.msk [vmem:[%s8284_s2 + $0x1a0] sm:$0xf] %vm4734_vm3, %v5749_v37  ;;  %v3559_v43 = vsel %vm3047_vm11, %v2338_v35, %v3303_v39 }
 0x2a3   :  { %4967 = vst.msk [vmem:[%s8284_s2 + $0x3a0] sm:$0xf] %vm4734_vm3, %v5877_v38  ;;  %v5750_v44 = vpack.c.bf16 %v3559_v43, %v3559_v43  ;;  %v3687_v45 = vsel %vm3175_vm12, %v2850_v36, %v3431_v42 }
 0x2a4   :  { %v5878_v46 = vpack.c.bf16 %v3687_v45, %v3687_v45  ;;  %v2343_v47 = vpop.f32.mrb[212].mxu0  ;;  %v2855_v48 = vpop.f32.mrb[212].mxu1 }
 0x2a5   :  { %4840 = vst.msk [vmem:[%s8284_s2 + $0x1a4] sm:$0xf] %vm4734_vm3, %v5750_v44  ;;  %vm3048_vm13 = vcmp.gt.f32.partialorder %v2343_v47, 0.0  ;;  %v3304_v49 = vmul.f32 0.2, %v2343_v47  ;;  %vm3176_vm14 = vcmp.gt.f32.partialorder %v2855_v48, 0.0 }
 0x2a6   :  { %v3432_v50 = vmul.f32 0.2, %v2855_v48  ;;  %4968 = vst.msk [vmem:[%s8284_s2 + $0x3a4] sm:$0xf] %vm4734_vm3, %v5878_v46  ;;  %v2345_v51 = vpop.f32.mrb[213].mxu0  ;;  %v2857_v52 = vpop.f32.mrb[213].mxu1 }
 0x2a7   :  { %v3560_v53 = vsel %vm3048_vm13, %v2343_v47, %v3304_v49  ;;  %v2346_v55 = vpop.f32.mrb[214].mxu0  ;;  %v2858_v56 = vpop.f32.mrb[214].mxu1 }
 0x2a8   :  { %v3688_v54 = vsel %vm3176_vm14, %v2855_v48, %v3432_v50  ;;  %v5751_v57 = vpack.c.bf16 %v3560_v53, %v3560_v53  ;;  %vm3049_vm15 = vcmp.gt.f32.partialorder %v2346_v55, 0.0  ;;  %v3305_v59 = vmul.f32 0.2, %v2346_v55  ;;  %v2348_v60 = vpop.f32.mrb[215].mxu0  ;;  %v2860_v61 = vpop.f32.mrb[215].mxu1 }
 0x2a9   :  { %v5879_v58 = vpack.c.bf16 %v3688_v54, %v3688_v54  ;;  %vm3177_vm1 = vcmp.gt.f32.partialorder %v2858_v56, 0.0  ;;  %v3433_v62 = vmul.f32 0.2, %v2858_v56 }
 0x2aa   :  { %4841 = vst.msk [vmem:[%s8284_s2 + $0x1a8] sm:$0xf] %vm4734_vm3, %v5751_v57  ;;  %v3561_v63 = vsel %vm3049_vm15, %v2346_v55, %v3305_v59 }
 0x2ab   :  { %4969 = vst.msk [vmem:[%s8284_s2 + $0x3a8] sm:$0xf] %vm4734_vm3, %v5879_v58  ;;  %v5752_v0 = vpack.c.bf16 %v3561_v63, %v3561_v63  ;;  %v3689_v1 = vsel %vm3177_vm1, %v2858_v56, %v3433_v62 }
 0x2ac   :  { %v5880_v2 = vpack.c.bf16 %v3689_v1, %v3689_v1  ;;  %v2351_v3 = vpop.f32.mrb[216].mxu0  ;;  %v2863_v4 = vpop.f32.mrb[216].mxu1 }
 0x2ad   :  { %4842 = vst.msk [vmem:[%s8284_s2 + $0x1ac] sm:$0xf] %vm4734_vm3, %v5752_v0  ;;  %vm3050_vm2 = vcmp.gt.f32.partialorder %v2351_v3, 0.0  ;;  %v3306_v5 = vmul.f32 0.2, %v2351_v3  ;;  %vm3178_vm4 = vcmp.gt.f32.partialorder %v2863_v4, 0.0 }
 0x2ae   :  { %v3434_v6 = vmul.f32 0.2, %v2863_v4  ;;  %4970 = vst.msk [vmem:[%s8284_s2 + $0x3ac] sm:$0xf] %vm4734_vm3, %v5880_v2  ;;  %v2353_v7 = vpop.f32.mrb[217].mxu0  ;;  %v2865_v8 = vpop.f32.mrb[217].mxu1 }
 0x2af   :  { %v3562_v9 = vsel %vm3050_vm2, %v2351_v3, %v3306_v5  ;;  %v2354_v11 = vpop.f32.mrb[218].mxu0  ;;  %v2866_v12 = vpop.f32.mrb[218].mxu1 }
 0x2b0   :  { %v3690_v10 = vsel %vm3178_vm4, %v2863_v4, %v3434_v6  ;;  %v5753_v13 = vpack.c.bf16 %v3562_v9, %v3562_v9  ;;  %vm3051_vm5 = vcmp.gt.f32.partialorder %v2354_v11, 0.0  ;;  %v3307_v15 = vmul.f32 0.2, %v2354_v11  ;;  %v2356_v16 = vpop.f32.mrb[219].mxu0  ;;  %v2868_v17 = vpop.f32.mrb[219].mxu1 }
 0x2b1   :  { %v5881_v14 = vpack.c.bf16 %v3690_v10, %v3690_v10  ;;  %vm3179_vm6 = vcmp.gt.f32.partialorder %v2866_v12, 0.0  ;;  %v3435_v18 = vmul.f32 0.2, %v2866_v12 }
 0x2b2   :  { %4843 = vst.msk [vmem:[%s8284_s2 + $0x1b0] sm:$0xf] %vm4734_vm3, %v5753_v13  ;;  %v3563_v19 = vsel %vm3051_vm5, %v2354_v11, %v3307_v15 }
 0x2b3   :  { %4971 = vst.msk [vmem:[%s8284_s2 + $0x3b0] sm:$0xf] %vm4734_vm3, %v5881_v14  ;;  %v5754_v20 = vpack.c.bf16 %v3563_v19, %v3563_v19  ;;  %v3691_v21 = vsel %vm3179_vm6, %v2866_v12, %v3435_v18 }
 0x2b4   :  { %v5882_v22 = vpack.c.bf16 %v3691_v21, %v3691_v21  ;;  %v2359_v23 = vpop.f32.mrb[220].mxu0  ;;  %v2871_v24 = vpop.f32.mrb[220].mxu1 }
 0x2b5   :  { %4844 = vst.msk [vmem:[%s8284_s2 + $0x1b4] sm:$0xf] %vm4734_vm3, %v5754_v20  ;;  %vm3052_vm0 = vcmp.gt.f32.partialorder %v2359_v23, 0.0  ;;  %v3308_v25 = vmul.f32 0.2, %v2359_v23  ;;  %vm3180_vm7 = vcmp.gt.f32.partialorder %v2871_v24, 0.0 }
 0x2b6   :  { %v3436_v26 = vmul.f32 0.2, %v2871_v24  ;;  %4972 = vst.msk [vmem:[%s8284_s2 + $0x3b4] sm:$0xf] %vm4734_vm3, %v5882_v22  ;;  %v2361_v27 = vpop.f32.mrb[221].mxu0  ;;  %v2873_v28 = vpop.f32.mrb[221].mxu1 }
 0x2b7   :  { %v3564_v29 = vsel %vm3052_vm0, %v2359_v23, %v3308_v25  ;;  %v2362_v31 = vpop.f32.mrb[222].mxu0  ;;  %v2874_v32 = vpop.f32.mrb[222].mxu1 }
 0x2b8   :  { %v3692_v30 = vsel %vm3180_vm7, %v2871_v24, %v3436_v26  ;;  %v5755_v33 = vpack.c.bf16 %v3564_v29, %v3564_v29  ;;  %vm3053_vm8 = vcmp.gt.f32.partialorder %v2362_v31, 0.0  ;;  %v3309_v35 = vmul.f32 0.2, %v2362_v31  ;;  %v2364_v36 = vpop.f32.mrb[223].mxu0  ;;  %v2876_v37 = vpop.f32.mrb[223].mxu1 }
 0x2b9   :  { %v5883_v34 = vpack.c.bf16 %v3692_v30, %v3692_v30  ;;  %vm3181_vm9 = vcmp.gt.f32.partialorder %v2874_v32, 0.0  ;;  %v3437_v38 = vmul.f32 0.2, %v2874_v32 }
 0x2ba   :  { %4845 = vst.msk [vmem:[%s8284_s2 + $0x1b8] sm:$0xf] %vm4734_vm3, %v5755_v33  ;;  %v3565_v39 = vsel %vm3053_vm8, %v2362_v31, %v3309_v35 }
 0x2bb   :  { %4973 = vst.msk [vmem:[%s8284_s2 + $0x3b8] sm:$0xf] %vm4734_vm3, %v5883_v34  ;;  %v5756_v40 = vpack.c.bf16 %v3565_v39, %v3565_v39  ;;  %v3693_v41 = vsel %vm3181_vm9, %v2874_v32, %v3437_v38 }
 0x2bc   :  { %v5884_v42 = vpack.c.bf16 %v3693_v41, %v3693_v41  ;;  %v2367_v43 = vpop.f32.mrb[224].mxu0  ;;  %v2879_v44 = vpop.f32.mrb[224].mxu1 }
 0x2bd   :  { %4846 = vst.msk [vmem:[%s8284_s2 + $0x1bc] sm:$0xf] %vm4734_vm3, %v5756_v40  ;;  %vm3054_vm10 = vcmp.gt.f32.partialorder %v2367_v43, 0.0  ;;  %v3310_v45 = vmul.f32 0.2, %v2367_v43  ;;  %vm3182_vm11 = vcmp.gt.f32.partialorder %v2879_v44, 0.0 }
 0x2be   :  { %v3438_v46 = vmul.f32 0.2, %v2879_v44  ;;  %4974 = vst.msk [vmem:[%s8284_s2 + $0x3bc] sm:$0xf] %vm4734_vm3, %v5884_v42  ;;  %v2369_v47 = vpop.f32.mrb[225].mxu0  ;;  %v2881_v48 = vpop.f32.mrb[225].mxu1 }
 0x2bf   :  { %v3566_v49 = vsel %vm3054_vm10, %v2367_v43, %v3310_v45  ;;  %v2370_v51 = vpop.f32.mrb[226].mxu0  ;;  %v2882_v52 = vpop.f32.mrb[226].mxu1 }
 0x2c0   :  { %v3694_v50 = vsel %vm3182_vm11, %v2879_v44, %v3438_v46  ;;  %v5757_v53 = vpack.c.bf16 %v3566_v49, %v3566_v49  ;;  %vm3055_vm12 = vcmp.gt.f32.partialorder %v2370_v51, 0.0  ;;  %v3311_v55 = vmul.f32 0.2, %v2370_v51  ;;  %v2372_v56 = vpop.f32.mrb[227].mxu0  ;;  %v2884_v57 = vpop.f32.mrb[227].mxu1 }
 0x2c1   :  { %v5885_v54 = vpack.c.bf16 %v3694_v50, %v3694_v50  ;;  %vm3183_vm13 = vcmp.gt.f32.partialorder %v2882_v52, 0.0  ;;  %v3439_v58 = vmul.f32 0.2, %v2882_v52 }
 0x2c2   :  { %4847 = vst.msk [vmem:[%s8284_s2 + $0x1c0] sm:$0xf] %vm4734_vm3, %v5757_v53  ;;  %v3567_v59 = vsel %vm3055_vm12, %v2370_v51, %v3311_v55 }
 0x2c3   :  { %4975 = vst.msk [vmem:[%s8284_s2 + $0x3c0] sm:$0xf] %vm4734_vm3, %v5885_v54  ;;  %v5758_v60 = vpack.c.bf16 %v3567_v59, %v3567_v59  ;;  %v3695_v61 = vsel %vm3183_vm13, %v2882_v52, %v3439_v58 }
 0x2c4   :  { %v5886_v62 = vpack.c.bf16 %v3695_v61, %v3695_v61  ;;  %v2375_v63 = vpop.f32.mrb[228].mxu0  ;;  %v2887_v0 = vpop.f32.mrb[228].mxu1 }
 0x2c5   :  { %4848 = vst.msk [vmem:[%s8284_s2 + $0x1c4] sm:$0xf] %vm4734_vm3, %v5758_v60  ;;  %vm3056_vm14 = vcmp.gt.f32.partialorder %v2375_v63, 0.0  ;;  %v3312_v1 = vmul.f32 0.2, %v2375_v63  ;;  %vm3184_vm15 = vcmp.gt.f32.partialorder %v2887_v0, 0.0 }
 0x2c6   :  { %v3440_v2 = vmul.f32 0.2, %v2887_v0  ;;  %4976 = vst.msk [vmem:[%s8284_s2 + $0x3c4] sm:$0xf] %vm4734_vm3, %v5886_v62  ;;  %v2377_v3 = vpop.f32.mrb[229].mxu0  ;;  %v2889_v4 = vpop.f32.mrb[229].mxu1 }
 0x2c7   :  { %v3568_v5 = vsel %vm3056_vm14, %v2375_v63, %v3312_v1  ;;  %v2378_v7 = vpop.f32.mrb[230].mxu0  ;;  %v2890_v8 = vpop.f32.mrb[230].mxu1 }
 0x2c8   :  { %v3696_v6 = vsel %vm3184_vm15, %v2887_v0, %v3440_v2  ;;  %v5759_v9 = vpack.c.bf16 %v3568_v5, %v3568_v5  ;;  %vm3057_vm1 = vcmp.gt.f32.partialorder %v2378_v7, 0.0  ;;  %v3313_v11 = vmul.f32 0.2, %v2378_v7  ;;  %v2380_v12 = vpop.f32.mrb[231].mxu0  ;;  %v2892_v13 = vpop.f32.mrb[231].mxu1 }
 0x2c9   :  { %v5887_v10 = vpack.c.bf16 %v3696_v6, %v3696_v6  ;;  %vm3185_vm2 = vcmp.gt.f32.partialorder %v2890_v8, 0.0  ;;  %v3441_v14 = vmul.f32 0.2, %v2890_v8 }
 0x2ca   :  { %4849 = vst.msk [vmem:[%s8284_s2 + $0x1c8] sm:$0xf] %vm4734_vm3, %v5759_v9  ;;  %v3569_v15 = vsel %vm3057_vm1, %v2378_v7, %v3313_v11 }
 0x2cb   :  { %4977 = vst.msk [vmem:[%s8284_s2 + $0x3c8] sm:$0xf] %vm4734_vm3, %v5887_v10  ;;  %v5760_v16 = vpack.c.bf16 %v3569_v15, %v3569_v15  ;;  %v3697_v17 = vsel %vm3185_vm2, %v2890_v8, %v3441_v14 }
 0x2cc   :  { %v5888_v18 = vpack.c.bf16 %v3697_v17, %v3697_v17  ;;  %v2383_v19 = vpop.f32.mrb[232].mxu0  ;;  %v2895_v20 = vpop.f32.mrb[232].mxu1 }
 0x2cd   :  { %4850 = vst.msk [vmem:[%s8284_s2 + $0x1cc] sm:$0xf] %vm4734_vm3, %v5760_v16  ;;  %vm3058_vm4 = vcmp.gt.f32.partialorder %v2383_v19, 0.0  ;;  %v3314_v21 = vmul.f32 0.2, %v2383_v19  ;;  %vm3186_vm5 = vcmp.gt.f32.partialorder %v2895_v20, 0.0 }
 0x2ce   :  { %v3442_v22 = vmul.f32 0.2, %v2895_v20  ;;  %4978 = vst.msk [vmem:[%s8284_s2 + $0x3cc] sm:$0xf] %vm4734_vm3, %v5888_v18  ;;  %v2385_v23 = vpop.f32.mrb[233].mxu0  ;;  %v2897_v24 = vpop.f32.mrb[233].mxu1 }
 0x2cf   :  { %v3570_v25 = vsel %vm3058_vm4, %v2383_v19, %v3314_v21  ;;  %v2386_v27 = vpop.f32.mrb[234].mxu0  ;;  %v2898_v28 = vpop.f32.mrb[234].mxu1 }
 0x2d0   :  { %v3698_v26 = vsel %vm3186_vm5, %v2895_v20, %v3442_v22  ;;  %v5761_v29 = vpack.c.bf16 %v3570_v25, %v3570_v25  ;;  %vm3059_vm6 = vcmp.gt.f32.partialorder %v2386_v27, 0.0  ;;  %v3315_v31 = vmul.f32 0.2, %v2386_v27  ;;  %v2388_v32 = vpop.f32.mrb[235].mxu0  ;;  %v2900_v33 = vpop.f32.mrb[235].mxu1 }
 0x2d1   :  { %v5889_v30 = vpack.c.bf16 %v3698_v26, %v3698_v26  ;;  %vm3187_vm0 = vcmp.gt.f32.partialorder %v2898_v28, 0.0  ;;  %v3443_v34 = vmul.f32 0.2, %v2898_v28 }
 0x2d2   :  { %4851 = vst.msk [vmem:[%s8284_s2 + $0x1d0] sm:$0xf] %vm4734_vm3, %v5761_v29  ;;  %v3571_v35 = vsel %vm3059_vm6, %v2386_v27, %v3315_v31 }
 0x2d3   :  { %4979 = vst.msk [vmem:[%s8284_s2 + $0x3d0] sm:$0xf] %vm4734_vm3, %v5889_v30  ;;  %v5762_v36 = vpack.c.bf16 %v3571_v35, %v3571_v35  ;;  %v3699_v37 = vsel %vm3187_vm0, %v2898_v28, %v3443_v34 }
 0x2d4   :  { %v5890_v38 = vpack.c.bf16 %v3699_v37, %v3699_v37  ;;  %v2391_v39 = vpop.f32.mrb[236].mxu0  ;;  %v2903_v40 = vpop.f32.mrb[236].mxu1 }
 0x2d5   :  { %4852 = vst.msk [vmem:[%s8284_s2 + $0x1d4] sm:$0xf] %vm4734_vm3, %v5762_v36  ;;  %vm3060_vm7 = vcmp.gt.f32.partialorder %v2391_v39, 0.0  ;;  %v3316_v41 = vmul.f32 0.2, %v2391_v39  ;;  %vm3188_vm8 = vcmp.gt.f32.partialorder %v2903_v40, 0.0 }
 0x2d6   :  { %v3444_v42 = vmul.f32 0.2, %v2903_v40  ;;  %4980 = vst.msk [vmem:[%s8284_s2 + $0x3d4] sm:$0xf] %vm4734_vm3, %v5890_v38  ;;  %v2393_v43 = vpop.f32.mrb[237].mxu0  ;;  %v2905_v44 = vpop.f32.mrb[237].mxu1 }
 0x2d7   :  { %v3572_v45 = vsel %vm3060_vm7, %v2391_v39, %v3316_v41  ;;  %v2394_v47 = vpop.f32.mrb[238].mxu0  ;;  %v2906_v48 = vpop.f32.mrb[238].mxu1 }
 0x2d8   :  { %v3700_v46 = vsel %vm3188_vm8, %v2903_v40, %v3444_v42  ;;  %v5763_v49 = vpack.c.bf16 %v3572_v45, %v3572_v45  ;;  %vm3061_vm9 = vcmp.gt.f32.partialorder %v2394_v47, 0.0  ;;  %v3317_v51 = vmul.f32 0.2, %v2394_v47  ;;  %v2396_v52 = vpop.f32.mrb[239].mxu0  ;;  %v2908_v53 = vpop.f32.mrb[239].mxu1 }
 0x2d9   :  { %v5891_v50 = vpack.c.bf16 %v3700_v46, %v3700_v46  ;;  %vm3189_vm10 = vcmp.gt.f32.partialorder %v2906_v48, 0.0  ;;  %v3445_v54 = vmul.f32 0.2, %v2906_v48 }
 0x2da   :  { %4853 = vst.msk [vmem:[%s8284_s2 + $0x1d8] sm:$0xf] %vm4734_vm3, %v5763_v49  ;;  %v3573_v55 = vsel %vm3061_vm9, %v2394_v47, %v3317_v51 }
 0x2db   :  { %4981 = vst.msk [vmem:[%s8284_s2 + $0x3d8] sm:$0xf] %vm4734_vm3, %v5891_v50  ;;  %v5764_v56 = vpack.c.bf16 %v3573_v55, %v3573_v55  ;;  %v3701_v57 = vsel %vm3189_vm10, %v2906_v48, %v3445_v54 }
 0x2dc   :  { %v5892_v58 = vpack.c.bf16 %v3701_v57, %v3701_v57  ;;  %v2399_v59 = vpop.f32.mrb[240].mxu0  ;;  %v2911_v60 = vpop.f32.mrb[240].mxu1 }
 0x2dd   :  { %4854 = vst.msk [vmem:[%s8284_s2 + $0x1dc] sm:$0xf] %vm4734_vm3, %v5764_v56  ;;  %vm3062_vm11 = vcmp.gt.f32.partialorder %v2399_v59, 0.0  ;;  %v3318_v61 = vmul.f32 0.2, %v2399_v59  ;;  %vm3190_vm12 = vcmp.gt.f32.partialorder %v2911_v60, 0.0 }
 0x2de   :  { %v3446_v62 = vmul.f32 0.2, %v2911_v60  ;;  %4982 = vst.msk [vmem:[%s8284_s2 + $0x3dc] sm:$0xf] %vm4734_vm3, %v5892_v58  ;;  %v2401_v63 = vpop.f32.mrb[241].mxu0  ;;  %v2913_v0 = vpop.f32.mrb[241].mxu1 }
 0x2df   :  { %v3574_v1 = vsel %vm3062_vm11, %v2399_v59, %v3318_v61  ;;  %v2402_v3 = vpop.f32.mrb[242].mxu0  ;;  %v2914_v4 = vpop.f32.mrb[242].mxu1 }
 0x2e0   :  { %v3702_v2 = vsel %vm3190_vm12, %v2911_v60, %v3446_v62  ;;  %v5765_v5 = vpack.c.bf16 %v3574_v1, %v3574_v1  ;;  %vm3063_vm13 = vcmp.gt.f32.partialorder %v2402_v3, 0.0  ;;  %v3319_v7 = vmul.f32 0.2, %v2402_v3  ;;  %v2404_v8 = vpop.f32.mrb[243].mxu0  ;;  %v2916_v9 = vpop.f32.mrb[243].mxu1 }
 0x2e1   :  { %v5893_v6 = vpack.c.bf16 %v3702_v2, %v3702_v2  ;;  %vm3191_vm14 = vcmp.gt.f32.partialorder %v2914_v4, 0.0  ;;  %v3447_v10 = vmul.f32 0.2, %v2914_v4 }
 0x2e2   :  { %4855 = vst.msk [vmem:[%s8284_s2 + $0x1e0] sm:$0xf] %vm4734_vm3, %v5765_v5  ;;  %v3575_v11 = vsel %vm3063_vm13, %v2402_v3, %v3319_v7 }
 0x2e3   :  { %4983 = vst.msk [vmem:[%s8284_s2 + $0x3e0] sm:$0xf] %vm4734_vm3, %v5893_v6  ;;  %v5766_v12 = vpack.c.bf16 %v3575_v11, %v3575_v11  ;;  %v3703_v13 = vsel %vm3191_vm14, %v2914_v4, %v3447_v10 }
 0x2e4   :  { %v5894_v14 = vpack.c.bf16 %v3703_v13, %v3703_v13  ;;  %v2407_v15 = vpop.f32.mrb[244].mxu0  ;;  %v2919_v16 = vpop.f32.mrb[244].mxu1 }
 0x2e5   :  { %4856 = vst.msk [vmem:[%s8284_s2 + $0x1e4] sm:$0xf] %vm4734_vm3, %v5766_v12  ;;  %vm3064_vm15 = vcmp.gt.f32.partialorder %v2407_v15, 0.0  ;;  %v3320_v17 = vmul.f32 0.2, %v2407_v15  ;;  %vm3192_vm1 = vcmp.gt.f32.partialorder %v2919_v16, 0.0 }
 0x2e6   :  { %v3448_v18 = vmul.f32 0.2, %v2919_v16  ;;  %4984 = vst.msk [vmem:[%s8284_s2 + $0x3e4] sm:$0xf] %vm4734_vm3, %v5894_v14  ;;  %v2409_v19 = vpop.f32.mrb[245].mxu0  ;;  %v2921_v20 = vpop.f32.mrb[245].mxu1 }
 0x2e7   :  { %v3576_v21 = vsel %vm3064_vm15, %v2407_v15, %v3320_v17  ;;  %v2410_v23 = vpop.f32.mrb[246].mxu0  ;;  %v2922_v24 = vpop.f32.mrb[246].mxu1 }
 0x2e8   :  { %v3704_v22 = vsel %vm3192_vm1, %v2919_v16, %v3448_v18  ;;  %v5767_v25 = vpack.c.bf16 %v3576_v21, %v3576_v21  ;;  %vm3065_vm2 = vcmp.gt.f32.partialorder %v2410_v23, 0.0  ;;  %v3321_v27 = vmul.f32 0.2, %v2410_v23  ;;  %v2412_v28 = vpop.f32.mrb[247].mxu0  ;;  %v2924_v29 = vpop.f32.mrb[247].mxu1 }
 0x2e9   :  { %v5895_v26 = vpack.c.bf16 %v3704_v22, %v3704_v22  ;;  %vm3193_vm4 = vcmp.gt.f32.partialorder %v2922_v24, 0.0  ;;  %v3449_v30 = vmul.f32 0.2, %v2922_v24 }
 0x2ea   :  { %4857 = vst.msk [vmem:[%s8284_s2 + $0x1e8] sm:$0xf] %vm4734_vm3, %v5767_v25  ;;  %v3577_v31 = vsel %vm3065_vm2, %v2410_v23, %v3321_v27 }
 0x2eb   :  { %4985 = vst.msk [vmem:[%s8284_s2 + $0x3e8] sm:$0xf] %vm4734_vm3, %v5895_v26  ;;  %v5768_v32 = vpack.c.bf16 %v3577_v31, %v3577_v31  ;;  %v3705_v33 = vsel %vm3193_vm4, %v2922_v24, %v3449_v30 }
 0x2ec   :  { %v5896_v34 = vpack.c.bf16 %v3705_v33, %v3705_v33  ;;  %v2415_v35 = vpop.f32.mrb[248].mxu0  ;;  %v2927_v36 = vpop.f32.mrb[248].mxu1 }
 0x2ed   :  { %4858 = vst.msk [vmem:[%s8284_s2 + $0x1ec] sm:$0xf] %vm4734_vm3, %v5768_v32  ;;  %vm3066_vm5 = vcmp.gt.f32.partialorder %v2415_v35, 0.0  ;;  %v3322_v37 = vmul.f32 0.2, %v2415_v35  ;;  %vm3194_vm6 = vcmp.gt.f32.partialorder %v2927_v36, 0.0 }
 0x2ee   :  { %v3450_v38 = vmul.f32 0.2, %v2927_v36  ;;  %4986 = vst.msk [vmem:[%s8284_s2 + $0x3ec] sm:$0xf] %vm4734_vm3, %v5896_v34  ;;  %v2417_v39 = vpop.f32.mrb[249].mxu0  ;;  %v2929_v40 = vpop.f32.mrb[249].mxu1 }
 0x2ef   :  { %v3578_v41 = vsel %vm3066_vm5, %v2415_v35, %v3322_v37  ;;  %v2418_v43 = vpop.f32.mrb[250].mxu0  ;;  %v2930_v44 = vpop.f32.mrb[250].mxu1 }
 0x2f0   :  { %v3706_v42 = vsel %vm3194_vm6, %v2927_v36, %v3450_v38  ;;  %v5769_v45 = vpack.c.bf16 %v3578_v41, %v3578_v41  ;;  %vm3067_vm0 = vcmp.gt.f32.partialorder %v2418_v43, 0.0  ;;  %v3323_v47 = vmul.f32 0.2, %v2418_v43  ;;  %v2420_v48 = vpop.f32.mrb[251].mxu0  ;;  %v2932_v49 = vpop.f32.mrb[251].mxu1 }
 0x2f1   :  { %v5897_v46 = vpack.c.bf16 %v3706_v42, %v3706_v42  ;;  %vm3195_vm7 = vcmp.gt.f32.partialorder %v2930_v44, 0.0  ;;  %v3451_v50 = vmul.f32 0.2, %v2930_v44 }
 0x2f2   :  { %4859 = vst.msk [vmem:[%s8284_s2 + $0x1f0] sm:$0xf] %vm4734_vm3, %v5769_v45  ;;  %v3579_v51 = vsel %vm3067_vm0, %v2418_v43, %v3323_v47 }
 0x2f3   :  { %4987 = vst.msk [vmem:[%s8284_s2 + $0x3f0] sm:$0xf] %vm4734_vm3, %v5897_v46  ;;  %v5770_v52 = vpack.c.bf16 %v3579_v51, %v3579_v51  ;;  %v3707_v53 = vsel %vm3195_vm7, %v2930_v44, %v3451_v50 }
 0x2f4   :  { %v5898_v54 = vpack.c.bf16 %v3707_v53, %v3707_v53  ;;  %v2423_v55 = vpop.f32.mrb[252].mxu0  ;;  %v2935_v56 = vpop.f32.mrb[252].mxu1 }
 0x2f5   :  { %4860 = vst.msk [vmem:[%s8284_s2 + $0x1f4] sm:$0xf] %vm4734_vm3, %v5770_v52  ;;  %vm3068_vm8 = vcmp.gt.f32.partialorder %v2423_v55, 0.0  ;;  %v3324_v57 = vmul.f32 0.2, %v2423_v55  ;;  %vm3196_vm9 = vcmp.gt.f32.partialorder %v2935_v56, 0.0 }
 0x2f6   :  { %v3452_v58 = vmul.f32 0.2, %v2935_v56  ;;  %4988 = vst.msk [vmem:[%s8284_s2 + $0x3f4] sm:$0xf] %vm4734_vm3, %v5898_v54  ;;  %v2425_v59 = vpop.f32.mrb[253].mxu0  ;;  %v2937_v60 = vpop.f32.mrb[253].mxu1 }
 0x2f7   :  { %v3580_v61 = vsel %vm3068_vm8, %v2423_v55, %v3324_v57  ;;  %v2426_v63 = vpop.f32.mrb[254].mxu0  ;;  %v2938_v0 = vpop.f32.mrb[254].mxu1 }
 0x2f8   :  { %v3708_v62 = vsel %vm3196_vm9, %v2935_v56, %v3452_v58  ;;  %v5771_v1 = vpack.c.bf16 %v3580_v61, %v3580_v61  ;;  %vm3069_vm10 = vcmp.gt.f32.partialorder %v2426_v63, 0.0  ;;  %v3325_v3 = vmul.f32 0.2, %v2426_v63  ;;  %v2428_v4 = vpop.f32.mrb[255].mxu0  ;;  %v2940_v5 = vpop.f32.mrb[255].mxu1 }
 0x2f9   :  { %v5899_v2 = vpack.c.bf16 %v3708_v62, %v3708_v62  ;;  %vm3197_vm11 = vcmp.gt.f32.partialorder %v2938_v0, 0.0  ;;  %v3453_v6 = vmul.f32 0.2, %v2938_v0 }
 0x2fa   :  { %4861 = vst.msk [vmem:[%s8284_s2 + $0x1f8] sm:$0xf] %vm4734_vm3, %v5771_v1  ;;  %v3581_v7 = vsel %vm3069_vm10, %v2426_v63, %v3325_v3 }
 0x2fb   :  { %4989 = vst.msk [vmem:[%s8284_s2 + $0x3f8] sm:$0xf] %vm4734_vm3, %v5899_v2  ;;  %v5772_v8 = vpack.c.bf16 %v3581_v7, %v3581_v7  ;;  %v3709_v9 = vsel %vm3197_vm11, %v2938_v0, %v3453_v6 }
 0x2fc   :  { %v5900_v10 = vpack.c.bf16 %v3709_v9, %v3709_v9 }
 0x2fd   :  { %4862 = vst.msk [vmem:[%s8284_s2 + $0x1fc] sm:$0xf] %vm4734_vm3, %v5772_v8 }
 0x2fe   :  { %4990 = vst.msk [vmem:[%s8284_s2 + $0x3fc] sm:$0xf] %vm4734_vm3, %v5900_v10 }

// kernel: discriminator_ca_forward.5
= control target key start
LH: loop header
LB: loop body
LE: loop exit
PB: predicated region body
PF: predicated region fallthrough
CT: control target
= control target key end

     0   :  { %vm627_vm0 = vcmask 130048   ;;  %s4200_s1 = inlined_call_operand.vmem [shape: bf16[128,16], index: 1, kind: input, shape index: {}]   ;;  %s4201_s0 = inlined_call_operand.vmem [shape: bf16[512,128], index: 0, kind: input, shape index: {}]   ;;  %s4202_s2 = inlined_call_operand.vmem [shape: f32[1,16], index: 2, kind: input, shape index: {}]   ;;  %s4203_s3 = inlined_call_operand.vmem [shape: f32[1,16], index: 3, kind: input, shape index: {}]   ;;  %s4204_s4 = inlined_call_operand.vmem [shape: bf16[512,16], index: 4, kind: output, shape index: {}]  }
   0x1   :  { %v1992_v0 = vld [vmem:[%s4200_s1] sm:$0xff]   ;;  %v1993_v1 = vld [vmem:[%s4200_s1 + $0x8] sm:$0xff]   ;;  %v1994_v2 = vld [vmem:[%s4200_s1 + $0x10] sm:$0xff]  }
   0x2   :  { %1896 = vmatprep.subr.bf16.mxu0 %v1992_v0  ;;  %1976 = vmatprep.subr.bf16.mxu1 %v1992_v0  ;;  %v1995_v3 = vld [vmem:[%s4200_s1 + $0x18] sm:$0xff]   ;;  %v2000_v4 = vld [vmem:[%s4201_s0] sm:$0xff]   ;;  %v1997_v6 = vld [vmem:[%s4200_s1 + $0x28] sm:$0xff]  }
   0x3   :  { %1897 = vmatpush3.bf16.msra.mxu0 %v1992_v0  ;;  %1984 = vmatpush3.bf16.msra.mxu1 %v1992_v0  ;;  %v1996_v5 = vld [vmem:[%s4200_s1 + $0x20] sm:$0xff]   ;;  %v1998_v7 = vld [vmem:[%s4200_s1 + $0x30] sm:$0xff]   ;;  %v1999_v8 = vld [vmem:[%s4200_s1 + $0x38] sm:$0xff]  }
   0x4   :  { %1898 = vmatprep.subr.bf16.mxu0 %v1993_v1  ;;  %1977 = vmatprep.subr.bf16.mxu1 %v1993_v1  ;;  %v2016_v9 = vld [vmem:[%s4201_s0 + $0x80] sm:$0xff]   ;;  %v2001_v10 = vld [vmem:[%s4201_s0 + $0x8] sm:$0xff]   ;;  %v2002_v11 = vld [vmem:[%s4201_s0 + $0x10] sm:$0xff]  }
   0x5   :  { %1912 = vmatprep.mubr.bf16.mxu0 %v2000_v4  ;;  %1944 = vmatprep.mubr.bf16.mxu1 %v2016_v9  ;;  %v2017_v12 = vld [vmem:[%s4201_s0 + $0x88] sm:$0xff]   ;;  %v2018_v13 = vld [vmem:[%s4201_s0 + $0x90] sm:$0xff]   ;;  %v2003_v14 = vld [vmem:[%s4201_s0 + $0x18] sm:$0xff]  }
   0x6   :  { %v2004_v15 = vld [vmem:[%s4201_s0 + $0x20] sm:$0xff]   ;;  %v2019_v16 = vld [vmem:[%s4201_s0 + $0x98] sm:$0xff]   ;;  %v2005_v18 = vld [vmem:[%s4201_s0 + $0x28] sm:$0xff]  }
   0x7   :  { %1899 = vmatpush3.bf16.msra.mxu0 %v1993_v1  ;;  %1985 = vmatpush3.bf16.msra.mxu1 %v1993_v1  ;;  %v2020_v17 = vld [vmem:[%s4201_s0 + $0xa0] sm:$0xff]   ;;  %v2021_v19 = vld [vmem:[%s4201_s0 + $0xa8] sm:$0xff]   ;;  %v2006_v20 = vld [vmem:[%s4201_s0 + $0x30] sm:$0xff]  }
   0x8   :  { %1900 = vmatprep.subr.bf16.mxu0 %v1994_v2  ;;  %1978 = vmatprep.subr.bf16.mxu1 %v1994_v2  ;;  %v2022_v21 = vld [vmem:[%s4201_s0 + $0xb0] sm:$0xff]   ;;  %v2007_v22 = vld [vmem:[%s4201_s0 + $0x38] sm:$0xff]   ;;  %v2008_v24 = vld [vmem:[%s4201_s0 + $0x40] sm:$0xff]  }
   0x9   :  { %v2023_v23 = vld [vmem:[%s4201_s0 + $0xb8] sm:$0xff]   ;;  %v2024_v25 = vld [vmem:[%s4201_s0 + $0xc0] sm:$0xff]   ;;  %v2009_v26 = vld [vmem:[%s4201_s0 + $0x48] sm:$0xff]  }
   0xa   :  { %v2025_v27 = vld [vmem:[%s4201_s0 + $0xc8] sm:$0xff]   ;;  %v2010_v28 = vld [vmem:[%s4201_s0 + $0x50] sm:$0xff]   ;;  %v2011_v30 = vld [vmem:[%s4201_s0 + $0x58] sm:$0xff]  }
   0xb   :  { %1901 = vmatpush3.bf16.msra.mxu0 %v1994_v2  ;;  %1986 = vmatpush3.bf16.msra.mxu1 %v1994_v2  ;;  %v2026_v29 = vld [vmem:[%s4201_s0 + $0xd0] sm:$0xff]   ;;  %v2027_v31 = vld [vmem:[%s4201_s0 + $0xd8] sm:$0xff]   ;;  %v2012_v32 = vld [vmem:[%s4201_s0 + $0x60] sm:$0xff]  }
   0xc   :  { %1902 = vmatprep.subr.bf16.mxu0 %v1995_v3  ;;  %1979 = vmatprep.subr.bf16.mxu1 %v1995_v3  ;;  %v2028_v33 = vld [vmem:[%s4201_s0 + $0xe0] sm:$0xff]   ;;  %v2013_v34 = vld [vmem:[%s4201_s0 + $0x68] sm:$0xff]   ;;  %v2014_v36 = vld [vmem:[%s4201_s0 + $0x70] sm:$0xff]  }
   0xd   :  { %v2029_v35 = vld [vmem:[%s4201_s0 + $0xe8] sm:$0xff]   ;;  %v2030_v37 = vld [vmem:[%s4201_s0 + $0xf0] sm:$0xff]   ;;  %v2015_v38 = vld [vmem:[%s4201_s0 + $0x78] sm:$0xff]  }
   0xe   :  { %v2031_v39 = vld [vmem:[%s4201_s0 + $0xf8] sm:$0xff]  }
   0xf   :  { %1903 = vmatpush3.bf16.msra.mxu0 %v1995_v3  ;;  %1987 = vmatpush3.bf16.msra.mxu1 %v1995_v3 }
  0x10   :  { %1904 = vmatprep.subr.bf16.mxu0 %v1996_v5  ;;  %1980 = vmatprep.subr.bf16.mxu1 %v1996_v5 }
  0x13   :  { %1905 = vmatpush3.bf16.msra.mxu0 %v1996_v5  ;;  %1988 = vmatpush3.bf16.msra.mxu1 %v1996_v5 }
  0x14   :  { %1906 = vmatprep.subr.bf16.mxu0 %v1997_v6  ;;  %1981 = vmatprep.subr.bf16.mxu1 %v1997_v6 }
  0x17   :  { %1907 = vmatpush3.bf16.msra.mxu0 %v1997_v6  ;;  %1989 = vmatpush3.bf16.msra.mxu1 %v1997_v6 }
  0x18   :  { %1908 = vmatprep.subr.bf16.mxu0 %v1998_v7  ;;  %1982 = vmatprep.subr.bf16.mxu1 %v1998_v7 }
  0x1b   :  { %1909 = vmatpush3.bf16.msra.mxu0 %v1998_v7  ;;  %1990 = vmatpush3.bf16.msra.mxu1 %v1998_v7 }
  0x1c   :  { %1910 = vmatprep.subr.bf16.mxu0 %v1999_v8  ;;  %1983 = vmatprep.subr.bf16.mxu1 %v1999_v8 }
  0x1f   :  { %1911 = vmatpush3.bf16.msra.mxu0 %v1999_v8  ;;  %1991 = vmatpush3.bf16.msra.mxu1 %v1999_v8 }
  0x22   :  { %1913 = vmatmul.mubr.bf16.vlgmr.msra.gmra.mrb[0].mxu0 %v2001_v10  ;;  %1945 = vmatmul.mubr.bf16.vlgmr.msra.gmra.mrb[0].mxu1 %v2017_v12 }
  0x23   :  { %1916 = vmatprep.mubr.bf16.mxu0 %v2002_v11  ;;  %1948 = vmatprep.mubr.bf16.mxu1 %v2018_v13 }
  0x2a   :  { %1917 = vmatmul.mubr.bf16.gmra.mrb[4].mxu0 %v2003_v14  ;;  %1949 = vmatmul.mubr.bf16.gmra.mrb[4].mxu1 %v2019_v16 }
  0x2b   :  { %1920 = vmatprep.mubr.bf16.mxu0 %v2004_v15  ;;  %1952 = vmatprep.mubr.bf16.mxu1 %v2020_v17 }
  0x32   :  { %1921 = vmatmul.mubr.bf16.gmra.mrb[8].mxu0 %v2005_v18  ;;  %1953 = vmatmul.mubr.bf16.gmra.mrb[8].mxu1 %v2021_v19 }
  0x33   :  { %1924 = vmatprep.mubr.bf16.mxu0 %v2006_v20  ;;  %1956 = vmatprep.mubr.bf16.mxu1 %v2022_v21 }
  0x3a   :  { %1925 = vmatmul.mubr.bf16.gmra.mrb[12].mxu0 %v2007_v22  ;;  %1957 = vmatmul.mubr.bf16.gmra.mrb[12].mxu1 %v2023_v23 }
  0x3b   :  { %1928 = vmatprep.mubr.bf16.mxu0 %v2008_v24  ;;  %1960 = vmatprep.mubr.bf16.mxu1 %v2024_v25 }
  0x42   :  { %1929 = vmatmul.mubr.bf16.gmra.mrb[16].mxu0 %v2009_v26  ;;  %1961 = vmatmul.mubr.bf16.gmra.mrb[16].mxu1 %v2025_v27 }
  0x43   :  { %1932 = vmatprep.mubr.bf16.mxu0 %v2010_v28  ;;  %1964 = vmatprep.mubr.bf16.mxu1 %v2026_v29 }
  0x4a   :  { %1933 = vmatmul.mubr.bf16.gmra.mrb[20].mxu0 %v2011_v30  ;;  %1965 = vmatmul.mubr.bf16.gmra.mrb[20].mxu1 %v2027_v31 }
  0x4b   :  { %1936 = vmatprep.mubr.bf16.mxu0 %v2012_v32  ;;  %1968 = vmatprep.mubr.bf16.mxu1 %v2028_v33 }
  0x52   :  { %1937 = vmatmul.mubr.bf16.gmra.mrb[24].mxu0 %v2013_v34  ;;  %1969 = vmatmul.mubr.bf16.gmra.mrb[24].mxu1 %v2029_v35 }
  0x53   :  { %1940 = vmatprep.mubr.bf16.mxu0 %v2014_v36  ;;  %1972 = vmatprep.mubr.bf16.mxu1 %v2030_v37 }
  0x5a   :  { %1941 = vmatmul.mubr.bf16.gmra.mrb[28].mxu0 %v2015_v38  ;;  %1973 = vmatmul.mubr.bf16.gmra.mrb[28].mxu1 %v2031_v39 }
  0xf5   :  { %v2179_v40 = vpop.f32.mrb[0].mxu0  ;;  %v2181_v41 = vpop.f32.mrb[0].mxu1 }
  0xf6   :  { %v2183_v42 = vpop.f32.mrb[1].mxu0  ;;  %v2185_v43 = vpop.f32.mrb[1].mxu1  ;;  %v631_v51 = vsel %vm627_vm0, %v2179_v40, 0.0 }
  0xf7   :  { %v2187_v44 = vpop.f32.mrb[2].mxu0  ;;  %v2189_v45 = vpop.f32.mrb[2].mxu1  ;;  %v628_v48 = vsel %vm627_vm0, %v2183_v42, 0.0 }
  0xf8   :  { %v2191_v46 = vpop.f32.mrb[3].mxu0  ;;  %v2193_v47 = vpop.f32.mrb[3].mxu1  ;;  %v633_v53 = vsel %vm627_vm0, %v2187_v44, 0.0 }
  0xf9   :  { %v629_v49 = vsel %vm627_vm0, %v2191_v46, 0.0 }
  0xfa   :  { %v630_v50 = vadd.f32 %v629_v49, %v628_v48 }
  0xfc   :  { %v632_v52 = vadd.f32 %v631_v51, %v630_v50 }
  0xfd   :  { %v2203_v54 = vpop.f32.mrb[4].mxu0  ;;  %v2205_v55 = vpop.f32.mrb[4].mxu1 }
  0xfe   :  { %v2207_v56 = vpop.f32.mrb[5].mxu0  ;;  %v634_v57 = vadd.f32 %v633_v53, %v632_v52  ;;  %v2209_v58 = vpop.f32.mrb[5].mxu1  ;;  %v639_v3 = vsel %vm627_vm0, %v2203_v54, 0.0 }
  0xff   :  { %v635_v59 = vsel %vm627_vm0, %v2207_v56, 0.0  ;;  %v2213_v60 = vpop.f32.mrb[6].mxu0  ;;  %v2215_v61 = vpop.f32.mrb[6].mxu1 }
 0x100   :  { %v636_v62 = vadd.f32 %v635_v59, %v634_v57  ;;  %v2217_v63 = vpop.f32.mrb[7].mxu0  ;;  %v2219_v0 = vpop.f32.mrb[7].mxu1  ;;  %v641_v5 = vsel %vm627_vm0, %v2213_v60, 0.0 }
 0x101   :  { %v637_v1 = vsel %vm627_vm0, %v2217_v63, 0.0 }
 0x102   :  { %v638_v2 = vadd.f32 %v637_v1, %v636_v62 }
 0x104   :  { %v640_v4 = vadd.f32 %v639_v3, %v638_v2 }
 0x105   :  { %v2227_v6 = vpop.f32.mrb[8].mxu0  ;;  %v2229_v7 = vpop.f32.mrb[8].mxu1 }
 0x106   :  { %v2231_v8 = vpop.f32.mrb[9].mxu0  ;;  %v642_v9 = vadd.f32 %v641_v5, %v640_v4  ;;  %v2233_v10 = vpop.f32.mrb[9].mxu1  ;;  %v647_v19 = vsel %vm627_vm0, %v2227_v6, 0.0 }
 0x107   :  { %v643_v11 = vsel %vm627_vm0, %v2231_v8, 0.0  ;;  %v2237_v12 = vpop.f32.mrb[10].mxu0  ;;  %v2239_v13 = vpop.f32.mrb[10].mxu1 }
 0x108   :  { %v644_v14 = vadd.f32 %v643_v11, %v642_v9  ;;  %v2241_v15 = vpop.f32.mrb[11].mxu0  ;;  %v2243_v16 = vpop.f32.mrb[11].mxu1  ;;  %v649_v21 = vsel %vm627_vm0, %v2237_v12, 0.0 }
 0x109   :  { %v645_v17 = vsel %vm627_vm0, %v2241_v15, 0.0 }
 0x10a   :  { %v646_v18 = vadd.f32 %v645_v17, %v644_v14 }
 0x10c   :  { %v648_v20 = vadd.f32 %v647_v19, %v646_v18 }
 0x10d   :  { %v2251_v22 = vpop.f32.mrb[12].mxu0  ;;  %v2253_v23 = vpop.f32.mrb[12].mxu1 }
 0x10e   :  { %v2255_v24 = vpop.f32.mrb[13].mxu0  ;;  %v650_v25 = vadd.f32 %v649_v21, %v648_v20  ;;  %v2257_v26 = vpop.f32.mrb[13].mxu1  ;;  %v655_v35 = vsel %vm627_vm0, %v2251_v22, 0.0 }
 0x10f   :  { %v651_v27 = vsel %vm627_vm0, %v2255_v24, 0.0  ;;  %v2261_v28 = vpop.f32.mrb[14].mxu0  ;;  %v2263_v29 = vpop.f32.mrb[14].mxu1 }
 0x110   :  { %v652_v30 = vadd.f32 %v651_v27, %v650_v25  ;;  %v2265_v31 = vpop.f32.mrb[15].mxu0  ;;  %v2267_v32 = vpop.f32.mrb[15].mxu1  ;;  %v657_v37 = vsel %vm627_vm0, %v2261_v28, 0.0 }
 0x111   :  { %v653_v33 = vsel %vm627_vm0, %v2265_v31, 0.0 }
 0x112   :  { %v654_v34 = vadd.f32 %v653_v33, %v652_v30 }
 0x114   :  { %v656_v36 = vadd.f32 %v655_v35, %v654_v34 }
 0x115   :  { %v2275_v38 = vpop.f32.mrb[16].mxu0  ;;  %v2277_v39 = vpop.f32.mrb[16].mxu1 }
 0x116   :  { %4282 = vst [vmem:[#allocation2_spill] sm:$0xff] %v2275_v38  ;;  %v2279_v48 = vpop.f32.mrb[17].mxu0  ;;  %v658_v49 = vadd.f32 %v657_v37, %v656_v36  ;;  %v2281_v50 = vpop.f32.mrb[17].mxu1  ;;  %v663_v3 = vsel %vm627_vm0, %v2275_v38, 0.0 }
 0x117   :  { %v659_v51 = vsel %vm627_vm0, %v2279_v48, 0.0  ;;  %v2285_v52 = vpop.f32.mrb[18].mxu0  ;;  %v2287_v53 = vpop.f32.mrb[18].mxu1 }
 0x118   :  { %4283 = vst [vmem:[#allocation3_spill] sm:$0xff] %v2285_v52  ;;  %v660_v57 = vadd.f32 %v659_v51, %v658_v49  ;;  %v2289_v59 = vpop.f32.mrb[19].mxu0  ;;  %v2291_v62 = vpop.f32.mrb[19].mxu1  ;;  %v665_v5 = vsel %vm627_vm0, %v2285_v52, 0.0 }
 0x119   :  { %v661_v1 = vsel %vm627_vm0, %v2289_v59, 0.0 }
 0x11a   :  { %v662_v2 = vadd.f32 %v661_v1, %v660_v57 }
 0x11c   :  { %v664_v4 = vadd.f32 %v663_v3, %v662_v2 }
 0x11d   :  { %v2299_v9 = vpop.f32.mrb[20].mxu0  ;;  %v2301_v11 = vpop.f32.mrb[20].mxu1 }
 0x11e   :  { %4284 = vst [vmem:[#allocation4_spill] sm:$0xff] %v2299_v9  ;;  %v2303_v14 = vpop.f32.mrb[21].mxu0  ;;  %v666_v17 = vadd.f32 %v665_v5, %v664_v4  ;;  %v2305_v18 = vpop.f32.mrb[21].mxu1  ;;  %v671_v35 = vsel %vm627_vm0, %v2299_v9, 0.0 }
 0x11f   :  { %4285 = vst [vmem:[#allocation5_spill] sm:$0xff] %v2303_v14  ;;  %v667_v19 = vsel %vm627_vm0, %v2303_v14, 0.0  ;;  %v2309_v20 = vpop.f32.mrb[22].mxu0  ;;  %v2311_v21 = vpop.f32.mrb[22].mxu1  ;;  %v691_v14 = vsel %vm627_vm0, %v2185_v43, 0.0 }
 0x120   :  { %4286 = vst [vmem:[#allocation6_spill] sm:$0xff] %v2309_v20  ;;  %v668_v25 = vadd.f32 %v667_v19, %v666_v17  ;;  %v2313_v27 = vpop.f32.mrb[23].mxu0  ;;  %v2315_v30 = vpop.f32.mrb[23].mxu1  ;;  %v673_v37 = vsel %vm627_vm0, %v2309_v20, 0.0 }
 0x121   :  { %4287 = vst [vmem:[#allocation7_spill] sm:$0xff] %v2313_v27  ;;  %v669_v33 = vsel %vm627_vm0, %v2313_v27, 0.0 }
 0x122   :  { %v670_v34 = vadd.f32 %v669_v33, %v668_v25 }
 0x124   :  { %v672_v36 = vadd.f32 %v671_v35, %v670_v34 }
 0x125   :  { %v2323_v49 = vpop.f32.mrb[24].mxu0  ;;  %v2325_v51 = vpop.f32.mrb[24].mxu1 }
 0x126   :  { %4288 = vst [vmem:[#allocation8_spill] sm:$0xff] %v2323_v49  ;;  %4289 = vst [vmem:[#allocation9_spill] sm:$0xff] %v2325_v51  ;;  %v2327_v57 = vpop.f32.mrb[25].mxu0  ;;  %v674_v1 = vadd.f32 %v673_v37, %v672_v36  ;;  %v2329_v2 = vpop.f32.mrb[25].mxu1  ;;  %v679_v35 = vsel %vm627_vm0, %v2323_v49, 0.0 }
 0x127   :  { %4290 = vst [vmem:[#allocation10_spill] sm:$0xff] %v2327_v57  ;;  %v675_v3 = vsel %vm627_vm0, %v2327_v57, 0.0  ;;  %v2333_v4 = vpop.f32.mrb[26].mxu0  ;;  %v2335_v5 = vpop.f32.mrb[26].mxu1 }
 0x128   :  { %4291 = vst [vmem:[#allocation11_spill] sm:$0xff] %v2333_v4  ;;  %4292 = vst [vmem:[#allocation12_spill] sm:$0xff] %v2335_v5  ;;  %v676_v17 = vadd.f32 %v675_v3, %v674_v1  ;;  %v2337_v19 = vpop.f32.mrb[27].mxu0  ;;  %v2339_v25 = vpop.f32.mrb[27].mxu1  ;;  %v681_v37 = vsel %vm627_vm0, %v2333_v4, 0.0 }
 0x129   :  { %4293 = vst [vmem:[#allocation13_spill] sm:$0xff] %v2337_v19  ;;  %4294 = vst [vmem:[#allocation14_spill] sm:$0xff] %v2339_v25  ;;  %v677_v33 = vsel %vm627_vm0, %v2337_v19, 0.0 }
 0x12a   :  { %v678_v34 = vadd.f32 %v677_v33, %v676_v17 }
 0x12c   :  { %v680_v36 = vadd.f32 %v679_v35, %v678_v34 }
 0x12d   :  { %v2347_v57 = vpop.f32.mrb[28].mxu0  ;;  %v2349_v20 = vpop.f32.mrb[28].mxu1 }
 0x12e   :  { %v2351_v1 = vpop.f32.mrb[29].mxu0  ;;  %v682_v3 = vadd.f32 %v681_v37, %v680_v36  ;;  %v2353_v9 = vpop.f32.mrb[29].mxu1  ;;  %v687_v36 = vsel %vm627_vm0, %v2347_v57, 0.0 }
 0x12f   :  { %4295 = vst [vmem:[#allocation15_spill] sm:$0xff] %v2351_v1  ;;  %4296 = vst [vmem:[#allocation16_spill] sm:$0xff] %v2353_v9  ;;  %v683_v19 = vsel %vm627_vm0, %v2351_v1, 0.0  ;;  %v2357_v17 = vpop.f32.mrb[30].mxu0  ;;  %v2359_v33 = vpop.f32.mrb[30].mxu1 }
 0x130   :  { %4297 = vst [vmem:[#allocation17_spill] sm:$0xff] %v2357_v17  ;;  %v684_v34 = vadd.f32 %v683_v19, %v682_v3  ;;  %v2361_v35 = vpop.f32.mrb[31].mxu0  ;;  %v2363_v4 = vpop.f32.mrb[31].mxu1  ;;  %v689_v1 = vsel %vm627_vm0, %v2357_v17, 0.0  ;;  %v693_v3 = vsel %vm627_vm0, %v2193_v47, 0.0 }
 0x131   :  { %4298 = vst [vmem:[#allocation18_spill] sm:$0xff] %v2361_v35  ;;  %v685_v49 = vsel %vm627_vm0, %v2361_v35, 0.0  ;;  %v695_v35 = vsel %vm627_vm0, %v2181_v41, 0.0 }
 0x132   :  { %v686_v27 = vadd.f32 %v685_v49, %v684_v34  ;;  %v697_v34 = vsel %vm627_vm0, %v2189_v45, 0.0 }
 0x134   :  { %v688_v37 = vadd.f32 %v687_v36, %v686_v27  ;;  %v699_v27 = vsel %vm627_vm0, %v2209_v58, 0.0 }
 0x136   :  { %v690_v52 = vadd.f32 %v689_v1, %v688_v37  ;;  %v701_v1 = vsel %vm627_vm0, %v2219_v0, 0.0 }
 0x138   :  { %v692_v19 = vadd.f32 %v691_v14, %v690_v52  ;;  %v703_v14 = vsel %vm627_vm0, %v2205_v55, 0.0 }
 0x13a   :  { %v694_v38 = vadd.f32 %v693_v3, %v692_v19  ;;  %v705_v19 = vsel %vm627_vm0, %v2215_v61, 0.0 }
 0x13c   :  { %v696_v49 = vadd.f32 %v695_v35, %v694_v38  ;;  %v707_v38 = vsel %vm627_vm0, %v2233_v10, 0.0 }
 0x13e   :  { %v698_v36 = vadd.f32 %v697_v34, %v696_v49  ;;  %v709_v49 = vsel %vm627_vm0, %v2243_v16, 0.0 }
 0x140   :  { %v700_v17 = vadd.f32 %v699_v27, %v698_v36  ;;  %v711_v27 = vsel %vm627_vm0, %v2229_v7, 0.0  ;;  %v713_v36 = vsel %vm627_vm0, %v2239_v13, 0.0 }
 0x142   :  { %v702_v52 = vadd.f32 %v701_v1, %v700_v17  ;;  %v715_v1 = vsel %vm627_vm0, %v2257_v26, 0.0 }
 0x144   :  { %v704_v37 = vadd.f32 %v703_v14, %v702_v52 }
 0x146   :  { %v706_v35 = vadd.f32 %v705_v19, %v704_v37  ;;  %v717_v37 = vsel %vm627_vm0, %v2267_v32, 0.0 }
 0x148   :  { %v708_v3 = vadd.f32 %v707_v38, %v706_v35  ;;  %v719_v38 = vsel %vm627_vm0, %v2253_v23, 0.0 }
 0x14a   :  { %v710_v34 = vadd.f32 %v709_v49, %v708_v3  ;;  %v721_v3 = vsel %vm627_vm0, %v2263_v29, 0.0  ;;  %v723_v49 = vsel %vm627_vm0, %v2281_v50, 0.0 }
 0x14c   :  { %v712_v17 = vadd.f32 %v711_v27, %v710_v34 }
 0x14e   :  { %v714_v52 = vadd.f32 %v713_v36, %v712_v17  ;;  %v725_v17 = vsel %vm627_vm0, %v2291_v62, 0.0 }
 0x150   :  { %v716_v14 = vadd.f32 %v715_v1, %v714_v52  ;;  %v727_v1 = vsel %vm627_vm0, %v2277_v39, 0.0 }
 0x152   :  { %v718_v19 = vadd.f32 %v717_v37, %v716_v14  ;;  %v729_v14 = vsel %vm627_vm0, %v2287_v53, 0.0  ;;  %v731_v37 = vsel %vm627_vm0, %v2305_v18, 0.0 }
 0x154   :  { %v720_v35 = vadd.f32 %v719_v38, %v718_v19 }
 0x156   :  { %v722_v34 = vadd.f32 %v721_v3, %v720_v35  ;;  %v733_v35 = vsel %vm627_vm0, %v2315_v30, 0.0 }
 0x158   :  { %v724_v27 = vadd.f32 %v723_v49, %v722_v34  ;;  %v735_v49 = vsel %vm627_vm0, %v2301_v11, 0.0 }
 0x15a   :  { %v726_v36 = vadd.f32 %v725_v17, %v724_v27  ;;  %v737_v27 = vsel %vm627_vm0, %v2311_v21, 0.0  ;;  %v739_v17 = vsel %vm627_vm0, %v2329_v2, 0.0 }
 0x15c   :  { %v728_v52 = vadd.f32 %v727_v1, %v726_v36 }
 0x15e   :  { %v730_v19 = vadd.f32 %v729_v14, %v728_v52  ;;  %v741_v52 = vsel %vm627_vm0, %v2339_v25, 0.0 }
 0x160   :  { %v732_v38 = vadd.f32 %v731_v37, %v730_v19  ;;  %v743_v37 = vsel %vm627_vm0, %v2325_v51, 0.0 }
 0x162   :  { %v734_v3 = vadd.f32 %v733_v35, %v732_v38  ;;  %v745_v38 = vsel %vm627_vm0, %v2335_v5, 0.0  ;;  %v747_v35 = vsel %vm627_vm0, %v2353_v9, 0.0 }
 0x164   :  { %v736_v34 = vadd.f32 %v735_v49, %v734_v3 }
 0x166   :  { %v738_v36 = vadd.f32 %v737_v27, %v736_v34  ;;  %v749_v34 = vsel %vm627_vm0, %v2363_v4, 0.0 }
 0x168   :  { %v740_v1 = vadd.f32 %v739_v17, %v738_v36  ;;  %v751_v17 = vsel %vm627_vm0, %v2349_v20, 0.0 }
 0x16a   :  { %v742_v14 = vadd.f32 %v741_v52, %v740_v1  ;;  %v753_v1 = vsel %vm627_vm0, %v2359_v33, 0.0 }
 0x16c   :  { %v744_v19 = vadd.f32 %v743_v37, %v742_v14 }
 0x16e   :  { %v746_v3 = vadd.f32 %v745_v38, %v744_v19 }
 0x170   :  { %v748_v49 = vadd.f32 %v747_v35, %v746_v3 }
 0x172   :  { %v750_v27 = vadd.f32 %v749_v34, %v748_v49  ;;  %v4307_v34 = vld [vmem:[#allocation7_spill] sm:$0xff] }
 0x174   :  { %v752_v36 = vadd.f32 %v751_v17, %v750_v27  ;;  %v4308_v27 = vld [vmem:[#allocation4_spill] sm:$0xff]  ;;  %v4310_v17 = vld [vmem:[#allocation6_spill] sm:$0xff] }
 0x176   :  { %v754_v52 = vadd.f32 %v753_v1, %v752_v36  ;;  %v4312_v1 = vld [vmem:[#allocation10_spill] sm:$0xff] }
 0x178   :  { %v755_v14 = vrot.slane %v754_v52, 4 }
 0x17a   :  { %v756_v37 = vadd.f32 %v755_v14, %v754_v52  ;;  %v4313_v14 = vld [vmem:[#allocation13_spill] sm:$0xff] }
 0x17c   :  { %v757_v5 = vrot.slane %v756_v37, 2 }
 0x17e   :  { %v758_v51 = vadd.f32 %v757_v5, %v756_v37  ;;  %v4304_v5 = vld [vmem:[#allocation3_spill] sm:$0xff] }
 0x180   :  { %v759_v25 = vrot.slane %v758_v51, 1 }
 0x182   :  { %v760_v9 = vadd.f32 %v759_v25, %v758_v51  ;;  %v4303_v51 = vld [vmem:[#allocation2_spill] sm:$0xff]  ;;  %v4305_v25 = vld [vmem:[#allocation5_spill] sm:$0xff] }
 0x184   :  { %v2435_v19 = vmul.f32 0.001953125, %v760_v9 }
 0x186   :  { %v2439_v38 = vsub.f32 %v2183_v42, %v2435_v19  ;;  %v2443_v35 = vsub.f32 %v2191_v46, %v2435_v19  ;;  %v2447_v3 = vsub.f32 %v2179_v40, %v2435_v19  ;;  %v2451_v49 = vsub.f32 %v2187_v44, %v2435_v19 }
 0x187   :  { %v2455_v9 = vsub.f32 %v2207_v56, %v2435_v19  ;;  %v2459_v42 = vsub.f32 %v2217_v63, %v2435_v19  ;;  %v2463_v46 = vsub.f32 %v2203_v54, %v2435_v19  ;;  %v2467_v40 = vsub.f32 %v2213_v60, %v2435_v19 }
 0x188   :  { %4299 = vst [vmem:[#allocation19_spill] sm:$0xff] %v2439_v38  ;;  %4300 = vst [vmem:[#allocation20_spill] sm:$0xff] %v2443_v35  ;;  %v2471_v44 = vsub.f32 %v2231_v8, %v2435_v19  ;;  %v2475_v56 = vsub.f32 %v2241_v15, %v2435_v19  ;;  %v2479_v63 = vsub.f32 %v2227_v6, %v2435_v19 }
 0x189   :  { %4301 = vst [vmem:[#allocation21_spill] sm:$0xff] %v2447_v3  ;;  %4302 = vst [vmem:[#allocation22_spill] sm:$0xff] %v2451_v49  ;;  %v2483_v54 = vsub.f32 %v2237_v12, %v2435_v19  ;;  %v2487_v60 = vsub.f32 %v2255_v24, %v2435_v19  ;;  %v2491_v8 = vsub.f32 %v2265_v31, %v2435_v19 }
 0x18a   :  { %v2495_v15 = vsub.f32 %v2251_v22, %v2435_v19  ;;  %v2499_v6 = vsub.f32 %v2261_v28, %v2435_v19  ;;  %v2503_v12 = vsub.f32 %v2279_v48, %v2435_v19  ;;  %v2507_v24 = vsub.f32 %v2289_v59, %v2435_v19 }
 0x18b   :  { %v2511_v31 = vsub.f32 %v4303_v51, %v2435_v19  ;;  %v2515_v22 = vsub.f32 %v4304_v5, %v2435_v19  ;;  %v2519_v28 = vsub.f32 %v4305_v25, %v2435_v19  ;;  %v2523_v48 = vsub.f32 %v4307_v34, %v2435_v19  ;;  %v4315_v51 = vld [vmem:[#allocation8_spill] sm:$0xff]  ;;  %v4316_v25 = vld [vmem:[#allocation11_spill] sm:$0xff] }
 0x18c   :  { %v2527_v59 = vsub.f32 %v4308_v27, %v2435_v19  ;;  %v2531_v36 = vsub.f32 %v4310_v17, %v2435_v19  ;;  %v2535_v52 = vsub.f32 %v4312_v1, %v2435_v19  ;;  %v2539_v37 = vsub.f32 %v4313_v14, %v2435_v19  ;;  %v4317_v27 = vld [vmem:[#allocation15_spill] sm:$0xff] }
 0x18d   :  { %4306 = vst [vmem:[#allocation2_spill] sm:$0xff] %v2519_v28  ;;  %v2543_v5 = vsub.f32 %v4315_v51, %v2435_v19  ;;  %v2547_v34 = vsub.f32 %v4316_v25, %v2435_v19  ;;  %v2551_v17 = vsub.f32 %v4317_v27, %v2435_v19  ;;  %v2559_v14 = vsub.f32 %v2347_v57, %v2435_v19 }
 0x18e   :  { %4309 = vst [vmem:[#allocation3_spill] sm:$0xff] %v2527_v59  ;;  %4311 = vst [vmem:[#allocation5_spill] sm:$0xff] %v2531_v36  ;;  %v4318_v36 = vld [vmem:[#allocation18_spill] sm:$0xff]  ;;  %v2567_v25 = vsub.f32 %v2185_v43, %v2435_v19  ;;  %v2571_v27 = vsub.f32 %v2193_v47, %v2435_v19  ;;  %v2579_v57 = vsub.f32 %v2189_v45, %v2435_v19 }
 0x18f   :  { %4314 = vst [vmem:[#allocation7_spill] sm:$0xff] %v2539_v37  ;;  %v2555_v1 = vsub.f32 %v4318_v36, %v2435_v19  ;;  %v4319_v37 = vld [vmem:[#allocation17_spill] sm:$0xff]  ;;  %v2575_v36 = vsub.f32 %v2181_v41, %v2435_v19  ;;  %v2587_v43 = vsub.f32 %v2219_v0, %v2435_v19  ;;  %v2591_v47 = vsub.f32 %v2205_v55, %v2435_v19 }
 0x190   :  { %v2563_v51 = vsub.f32 %v4319_v37, %v2435_v19  ;;  %v2583_v37 = vsub.f32 %v2209_v58, %v2435_v19  ;;  %v2595_v41 = vsub.f32 %v2215_v61, %v2435_v19  ;;  %v2599_v45 = vsub.f32 %v2233_v10, %v2435_v19 }
 0x191   :  { %v2603_v58 = vsub.f32 %v2243_v16, %v2435_v19  ;;  %v2607_v0 = vsub.f32 %v2229_v7, %v2435_v19  ;;  %v2611_v55 = vsub.f32 %v2239_v13, %v2435_v19  ;;  %v2615_v61 = vsub.f32 %v2257_v26, %v2435_v19 }
 0x192   :  { %v2619_v10 = vsub.f32 %v2267_v32, %v2435_v19  ;;  %v2623_v16 = vsub.f32 %v2253_v23, %v2435_v19  ;;  %v2627_v7 = vsub.f32 %v2263_v29, %v2435_v19  ;;  %v2631_v13 = vsub.f32 %v2281_v50, %v2435_v19 }
 0x193   :  { %4320 = vst [vmem:[#allocation4_spill] sm:$0xff] %v2603_v58  ;;  %4321 = vst [vmem:[#allocation6_spill] sm:$0xff] %v2607_v0  ;;  %v2635_v26 = vsub.f32 %v2291_v62, %v2435_v19  ;;  %v2639_v32 = vsub.f32 %v2277_v39, %v2435_v19  ;;  %v2643_v23 = vsub.f32 %v2287_v53, %v2435_v19 }
 0x194   :  { %4322 = vst [vmem:[#allocation10_spill] sm:$0xff] %v2611_v55  ;;  %4323 = vst [vmem:[#allocation13_spill] sm:$0xff] %v2615_v61  ;;  %v2647_v29 = vsub.f32 %v2305_v18, %v2435_v19  ;;  %v2651_v50 = vsub.f32 %v2315_v30, %v2435_v19  ;;  %v2655_v62 = vsub.f32 %v2301_v11, %v2435_v19 }
 0x195   :  { %4324 = vst [vmem:[#allocation8_spill] sm:$0xff] %v2619_v10  ;;  %4325 = vst [vmem:[#allocation11_spill] sm:$0xff] %v2623_v16  ;;  %v2659_v39 = vsub.f32 %v2311_v21, %v2435_v19  ;;  %v2663_v53 = vsub.f32 %v2329_v2, %v2435_v19  ;;  %v2683_v2 = vsub.f32 %v2363_v4, %v2435_v19 }
 0x196   :  { %4326 = vst [vmem:[#allocation15_spill] sm:$0xff] %v2627_v7  ;;  %4327 = vst [vmem:[#allocation18_spill] sm:$0xff] %v2631_v13  ;;  %v830_v4 = vmul.f32 %v2451_v49, %v2451_v49  ;;  %v833_v49 = vmul.f32 %v2463_v46, %v2463_v46 }
 0x197   :  { %4328 = vst [vmem:[#allocation17_spill] sm:$0xff] %v2635_v26  ;;  %4329 = vst [vmem:[#allocation23_spill] sm:$0xff] %v2639_v32 }
 0x198   :  { %4330 = vst [vmem:[#allocation24_spill] sm:$0xff] %v2643_v23  ;;  %4331 = vst [vmem:[#allocation25_spill] sm:$0xff] %v2647_v29  ;;  %v4335_v23 = vld [vmem:[#allocation14_spill] sm:$0xff]  ;;  %v4336_v29 = vld [vmem:[#allocation9_spill] sm:$0xff] }
 0x199   :  { %4332 = vst [vmem:[#allocation26_spill] sm:$0xff] %v2651_v50  ;;  %4333 = vst [vmem:[#allocation27_spill] sm:$0xff] %v2655_v62  ;;  %v2667_v18 = vsub.f32 %v4335_v23, %v2435_v19  ;;  %v2671_v30 = vsub.f32 %v4336_v29, %v2435_v19  ;;  %v4337_v50 = vld [vmem:[#allocation12_spill] sm:$0xff]  ;;  %v2687_v23 = vsub.f32 %v2349_v20, %v2435_v19 }
 0x19a   :  { %4334 = vst [vmem:[#allocation28_spill] sm:$0xff] %v2659_v39  ;;  %v2675_v11 = vsub.f32 %v4337_v50, %v2435_v19  ;;  %v4339_v62 = vld [vmem:[#allocation16_spill] sm:$0xff]  ;;  %4341 = vst [vmem:[#allocation12_spill] sm:$0xff] %v2683_v2  ;;  %v2691_v29 = vsub.f32 %v2359_v33, %v2435_v19  ;;  %v827_v50 = vmul.f32 %v2439_v38, %v2439_v38 }
 0x19b   :  { %v2679_v21 = vsub.f32 %v4339_v62, %v2435_v19  ;;  %4342 = vst [vmem:[#allocation16_spill] sm:$0xff] %v2687_v23  ;;  %v829_v62 = vmul.f32 %v2447_v3, %v2447_v3  ;;  %v831_v33 = vmul.f32 %v2455_v9, %v2455_v9 }
 0x19c   :  { %4338 = vst [vmem:[#allocation14_spill] sm:$0xff] %v2675_v11  ;;  %4343 = vst [vmem:[#allocation29_spill] sm:$0xff] %v2691_v29  ;;  %v828_v11 = vmul.f32 %v2443_v35, %v2443_v35  ;;  %v891_v2 = vsel %vm627_vm0, %v827_v50, 0.0  ;;  %v832_v35 = vmul.f32 %v2459_v42, %v2459_v42  ;;  %v896_v29 = vsel %vm627_vm0, %v830_v4, 0.0 }
 0x19d   :  { %4340 = vst [vmem:[#allocation9_spill] sm:$0xff] %v2679_v21  ;;  %v894_v19 = vsel %vm627_vm0, %v829_v62, 0.0  ;;  %v898_v50 = vsel %vm627_vm0, %v831_v33, 0.0  ;;  %v902_v62 = vsel %vm627_vm0, %v833_v49, 0.0  ;;  %v839_v49 = vmul.f32 %v2487_v60, %v2487_v60 }
 0x19e   :  { %v892_v20 = vsel %vm627_vm0, %v828_v11, 0.0  ;;  %v834_v11 = vmul.f32 %v2467_v40, %v2467_v40 }
 0x19f   :  { %v893_v23 = vadd.f32 %v892_v20, %v891_v2  ;;  %v900_v2 = vsel %vm627_vm0, %v832_v35, 0.0  ;;  %v838_v35 = vmul.f32 %v2483_v54, %v2483_v54 }
 0x1a1   :  { %v895_v38 = vadd.f32 %v894_v19, %v893_v23  ;;  %v835_v23 = vmul.f32 %v2471_v44, %v2471_v44 }
 0x1a3   :  { %v897_v3 = vadd.f32 %v896_v29, %v895_v38  ;;  %v836_v38 = vmul.f32 %v2475_v56, %v2475_v56  ;;  %v904_v29 = vsel %vm627_vm0, %v834_v11, 0.0  ;;  %v906_v33 = vsel %vm627_vm0, %v835_v23, 0.0 }
 0x1a4   :  { %v840_v11 = vmul.f32 %v2491_v8, %v2491_v8  ;;  %v841_v23 = vmul.f32 %v2495_v15, %v2495_v15 }
 0x1a5   :  { %v899_v21 = vadd.f32 %v898_v50, %v897_v3  ;;  %v837_v3 = vmul.f32 %v2479_v63, %v2479_v63 }
 0x1a7   :  { %v901_v20 = vadd.f32 %v900_v2, %v899_v21  ;;  %v908_v21 = vsel %vm627_vm0, %v836_v38, 0.0  ;;  %v842_v38 = vmul.f32 %v2499_v6, %v2499_v6 }
 0x1a9   :  { %v903_v19 = vadd.f32 %v902_v62, %v901_v20  ;;  %v910_v20 = vsel %vm627_vm0, %v837_v3, 0.0  ;;  %v843_v3 = vmul.f32 %v2503_v12, %v2503_v12 }
 0x1ab   :  { %v905_v4 = vadd.f32 %v904_v29, %v903_v19  ;;  %v912_v19 = vsel %vm627_vm0, %v838_v35, 0.0  ;;  %v844_v35 = vmul.f32 %v2507_v24, %v2507_v24 }
 0x1ad   :  { %v907_v50 = vadd.f32 %v906_v33, %v905_v4  ;;  %v914_v4 = vsel %vm627_vm0, %v839_v49, 0.0  ;;  %v845_v49 = vmul.f32 %v2511_v31, %v2511_v31 }
 0x1af   :  { %v909_v2 = vadd.f32 %v908_v21, %v907_v50  ;;  %v916_v50 = vsel %vm627_vm0, %v840_v11, 0.0  ;;  %v846_v11 = vmul.f32 %v2515_v22, %v2515_v22 }
 0x1b1   :  { %v911_v62 = vadd.f32 %v910_v20, %v909_v2  ;;  %v918_v2 = vsel %vm627_vm0, %v841_v23, 0.0  ;;  %v847_v23 = vmul.f32 %v2519_v28, %v2519_v28 }
 0x1b3   :  { %v913_v29 = vadd.f32 %v912_v19, %v911_v62  ;;  %v920_v62 = vsel %vm627_vm0, %v842_v38, 0.0  ;;  %v848_v38 = vmul.f32 %v2523_v48, %v2523_v48 }
 0x1b5   :  { %v915_v33 = vadd.f32 %v914_v4, %v913_v29  ;;  %v922_v29 = vsel %vm627_vm0, %v843_v3, 0.0  ;;  %v849_v3 = vmul.f32 %v2527_v59, %v2527_v59 }
 0x1b7   :  { %v917_v21 = vadd.f32 %v916_v50, %v915_v33  ;;  %v924_v33 = vsel %vm627_vm0, %v844_v35, 0.0  ;;  %v4344_v35 = vld [vmem:[#allocation5_spill] sm:$0xff] }
 0x1b9   :  { %v919_v20 = vadd.f32 %v918_v2, %v917_v21  ;;  %v926_v21 = vsel %vm627_vm0, %v845_v49, 0.0  ;;  %v851_v49 = vmul.f32 %v2535_v52, %v2535_v52 }
 0x1bb   :  { %v921_v19 = vadd.f32 %v920_v62, %v919_v20  ;;  %v928_v20 = vsel %vm627_vm0, %v846_v11, 0.0  ;;  %v4345_v11 = vld [vmem:[#allocation7_spill] sm:$0xff] }
 0x1bd   :  { %v923_v4 = vadd.f32 %v922_v29, %v921_v19  ;;  %v930_v19 = vsel %vm627_vm0, %v847_v23, 0.0  ;;  %v853_v23 = vmul.f32 %v2543_v5, %v2543_v5 }
 0x1bf   :  { %v925_v50 = vadd.f32 %v924_v33, %v923_v4  ;;  %v850_v4 = vmul.f32 %v4344_v35, %v4344_v35  ;;  %v932_v33 = vsel %vm627_vm0, %v848_v38, 0.0  ;;  %v854_v38 = vmul.f32 %v2547_v34, %v2547_v34 }
 0x1c1   :  { %v927_v2 = vadd.f32 %v926_v21, %v925_v50  ;;  %v934_v50 = vsel %vm627_vm0, %v849_v3, 0.0  ;;  %v942_v3 = vsel %vm627_vm0, %v853_v23, 0.0  ;;  %v859_v23 = vmul.f32 %v2567_v25, %v2567_v25 }
 0x1c3   :  { %v929_v62 = vadd.f32 %v928_v20, %v927_v2  ;;  %v852_v2 = vmul.f32 %v4345_v11, %v4345_v11  ;;  %v936_v20 = vsel %vm627_vm0, %v850_v4, 0.0  ;;  %v856_v4 = vmul.f32 %v2555_v1, %v2555_v1 }
 0x1c5   :  { %v931_v29 = vadd.f32 %v930_v19, %v929_v62  ;;  %v938_v62 = vsel %vm627_vm0, %v851_v49, 0.0 }
 0x1c7   :  { %v933_v28 = vadd.f32 %v932_v33, %v931_v29  ;;  %v940_v29 = vsel %vm627_vm0, %v852_v2, 0.0  ;;  %v858_v2 = vmul.f32 %v2563_v51, %v2563_v51 }
 0x1c9   :  { %v935_v21 = vadd.f32 %v934_v50, %v933_v28  ;;  %v855_v28 = vmul.f32 %v2551_v17, %v2551_v17 }
 0x1cb   :  { %v937_v59 = vadd.f32 %v936_v20, %v935_v21  ;;  %v944_v21 = vsel %vm627_vm0, %v854_v38, 0.0  ;;  %v946_v49 = vsel %vm627_vm0, %v855_v28, 0.0  ;;  %v860_v38 = vmul.f32 %v2571_v27, %v2571_v27 }
 0x1cc   :  { %v861_v28 = vmul.f32 %v2575_v36, %v2575_v36 }
 0x1cd   :  { %v939_v19 = vadd.f32 %v938_v62, %v937_v59  ;;  %v857_v59 = vmul.f32 %v2559_v14, %v2559_v14 }
 0x1cf   :  { %v941_v33 = vadd.f32 %v940_v29, %v939_v19  ;;  %v948_v19 = vsel %vm627_vm0, %v856_v4, 0.0  ;;  %v862_v4 = vmul.f32 %v2579_v57, %v2579_v57 }
 0x1d1   :  { %v943_v50 = vadd.f32 %v942_v3, %v941_v33  ;;  %v950_v33 = vsel %vm627_vm0, %v857_v59, 0.0  ;;  %v863_v59 = vmul.f32 %v2583_v37, %v2583_v37 }
 0x1d3   :  { %v945_v20 = vadd.f32 %v944_v21, %v943_v50  ;;  %v952_v50 = vsel %vm627_vm0, %v858_v2, 0.0  ;;  %v864_v2 = vmul.f32 %v2587_v43, %v2587_v43 }
 0x1d5   :  { %v947_v62 = vadd.f32 %v946_v49, %v945_v20  ;;  %v954_v20 = vsel %vm627_vm0, %v859_v23, 0.0  ;;  %v865_v23 = vmul.f32 %v2591_v47, %v2591_v47 }
 0x1d7   :  { %v949_v29 = vadd.f32 %v948_v19, %v947_v62  ;;  %v956_v62 = vsel %vm627_vm0, %v860_v38, 0.0  ;;  %v866_v38 = vmul.f32 %v2595_v41, %v2595_v41 }
 0x1d9   :  { %v951_v3 = vadd.f32 %v950_v33, %v949_v29  ;;  %v958_v29 = vsel %vm627_vm0, %v861_v28, 0.0  ;;  %v867_v28 = vmul.f32 %v2599_v45, %v2599_v45 }
 0x1db   :  { %v953_v21 = vadd.f32 %v952_v50, %v951_v3  ;;  %v960_v3 = vsel %vm627_vm0, %v862_v4, 0.0  ;;  %v868_v4 = vmul.f32 %v2603_v58, %v2603_v58 }
 0x1dd   :  { %v955_v49 = vadd.f32 %v954_v20, %v953_v21  ;;  %v962_v21 = vsel %vm627_vm0, %v863_v59, 0.0  ;;  %v869_v59 = vmul.f32 %v2607_v0, %v2607_v0 }
 0x1df   :  { %v957_v19 = vadd.f32 %v956_v62, %v955_v49  ;;  %v964_v49 = vsel %vm627_vm0, %v864_v2, 0.0  ;;  %v870_v2 = vmul.f32 %v2611_v55, %v2611_v55 }
 0x1e1   :  { %v959_v33 = vadd.f32 %v958_v29, %v957_v19  ;;  %v966_v19 = vsel %vm627_vm0, %v865_v23, 0.0  ;;  %v871_v23 = vmul.f32 %v2615_v61, %v2615_v61 }
 0x1e3   :  { %v961_v50 = vadd.f32 %v960_v3, %v959_v33  ;;  %v968_v33 = vsel %vm627_vm0, %v866_v38, 0.0  ;;  %v872_v38 = vmul.f32 %v2619_v10, %v2619_v10 }
 0x1e5   :  { %v963_v20 = vadd.f32 %v962_v21, %v961_v50  ;;  %v970_v50 = vsel %vm627_vm0, %v867_v28, 0.0  ;;  %v873_v28 = vmul.f32 %v2623_v16, %v2623_v16 }
 0x1e7   :  { %v965_v62 = vadd.f32 %v964_v49, %v963_v20  ;;  %v972_v20 = vsel %vm627_vm0, %v868_v4, 0.0  ;;  %v874_v4 = vmul.f32 %v2627_v7, %v2627_v7 }
 0x1e9   :  { %v967_v29 = vadd.f32 %v966_v19, %v965_v62  ;;  %v974_v62 = vsel %vm627_vm0, %v869_v59, 0.0  ;;  %v875_v59 = vmul.f32 %v2631_v13, %v2631_v13 }
 0x1eb   :  { %v969_v3 = vadd.f32 %v968_v33, %v967_v29  ;;  %v976_v29 = vsel %vm627_vm0, %v870_v2, 0.0  ;;  %v876_v2 = vmul.f32 %v2635_v26, %v2635_v26 }
 0x1ed   :  { %v971_v21 = vadd.f32 %v970_v50, %v969_v3  ;;  %v978_v3 = vsel %vm627_vm0, %v871_v23, 0.0  ;;  %v877_v23 = vmul.f32 %v2639_v32, %v2639_v32 }
 0x1ef   :  { %v973_v49 = vadd.f32 %v972_v20, %v971_v21  ;;  %v980_v21 = vsel %vm627_vm0, %v872_v38, 0.0  ;;  %v4346_v38 = vld [vmem:[#allocation24_spill] sm:$0xff] }
 0x1f1   :  { %v975_v19 = vadd.f32 %v974_v62, %v973_v49  ;;  %v982_v49 = vsel %vm627_vm0, %v873_v28, 0.0  ;;  %v4347_v28 = vld [vmem:[#allocation25_spill] sm:$0xff] }
 0x1f3   :  { %v977_v33 = vadd.f32 %v976_v29, %v975_v19  ;;  %v984_v19 = vsel %vm627_vm0, %v874_v4, 0.0  ;;  %v4348_v4 = vld [vmem:[#allocation26_spill] sm:$0xff] }
 0x1f5   :  { %v979_v50 = vadd.f32 %v978_v3, %v977_v33  ;;  %v986_v33 = vsel %vm627_vm0, %v875_v59, 0.0  ;;  %v4349_v59 = vld [vmem:[#allocation27_spill] sm:$0xff] }
 0x1f7   :  { %v981_v20 = vadd.f32 %v980_v21, %v979_v50  ;;  %v878_v50 = vmul.f32 %v4346_v38, %v4346_v38  ;;  %v988_v21 = vsel %vm627_vm0, %v876_v2, 0.0  ;;  %v882_v2 = vmul.f32 %v2659_v39, %v2659_v39 }
 0x1f9   :  { %v983_v62 = vadd.f32 %v982_v49, %v981_v20  ;;  %v879_v20 = vmul.f32 %v4347_v28, %v4347_v28  ;;  %v990_v49 = vsel %vm627_vm0, %v877_v23, 0.0 }
 0x1fb   :  { %v985_v29 = vadd.f32 %v984_v19, %v983_v62  ;;  %v880_v62 = vmul.f32 %v4348_v4, %v4348_v4  ;;  %v992_v19 = vsel %vm627_vm0, %v878_v50, 0.0  ;;  %v1000_v50 = vsel %vm627_vm0, %v882_v2, 0.0  ;;  %v4352_v2 = vld [vmem:[#allocation12_spill] sm:$0xff] }
 0x1fd   :  { %v987_v3 = vadd.f32 %v986_v33, %v985_v29  ;;  %v881_v29 = vmul.f32 %v4349_v59, %v4349_v59  ;;  %v994_v33 = vsel %vm627_vm0, %v879_v20, 0.0 }
 0x1ff   :  { %v989_v13 = vadd.f32 %v988_v21, %v987_v3  ;;  %v996_v3 = vsel %vm627_vm0, %v880_v62, 0.0  ;;  %v998_v23 = vsel %vm627_vm0, %v881_v29, 0.0  ;;  %v4350_v62 = vld [vmem:[#allocation14_spill] sm:$0xff]  ;;  %v4351_v29 = vld [vmem:[#allocation9_spill] sm:$0xff] }
 0x201   :  { %v991_v26 = vadd.f32 %v990_v49, %v989_v13  ;;  %v883_v13 = vmul.f32 %v2663_v53, %v2663_v53 }
 0x203   :  { %v993_v32 = vadd.f32 %v992_v19, %v991_v26  ;;  %v884_v26 = vmul.f32 %v2667_v18, %v2667_v18  ;;  %v1002_v20 = vsel %vm627_vm0, %v883_v13, 0.0  ;;  %v4353_v13 = vld [vmem:[#allocation16_spill] sm:$0xff] }
 0x205   :  { %v995_v38 = vadd.f32 %v994_v33, %v993_v32  ;;  %v885_v32 = vmul.f32 %v2671_v30, %v2671_v30 }
 0x207   :  { %v997_v21 = vadd.f32 %v996_v3, %v995_v38  ;;  %v886_v38 = vmul.f32 %v4350_v62, %v4350_v62  ;;  %v1004_v3 = vsel %vm627_vm0, %v884_v26, 0.0  ;;  %v4354_v26 = vld [vmem:[#allocation29_spill] sm:$0xff] }
 0x209   :  { %v999_v49 = vadd.f32 %v998_v23, %v997_v21  ;;  %v887_v21 = vmul.f32 %v4351_v29, %v4351_v29  ;;  %v1006_v23 = vsel %vm627_vm0, %v885_v32, 0.0 }
 0x20b   :  { %v1001_v19 = vadd.f32 %v1000_v50, %v999_v49  ;;  %v888_v49 = vmul.f32 %v4352_v2, %v4352_v2  ;;  %v1008_v50 = vsel %vm627_vm0, %v886_v38, 0.0 }
 0x20d   :  { %v1003_v33 = vadd.f32 %v1002_v20, %v1001_v19  ;;  %v889_v19 = vmul.f32 %v4353_v13, %v4353_v13  ;;  %v1010_v20 = vsel %vm627_vm0, %v887_v21, 0.0 }
 0x20f   :  { %v1005_v39 = vadd.f32 %v1004_v3, %v1003_v33  ;;  %v890_v33 = vmul.f32 %v4354_v26, %v4354_v26  ;;  %v1012_v3 = vsel %vm627_vm0, %v888_v49, 0.0 }
 0x211   :  { %v1007_v59 = vadd.f32 %v1006_v23, %v1005_v39  ;;  %v1014_v39 = vsel %vm627_vm0, %v889_v19, 0.0  ;;  %v1016_v23 = vsel %vm627_vm0, %v890_v33, 0.0  ;;  %v4364_v33 = vld [vmem:[#allocation20_spill] sm:$0xff] }
 0x213   :  { %v1009_v4 = vadd.f32 %v1008_v50, %v1007_v59 }
 0x215   :  { %v1011_v28 = vadd.f32 %v1010_v20, %v1009_v4  ;;  %v1030_v20 = vlaneseq }
 0x217   :  { %v1013_v7 = vadd.f32 %v1012_v3, %v1011_v28  ;;  %v1031_v0 = vshrl.u32 %v1030_v20, 7  ;;  %v1025_v28 = vld [vmem:[%s4202_s2] sm:$0x1]  ;;  %v4368_v20 = vld [vmem:[#allocation3_spill] sm:$0xff] }
 0x219   :  { %v1015_v32 = vadd.f32 %v1014_v39, %v1013_v7  ;;  %v1032_v49 = vsub.s32 0, %v1031_v0 }
 0x21b   :  { %v1017_v16 = vadd.f32 %v1016_v23, %v1015_v32  ;;  %v4366_v32 = vld [vmem:[#allocation22_spill] sm:$0xff] }
 0x21d   :  { %v1018_v38 = vrot.slane %v1017_v16, 4 }
 0x21f   :  { %v1019_v59 = vadd.f32 %v1018_v38, %v1017_v16 }
 0x221   :  { %v1020_v50 = vrot.slane %v1019_v59, 2 }
 0x223   :  { %v1021_v10 = vadd.f32 %v1020_v50, %v1019_v59 }
 0x225   :  { %v1022_v61 = vrot.slane %v1021_v10, 1 }
 0x227   :  { %v1023_v55 = vadd.f32 %v1022_v61, %v1021_v10 }
 0x229   :  { %v1024_v21 = vmul.f32 0.001953125, %v1023_v55 }
 0x22b   :  { %v1026_v4 = vadd.f32 1e-05, %v1024_v21 }
 0x22d   :  { %2032 = vrsqrt.f32 %v1026_v4  ;;  %v4367_v4 = vld [vmem:[#allocation2_spill] sm:$0xff] }
 0x237   :  { %v2033_v58 = vpop.eup %2032 }
 0x238   :  { %v1028_v7 = vmul.f32 %v2033_v58, %v1025_v28 }
 0x23a   :  { %v2888_v19 = vrot.slane %v1028_v7, %v1032_v49  ;;  %v4369_v49 = vld [vmem:[#allocation4_spill] sm:$0xff] }
 0x23c   :  { %v2892_v16 = vmul.f32 %v2888_v19, %v2663_v53  ;;  %v2896_v55 = vmul.f32 %v2888_v19, %v2667_v18  ;;  %v2900_v61 = vmul.f32 %v2888_v19, %v2671_v30  ;;  %v2904_v10 = vmul.f32 %v2888_v19, %v4350_v62  ;;  %v4363_v30 = vld [vmem:[#allocation19_spill] sm:$0xff] }
 0x23d   :  { %v2908_v58 = vmul.f32 %v2888_v19, %v4351_v29  ;;  %v2912_v0 = vmul.f32 %v2888_v19, %v4352_v2  ;;  %v2916_v53 = vmul.f32 %v2888_v19, %v4353_v13  ;;  %v2920_v18 = vmul.f32 %v2888_v19, %v4354_v26  ;;  %v4365_v29 = vld [vmem:[#allocation21_spill] sm:$0xff] }
 0x23e   :  { %4355 = vst [vmem:[#allocation5_spill] sm:$0xff] %v2892_v16  ;;  %4356 = vst [vmem:[#allocation7_spill] sm:$0xff] %v2896_v55  ;;  %v1035_v62 = vmul.f32 %v2888_v19, %v4363_v30  ;;  %v1036_v3 = vmul.f32 %v2888_v19, %v4364_v33  ;;  %v1037_v39 = vmul.f32 %v2888_v19, %v4365_v29  ;;  %v4370_v30 = vld [vmem:[#allocation6_spill] sm:$0xff]  ;;  %v4372_v29 = vld [vmem:[#allocation13_spill] sm:$0xff] }
 0x23f   :  { %4357 = vst [vmem:[#allocation14_spill] sm:$0xff] %v2900_v61  ;;  %4358 = vst [vmem:[#allocation9_spill] sm:$0xff] %v2904_v10  ;;  %v1038_v2 = vmul.f32 %v2888_v19, %v4366_v32  ;;  %v1039_v13 = vmul.f32 %v2888_v19, %v2455_v9  ;;  %v1040_v23 = vmul.f32 %v2888_v19, %v2459_v42  ;;  %v4371_v33 = vld [vmem:[#allocation10_spill] sm:$0xff]  ;;  %v4373_v32 = vld [vmem:[#allocation8_spill] sm:$0xff] }
 0x240   :  { %4359 = vst [vmem:[#allocation12_spill] sm:$0xff] %v2908_v58  ;;  %4360 = vst [vmem:[#allocation16_spill] sm:$0xff] %v2912_v0  ;;  %v1041_v26 = vmul.f32 %v2888_v19, %v2463_v46  ;;  %v1042_v38 = vmul.f32 %v2888_v19, %v2467_v40  ;;  %v1043_v59 = vmul.f32 %v2888_v19, %v2471_v44  ;;  %v4380_v0 = vld [vmem:[#allocation24_spill] sm:$0xff]  ;;  %v4381_v58 = vld [vmem:[#allocation25_spill] sm:$0xff] }
 0x241   :  { %4361 = vst [vmem:[#allocation29_spill] sm:$0xff] %v2916_v53  ;;  %4362 = vst [vmem:[#allocation30_spill] sm:$0xff] %v2920_v18  ;;  %v1044_v50 = vmul.f32 %v2888_v19, %v2475_v56  ;;  %v1045_v21 = vmul.f32 %v2888_v19, %v2479_v63  ;;  %v1046_v9 = vmul.f32 %v2888_v19, %v2483_v54  ;;  %v4378_v18 = vld [vmem:[#allocation17_spill] sm:$0xff]  ;;  %v4379_v53 = vld [vmem:[#allocation23_spill] sm:$0xff] }
 0x242   :  { %v1047_v42 = vmul.f32 %v2888_v19, %v2487_v60  ;;  %v1048_v46 = vmul.f32 %v2888_v19, %v2491_v8  ;;  %v1049_v40 = vmul.f32 %v2888_v19, %v2495_v15  ;;  %v1050_v44 = vmul.f32 %v2888_v19, %v2499_v6  ;;  %v4382_v61 = vld [vmem:[#allocation26_spill] sm:$0xff]  ;;  %v4383_v16 = vld [vmem:[#allocation27_spill] sm:$0xff] }
 0x243   :  { %v1051_v56 = vmul.f32 %v2888_v19, %v2503_v12  ;;  %v1052_v63 = vmul.f32 %v2888_v19, %v2507_v24  ;;  %v1053_v54 = vmul.f32 %v2888_v19, %v2511_v31  ;;  %v1054_v60 = vmul.f32 %v2888_v19, %v2515_v22 }
 0x244   :  { %v1055_v8 = vmul.f32 %v2888_v19, %v4367_v4  ;;  %v1056_v15 = vmul.f32 %v2888_v19, %v2523_v48  ;;  %v1057_v6 = vmul.f32 %v2888_v19, %v4368_v20  ;;  %v1058_v12 = vmul.f32 %v2888_v19, %v4344_v35  ;;  %v4374_v4 = vld [vmem:[#allocation11_spill] sm:$0xff] }
 0x245   :  { %v1059_v24 = vmul.f32 %v2888_v19, %v2535_v52  ;;  %v1060_v31 = vmul.f32 %v2888_v19, %v4345_v11  ;;  %v1061_v22 = vmul.f32 %v2888_v19, %v2543_v5  ;;  %v1062_v28 = vmul.f32 %v2888_v19, %v2547_v34  ;;  %v4376_v20 = vld [vmem:[#allocation15_spill] sm:$0xff] }
 0x246   :  { %v1063_v48 = vmul.f32 %v2888_v19, %v2551_v17  ;;  %v1064_v7 = vmul.f32 %v2888_v19, %v2555_v1  ;;  %v1065_v35 = vmul.f32 %v2888_v19, %v2559_v14  ;;  %v1066_v52 = vmul.f32 %v2888_v19, %v2563_v51 }
 0x247   :  { %v1067_v11 = vmul.f32 %v2888_v19, %v2567_v25  ;;  %v1068_v5 = vmul.f32 %v2888_v19, %v2571_v27  ;;  %v1069_v34 = vmul.f32 %v2888_v19, %v2575_v36  ;;  %v1070_v17 = vmul.f32 %v2888_v19, %v2579_v57 }
 0x248   :  { %v1071_v1 = vmul.f32 %v2888_v19, %v2583_v37  ;;  %v1072_v14 = vmul.f32 %v2888_v19, %v2587_v43  ;;  %v1073_v51 = vmul.f32 %v2888_v19, %v2591_v47  ;;  %v1074_v25 = vmul.f32 %v2888_v19, %v2595_v41 }
 0x249   :  { %v1075_v27 = vmul.f32 %v2888_v19, %v2599_v45  ;;  %v1076_v36 = vmul.f32 %v2888_v19, %v4369_v49  ;;  %v1077_v57 = vmul.f32 %v2888_v19, %v4370_v30  ;;  %v1078_v37 = vmul.f32 %v2888_v19, %v4371_v33  ;;  %v3019_v45 = vld [vmem:[%s4203_s3] ss:$0 sm:$0xff] }
 0x24a   :  { %v1079_v43 = vmul.f32 %v2888_v19, %v4372_v29  ;;  %v1080_v47 = vmul.f32 %v2888_v19, %v4373_v32  ;;  %v1081_v41 = vmul.f32 %v2888_v19, %v4374_v4  ;;  %4375 = vst [vmem:[#allocation19_spill] sm:$0xff] %v3019_v45  ;;  %v1082_v49 = vmul.f32 %v2888_v19, %v4376_v20  ;;  %v4377_v30 = vld [vmem:[#allocation18_spill] sm:$0xff]  ;;  %v4384_v45 = vld [vmem:[#allocation28_spill] sm:$0xff] }
 0x24b   :  { %v1083_v33 = vmul.f32 %v2888_v19, %v4377_v30  ;;  %v1084_v29 = vmul.f32 %v2888_v19, %v4378_v18  ;;  %v1085_v32 = vmul.f32 %v2888_v19, %v4379_v53  ;;  %v1086_v4 = vmul.f32 %v2888_v19, %v4380_v0 }
 0x24c   :  { %v1087_v10 = vmul.f32 %v2888_v19, %v4381_v58  ;;  %v1088_v55 = vmul.f32 %v2888_v19, %v4382_v61  ;;  %v1089_v20 = vmul.f32 %v2888_v19, %v4383_v16  ;;  %v1090_v30 = vmul.f32 %v2888_v19, %v4384_v45 }
 0x251   :  { %v4385_v18 = vld [vmem:[#allocation19_spill] sm:$0xff] }
 0x252   :  { %v3040_v53 = vadd.f32 %v4385_v18, %v1035_v62  ;;  %v3043_v0 = vadd.f32 %v4385_v18, %v1036_v3  ;;  %v3046_v58 = vadd.f32 %v4385_v18, %v1037_v39  ;;  %v3049_v61 = vadd.f32 %v4385_v18, %v1038_v2 }
 0x253   :  { %v3052_v16 = vadd.f32 %v4385_v18, %v1039_v13  ;;  %v3055_v19 = vadd.f32 %v4385_v18, %v1040_v23  ;;  %v3058_v45 = vadd.f32 %v4385_v18, %v1041_v26  ;;  %v3061_v62 = vadd.f32 %v4385_v18, %v1042_v38 }
 0x254   :  { %v3064_v3 = vadd.f32 %v4385_v18, %v1043_v59  ;;  %v3067_v39 = vadd.f32 %v4385_v18, %v1044_v50  ;;  %v3070_v2 = vadd.f32 %v4385_v18, %v1045_v21  ;;  %v3073_v13 = vadd.f32 %v4385_v18, %v1046_v9 }
 0x255   :  { %v3076_v23 = vadd.f32 %v4385_v18, %v1047_v42  ;;  %v3079_v26 = vadd.f32 %v4385_v18, %v1048_v46  ;;  %v3082_v38 = vadd.f32 %v4385_v18, %v1049_v40  ;;  %v3085_v59 = vadd.f32 %v4385_v18, %v1050_v44 }
 0x256   :  { %v3088_v50 = vadd.f32 %v4385_v18, %v1051_v56  ;;  %v3091_v21 = vadd.f32 %v4385_v18, %v1052_v63  ;;  %v3094_v9 = vadd.f32 %v4385_v18, %v1053_v54  ;;  %v3097_v42 = vadd.f32 %v4385_v18, %v1054_v60 }
 0x257   :  { %v3100_v46 = vadd.f32 %v4385_v18, %v1055_v8  ;;  %v3103_v40 = vadd.f32 %v4385_v18, %v1056_v15  ;;  %v3106_v44 = vadd.f32 %v4385_v18, %v1057_v6  ;;  %v3109_v56 = vadd.f32 %v4385_v18, %v1058_v12 }
 0x258   :  { %v3112_v63 = vadd.f32 %v4385_v18, %v1059_v24  ;;  %v3115_v54 = vadd.f32 %v4385_v18, %v1060_v31  ;;  %v3118_v60 = vadd.f32 %v4385_v18, %v1061_v22  ;;  %v3121_v8 = vadd.f32 %v4385_v18, %v1062_v28 }
 0x259   :  { %v3124_v15 = vadd.f32 %v4385_v18, %v1063_v48  ;;  %v3127_v6 = vadd.f32 %v4385_v18, %v1064_v7  ;;  %v3130_v12 = vadd.f32 %v4385_v18, %v1065_v35  ;;  %v3133_v24 = vadd.f32 %v4385_v18, %v1066_v52 }
 0x25a   :  { %v3136_v31 = vadd.f32 %v4385_v18, %v1067_v11  ;;  %v3139_v22 = vadd.f32 %v4385_v18, %v1068_v5  ;;  %v3142_v28 = vadd.f32 %v4385_v18, %v1069_v34  ;;  %v3145_v48 = vadd.f32 %v4385_v18, %v1070_v17 }
 0x25b   :  { %v3148_v7 = vadd.f32 %v4385_v18, %v1071_v1  ;;  %v3151_v35 = vadd.f32 %v4385_v18, %v1072_v14  ;;  %v3154_v52 = vadd.f32 %v4385_v18, %v1073_v51  ;;  %v3157_v11 = vadd.f32 %v4385_v18, %v1074_v25 }
 0x25c   :  { %v3160_v5 = vadd.f32 %v4385_v18, %v1075_v27  ;;  %v3163_v34 = vadd.f32 %v4385_v18, %v1076_v36  ;;  %v3166_v17 = vadd.f32 %v4385_v18, %v1077_v57  ;;  %v3169_v1 = vadd.f32 %v4385_v18, %v1078_v37 }
 0x25d   :  { %v3172_v14 = vadd.f32 %v4385_v18, %v1079_v43  ;;  %v3175_v51 = vadd.f32 %v4385_v18, %v1080_v47  ;;  %v3178_v25 = vadd.f32 %v4385_v18, %v1081_v41  ;;  %v3181_v27 = vadd.f32 %v4385_v18, %v1082_v49 }
 0x25e   :  { %v3184_v36 = vadd.f32 %v4385_v18, %v1083_v33  ;;  %v3187_v57 = vadd.f32 %v4385_v18, %v1084_v29  ;;  %v3190_v37 = vadd.f32 %v4385_v18, %v1085_v32  ;;  %v3193_v43 = vadd.f32 %v4385_v18, %v1086_v4  ;;  %v4395_v29 = vld [vmem:[#allocation5_spill] sm:$0xff]  ;;  %v4397_v32 = vld [vmem:[#allocation7_spill] sm:$0xff] }
 0x25f   :  { %4386 = vst [vmem:[#allocation20_spill] sm:$0xff] %v3175_v51  ;;  %v3196_v47 = vadd.f32 %v4385_v18, %v1087_v10  ;;  %v3199_v41 = vadd.f32 %v4385_v18, %v1088_v55  ;;  %v3202_v49 = vadd.f32 %v4385_v18, %v1089_v20  ;;  %v3205_v33 = vadd.f32 %v4385_v18, %v1090_v30  ;;  %v4401_v55 = vld [vmem:[#allocation9_spill] sm:$0xff]  ;;  %v4403_v20 = vld [vmem:[#allocation12_spill] sm:$0xff] }
 0x260   :  { %4387 = vst [vmem:[#allocation21_spill] sm:$0xff] %v3184_v36  ;;  %4388 = vst [vmem:[#allocation22_spill] sm:$0xff] %v3187_v57  ;;  %v3209_v57 = vadd.f32 %v4385_v18, %v4395_v29  ;;  %v3213_v4 = vadd.f32 %v4385_v18, %v4397_v32  ;;  %v3225_v30 = vadd.f32 %v4385_v18, %v4403_v20  ;;  %vm1170_vm1 = vcmp.gt.f32.partialorder %v3040_v53, 0.0 }
 0x261   :  { %4389 = vst [vmem:[#allocation2_spill] sm:$0xff] %v3190_v37  ;;  %4390 = vst [vmem:[#allocation3_spill] sm:$0xff] %v3193_v43  ;;  %v4399_v43 = vld [vmem:[#allocation14_spill] sm:$0xff]  ;;  %vm1171_vm2 = vcmp.gt.f32.partialorder %v3043_v0, 0.0  ;;  %vm1172_vm3 = vcmp.gt.f32.partialorder %v3046_v58, 0.0  ;;  %vm1173_vm4 = vcmp.gt.f32.partialorder %v3049_v61, 0.0 }
 0x262   :  { %4391 = vst [vmem:[#allocation4_spill] sm:$0xff] %v3196_v47  ;;  %4392 = vst [vmem:[#allocation6_spill] sm:$0xff] %v3199_v41  ;;  %v3217_v10 = vadd.f32 %v4385_v18, %v4399_v43  ;;  %v3221_v41 = vadd.f32 %v4385_v18, %v4401_v55  ;;  %vm1174_vm5 = vcmp.gt.f32.partialorder %v3052_v16, 0.0  ;;  %vm1175_vm6 = vcmp.gt.f32.partialorder %v3055_v19, 0.0  ;;  %v4407_v43 = vld [vmem:[#allocation29_spill] sm:$0xff] }
 0x263   :  { %4393 = vst [vmem:[#allocation10_spill] sm:$0xff] %v3202_v49  ;;  %4394 = vst [vmem:[#allocation13_spill] sm:$0xff] %v3205_v33  ;;  %v4405_v33 = vld [vmem:[#allocation16_spill] sm:$0xff]  ;;  %vm1176_vm7 = vcmp.gt.f32.partialorder %v3058_v45, 0.0  ;;  %vm1177_vm8 = vcmp.gt.f32.partialorder %v3061_v62, 0.0  ;;  %vm1178_vm9 = vcmp.gt.f32.partialorder %v3064_v3, 0.0 }
 0x264   :  { %4396 = vst [vmem:[#allocation8_spill] sm:$0xff] %v3209_v57  ;;  %4398 = vst [vmem:[#allocation11_spill] sm:$0xff] %v3213_v4  ;;  %v3229_v29 = vadd.f32 %v4385_v18, %v4405_v33  ;;  %v3242_v33 = vadd.f32 %v4385_v18, %v4407_v43  ;;  %vm1179_vm10 = vcmp.gt.f32.partialorder %v3067_v39, 0.0  ;;  %v1234_v32 = vmul.f32 0.2, %v3040_v53 }
 0x265   :  { %4400 = vst [vmem:[#allocation15_spill] sm:$0xff] %v3217_v10  ;;  %4402 = vst [vmem:[#allocation18_spill] sm:$0xff] %v3221_v41  ;;  %v1235_v55 = vmul.f32 0.2, %v3043_v0  ;;  %v1236_v20 = vmul.f32 0.2, %v3046_v58 }
 0x266   :  { %4404 = vst [vmem:[#allocation17_spill] sm:$0xff] %v3225_v30  ;;  %4406 = vst [vmem:[#allocation23_spill] sm:$0xff] %v3229_v29  ;;  %v4409_v29 = vld [vmem:[#allocation30_spill] sm:$0xff]  ;;  %vm1180_vm11 = vcmp.gt.f32.partialorder %v3070_v2, 0.0  ;;  %v1237_v41 = vmul.f32 0.2, %v3049_v61 }
 0x267   :  { %4408 = vst [vmem:[#allocation24_spill] sm:$0xff] %v3242_v33  ;;  %v3250_v30 = vadd.f32 %v4385_v18, %v4409_v29  ;;  %v1238_v10 = vmul.f32 0.2, %v3052_v16  ;;  %v1239_v43 = vmul.f32 0.2, %v3055_v19  ;;  %vm1181_vm12 = vcmp.gt.f32.partialorder %v3073_v13, 0.0 }
 0x268   :  { %v1240_v33 = vmul.f32 0.2, %v3058_v45  ;;  %v1241_v4 = vmul.f32 0.2, %v3061_v62  ;;  %v1242_v57 = vmul.f32 0.2, %v3064_v3  ;;  %v3263_v18 = vsel %vm1170_vm1, %v3040_v53, %v1234_v32 }
 0x269   :  { %4410 = vst [vmem:[#allocation25_spill] sm:$0xff] %v3250_v30  ;;  %4411 = vst [vmem:[#allocation26_spill] sm:$0xff] %v3263_v18  ;;  %vm1182_vm13 = vcmp.gt.f32.partialorder %v3076_v23, 0.0  ;;  %v1243_v29 = vmul.f32 0.2, %v3067_v39  ;;  %v3274_v47 = vsel %vm1171_vm2, %v3043_v0, %v1235_v55  ;;  %vm1183_vm14 = vcmp.gt.f32.partialorder %v3079_v26, 0.0 }
 0x26a   :  { %v1244_v30 = vmul.f32 0.2, %v3070_v2  ;;  %v3269_v49 = vmul.f32 0.2, %v3073_v13  ;;  %4412 = vst [vmem:[#allocation27_spill] sm:$0xff] %v3274_v47  ;;  %v3289_v18 = vsel %vm1172_vm3, %v3046_v58, %v1236_v20  ;;  %vm1184_vm15 = vcmp.gt.f32.partialorder %v3082_v38, 0.0 }
 0x26b   :  { %v3278_v37 = vmul.f32 0.2, %v3076_v23  ;;  %v3281_v53 = vmul.f32 0.2, %v3079_v26  ;;  %v3284_v32 = vmul.f32 0.2, %v3082_v38 }
 0x26c   :  { %4414 = vst [vmem:[#allocation19_spill] sm:$0xff] %v3289_v18  ;;  %v3293_v0 = vmul.f32 0.2, %v3085_v59  ;;  %v3296_v55 = vmul.f32 0.2, %v3088_v50  ;;  %vm1185_vm0 = vcmp.gt.f32.partialorder %v3085_v59, 0.0 }
 0x26d   :  { %4413 = vst [vmem:[#allocation28_spill] sm:$0xff] %v3284_v32  ;;  %v3299_v47 = vmul.f32 0.2, %v3091_v21  ;;  %v3304_v32 = vsel %vm1173_vm4, %v3049_v61, %v1237_v41  ;;  %v3308_v58 = vmul.f32 0.2, %v3094_v9  ;;  %vm1186_vm1 = vcmp.gt.f32.partialorder %v3088_v50, 0.0 }
 0x26e   :  { %4416 = vst [vmem:[#allocation7_spill] sm:$0xff] %v3304_v32  ;;  %v3311_v20 = vmul.f32 0.2, %v3097_v42  ;;  %v3314_v18 = vmul.f32 0.2, %v3100_v46  ;;  %vm1187_vm2 = vcmp.gt.f32.partialorder %v3091_v21, 0.0 }
 0x26f   :  { %4415 = vst [vmem:[#allocation5_spill] sm:$0xff] %v3299_v47  ;;  %v3319_v47 = vsel %vm1174_vm5, %v3052_v16, %v1238_v10  ;;  %v3323_v61 = vmul.f32 0.2, %v3103_v40  ;;  %v3326_v41 = vmul.f32 0.2, %v3106_v44  ;;  %vm1188_vm3 = vcmp.gt.f32.partialorder %v3094_v9, 0.0 }
 0x270   :  { %4417 = vst [vmem:[#allocation14_spill] sm:$0xff] %v3314_v18  ;;  %4418 = vst [vmem:[#allocation9_spill] sm:$0xff] %v3319_v47  ;;  %v3329_v32 = vmul.f32 0.2, %v3109_v56  ;;  %v3334_v18 = vsel %vm1175_vm6, %v3055_v19, %v1239_v43  ;;  %v3338_v16 = vmul.f32 0.2, %v3112_v63 }
 0x271   :  { %4420 = vst [vmem:[#allocation16_spill] sm:$0xff] %v3334_v18  ;;  %v3341_v10 = vmul.f32 0.2, %v3115_v54  ;;  %v3344_v47 = vmul.f32 0.2, %v3118_v60  ;;  %vm1189_vm4 = vcmp.gt.f32.partialorder %v3097_v42, 0.0 }
 0x272   :  { %4419 = vst [vmem:[#allocation12_spill] sm:$0xff] %v3329_v32  ;;  %v3349_v32 = vsel %vm1176_vm7, %v3058_v45, %v1240_v33  ;;  %v3353_v19 = vmul.f32 0.2, %v3121_v8  ;;  %v3356_v43 = vmul.f32 0.2, %v3124_v15  ;;  %vm1192_vm7 = vcmp.gt.f32.partialorder %v3106_v44, 0.0 }
 0x273   :  { %4421 = vst [vmem:[#allocation29_spill] sm:$0xff] %v3344_v47  ;;  %4422 = vst [vmem:[#allocation30_spill] sm:$0xff] %v3349_v32  ;;  %v3359_v18 = vmul.f32 0.2, %v3127_v6  ;;  %v3364_v47 = vsel %vm1177_vm8, %v3061_v62, %v1241_v4  ;;  %v3370_v45 = vmul.f32 0.2, %v3130_v12  ;;  %v3381_v62 = vsel %vm1178_vm9, %v3064_v3, %v1242_v57 }
 0x274   :  { %4423 = vst [vmem:[#allocation31_spill] sm:$0xff] %v3364_v47  ;;  %v3373_v33 = vmul.f32 0.2, %v3133_v24  ;;  %v3376_v32 = vmul.f32 0.2, %v3136_v31  ;;  %4425 = vst [vmem:[#allocation33_spill] sm:$0xff] %v3381_v62  ;;  %v3399_v3 = vsel %vm1179_vm10, %v3067_v39, %v1243_v29  ;;  %v3417_v39 = vsel %vm1180_vm11, %v3070_v2, %v1244_v30 }
 0x275   :  { %v3388_v4 = vmul.f32 0.2, %v3139_v22  ;;  %v3391_v47 = vmul.f32 0.2, %v3142_v28  ;;  %4427 = vst [vmem:[#allocation35_spill] sm:$0xff] %v3399_v3  ;;  %vm1196_vm9 = vcmp.gt.f32.partialorder %v3118_v60, 0.0  ;;  %v3436_v2 = vsel %vm1181_vm12, %v3073_v13, %v3269_v49 }
 0x276   :  { %4424 = vst [vmem:[#allocation32_spill] sm:$0xff] %v3376_v32  ;;  %v3394_v32 = vmul.f32 0.2, %v3145_v48  ;;  %v3406_v57 = vmul.f32 0.2, %v3148_v7  ;;  %4429 = vst [vmem:[#allocation37_spill] sm:$0xff] %v3417_v39  ;;  %v3455_v13 = vsel %vm1182_vm13, %v3076_v23, %v3278_v37  ;;  %v3474_v23 = vsel %vm1183_vm14, %v3079_v26, %v3281_v53 }
 0x277   :  { %v3409_v62 = vmul.f32 0.2, %v3151_v35  ;;  %vm1200_vm10 = vcmp.gt.f32.partialorder %v3130_v12, 0.0  ;;  %v3424_v29 = vmul.f32 0.2, %v3157_v11  ;;  %4431 = vst [vmem:[#allocation39_spill] sm:$0xff] %v3436_v2 }
 0x278   :  { %4426 = vst [vmem:[#allocation34_spill] sm:$0xff] %v3394_v32  ;;  %v3412_v32 = vmul.f32 0.2, %v3154_v52  ;;  %v3427_v3 = vmul.f32 0.2, %v3160_v5  ;;  %vm1204_vm11 = vcmp.gt.f32.partialorder %v3142_v28, 0.0 }
 0x279   :  { %v3443_v30 = vmul.f32 0.2, %v3166_v17  ;;  %v3446_v39 = vmul.f32 0.2, %v3169_v1  ;;  %4434 = vst [vmem:[#allocation42_spill] sm:$0xff] %v3455_v13  ;;  %vm1208_vm12 = vcmp.gt.f32.partialorder %v3154_v52, 0.0 }
 0x27a   :  { %4428 = vst [vmem:[#allocation36_spill] sm:$0xff] %v3412_v32  ;;  %v3430_v32 = vmul.f32 0.2, %v3163_v34  ;;  %v3462_v49 = vmul.f32 0.2, %v3175_v51  ;;  %4438 = vst [vmem:[#allocation46_spill] sm:$0xff] %v3474_v23 }
 0x27b   :  { %4432 = vst [vmem:[#allocation40_spill] sm:$0xff] %v3446_v39  ;;  %v3465_v2 = vmul.f32 0.2, %v3178_v25  ;;  %vm1212_vm13 = vcmp.gt.f32.partialorder %v3166_v17, 0.0  ;;  %v3481_v37 = vmul.f32 0.2, %v3184_v36 }
 0x27c   :  { %4430 = vst [vmem:[#allocation38_spill] sm:$0xff] %v3430_v32  ;;  %v3449_v32 = vmul.f32 0.2, %v3172_v14  ;;  %4435 = vst [vmem:[#allocation43_spill] sm:$0xff] %v3462_v49  ;;  %v4440_v13 = vld [vmem:[#allocation22_spill] sm:$0xff]  ;;  %v4444_v39 = vld [vmem:[#allocation28_spill] sm:$0xff] }
 0x27d   :  { %4436 = vst [vmem:[#allocation44_spill] sm:$0xff] %v3465_v2  ;;  %4439 = vst [vmem:[#allocation47_spill] sm:$0xff] %v3481_v37  ;;  %v3484_v2 = vmul.f32 0.2, %v4440_v13  ;;  %v3493_v26 = vsel %vm1184_vm15, %v3082_v38, %v4444_v39  ;;  %vm1216_vm14 = vcmp.gt.f32.partialorder %v3178_v25, 0.0  ;;  %v4446_v53 = vld [vmem:[#allocation3_spill] sm:$0xff]  ;;  %v3512_v38 = vsel %vm1185_vm0, %v3085_v59, %v3293_v0 }
 0x27e   :  { %4433 = vst [vmem:[#allocation41_spill] sm:$0xff] %v3449_v32  ;;  %v3468_v32 = vmul.f32 0.2, %v3181_v27  ;;  %4445 = vst [vmem:[#allocation28_spill] sm:$0xff] %v3493_v26  ;;  %v3500_v23 = vmul.f32 0.2, %v4446_v53  ;;  %v3525_v59 = vsel %vm1186_vm1, %v3088_v50, %v3296_v55 }
 0x27f   :  { %4441 = vst [vmem:[#allocation48_spill] sm:$0xff] %v3484_v2  ;;  %v4448_v2 = vld [vmem:[#allocation4_spill] sm:$0xff]  ;;  %4452 = vst [vmem:[#allocation53_spill] sm:$0xff] %v3512_v38  ;;  %v4453_v39 = vld [vmem:[#allocation10_spill] sm:$0xff]  ;;  %vm4467_vm8 = vcmp.gt.f32.partialorder %v3100_v46, 0.0 }
 0x280   :  { %4437 = vst [vmem:[#allocation45_spill] sm:$0xff] %v3468_v32  ;;  %v4442_v32 = vld [vmem:[#allocation2_spill] sm:$0xff]  ;;  %4447 = vst [vmem:[#allocation50_spill] sm:$0xff] %v3500_v23  ;;  %v3503_v37 = vmul.f32 0.2, %v4448_v2  ;;  %v4455_v13 = vld [vmem:[#allocation8_spill] sm:$0xff] }
 0x281   :  { %v3487_v49 = vmul.f32 0.2, %v4442_v32  ;;  %vm1220_vm15 = vcmp.gt.f32.partialorder %v4442_v32, 0.0  ;;  %v1288_v26 = vmul.f32 0.2, %v4453_v39  ;;  %4456 = vst [vmem:[#allocation54_spill] sm:$0xff] %v3525_v59 }
 0x282   :  { %4449 = vst [vmem:[#allocation51_spill] sm:$0xff] %v3503_v37  ;;  %v4454_v37 = vld [vmem:[#allocation13_spill] sm:$0xff]  ;;  %vm1224_vm0 = vcmp.gt.f32.partialorder %v4453_v39, 0.0  ;;  %v4457_v0 = vld [vmem:[#allocation11_spill] sm:$0xff]  ;;  %v4459_v53 = vld [vmem:[#allocation18_spill] sm:$0xff] }
 0x283   :  { %4443 = vst [vmem:[#allocation49_spill] sm:$0xff] %v3487_v49  ;;  %v4450_v49 = vld [vmem:[#allocation6_spill] sm:$0xff]  ;;  %v1289_v23 = vmul.f32 0.2, %v4454_v37  ;;  %v1291_v38 = vmul.f32 0.2, %v4457_v0 }
 0x284   :  { %v3506_v51 = vmul.f32 0.2, %v4450_v49  ;;  %v4458_v49 = vld [vmem:[#allocation15_spill] sm:$0xff]  ;;  %v1293_v32 = vmul.f32 0.2, %v4459_v53  ;;  %v4460_v36 = vld [vmem:[#allocation5_spill] sm:$0xff] }
 0x285   :  { %v1292_v2 = vmul.f32 0.2, %v4458_v49  ;;  %v3538_v50 = vsel %vm1187_vm2, %v3091_v21, %v4460_v36  ;;  %vm1228_vm1 = vcmp.gt.f32.partialorder %v4458_v49, 0.0  ;;  %v4462_v55 = vld [vmem:[#allocation17_spill] sm:$0xff]  ;;  %v4463_v59 = vld [vmem:[#allocation23_spill] sm:$0xff]  ;;  %v4464_v37 = vld [vmem:[#allocation24_spill] sm:$0xff]  ;;  %v3551_v21 = vsel %vm1188_vm3, %v3094_v9, %v3308_v58 }
 0x286   :  { %4451 = vst [vmem:[#allocation52_spill] sm:$0xff] %v3506_v51  ;;  %v1290_v51 = vmul.f32 0.2, %v4455_v13  ;;  %4461 = vst [vmem:[#allocation15_spill] sm:$0xff] %v3538_v50  ;;  %vm1230_vm5 = vcmp.gt.f32.partialorder %v4462_v55, 0.0  ;;  %vm1232_vm2 = vcmp.gt.f32.partialorder %v4464_v37, 0.0  ;;  %v3578_v58 = vsel %vm1192_vm7, %v3106_v44, %v3326_v41 }
 0x287   :  { %v1294_v0 = vmul.f32 0.2, %v4462_v55  ;;  %v1295_v13 = vmul.f32 0.2, %v4463_v59  ;;  %v1296_v39 = vmul.f32 0.2, %v4464_v37  ;;  %v3560_v55 = vsel %vm1189_vm4, %v3097_v42, %v3311_v20 }
 0x288   :  { %v4465_v36 = vld [vmem:[#allocation25_spill] sm:$0xff]  ;;  %v4466_v59 = vld [vmem:[#allocation14_spill] sm:$0xff]  ;;  %vm4468_vm3 = vcmp.gt.f32.partialorder %v3103_v40, 0.0  ;;  %v4469_v42 = vld [vmem:[#allocation12_spill] sm:$0xff]  ;;  %vm4470_vm4 = vcmp.gt.f32.partialorder %v3109_v56, 0.0  ;;  %vm4474_vm7 = vcmp.gt.f32.partialorder %v3121_v8, 0.0 }
 0x289   :  { %vm1233_vm6 = vcmp.gt.f32.partialorder %v4465_v36, 0.0  ;;  %v1297_v50 = vmul.f32 0.2, %v4465_v36  ;;  %v3566_v53 = vsel %vm4467_vm8, %v3100_v46, %v4466_v59  ;;  %v3572_v9 = vsel %vm4468_vm3, %v3103_v40, %v3323_v61  ;;  %v4473_v44 = vld [vmem:[#allocation29_spill] sm:$0xff]  ;;  %v4507_v59 = vld [vmem:[#allocation2_spill] sm:$0xff] }
 0x28a   :  { %v3584_v20 = vsel %vm4470_vm4, %v3109_v56, %v4469_v42  ;;  %vm4471_vm8 = vcmp.gt.f32.partialorder %v3112_v63, 0.0  ;;  %vm4472_vm3 = vcmp.gt.f32.partialorder %v3115_v54, 0.0  ;;  %v3602_v61 = vsel %vm1196_vm9, %v3118_v60, %v4473_v44  ;;  %v4509_v44 = vld [vmem:[#allocation3_spill] sm:$0xff] }
 0x28b   :  { %v3590_v46 = vsel %vm4471_vm8, %v3112_v63, %v3338_v16  ;;  %v3596_v40 = vsel %vm4472_vm3, %v3115_v54, %v3341_v10  ;;  %v3608_v56 = vsel %vm4474_vm7, %v3121_v8, %v3353_v19  ;;  %vm4475_vm4 = vcmp.gt.f32.partialorder %v3124_v15, 0.0 }
 0x28c   :  { %v3614_v63 = vsel %vm4475_vm4, %v3124_v15, %v3356_v43  ;;  %vm4476_vm8 = vcmp.gt.f32.partialorder %v3127_v6, 0.0  ;;  %vm1618_vm9 = vcmask 125952   ;;  %v3626_v60 = vsel %vm1200_vm10, %v3130_v12, %v3370_v45  ;;  %v4478_v15 = vld [vmem:[#allocation32_spill] sm:$0xff] }
 0x28d   :  { %v3620_v54 = vsel %vm4476_vm8, %v3127_v6, %v3359_v18  ;;  %vm4477_vm3 = vcmp.gt.f32.partialorder %v3133_v24, 0.0  ;;  %vm4479_vm7 = vcmp.gt.f32.partialorder %v3136_v31, 0.0  ;;  %vm4480_vm4 = vcmp.gt.f32.partialorder %v3139_v22, 0.0  ;;  %v4495_v43 = vld [vmem:[#allocation20_spill] sm:$0xff] }
 0x28e   :  { %v3632_v8 = vsel %vm4477_vm3, %v3133_v24, %v3373_v33  ;;  %v3638_v41 = vsel %vm4479_vm7, %v3136_v31, %v4478_v15  ;;  %v3644_v6 = vsel %vm4480_vm4, %v3139_v22, %v3388_v4  ;;  %v3650_v12 = vsel %vm1204_vm11, %v3142_v28, %v3391_v47  ;;  %v4481_v24 = vld [vmem:[#allocation34_spill] sm:$0xff]  ;;  %v4485_v28 = vld [vmem:[#allocation36_spill] sm:$0xff]  ;;  %v4501_v4 = vld [vmem:[#allocation21_spill] sm:$0xff] }
 0x28f   :  { %vm4482_vm10 = vcmp.gt.f32.partialorder %v3145_v48, 0.0  ;;  %vm4483_vm8 = vcmp.gt.f32.partialorder %v3148_v7, 0.0  ;;  %vm4484_vm3 = vcmp.gt.f32.partialorder %v3151_v35, 0.0  ;;  %v3674_v47 = vsel %vm1208_vm12, %v3154_v52, %v4485_v28  ;;  %v4512_v28 = vld [vmem:[#allocation4_spill] sm:$0xff] }
 0x290   :  { %v3656_v18 = vsel %vm4482_vm10, %v3145_v48, %v4481_v24  ;;  %v3662_v31 = vsel %vm4483_vm8, %v3148_v7, %v3406_v57  ;;  %v3668_v22 = vsel %vm4484_vm3, %v3151_v35, %v3409_v62  ;;  %vm4486_vm11 = vcmp.gt.f32.partialorder %v3157_v11, 0.0  ;;  %v4488_v35 = vld [vmem:[#allocation38_spill] sm:$0xff]  ;;  %v4503_v57 = vld [vmem:[#allocation48_spill] sm:$0xff]  ;;  %v4511_v24 = vld [vmem:[#allocation51_spill] sm:$0xff] }
 0x291   :  { %v3680_v48 = vsel %vm4486_vm11, %v3157_v11, %v3424_v29  ;;  %vm4487_vm7 = vcmp.gt.f32.partialorder %v3160_v5, 0.0  ;;  %vm4489_vm4 = vcmp.gt.f32.partialorder %v3163_v34, 0.0  ;;  %v3698_v52 = vsel %vm1212_vm13, %v3166_v17, %v3443_v30  ;;  %v4490_v11 = vld [vmem:[#allocation40_spill] sm:$0xff]  ;;  %v4504_v29 = vld [vmem:[#allocation22_spill] sm:$0xff] }
 0x292   :  { %v3686_v7 = vsel %vm4487_vm7, %v3160_v5, %v3427_v3  ;;  %v3692_v16 = vsel %vm4489_vm4, %v3163_v34, %v4488_v35  ;;  %vm4491_vm12 = vcmp.gt.f32.partialorder %v3169_v1, 0.0  ;;  %v4492_v5 = vld [vmem:[#allocation41_spill] sm:$0xff]  ;;  %vm4493_vm10 = vcmp.gt.f32.partialorder %v3172_v14, 0.0  ;;  %v4494_v34 = vld [vmem:[#allocation43_spill] sm:$0xff]  ;;  %v4497_v17 = vld [vmem:[#allocation44_spill] sm:$0xff] }
 0x293   :  { %v3704_v10 = vsel %vm4491_vm12, %v3169_v1, %v4490_v11  ;;  %v3710_v19 = vsel %vm4493_vm10, %v3172_v14, %v4492_v5  ;;  %vm4496_vm8 = vcmp.gt.f32.partialorder %v4495_v43, 0.0  ;;  %v3722_v33 = vsel %vm1216_vm14, %v3178_v25, %v4497_v17  ;;  %v4498_v1 = vld [vmem:[#allocation45_spill] sm:$0xff]  ;;  %v4500_v14 = vld [vmem:[#allocation47_spill] sm:$0xff]  ;;  %v4514_v11 = vld [vmem:[#allocation52_spill] sm:$0xff] }
 0x294   :  { %v3716_v45 = vsel %vm4496_vm8, %v4495_v43, %v4494_v34  ;;  %vm4499_vm13 = vcmp.gt.f32.partialorder %v3181_v27, 0.0  ;;  %vm4502_vm3 = vcmp.gt.f32.partialorder %v4501_v4, 0.0  ;;  %vm4505_vm11 = vcmp.gt.f32.partialorder %v4504_v29, 0.0  ;;  %v4506_v25 = vld [vmem:[#allocation49_spill] sm:$0xff]  ;;  %v4515_v5 = vld [vmem:[#allocation6_spill] sm:$0xff] }
 0x295   :  { %v3728_v62 = vsel %vm4499_vm13, %v3181_v27, %v4498_v1  ;;  %v3734_v3 = vsel %vm4502_vm3, %v4501_v4, %v4500_v14  ;;  %v3740_v30 = vsel %vm4505_vm11, %v4504_v29, %v4503_v57  ;;  %v3746_v42 = vsel %vm1220_vm15, %v4507_v59, %v4506_v25  ;;  %v4508_v27 = vld [vmem:[#allocation50_spill] sm:$0xff]  ;;  %v4518_v1 = vld [vmem:[#allocation13_spill] sm:$0xff]  ;;  %v4520_v4 = vld [vmem:[#allocation8_spill] sm:$0xff] }
 0x296   :  { %vm4510_vm14 = vcmp.gt.f32.partialorder %v4509_v44, 0.0  ;;  %vm4513_vm7 = vcmp.gt.f32.partialorder %v4512_v28, 0.0  ;;  %vm4516_vm4 = vcmp.gt.f32.partialorder %v4515_v5, 0.0  ;;  %v4517_v43 = vld [vmem:[#allocation10_spill] sm:$0xff]  ;;  %vm4519_vm15 = vcmp.gt.f32.partialorder %v4518_v1, 0.0  ;;  %v4522_v29 = vld [vmem:[#allocation11_spill] sm:$0xff] }
 0x297   :  { %v3752_v15 = vsel %vm4510_vm14, %v4509_v44, %v4508_v27  ;;  %v3758_v35 = vsel %vm4513_vm7, %v4512_v28, %v4511_v24  ;;  %v3764_v34 = vsel %vm4516_vm4, %v4515_v5, %v4514_v11  ;;  %v3769_v17 = vsel %vm1224_vm0, %v4517_v43, %v1288_v26  ;;  %v4524_v59 = vld [vmem:[#allocation18_spill] sm:$0xff]  ;;  %v4526_v27 = vld [vmem:[#allocation17_spill] sm:$0xff]  ;;  %v4527_v44 = vld [vmem:[#allocation23_spill] sm:$0xff] }
 0x298   :  { %v3774_v14 = vsel %vm4519_vm15, %v4518_v1, %v1289_v23  ;;  %vm4521_vm12 = vcmp.gt.f32.partialorder %v4520_v4, 0.0  ;;  %vm4523_vm10 = vcmp.gt.f32.partialorder %v4522_v29, 0.0  ;;  %v3789_v26 = vsel %vm1228_vm1, %v4458_v49, %v1292_v2  ;;  %v4529_v49 = vld [vmem:[#allocation26_spill] sm:$0xff]  ;;  %v4531_v11 = vld [vmem:[#allocation19_spill] sm:$0xff]  ;;  %v4533_v1 = vld [vmem:[#allocation9_spill] sm:$0xff] }
 0x299   :  { %v3779_v57 = vsel %vm4521_vm12, %v4520_v4, %v1290_v51  ;;  %v3784_v25 = vsel %vm4523_vm10, %v4522_v29, %v1291_v38  ;;  %vm4525_vm0 = vcmp.gt.f32.partialorder %v4524_v59, 0.0  ;;  %v3799_v51 = vsel %vm1230_vm5, %v4526_v27, %v1294_v0  ;;  %v4530_v0 = vld [vmem:[#allocation27_spill] sm:$0xff]  ;;  %v4537_v27 = vld [vmem:[#allocation33_spill] sm:$0xff] }
 0x29a   :  { %v3794_v23 = vsel %vm4525_vm0, %v4524_v59, %v1293_v32  ;;  %vm4528_vm8 = vcmp.gt.f32.partialorder %v4527_v44, 0.0  ;;  %v3809_v2 = vsel %vm1232_vm2, %v4464_v37, %v1296_v39  ;;  %v3814_v32 = vsel %vm1233_vm6, %v4465_v36, %v1297_v50  ;;  %v4532_v5 = vld [vmem:[#allocation7_spill] sm:$0xff]  ;;  %v4534_v39 = vld [vmem:[#allocation16_spill] sm:$0xff]  ;;  %v4535_v50 = vld [vmem:[#allocation30_spill] sm:$0xff] }
 0x29b   :  { %v3804_v38 = vsel %vm4528_vm8, %v4527_v44, %v1295_v13  ;;  %v1792_v24 = vpack.c.bf16 %v4529_v49, %v4529_v49  ;;  %v1793_v28 = vpack.c.bf16 %v4530_v0, %v4530_v0  ;;  %v1794_v13 = vpack.c.bf16 %v4531_v11, %v4531_v11  ;;  %v4536_v29 = vld [vmem:[#allocation31_spill] sm:$0xff]  ;;  %v4539_v11 = vld [vmem:[#allocation37_spill] sm:$0xff] }
 0x29c   :  { %v1795_v43 = vpack.c.bf16 %v4532_v5, %v4532_v5  ;;  %v1796_v37 = vpack.c.bf16 %v4533_v1, %v4533_v1  ;;  %v1797_v4 = vpack.c.bf16 %v4534_v39, %v4534_v39  ;;  %v1798_v36 = vpack.c.bf16 %v4535_v50, %v4535_v50  ;;  %v4538_v49 = vld [vmem:[#allocation35_spill] sm:$0xff]  ;;  %v4541_v50 = vld [vmem:[#allocation42_spill] sm:$0xff] }
 0x29d   :  { %v1799_v59 = vpack.c.bf16 %v4536_v29, %v4536_v29  ;;  %v1800_v44 = vpack.c.bf16 %v4537_v27, %v4537_v27  ;;  %v1801_v0 = vpack.c.bf16 %v4538_v49, %v4538_v49  ;;  %1619 = vst.msk [vmem:[%s4204_s4] sm:$0xf] %vm1618_vm9, %v1792_v24  ;;  %1620 = vst.msk [vmem:[%s4204_s4 + $0x4] sm:$0xf] %vm1618_vm9, %v1793_v28  ;;  %v4540_v1 = vld [vmem:[#allocation39_spill] sm:$0xff]  ;;  %v4542_v27 = vld [vmem:[#allocation46_spill] sm:$0xff] }
 0x29e   :  { %v1802_v5 = vpack.c.bf16 %v4539_v11, %v4539_v11  ;;  %v1803_v39 = vpack.c.bf16 %v4540_v1, %v4540_v1  ;;  %v1804_v29 = vpack.c.bf16 %v4541_v50, %v4541_v50  ;;  %v1805_v49 = vpack.c.bf16 %v4542_v27, %v4542_v27  ;;  %1621 = vst.msk [vmem:[%s4204_s4 + $0x8] sm:$0xf] %vm1618_vm9, %v1794_v13  ;;  %v4543_v24 = vld [vmem:[#allocation28_spill] sm:$0xff]  ;;  %v4544_v11 = vld [vmem:[#allocation53_spill] sm:$0xff]  ;;  %v4545_v1 = vld [vmem:[#allocation54_spill] sm:$0xff] }
 0x29f   :  { %1622 = vst.msk [vmem:[%s4204_s4 + $0xc] sm:$0xf] %vm1618_vm9, %v1795_v43  ;;  %1623 = vst.msk [vmem:[%s4204_s4 + $0x10] sm:$0xf] %vm1618_vm9, %v1796_v37  ;;  %v1806_v28 = vpack.c.bf16 %v4543_v24, %v4543_v24  ;;  %v1807_v13 = vpack.c.bf16 %v4544_v11, %v4544_v11  ;;  %v1808_v50 = vpack.c.bf16 %v4545_v1, %v4545_v1  ;;  %v4546_v43 = vld [vmem:[#allocation15_spill] sm:$0xff] }
 0x2a0   :  { %1624 = vst.msk [vmem:[%s4204_s4 + $0x14] sm:$0xf] %vm1618_vm9, %v1797_v4  ;;  %v1809_v27 = vpack.c.bf16 %v4546_v43, %v4546_v43  ;;  %1625 = vst.msk [vmem:[%s4204_s4 + $0x18] sm:$0xf] %vm1618_vm9, %v1798_v36  ;;  %v1810_v37 = vpack.c.bf16 %v3551_v21, %v3551_v21  ;;  %v1811_v4 = vpack.c.bf16 %v3560_v55, %v3560_v55 }
 0x2a1   :  { %1626 = vst.msk [vmem:[%s4204_s4 + $0x1c] sm:$0xf] %vm1618_vm9, %v1799_v59  ;;  %1627 = vst.msk [vmem:[%s4204_s4 + $0x20] sm:$0xf] %vm1618_vm9, %v1800_v44  ;;  %v1812_v36 = vpack.c.bf16 %v3566_v53, %v3566_v53  ;;  %v1813_v59 = vpack.c.bf16 %v3572_v9, %v3572_v9  ;;  %v1814_v53 = vpack.c.bf16 %v3578_v58, %v3578_v58 }
 0x2a2   :  { %1628 = vst.msk [vmem:[%s4204_s4 + $0x24] sm:$0xf] %vm1618_vm9, %v1801_v0  ;;  %1629 = vst.msk [vmem:[%s4204_s4 + $0x28] sm:$0xf] %vm1618_vm9, %v1802_v5  ;;  %v1815_v55 = vpack.c.bf16 %v3584_v20, %v3584_v20  ;;  %v1816_v21 = vpack.c.bf16 %v3590_v46, %v3590_v46  ;;  %v1817_v9 = vpack.c.bf16 %v3596_v40, %v3596_v40 }
 0x2a3   :  { %1630 = vst.msk [vmem:[%s4204_s4 + $0x2c] sm:$0xf] %vm1618_vm9, %v1803_v39  ;;  %1631 = vst.msk [vmem:[%s4204_s4 + $0x30] sm:$0xf] %vm1618_vm9, %v1804_v29  ;;  %v1818_v58 = vpack.c.bf16 %v3602_v61, %v3602_v61  ;;  %v1819_v20 = vpack.c.bf16 %v3608_v56, %v3608_v56  ;;  %v1820_v46 = vpack.c.bf16 %v3614_v63, %v3614_v63 }
 0x2a4   :  { %1632 = vst.msk [vmem:[%s4204_s4 + $0x34] sm:$0xf] %vm1618_vm9, %v1805_v49  ;;  %1633 = vst.msk [vmem:[%s4204_s4 + $0x38] sm:$0xf] %vm1618_vm9, %v1806_v28  ;;  %v1821_v40 = vpack.c.bf16 %v3620_v54, %v3620_v54  ;;  %v1822_v61 = vpack.c.bf16 %v3626_v60, %v3626_v60  ;;  %v1823_v56 = vpack.c.bf16 %v3632_v8, %v3632_v8 }
 0x2a5   :  { %1634 = vst.msk [vmem:[%s4204_s4 + $0x3c] sm:$0xf] %vm1618_vm9, %v1807_v13  ;;  %1635 = vst.msk [vmem:[%s4204_s4 + $0x40] sm:$0xf] %vm1618_vm9, %v1808_v50  ;;  %v1824_v63 = vpack.c.bf16 %v3638_v41, %v3638_v41  ;;  %v1825_v54 = vpack.c.bf16 %v3644_v6, %v3644_v6  ;;  %v1826_v60 = vpack.c.bf16 %v3650_v12, %v3650_v12 }
 0x2a6   :  { %1636 = vst.msk [vmem:[%s4204_s4 + $0x44] sm:$0xf] %vm1618_vm9, %v1809_v27  ;;  %1637 = vst.msk [vmem:[%s4204_s4 + $0x48] sm:$0xf] %vm1618_vm9, %v1810_v37  ;;  %v1827_v8 = vpack.c.bf16 %v3656_v18, %v3656_v18  ;;  %v1828_v41 = vpack.c.bf16 %v3662_v31, %v3662_v31  ;;  %v1829_v6 = vpack.c.bf16 %v3668_v22, %v3668_v22 }
 0x2a7   :  { %1638 = vst.msk [vmem:[%s4204_s4 + $0x4c] sm:$0xf] %vm1618_vm9, %v1811_v4  ;;  %1639 = vst.msk [vmem:[%s4204_s4 + $0x50] sm:$0xf] %vm1618_vm9, %v1812_v36  ;;  %v1830_v12 = vpack.c.bf16 %v3674_v47, %v3674_v47  ;;  %v1831_v18 = vpack.c.bf16 %v3680_v48, %v3680_v48  ;;  %v1832_v31 = vpack.c.bf16 %v3686_v7, %v3686_v7 }
 0x2a8   :  { %1640 = vst.msk [vmem:[%s4204_s4 + $0x54] sm:$0xf] %vm1618_vm9, %v1813_v59  ;;  %1641 = vst.msk [vmem:[%s4204_s4 + $0x58] sm:$0xf] %vm1618_vm9, %v1814_v53  ;;  %v1833_v22 = vpack.c.bf16 %v3692_v16, %v3692_v16  ;;  %v1834_v47 = vpack.c.bf16 %v3698_v52, %v3698_v52  ;;  %v1835_v48 = vpack.c.bf16 %v3704_v10, %v3704_v10 }
 0x2a9   :  { %1642 = vst.msk [vmem:[%s4204_s4 + $0x5c] sm:$0xf] %vm1618_vm9, %v1815_v55  ;;  %1643 = vst.msk [vmem:[%s4204_s4 + $0x60] sm:$0xf] %vm1618_vm9, %v1816_v21  ;;  %v1836_v7 = vpack.c.bf16 %v3710_v19, %v3710_v19  ;;  %v1837_v16 = vpack.c.bf16 %v3716_v45, %v3716_v45  ;;  %v1838_v52 = vpack.c.bf16 %v3722_v33, %v3722_v33 }
 0x2aa   :  { %1644 = vst.msk [vmem:[%s4204_s4 + $0x64] sm:$0xf] %vm1618_vm9, %v1817_v9  ;;  %1645 = vst.msk [vmem:[%s4204_s4 + $0x68] sm:$0xf] %vm1618_vm9, %v1818_v58  ;;  %v1839_v10 = vpack.c.bf16 %v3728_v62, %v3728_v62  ;;  %v1840_v19 = vpack.c.bf16 %v3734_v3, %v3734_v3  ;;  %v1841_v45 = vpack.c.bf16 %v3740_v30, %v3740_v30 }
 0x2ab   :  { %1646 = vst.msk [vmem:[%s4204_s4 + $0x6c] sm:$0xf] %vm1618_vm9, %v1819_v20  ;;  %1647 = vst.msk [vmem:[%s4204_s4 + $0x70] sm:$0xf] %vm1618_vm9, %v1820_v46  ;;  %v1842_v33 = vpack.c.bf16 %v3746_v42, %v3746_v42  ;;  %v1843_v62 = vpack.c.bf16 %v3752_v15, %v3752_v15  ;;  %v1844_v3 = vpack.c.bf16 %v3758_v35, %v3758_v35 }
 0x2ac   :  { %1648 = vst.msk [vmem:[%s4204_s4 + $0x74] sm:$0xf] %vm1618_vm9, %v1821_v40  ;;  %1649 = vst.msk [vmem:[%s4204_s4 + $0x78] sm:$0xf] %vm1618_vm9, %v1822_v61  ;;  %v1845_v30 = vpack.c.bf16 %v3764_v34, %v3764_v34  ;;  %v1846_v42 = vpack.c.bf16 %v3769_v17, %v3769_v17  ;;  %v1847_v15 = vpack.c.bf16 %v3774_v14, %v3774_v14 }
 0x2ad   :  { %1650 = vst.msk [vmem:[%s4204_s4 + $0x7c] sm:$0xf] %vm1618_vm9, %v1823_v56  ;;  %1651 = vst.msk [vmem:[%s4204_s4 + $0x80] sm:$0xf] %vm1618_vm9, %v1824_v63  ;;  %v1848_v35 = vpack.c.bf16 %v3779_v57, %v3779_v57  ;;  %v1849_v34 = vpack.c.bf16 %v3784_v25, %v3784_v25  ;;  %v1850_v17 = vpack.c.bf16 %v3789_v26, %v3789_v26 }
 0x2ae   :  { %1652 = vst.msk [vmem:[%s4204_s4 + $0x84] sm:$0xf] %vm1618_vm9, %v1825_v54  ;;  %1653 = vst.msk [vmem:[%s4204_s4 + $0x88] sm:$0xf] %vm1618_vm9, %v1826_v60  ;;  %v1851_v14 = vpack.c.bf16 %v3794_v23, %v3794_v23  ;;  %v1852_v57 = vpack.c.bf16 %v3799_v51, %v3799_v51  ;;  %v1853_v25 = vpack.c.bf16 %v3804_v38, %v3804_v38 }
 0x2af   :  { %1654 = vst.msk [vmem:[%s4204_s4 + $0x8c] sm:$0xf] %vm1618_vm9, %v1827_v8  ;;  %1655 = vst.msk [vmem:[%s4204_s4 + $0x90] sm:$0xf] %vm1618_vm9, %v1828_v41  ;;  %v1854_v26 = vpack.c.bf16 %v3809_v2, %v3809_v2  ;;  %v1855_v23 = vpack.c.bf16 %v3814_v32, %v3814_v32 }
 0x2b0   :  { %1656 = vst.msk [vmem:[%s4204_s4 + $0x94] sm:$0xf] %vm1618_vm9, %v1829_v6  ;;  %1657 = vst.msk [vmem:[%s4204_s4 + $0x98] sm:$0xf] %vm1618_vm9, %v1830_v12 }
 0x2b1   :  { %1658 = vst.msk [vmem:[%s4204_s4 + $0x9c] sm:$0xf] %vm1618_vm9, %v1831_v18  ;;  %1659 = vst.msk [vmem:[%s4204_s4 + $0xa0] sm:$0xf] %vm1618_vm9, %v1832_v31 }
 0x2b2   :  { %1660 = vst.msk [vmem:[%s4204_s4 + $0xa4] sm:$0xf] %vm1618_vm9, %v1833_v22  ;;  %1661 = vst.msk [vmem:[%s4204_s4 + $0xa8] sm:$0xf] %vm1618_vm9, %v1834_v47 }
 0x2b3   :  { %1662 = vst.msk [vmem:[%s4204_s4 + $0xac] sm:$0xf] %vm1618_vm9, %v1835_v48  ;;  %1663 = vst.msk [vmem:[%s4204_s4 + $0xb0] sm:$0xf] %vm1618_vm9, %v1836_v7 }
 0x2b4   :  { %1664 = vst.msk [vmem:[%s4204_s4 + $0xb4] sm:$0xf] %vm1618_vm9, %v1837_v16  ;;  %1665 = vst.msk [vmem:[%s4204_s4 + $0xb8] sm:$0xf] %vm1618_vm9, %v1838_v52 }
 0x2b5   :  { %1666 = vst.msk [vmem:[%s4204_s4 + $0xbc] sm:$0xf] %vm1618_vm9, %v1839_v10  ;;  %1667 = vst.msk [vmem:[%s4204_s4 + $0xc0] sm:$0xf] %vm1618_vm9, %v1840_v19 }
 0x2b6   :  { %1668 = vst.msk [vmem:[%s4204_s4 + $0xc4] sm:$0xf] %vm1618_vm9, %v1841_v45  ;;  %1669 = vst.msk [vmem:[%s4204_s4 + $0xc8] sm:$0xf] %vm1618_vm9, %v1842_v33 }
 0x2b7   :  { %1670 = vst.msk [vmem:[%s4204_s4 + $0xcc] sm:$0xf] %vm1618_vm9, %v1843_v62  ;;  %1671 = vst.msk [vmem:[%s4204_s4 + $0xd0] sm:$0xf] %vm1618_vm9, %v1844_v3 }
 0x2b8   :  { %1672 = vst.msk [vmem:[%s4204_s4 + $0xd4] sm:$0xf] %vm1618_vm9, %v1845_v30  ;;  %1673 = vst.msk [vmem:[%s4204_s4 + $0xd8] sm:$0xf] %vm1618_vm9, %v1846_v42 }
 0x2b9   :  { %1674 = vst.msk [vmem:[%s4204_s4 + $0xdc] sm:$0xf] %vm1618_vm9, %v1847_v15  ;;  %1675 = vst.msk [vmem:[%s4204_s4 + $0xe0] sm:$0xf] %vm1618_vm9, %v1848_v35 }
 0x2ba   :  { %1676 = vst.msk [vmem:[%s4204_s4 + $0xe4] sm:$0xf] %vm1618_vm9, %v1849_v34  ;;  %1677 = vst.msk [vmem:[%s4204_s4 + $0xe8] sm:$0xf] %vm1618_vm9, %v1850_v17 }
 0x2bb   :  { %1678 = vst.msk [vmem:[%s4204_s4 + $0xec] sm:$0xf] %vm1618_vm9, %v1851_v14  ;;  %1679 = vst.msk [vmem:[%s4204_s4 + $0xf0] sm:$0xf] %vm1618_vm9, %v1852_v57 }
 0x2bc   :  { %1680 = vst.msk [vmem:[%s4204_s4 + $0xf4] sm:$0xf] %vm1618_vm9, %v1853_v25  ;;  %1681 = vst.msk [vmem:[%s4204_s4 + $0xf8] sm:$0xf] %vm1618_vm9, %v1854_v26 }
 0x2bd   :  { %1682 = vst.msk [vmem:[%s4204_s4 + $0xfc] sm:$0xf] %vm1618_vm9, %v1855_v23 }

// kernel: discriminator_ca_forward.6
= control target key start
LH: loop header
LB: loop body
LE: loop exit
PB: predicated region body
PF: predicated region fallthrough
CT: control target
= control target key end

     0   :  { %vm339_vm0 = vcmask 261120   ;;  %s1169_s1 = inlined_call_operand.vmem [shape: bf16[256,32], index: 1, kind: input, shape index: {}]   ;;  %s1170_s0 = inlined_call_operand.vmem [shape: bf16[128,256], index: 0, kind: input, shape index: {}]   ;;  %s1171_s2 = inlined_call_operand.vmem [shape: f32[1,32], index: 2, kind: input, shape index: {}]   ;;  %s1172_s3 = inlined_call_operand.vmem [shape: f32[1,32], index: 3, kind: input, shape index: {}]   ;;  %s1173_s4 = inlined_call_operand.vmem [shape: bf16[128,32], index: 4, kind: output, shape index: {}]  }
   0x1   :  { %v776_v0 = vld [vmem:[%s1169_s1 + $0x40] sm:$0xff]   ;;  %v778_v2 = vld [vmem:[%s1169_s1 + $0x48] sm:$0xff]   ;;  %v780_v4 = vld [vmem:[%s1169_s1 + $0x50] sm:$0xff]  }
   0x2   :  { %v777_v1 = vld [vmem:[%s1169_s1] sm:$0xff]   ;;  %696 = vmatprep.subr.bf16.mxu0 %v776_v0  ;;  %760 = vmatprep.subr.bf16.mxu1 %v776_v0  ;;  %v779_v3 = vld [vmem:[%s1169_s1 + $0x8] sm:$0xff]   ;;  %v781_v5 = vld [vmem:[%s1169_s1 + $0x10] sm:$0xff]  }
   0x3   :  { %697 = vmatpush3.bf16.msra.mxu0 %v777_v1  ;;  %768 = vmatpush3.bf16.msra.mxu1 %v777_v1  ;;  %v782_v6 = vld [vmem:[%s1169_s1 + $0x58] sm:$0xff]   ;;  %v784_v8 = vld [vmem:[%s1169_s1 + $0x60] sm:$0xff]   ;;  %v786_v10 = vld [vmem:[%s1169_s1 + $0x68] sm:$0xff]  }
   0x4   :  { %698 = vmatprep.subr.bf16.mxu0 %v778_v2  ;;  %761 = vmatprep.subr.bf16.mxu1 %v778_v2  ;;  %v783_v7 = vld [vmem:[%s1169_s1 + $0x18] sm:$0xff]   ;;  %v785_v9 = vld [vmem:[%s1169_s1 + $0x20] sm:$0xff]   ;;  %v787_v12 = vld [vmem:[%s1169_s1 + $0x28] sm:$0xff]  }
   0x5   :  { %v794_v11 = vld [vmem:[%s1170_s0 + $0x4] ss:$8 sps:$4 sm:$0xff]   ;;  %v788_v14 = vld [vmem:[%s1169_s1 + $0x70] sm:$0xff]   ;;  %v790_v16 = vld [vmem:[%s1169_s1 + $0x78] sm:$0xff]  }
   0x6   :  { %v800_v13 = vld [vmem:[%s1170_s0 + $0x44] ss:$8 sps:$4 sm:$0xff]   ;;  %274 = vmatprep.mubr.bf16.mxu0 %v794_v11  ;;  %v789_v15 = vld [vmem:[%s1169_s1 + $0x30] sm:$0xff]   ;;  %v791_v17 = vld [vmem:[%s1169_s1 + $0x38] sm:$0xff]  }
   0x7   :  { %699 = vmatpush3.bf16.msra.mxu0 %v779_v3  ;;  %769 = vmatpush3.bf16.msra.mxu1 %v779_v3  ;;  %v792_v18 = vld [vmem:[%s1170_s0] ss:$8 sps:$4 sm:$0xff]   ;;  %v795_v20 = vld [vmem:[%s1170_s0 + $0x14] ss:$8 sps:$4 sm:$0xff]   ;;  %v797_v22 = vld [vmem:[%s1170_s0 + $0x10] ss:$8 sps:$4 sm:$0xff]  }
   0x8   :  { %700 = vmatprep.subr.bf16.mxu0 %v780_v4  ;;  %762 = vmatprep.subr.bf16.mxu1 %v780_v4  ;;  %v798_v19 = vld [vmem:[%s1170_s0 + $0x40] ss:$8 sps:$4 sm:$0xff]   ;;  %v804_v21 = vld [vmem:[%s1170_s0 + $0x54] ss:$8 sps:$4 sm:$0xff]   ;;  %v806_v23 = vld [vmem:[%s1170_s0 + $0x50] ss:$8 sps:$4 sm:$0xff]  }
   0x9   :  { %306 = vmatprep.mubr.bf16.mxu1 %v800_v13  ;;  %v801_v24 = vld [vmem:[%s1170_s0 + $0x24] ss:$8 sps:$4 sm:$0xff]   ;;  %v803_v26 = vld [vmem:[%s1170_s0 + $0x20] ss:$8 sps:$4 sm:$0xff]   ;;  %v807_v28 = vld [vmem:[%s1170_s0 + $0x34] ss:$8 sps:$4 sm:$0xff]  }
   0xa   :  { %v810_v25 = vld [vmem:[%s1170_s0 + $0x64] ss:$8 sps:$4 sm:$0xff]   ;;  %v812_v27 = vld [vmem:[%s1170_s0 + $0x60] ss:$8 sps:$4 sm:$0xff]   ;;  %v813_v29 = vld [vmem:[%s1170_s0 + $0x74] ss:$8 sps:$4 sm:$0xff]  }
   0xb   :  { %701 = vmatpush3.bf16.msra.mxu0 %v781_v5  ;;  %770 = vmatpush3.bf16.msra.mxu1 %v781_v5  ;;  %v809_v30 = vld [vmem:[%s1170_s0 + $0x30] ss:$8 sps:$4 sm:$0xff]  }
   0xc   :  { %702 = vmatprep.subr.bf16.mxu0 %v782_v6  ;;  %763 = vmatprep.subr.bf16.mxu1 %v782_v6  ;;  %v815_v31 = vld [vmem:[%s1170_s0 + $0x70] ss:$8 sps:$4 sm:$0xff]  }
   0xf   :  { %703 = vmatpush3.bf16.msra.mxu0 %v783_v7  ;;  %771 = vmatpush3.bf16.msra.mxu1 %v783_v7 }
  0x10   :  { %704 = vmatprep.subr.bf16.mxu0 %v784_v8  ;;  %764 = vmatprep.subr.bf16.mxu1 %v784_v8 }
  0x13   :  { %705 = vmatpush3.bf16.msra.mxu0 %v785_v9  ;;  %772 = vmatpush3.bf16.msra.mxu1 %v785_v9 }
  0x14   :  { %706 = vmatprep.subr.bf16.mxu0 %v786_v10  ;;  %765 = vmatprep.subr.bf16.mxu1 %v786_v10 }
  0x17   :  { %707 = vmatpush3.bf16.msra.mxu0 %v787_v12  ;;  %773 = vmatpush3.bf16.msra.mxu1 %v787_v12 }
  0x18   :  { %708 = vmatprep.subr.bf16.mxu0 %v788_v14  ;;  %766 = vmatprep.subr.bf16.mxu1 %v788_v14 }
  0x1b   :  { %709 = vmatpush3.bf16.msra.mxu0 %v789_v15  ;;  %774 = vmatpush3.bf16.msra.mxu1 %v789_v15 }
  0x1c   :  { %710 = vmatprep.subr.bf16.mxu0 %v790_v16  ;;  %767 = vmatprep.subr.bf16.mxu1 %v790_v16 }
  0x1f   :  { %711 = vmatpush3.bf16.msra.mxu0 %v791_v17  ;;  %775 = vmatpush3.bf16.msra.mxu1 %v791_v17 }
  0x22   :  { %275 = vmatmul.mubr.bf16.vlgmr.msra.gmra.mrb[0].mxu0 %v792_v18  ;;  %307 = vmatmul.mubr.bf16.vlgmr.msra.gmra.mrb[0].mxu1 %v798_v19 }
  0x23   :  { %282 = vmatprep.mubr.bf16.mxu0 %v795_v20  ;;  %314 = vmatprep.mubr.bf16.mxu1 %v804_v21 }
  0x2a   :  { %283 = vmatmul.mubr.bf16.gmra.mrb[4].mxu0 %v797_v22  ;;  %315 = vmatmul.mubr.bf16.gmra.mrb[4].mxu1 %v806_v23 }
  0x2b   :  { %290 = vmatprep.mubr.bf16.mxu0 %v801_v24  ;;  %322 = vmatprep.mubr.bf16.mxu1 %v810_v25 }
  0x32   :  { %291 = vmatmul.mubr.bf16.gmra.mrb[8].mxu0 %v803_v26  ;;  %323 = vmatmul.mubr.bf16.gmra.mrb[8].mxu1 %v812_v27 }
  0x33   :  { %298 = vmatprep.mubr.bf16.mxu0 %v807_v28  ;;  %330 = vmatprep.mubr.bf16.mxu1 %v813_v29 }
  0x3a   :  { %299 = vmatmul.mubr.bf16.gmra.mrb[12].mxu0 %v809_v30  ;;  %331 = vmatmul.mubr.bf16.gmra.mrb[12].mxu1 %v815_v31 }
  0xf5   :  { %v712_v32 = vpop.f32.mrb[0].mxu0  ;;  %v736_v33 = vpop.f32.mrb[0].mxu1 }
  0xf6   :  { %v713_v34 = vpop.f32.mrb[1].mxu0  ;;  %v737_v35 = vpop.f32.mrb[1].mxu1 }
  0xf7   :  { %v939_v36 = vadd.f32 %v713_v34, %v712_v32  ;;  %v715_v37 = vpop.f32.mrb[2].mxu0  ;;  %v941_v38 = vadd.f32 %v737_v35, %v736_v33  ;;  %v739_v39 = vpop.f32.mrb[2].mxu1 }
  0xf8   :  { %v716_v40 = vpop.f32.mrb[3].mxu0  ;;  %v740_v41 = vpop.f32.mrb[3].mxu1 }
  0xf9   :  { %v943_v42 = vadd.f32 %v716_v40, %v715_v37  ;;  %v945_v43 = vadd.f32 %v740_v41, %v739_v39  ;;  %v340_v44 = vsel %vm339_vm0, %v939_v36, 0.0  ;;  %v355_v31 = vsel %vm339_vm0, %v941_v38, 0.0 }
  0xfb   :  { %v341_v45 = vsel %vm339_vm0, %v943_v42, 0.0  ;;  %v357_v33 = vsel %vm339_vm0, %v945_v43, 0.0 }
  0xfc   :  { %v342_v46 = vadd.f32 %v341_v45, %v340_v44 }
  0xfd   :  { %v718_v47 = vpop.f32.mrb[4].mxu0  ;;  %v742_v48 = vpop.f32.mrb[4].mxu1 }
  0xfe   :  { %v719_v49 = vpop.f32.mrb[5].mxu0  ;;  %v743_v50 = vpop.f32.mrb[5].mxu1 }
  0xff   :  { %v951_v51 = vadd.f32 %v719_v49, %v718_v47  ;;  %v721_v52 = vpop.f32.mrb[6].mxu0  ;;  %v953_v53 = vadd.f32 %v743_v50, %v742_v48  ;;  %v745_v54 = vpop.f32.mrb[6].mxu1 }
 0x100   :  { %v722_v55 = vpop.f32.mrb[7].mxu0  ;;  %v746_v56 = vpop.f32.mrb[7].mxu1 }
 0x101   :  { %v343_v57 = vsel %vm339_vm0, %v951_v51, 0.0  ;;  %v957_v58 = vadd.f32 %v722_v55, %v721_v52  ;;  %v959_v59 = vadd.f32 %v746_v56, %v745_v54  ;;  %v359_v35 = vsel %vm339_vm0, %v953_v53, 0.0 }
 0x102   :  { %v344_v60 = vadd.f32 %v343_v57, %v342_v46 }
 0x103   :  { %v345_v61 = vsel %vm339_vm0, %v957_v58, 0.0  ;;  %v361_v39 = vsel %vm339_vm0, %v959_v59, 0.0 }
 0x104   :  { %v346_v62 = vadd.f32 %v345_v61, %v344_v60 }
 0x105   :  { %v724_v63 = vpop.f32.mrb[8].mxu0  ;;  %v748_v0 = vpop.f32.mrb[8].mxu1 }
 0x106   :  { %v725_v1 = vpop.f32.mrb[9].mxu0  ;;  %v749_v2 = vpop.f32.mrb[9].mxu1 }
 0x107   :  { %v726_v3 = vadd.f32 %v725_v1, %v724_v63  ;;  %v727_v4 = vpop.f32.mrb[10].mxu0  ;;  %v750_v5 = vadd.f32 %v749_v2, %v748_v0  ;;  %v751_v6 = vpop.f32.mrb[10].mxu1 }
 0x108   :  { %v728_v7 = vpop.f32.mrb[11].mxu0  ;;  %v752_v8 = vpop.f32.mrb[11].mxu1 }
 0x109   :  { %v347_v9 = vsel %vm339_vm0, %v726_v3, 0.0  ;;  %v729_v10 = vadd.f32 %v728_v7, %v727_v4  ;;  %v753_v11 = vadd.f32 %v752_v8, %v751_v6  ;;  %v363_v41 = vsel %vm339_vm0, %v750_v5, 0.0 }
 0x10a   :  { %v348_v12 = vadd.f32 %v347_v9, %v346_v62 }
 0x10b   :  { %v349_v13 = vsel %vm339_vm0, %v729_v10, 0.0  ;;  %v365_v45 = vsel %vm339_vm0, %v753_v11, 0.0 }
 0x10c   :  { %v350_v14 = vadd.f32 %v349_v13, %v348_v12 }
 0x10d   :  { %v730_v15 = vpop.f32.mrb[12].mxu0  ;;  %v754_v16 = vpop.f32.mrb[12].mxu1 }
 0x10e   :  { %v731_v17 = vpop.f32.mrb[13].mxu0  ;;  %v755_v18 = vpop.f32.mrb[13].mxu1 }
 0x10f   :  { %v732_v19 = vadd.f32 %v731_v17, %v730_v15  ;;  %v733_v20 = vpop.f32.mrb[14].mxu0  ;;  %v756_v21 = vadd.f32 %v755_v18, %v754_v16  ;;  %v757_v22 = vpop.f32.mrb[14].mxu1 }
 0x110   :  { %v734_v23 = vpop.f32.mrb[15].mxu0  ;;  %v758_v24 = vpop.f32.mrb[15].mxu1 }
 0x111   :  { %v351_v25 = vsel %vm339_vm0, %v732_v19, 0.0  ;;  %v735_v26 = vadd.f32 %v734_v23, %v733_v20  ;;  %v759_v27 = vadd.f32 %v758_v24, %v757_v22  ;;  %v367_v46 = vsel %vm339_vm0, %v756_v21, 0.0 }
 0x112   :  { %v352_v28 = vadd.f32 %v351_v25, %v350_v14 }
 0x113   :  { %v353_v29 = vsel %vm339_vm0, %v735_v26, 0.0  ;;  %v369_v49 = vsel %vm339_vm0, %v759_v27, 0.0 }
 0x114   :  { %v354_v30 = vadd.f32 %v353_v29, %v352_v28 }
 0x116   :  { %v356_v32 = vadd.f32 %v355_v31, %v354_v30 }
 0x118   :  { %v358_v34 = vadd.f32 %v357_v33, %v356_v32 }
 0x11a   :  { %v360_v37 = vadd.f32 %v359_v35, %v358_v34 }
 0x11c   :  { %v362_v40 = vadd.f32 %v361_v39, %v360_v37 }
 0x11e   :  { %v364_v44 = vadd.f32 %v363_v41, %v362_v40 }
 0x120   :  { %v366_v47 = vadd.f32 %v365_v45, %v364_v44 }
 0x122   :  { %v368_v48 = vadd.f32 %v367_v46, %v366_v47 }
 0x124   :  { %v370_v50 = vadd.f32 %v369_v49, %v368_v48 }
 0x126   :  { %v371_v52 = vrot.slane %v370_v50, 4 }
 0x128   :  { %v372_v54 = vadd.f32 %v371_v52, %v370_v50 }
 0x12a   :  { %v373_v55 = vrot.slane %v372_v54, 2 }
 0x12c   :  { %v374_v56 = vadd.f32 %v373_v55, %v372_v54 }
 0x12e   :  { %v375_v57 = vrot.slane %v374_v56, 1 }
 0x130   :  { %v376_v60 = vadd.f32 %v375_v57, %v374_v56 }
 0x132   :  { %v378_v61 = vmul.f32 0.0078125, %v376_v60 }
 0x134   :  { %v980_v62 = vsub.f32 %v939_v36, %v378_v61  ;;  %v983_v63 = vsub.f32 %v943_v42, %v378_v61  ;;  %v986_v0 = vsub.f32 %v951_v51, %v378_v61  ;;  %v989_v1 = vsub.f32 %v957_v58, %v378_v61 }
 0x135   :  { %v991_v2 = vsub.f32 %v726_v3, %v378_v61  ;;  %v993_v4 = vsub.f32 %v729_v10, %v378_v61  ;;  %v995_v6 = vsub.f32 %v732_v19, %v378_v61  ;;  %v997_v7 = vsub.f32 %v735_v26, %v378_v61 }
 0x136   :  { %v1000_v36 = vsub.f32 %v941_v38, %v378_v61  ;;  %v1003_v42 = vsub.f32 %v945_v43, %v378_v61  ;;  %v1006_v51 = vsub.f32 %v953_v53, %v378_v61  ;;  %v1009_v58 = vsub.f32 %v959_v59, %v378_v61 }
 0x137   :  { %v1011_v3 = vsub.f32 %v750_v5, %v378_v61  ;;  %v1013_v8 = vsub.f32 %v753_v11, %v378_v61  ;;  %v1015_v9 = vsub.f32 %v756_v21, %v378_v61  ;;  %v1017_v10 = vsub.f32 %v759_v27, %v378_v61 }
 0x138   :  { %v395_v38 = vmul.f32 %v980_v62, %v980_v62  ;;  %v396_v43 = vmul.f32 %v983_v63, %v983_v63  ;;  %v397_v53 = vmul.f32 %v986_v0, %v986_v0  ;;  %v398_v59 = vmul.f32 %v989_v1, %v989_v1 }
 0x139   :  { %v399_v13 = vmul.f32 %v991_v2, %v991_v2  ;;  %v400_v16 = vmul.f32 %v993_v4, %v993_v4  ;;  %v401_v19 = vmul.f32 %v995_v6, %v995_v6  ;;  %v402_v22 = vmul.f32 %v997_v7, %v997_v7 }
 0x13a   :  { %v411_v5 = vsel %vm339_vm0, %v395_v38, 0.0  ;;  %v412_v11 = vsel %vm339_vm0, %v396_v43, 0.0  ;;  %v414_v14 = vsel %vm339_vm0, %v397_v53, 0.0  ;;  %v416_v17 = vsel %vm339_vm0, %v398_v59, 0.0 }
 0x13b   :  { %v413_v12 = vadd.f32 %v412_v11, %v411_v5  ;;  %v418_v20 = vsel %vm339_vm0, %v399_v13, 0.0  ;;  %v420_v23 = vsel %vm339_vm0, %v400_v16, 0.0  ;;  %v403_v25 = vmul.f32 %v1000_v36, %v1000_v36 }
 0x13c   :  { %v422_v26 = vsel %vm339_vm0, %v401_v19, 0.0  ;;  %v404_v28 = vmul.f32 %v1003_v42, %v1003_v42  ;;  %v424_v29 = vsel %vm339_vm0, %v402_v22, 0.0  ;;  %v405_v31 = vmul.f32 %v1006_v51, %v1006_v51 }
 0x13d   :  { %v415_v15 = vadd.f32 %v414_v14, %v413_v12  ;;  %v426_v32 = vsel %vm339_vm0, %v403_v25, 0.0  ;;  %v406_v34 = vmul.f32 %v1009_v58, %v1009_v58  ;;  %v407_v39 = vmul.f32 %v1011_v3, %v1011_v3 }
 0x13e   :  { %v428_v35 = vsel %vm339_vm0, %v404_v28, 0.0  ;;  %v430_v40 = vsel %vm339_vm0, %v405_v31, 0.0  ;;  %v408_v44 = vmul.f32 %v1013_v8, %v1013_v8  ;;  %v409_v47 = vmul.f32 %v1015_v9, %v1015_v9  ;;  %v663_v28 = vld [vmem:[%s1172_s3] ss:$0 sm:$0xff] }
 0x13f   :  { %v417_v18 = vadd.f32 %v416_v17, %v415_v15  ;;  %v432_v45 = vsel %vm339_vm0, %v406_v34, 0.0  ;;  %v434_v48 = vsel %vm339_vm0, %v407_v39, 0.0  ;;  %v410_v50 = vmul.f32 %v1017_v10, %v1017_v10  ;;  %v449_v15 = vld [vmem:[%s1171_s2] sm:$0x1] }
 0x140   :  { %v436_v52 = vsel %vm339_vm0, %v408_v44, 0.0  ;;  %v438_v55 = vsel %vm339_vm0, %v409_v47, 0.0  ;;  %v454_v13 = vlaneseq }
 0x141   :  { %v419_v21 = vadd.f32 %v418_v20, %v417_v18  ;;  %v440_v57 = vsel %vm339_vm0, %v410_v50, 0.0 }
 0x142   :  { %v455_v14 = vshrl.u32 %v454_v13, 7 }
 0x143   :  { %v421_v24 = vadd.f32 %v420_v23, %v419_v21 }
 0x144   :  { %v456_v16 = vsub.s32 0, %v455_v14 }
 0x145   :  { %v423_v27 = vadd.f32 %v422_v26, %v421_v24 }
 0x147   :  { %v425_v30 = vadd.f32 %v424_v29, %v423_v27 }
 0x149   :  { %v427_v33 = vadd.f32 %v426_v32, %v425_v30 }
 0x14b   :  { %v429_v37 = vadd.f32 %v428_v35, %v427_v33 }
 0x14d   :  { %v431_v41 = vadd.f32 %v430_v40, %v429_v37 }
 0x14f   :  { %v433_v46 = vadd.f32 %v432_v45, %v431_v41 }
 0x151   :  { %v435_v49 = vadd.f32 %v434_v48, %v433_v46 }
 0x153   :  { %v437_v54 = vadd.f32 %v436_v52, %v435_v49 }
 0x155   :  { %v439_v56 = vadd.f32 %v438_v55, %v437_v54 }
 0x157   :  { %v441_v60 = vadd.f32 %v440_v57, %v439_v56 }
 0x159   :  { %v442_v61 = vrot.slane %v441_v60, 4 }
 0x15b   :  { %v443_v38 = vadd.f32 %v442_v61, %v441_v60 }
 0x15d   :  { %v444_v43 = vrot.slane %v443_v38, 2 }
 0x15f   :  { %v445_v53 = vadd.f32 %v444_v43, %v443_v38 }
 0x161   :  { %v446_v59 = vrot.slane %v445_v53, 1 }
 0x163   :  { %v447_v5 = vadd.f32 %v446_v59, %v445_v53 }
 0x165   :  { %v448_v11 = vmul.f32 0.0078125, %v447_v5 }
 0x167   :  { %v450_v12 = vadd.f32 1e-05, %v448_v11 }
 0x169   :  { %816 = vrsqrt.f32 %v450_v12 }
 0x173   :  { %v817_v17 = vpop.eup %816 }
 0x174   :  { %v452_v18 = vmul.f32 %v817_v17, %v449_v15 }
 0x176   :  { %v457_v19 = vrot.slane %v452_v18, %v456_v16 }
 0x178   :  { %v459_v20 = vmul.f32 %v457_v19, %v980_v62  ;;  %v460_v21 = vmul.f32 %v457_v19, %v983_v63  ;;  %v461_v22 = vmul.f32 %v457_v19, %v986_v0  ;;  %v462_v23 = vmul.f32 %v457_v19, %v989_v1 }
 0x179   :  { %v463_v24 = vmul.f32 %v457_v19, %v991_v2  ;;  %v464_v25 = vmul.f32 %v457_v19, %v993_v4  ;;  %v465_v26 = vmul.f32 %v457_v19, %v995_v6  ;;  %v466_v27 = vmul.f32 %v457_v19, %v997_v7 }
 0x17a   :  { %v467_v62 = vmul.f32 %v457_v19, %v1000_v36  ;;  %v468_v63 = vmul.f32 %v457_v19, %v1003_v42  ;;  %v469_v0 = vmul.f32 %v457_v19, %v1006_v51  ;;  %v470_v1 = vmul.f32 %v457_v19, %v1009_v58 }
 0x17b   :  { %v471_v2 = vmul.f32 %v457_v19, %v1011_v3  ;;  %v472_v4 = vmul.f32 %v457_v19, %v1013_v8  ;;  %v473_v6 = vmul.f32 %v457_v19, %v1015_v9  ;;  %v474_v7 = vmul.f32 %v457_v19, %v1017_v10 }
 0x17c   :  { %v482_v29 = vadd.f32 %v663_v28, %v459_v20  ;;  %v483_v30 = vadd.f32 %v663_v28, %v460_v21  ;;  %v484_v31 = vadd.f32 %v663_v28, %v461_v22  ;;  %v485_v32 = vadd.f32 %v663_v28, %v462_v23 }
 0x17d   :  { %v486_v33 = vadd.f32 %v663_v28, %v463_v24  ;;  %v487_v36 = vadd.f32 %v663_v28, %v464_v25  ;;  %v488_v34 = vadd.f32 %v663_v28, %v465_v26  ;;  %v489_v42 = vadd.f32 %v663_v28, %v466_v27 }
 0x17e   :  { %v490_v35 = vadd.f32 %v663_v28, %v467_v62  ;;  %v491_v51 = vadd.f32 %v663_v28, %v468_v63  ;;  %v492_v37 = vadd.f32 %v663_v28, %v469_v0  ;;  %v493_v58 = vadd.f32 %v663_v28, %v470_v1 }
 0x17f   :  { %v494_v39 = vadd.f32 %v663_v28, %v471_v2  ;;  %v495_v3 = vadd.f32 %v663_v28, %v472_v4  ;;  %v496_v40 = vadd.f32 %v663_v28, %v473_v6  ;;  %v497_v8 = vadd.f32 %v663_v28, %v474_v7 }
 0x180   :  { %vm499_vm2 = vcmp.gt.f32.partialorder %v483_v30, 0.0  ;;  %vm500_vm3 = vcmp.gt.f32.partialorder %v484_v31, 0.0  ;;  %vm501_vm4 = vcmp.gt.f32.partialorder %v485_v32, 0.0  ;;  %vm502_vm5 = vcmp.gt.f32.partialorder %v486_v33, 0.0 }
 0x181   :  { %vm503_vm6 = vcmp.gt.f32.partialorder %v487_v36, 0.0  ;;  %vm505_vm8 = vcmp.gt.f32.partialorder %v489_v42, 0.0  ;;  %vm506_vm9 = vcmp.gt.f32.partialorder %v490_v35, 0.0  ;;  %vm507_vm10 = vcmp.gt.f32.partialorder %v491_v51, 0.0 }
 0x182   :  { %vm508_vm11 = vcmp.gt.f32.partialorder %v492_v37, 0.0  ;;  %vm509_vm12 = vcmp.gt.f32.partialorder %v493_v58, 0.0  ;;  %vm510_vm13 = vcmp.gt.f32.partialorder %v494_v39, 0.0  ;;  %vm511_vm14 = vcmp.gt.f32.partialorder %v495_v3, 0.0 }
 0x183   :  { %vm512_vm15 = vcmp.gt.f32.partialorder %v496_v40, 0.0  ;;  %vm513_vm0 = vcmp.gt.f32.partialorder %v497_v8, 0.0  ;;  %v514_v9 = vmul.f32 0.2, %v482_v29  ;;  %v515_v10 = vmul.f32 0.2, %v483_v30 }
 0x184   :  { %v516_v41 = vmul.f32 0.2, %v484_v31  ;;  %v517_v44 = vmul.f32 0.2, %v485_v32  ;;  %v518_v45 = vmul.f32 0.2, %v486_v33 }
 0x185   :  { %v519_v46 = vmul.f32 0.2, %v487_v36  ;;  %v520_v47 = vmul.f32 0.2, %v488_v34  ;;  %v521_v48 = vmul.f32 0.2, %v489_v42  ;;  %v531_v56 = vsel %vm499_vm2, %v483_v30, %v515_v10 }
 0x186   :  { %v522_v49 = vmul.f32 0.2, %v490_v35  ;;  %vm1174_vm7 = vcmp.gt.f32.partialorder %v482_v29, 0.0  ;;  %v523_v52 = vmul.f32 0.2, %v491_v51  ;;  %v532_v38 = vsel %vm500_vm3, %v484_v31, %v516_v41 }
 0x187   :  { %v530_v50 = vsel %vm1174_vm7, %v482_v29, %v514_v9  ;;  %v524_v54 = vmul.f32 0.2, %v492_v37  ;;  %v525_v55 = vmul.f32 0.2, %v493_v58  ;;  %v526_v57 = vmul.f32 0.2, %v494_v39 }
 0x188   :  { %v527_v60 = vmul.f32 0.2, %v495_v3  ;;  %v528_v61 = vmul.f32 0.2, %v496_v40  ;;  %v529_v43 = vmul.f32 0.2, %v497_v8  ;;  %v533_v53 = vsel %vm501_vm4, %v485_v32, %v517_v44 }
 0x189   :  { %v534_v59 = vsel %vm502_vm5, %v486_v33, %v518_v45  ;;  %v535_v5 = vsel %vm503_vm6, %v487_v36, %v519_v46  ;;  %vm1175_vm1 = vcmp.gt.f32.partialorder %v488_v34, 0.0  ;;  %v537_v12 = vsel %vm505_vm8, %v489_v42, %v521_v48 }
 0x18a   :  { %v536_v11 = vsel %vm1175_vm1, %v488_v34, %v520_v47  ;;  %v538_v13 = vsel %vm506_vm9, %v490_v35, %v522_v49  ;;  %v539_v14 = vsel %vm507_vm10, %v491_v51, %v523_v52  ;;  %v540_v15 = vsel %vm508_vm11, %v492_v37, %v524_v54 }
 0x18b   :  { %v541_v16 = vsel %vm509_vm12, %v493_v58, %v525_v55  ;;  %v542_v17 = vsel %vm510_vm13, %v494_v39, %v526_v57  ;;  %v543_v18 = vsel %vm511_vm14, %v495_v3, %v527_v60  ;;  %v544_v19 = vsel %vm512_vm15, %v496_v40, %v528_v61 }
 0x18c   :  { %v545_v20 = vsel %vm513_vm0, %v497_v8, %v529_v43  ;;  %v680_v21 = vpack.c.bf16 %v530_v50, %v530_v50  ;;  %v681_v22 = vpack.c.bf16 %v531_v56, %v531_v56  ;;  %v682_v23 = vpack.c.bf16 %v532_v38, %v532_v38 }
 0x18d   :  { %v683_v24 = vpack.c.bf16 %v533_v53, %v533_v53  ;;  %v684_v25 = vpack.c.bf16 %v534_v59, %v534_v59  ;;  %v685_v26 = vpack.c.bf16 %v535_v5, %v535_v5  ;;  %v686_v27 = vpack.c.bf16 %v536_v11, %v536_v11 }
 0x18e   :  { %v687_v28 = vpack.c.bf16 %v537_v12, %v537_v12  ;;  %v688_v62 = vpack.c.bf16 %v538_v13, %v538_v13  ;;  %v689_v63 = vpack.c.bf16 %v539_v14, %v539_v14  ;;  %vm1176_vm1 = vcmask 257024  }
 0x18f   :  { %611 = vst.msk [vmem:[%s1173_s4] sm:$0xf] %vm1176_vm1, %v680_v21  ;;  %vm1177_vm2 = vmmov %vm1176_vm1  ;;  %v690_v0 = vpack.c.bf16 %v540_v15, %v540_v15  ;;  %v691_v1 = vpack.c.bf16 %v541_v16, %v541_v16  ;;  %v692_v2 = vpack.c.bf16 %v542_v17, %v542_v17  ;;  %v693_v4 = vpack.c.bf16 %v543_v18, %v543_v18 }
 0x190   :  { %612 = vst.msk [vmem:[%s1173_s4 + $0x4] sm:$0xf] %vm1177_vm2, %v681_v22  ;;  %vm1178_vm3 = vmmov %vm1176_vm1  ;;  %v694_v6 = vpack.c.bf16 %v544_v19, %v544_v19  ;;  %v695_v7 = vpack.c.bf16 %v545_v20, %v545_v20 }
 0x191   :  { %613 = vst.msk [vmem:[%s1173_s4 + $0x8] sm:$0xf] %vm1178_vm3, %v682_v23  ;;  %vm1179_vm4 = vmmov %vm1176_vm1 }
 0x192   :  { %614 = vst.msk [vmem:[%s1173_s4 + $0xc] sm:$0xf] %vm1179_vm4, %v683_v24  ;;  %vm1180_vm5 = vmmov %vm1176_vm1 }
 0x193   :  { %615 = vst.msk [vmem:[%s1173_s4 + $0x10] sm:$0xf] %vm1180_vm5, %v684_v25  ;;  %vm1181_vm6 = vmmov %vm1176_vm1 }
 0x194   :  { %616 = vst.msk [vmem:[%s1173_s4 + $0x14] sm:$0xf] %vm1181_vm6, %v685_v26  ;;  %vm1182_vm7 = vmmov %vm1176_vm1 }
 0x195   :  { %617 = vst.msk [vmem:[%s1173_s4 + $0x18] sm:$0xf] %vm1182_vm7, %v686_v27  ;;  %vm1183_vm8 = vmmov %vm1176_vm1 }
 0x196   :  { %618 = vst.msk [vmem:[%s1173_s4 + $0x1c] sm:$0xf] %vm1183_vm8, %v687_v28  ;;  %vm1184_vm9 = vmmov %vm1176_vm1 }
 0x197   :  { %619 = vst.msk [vmem:[%s1173_s4 + $0x20] sm:$0xf] %vm1184_vm9, %v688_v62  ;;  %vm1185_vm10 = vmmov %vm1176_vm1 }
 0x198   :  { %620 = vst.msk [vmem:[%s1173_s4 + $0x24] sm:$0xf] %vm1185_vm10, %v689_v63  ;;  %vm1186_vm11 = vmmov %vm1176_vm1 }
 0x199   :  { %621 = vst.msk [vmem:[%s1173_s4 + $0x28] sm:$0xf] %vm1186_vm11, %v690_v0  ;;  %vm1187_vm12 = vmmov %vm1176_vm1 }
 0x19a   :  { %622 = vst.msk [vmem:[%s1173_s4 + $0x2c] sm:$0xf] %vm1187_vm12, %v691_v1  ;;  %vm1188_vm13 = vmmov %vm1176_vm1 }
 0x19b   :  { %623 = vst.msk [vmem:[%s1173_s4 + $0x30] sm:$0xf] %vm1188_vm13, %v692_v2  ;;  %vm1189_vm14 = vmmov %vm1176_vm1 }
 0x19c   :  { %624 = vst.msk [vmem:[%s1173_s4 + $0x34] sm:$0xf] %vm1189_vm14, %v693_v4  ;;  %vm1190_vm15 = vmmov %vm1176_vm1 }
 0x19d   :  { %625 = vst.msk [vmem:[%s1173_s4 + $0x38] sm:$0xf] %vm1190_vm15, %v694_v6  ;;  %vm1191_vm0 = vmmov %vm1176_vm1 }
 0x19e   :  { %626 = vst.msk [vmem:[%s1173_s4 + $0x3c] sm:$0xf] %vm1191_vm0, %v695_v7 }

// kernel: discriminator_ca_forward.7
= control target key start
LH: loop header
LB: loop body
LE: loop exit
PB: predicated region body
PF: predicated region fallthrough
CT: control target
= control target key end

     0   :  { %vm420_vm0 = vcmask 523264   ;;  %vm511_vm5 = vcmask 519168   ;;  %s842_s1 = inlined_call_operand.vmem [shape: bf16[512,64], index: 1, kind: input, shape index: {}]   ;;  %s843_s0 = inlined_call_operand.vmem [shape: bf16[32,512], index: 0, kind: input, shape index: {}]   ;;  %s844_s2 = inlined_call_operand.vmem [shape: f32[1,64], index: 2, kind: input, shape index: {}]   ;;  %s845_s3 = inlined_call_operand.vmem [shape: f32[1,64], index: 3, kind: input, shape index: {}]   ;;  %s846_s4 = inlined_call_operand.vmem [shape: bf16[32,64], index: 4, kind: output, shape index: {}]  }
   0x1   :  { %v625_v0 = vld [vmem:[%s842_s1 + $0x40] sm:$0xff]   ;;  %v629_v4 = vld [vmem:[%s842_s1 + $0x48] sm:$0xff]   ;;  %v633_v8 = vld [vmem:[%s842_s1 + $0x50] sm:$0xff]  }
   0x2   :  { %v626_v1 = vld [vmem:[%s842_s1 + $0xc0] sm:$0xff]   ;;  %569 = vmatprep.subr.bf16.mxu0 %v625_v0  ;;  %v630_v5 = vld [vmem:[%s842_s1 + $0xc8] sm:$0xff]   ;;  %v634_v9 = vld [vmem:[%s842_s1 + $0xd0] sm:$0xff]  }
   0x3   :  { %v627_v2 = vld [vmem:[%s842_s1] sm:$0xff]   ;;  %597 = vmatprep.subr.bf16.mxu1 %v626_v1  ;;  %v631_v6 = vld [vmem:[%s842_s1 + $0x8] sm:$0xff]   ;;  %v635_v10 = vld [vmem:[%s842_s1 + $0x10] sm:$0xff]  }
   0x4   :  { %v628_v3 = vld [vmem:[%s842_s1 + $0x80] sm:$0xff]   ;;  %570 = vmatpush3.bf16.msra.mxu0 %v627_v2  ;;  %v632_v7 = vld [vmem:[%s842_s1 + $0x88] sm:$0xff]   ;;  %v636_v11 = vld [vmem:[%s842_s1 + $0x90] sm:$0xff]  }
   0x5   :  { %598 = vmatpush3.bf16.msra.mxu1 %v628_v3  ;;  %571 = vmatprep.subr.bf16.mxu0 %v629_v4  ;;  %v637_v12 = vld [vmem:[%s842_s1 + $0x58] sm:$0xff]   ;;  %v641_v16 = vld [vmem:[%s842_s1 + $0x60] sm:$0xff]   ;;  %v645_v20 = vld [vmem:[%s842_s1 + $0x68] sm:$0xff]  }
   0x6   :  { %599 = vmatprep.subr.bf16.mxu1 %v630_v5  ;;  %v638_v13 = vld [vmem:[%s842_s1 + $0xd8] sm:$0xff]   ;;  %v642_v17 = vld [vmem:[%s842_s1 + $0xe0] sm:$0xff]   ;;  %v646_v21 = vld [vmem:[%s842_s1 + $0xe8] sm:$0xff]  }
   0x7   :  { %v639_v14 = vld [vmem:[%s842_s1 + $0x18] sm:$0xff]   ;;  %v643_v18 = vld [vmem:[%s842_s1 + $0x20] sm:$0xff]   ;;  %v647_v22 = vld [vmem:[%s842_s1 + $0x28] sm:$0xff]  }
   0x8   :  { %572 = vmatpush3.bf16.msra.mxu0 %v631_v6  ;;  %v640_v15 = vld [vmem:[%s842_s1 + $0x98] sm:$0xff]   ;;  %v644_v19 = vld [vmem:[%s842_s1 + $0xa0] sm:$0xff]   ;;  %v648_v23 = vld [vmem:[%s842_s1 + $0xa8] sm:$0xff]  }
   0x9   :  { %600 = vmatpush3.bf16.msra.mxu1 %v632_v7  ;;  %573 = vmatprep.subr.bf16.mxu0 %v633_v8  ;;  %v649_v24 = vld [vmem:[%s842_s1 + $0x70] sm:$0xff]   ;;  %v653_v28 = vld [vmem:[%s842_s1 + $0x78] sm:$0xff]  }
   0xa   :  { %601 = vmatprep.subr.bf16.mxu1 %v634_v9  ;;  %v650_v25 = vld [vmem:[%s842_s1 + $0xf0] sm:$0xff]   ;;  %v654_v29 = vld [vmem:[%s842_s1 + $0xf8] sm:$0xff]  }
   0xb   :  { %v651_v26 = vld [vmem:[%s842_s1 + $0x30] sm:$0xff]   ;;  %v655_v30 = vld [vmem:[%s842_s1 + $0x38] sm:$0xff]  }
   0xc   :  { %574 = vmatpush3.bf16.msra.mxu0 %v635_v10  ;;  %v652_v27 = vld [vmem:[%s842_s1 + $0xb0] sm:$0xff]   ;;  %v656_v31 = vld [vmem:[%s842_s1 + $0xb8] sm:$0xff]  }
   0xd   :  { %602 = vmatpush3.bf16.msra.mxu1 %v636_v11  ;;  %575 = vmatprep.subr.bf16.mxu0 %v637_v12  ;;  %v657_v32 = vld [vmem:[%s843_s0] ss:$16 sps:$4 sm:$0xff]   ;;  %v659_v33 = vld [vmem:[%s843_s0 + $0x4] ss:$16 sps:$4 sm:$0xff]   ;;  %v660_v34 = vld [vmem:[%s843_s0 + $0x8] ss:$16 sps:$4 sm:$0xff]  }
   0xe   :  { %603 = vmatprep.subr.bf16.mxu1 %v638_v13  ;;  %v662_v35 = vld [vmem:[%s843_s0 + $0xc] ss:$16 sps:$4 sm:$0xff]   ;;  %354 = vmatprep.mubr.bf16.mxu0 %v659_v33  ;;  %v663_v36 = vld [vmem:[%s843_s0 + $0x24] ss:$16 sps:$4 sm:$0xff]   ;;  %v667_v38 = vld [vmem:[%s843_s0 + $0x20] ss:$16 sps:$4 sm:$0xff]  }
   0xf   :  { %403 = vmatprep.mubr.bf16.mxu1 %v662_v35  ;;  %v665_v37 = vld [vmem:[%s843_s0 + $0x2c] ss:$16 sps:$4 sm:$0xff]   ;;  %v668_v39 = vld [vmem:[%s843_s0 + $0x28] ss:$16 sps:$4 sm:$0xff]  }
  0x10   :  { %576 = vmatpush3.bf16.msra.mxu0 %v639_v14 }
  0x11   :  { %604 = vmatpush3.bf16.msra.mxu1 %v640_v15  ;;  %577 = vmatprep.subr.bf16.mxu0 %v641_v16 }
  0x12   :  { %605 = vmatprep.subr.bf16.mxu1 %v642_v17 }
  0x14   :  { %578 = vmatpush3.bf16.msra.mxu0 %v643_v18 }
  0x15   :  { %606 = vmatpush3.bf16.msra.mxu1 %v644_v19  ;;  %579 = vmatprep.subr.bf16.mxu0 %v645_v20 }
  0x16   :  { %607 = vmatprep.subr.bf16.mxu1 %v646_v21 }
  0x18   :  { %580 = vmatpush3.bf16.msra.mxu0 %v647_v22 }
  0x19   :  { %608 = vmatpush3.bf16.msra.mxu1 %v648_v23  ;;  %581 = vmatprep.subr.bf16.mxu0 %v649_v24 }
  0x1a   :  { %609 = vmatprep.subr.bf16.mxu1 %v650_v25 }
  0x1c   :  { %582 = vmatpush3.bf16.msra.mxu0 %v651_v26 }
  0x1d   :  { %610 = vmatpush3.bf16.msra.mxu1 %v652_v27  ;;  %583 = vmatprep.subr.bf16.mxu0 %v653_v28 }
  0x1e   :  { %611 = vmatprep.subr.bf16.mxu1 %v654_v29 }
  0x20   :  { %584 = vmatpush3.bf16.msra.mxu0 %v655_v30 }
  0x21   :  { %612 = vmatpush3.bf16.msra.mxu1 %v656_v31 }
  0x23   :  { %355 = vmatmul.mubr.bf16.vlgmr.msra.gmra.mrb[0].mxu0 %v657_v32 }
  0x24   :  { %404 = vmatmul.mubr.bf16.vlgmr.msra.gmra.mrb[0].mxu1 %v660_v34  ;;  %362 = vmatprep.mubr.bf16.mxu0 %v663_v36 }
  0x25   :  { %411 = vmatprep.mubr.bf16.mxu1 %v665_v37 }
  0x2b   :  { %363 = vmatmul.mubr.bf16.gmra.mrb[4].mxu0 %v667_v38 }
  0x2c   :  { %412 = vmatmul.mubr.bf16.gmra.mrb[4].mxu1 %v668_v39 }
  0xf6   :  { %v585_v40 = vpop.f32.mrb[0].mxu0 }
  0xf7   :  { %v613_v41 = vpop.f32.mrb[0].mxu1  ;;  %v586_v42 = vpop.f32.mrb[1].mxu0 }
  0xf8   :  { %v587_v43 = vadd.f32 %v586_v42, %v585_v40  ;;  %v614_v44 = vpop.f32.mrb[1].mxu1  ;;  %v588_v45 = vpop.f32.mrb[2].mxu0 }
  0xf9   :  { %v615_v46 = vadd.f32 %v614_v44, %v613_v41  ;;  %v616_v47 = vpop.f32.mrb[2].mxu1  ;;  %v589_v48 = vpop.f32.mrb[3].mxu0  ;;  %v463_v41 = vlaneseq }
  0xfa   :  { %v590_v49 = vadd.f32 %v589_v48, %v588_v45  ;;  %v617_v50 = vpop.f32.mrb[3].mxu1  ;;  %v560_v48 = vld [vmem:[%s845_s3] ss:$0 sm:$0xff] }
  0xfb   :  { %v406_v51 = vadd.f32 %v615_v46, %v587_v43  ;;  %v618_v52 = vadd.f32 %v617_v50, %v616_v47  ;;  %v464_v42 = vshrl.u32 %v463_v41, 7  ;;  %v458_v43 = vld [vmem:[%s844_s2] sm:$0x1] }
  0xfd   :  { %v409_v53 = vadd.f32 %v618_v52, %v590_v49  ;;  %v421_v55 = vsel %vm420_vm0, %v406_v51, 0.0  ;;  %v465_v44 = vsub.s32 0, %v464_v42 }
  0xfe   :  { %v591_v54 = vpop.f32.mrb[4].mxu0 }
  0xff   :  { %v422_v56 = vsel %vm420_vm0, %v409_v53, 0.0  ;;  %v619_v57 = vpop.f32.mrb[4].mxu1  ;;  %v592_v58 = vpop.f32.mrb[5].mxu0 }
 0x100   :  { %v423_v59 = vadd.f32 %v422_v56, %v421_v55  ;;  %v593_v60 = vadd.f32 %v592_v58, %v591_v54  ;;  %v620_v61 = vpop.f32.mrb[5].mxu1  ;;  %v594_v62 = vpop.f32.mrb[6].mxu0 }
 0x101   :  { %v621_v63 = vadd.f32 %v620_v61, %v619_v57  ;;  %v622_v0 = vpop.f32.mrb[6].mxu1  ;;  %v595_v1 = vpop.f32.mrb[7].mxu0 }
 0x102   :  { %v596_v2 = vadd.f32 %v595_v1, %v594_v62  ;;  %v623_v3 = vpop.f32.mrb[7].mxu1 }
 0x103   :  { %v414_v4 = vadd.f32 %v621_v63, %v593_v60  ;;  %v624_v5 = vadd.f32 %v623_v3, %v622_v0 }
 0x105   :  { %v424_v6 = vsel %vm420_vm0, %v414_v4, 0.0  ;;  %v417_v7 = vadd.f32 %v624_v5, %v596_v2 }
 0x106   :  { %v425_v8 = vadd.f32 %v424_v6, %v423_v59 }
 0x107   :  { %v426_v9 = vsel %vm420_vm0, %v417_v7, 0.0 }
 0x108   :  { %v427_v10 = vadd.f32 %v426_v9, %v425_v8 }
 0x10a   :  { %v428_v11 = vrot.slane %v427_v10, 4 }
 0x10c   :  { %v429_v12 = vadd.f32 %v428_v11, %v427_v10 }
 0x10e   :  { %v430_v13 = vrot.slane %v429_v12, 2 }
 0x110   :  { %v431_v14 = vadd.f32 %v430_v13, %v429_v12 }
 0x112   :  { %v432_v15 = vrot.slane %v431_v14, 1 }
 0x114   :  { %v433_v16 = vadd.f32 %v432_v15, %v431_v14 }
 0x116   :  { %v435_v17 = vmul.f32 0.03125, %v433_v16 }
 0x118   :  { %v436_v18 = vsub.f32 %v406_v51, %v435_v17  ;;  %v437_v19 = vsub.f32 %v409_v53, %v435_v17  ;;  %v438_v20 = vsub.f32 %v414_v4, %v435_v17  ;;  %v439_v21 = vsub.f32 %v417_v7, %v435_v17 }
 0x11a   :  { %v440_v22 = vmul.f32 %v436_v18, %v436_v18  ;;  %v441_v23 = vmul.f32 %v437_v19, %v437_v19  ;;  %v442_v24 = vmul.f32 %v438_v20, %v438_v20  ;;  %v443_v25 = vmul.f32 %v439_v21, %v439_v21 }
 0x11c   :  { %v444_v26 = vsel %vm420_vm0, %v440_v22, 0.0  ;;  %v445_v27 = vsel %vm420_vm0, %v441_v23, 0.0  ;;  %v447_v29 = vsel %vm420_vm0, %v442_v24, 0.0  ;;  %v449_v31 = vsel %vm420_vm0, %v443_v25, 0.0 }
 0x11d   :  { %v446_v28 = vadd.f32 %v445_v27, %v444_v26 }
 0x11f   :  { %v448_v30 = vadd.f32 %v447_v29, %v446_v28 }
 0x121   :  { %v450_v32 = vadd.f32 %v449_v31, %v448_v30 }
 0x123   :  { %v451_v33 = vrot.slane %v450_v32, 4 }
 0x125   :  { %v452_v34 = vadd.f32 %v451_v33, %v450_v32 }
 0x127   :  { %v453_v35 = vrot.slane %v452_v34, 2 }
 0x129   :  { %v454_v36 = vadd.f32 %v453_v35, %v452_v34 }
 0x12b   :  { %v455_v37 = vrot.slane %v454_v36, 1 }
 0x12d   :  { %v456_v38 = vadd.f32 %v455_v37, %v454_v36 }
 0x12f   :  { %v457_v39 = vmul.f32 0.03125, %v456_v38 }
 0x131   :  { %v459_v40 = vadd.f32 1e-05, %v457_v39 }
 0x133   :  { %669 = vrsqrt.f32 %v459_v40 }
 0x13d   :  { %v670_v45 = vpop.eup %669 }
 0x13e   :  { %v461_v46 = vmul.f32 %v670_v45, %v458_v43 }
 0x140   :  { %v466_v47 = vrot.slane %v461_v46, %v465_v44 }
 0x142   :  { %v468_v49 = vmul.f32 %v466_v47, %v436_v18  ;;  %v469_v50 = vmul.f32 %v466_v47, %v437_v19  ;;  %v470_v51 = vmul.f32 %v466_v47, %v438_v20  ;;  %v471_v52 = vmul.f32 %v466_v47, %v439_v21 }
 0x144   :  { %v479_v53 = vadd.f32 %v560_v48, %v468_v49  ;;  %v480_v54 = vadd.f32 %v560_v48, %v469_v50  ;;  %v481_v55 = vadd.f32 %v560_v48, %v470_v51  ;;  %v482_v56 = vadd.f32 %v560_v48, %v471_v52 }
 0x146   :  { %vm483_vm1 = vcmp.gt.f32.partialorder %v479_v53, 0.0  ;;  %vm484_vm2 = vcmp.gt.f32.partialorder %v480_v54, 0.0  ;;  %vm485_vm3 = vcmp.gt.f32.partialorder %v481_v55, 0.0  ;;  %vm486_vm4 = vcmp.gt.f32.partialorder %v482_v56, 0.0 }
 0x147   :  { %v487_v57 = vmul.f32 0.2, %v479_v53  ;;  %v488_v58 = vmul.f32 0.2, %v480_v54  ;;  %v489_v59 = vmul.f32 0.2, %v481_v55 }
 0x148   :  { %v490_v60 = vmul.f32 0.2, %v482_v56 }
 0x149   :  { %v491_v61 = vsel %vm483_vm1, %v479_v53, %v487_v57  ;;  %v492_v62 = vsel %vm484_vm2, %v480_v54, %v488_v58  ;;  %v493_v63 = vsel %vm485_vm3, %v481_v55, %v489_v59 }
 0x14a   :  { %v494_v0 = vsel %vm486_vm4, %v482_v56, %v490_v60  ;;  %v565_v1 = vpack.c.bf16 %v491_v61, %v491_v61  ;;  %v566_v2 = vpack.c.bf16 %v492_v62, %v492_v62  ;;  %v567_v3 = vpack.c.bf16 %v493_v63, %v493_v63 }
 0x14b   :  { %v568_v4 = vpack.c.bf16 %v494_v0, %v494_v0 }
 0x14c   :  { %512 = vst.msk [vmem:[%s846_s4] sm:$0xf] %vm511_vm5, %v565_v1  ;;  %513 = vst.msk [vmem:[%s846_s4 + $0x4] sm:$0xf] %vm511_vm5, %v566_v2 }
 0x14d   :  { %514 = vst.msk [vmem:[%s846_s4 + $0x8] sm:$0xf] %vm511_vm5, %v567_v3  ;;  %515 = vst.msk [vmem:[%s846_s4 + $0xc] sm:$0xf] %vm511_vm5, %v568_v4 }

</bundles_post_ra>
